<compile_context>
chip_gen: v5e
topology: v5e:2x2
jax: 0.10.0
libtpu: 0.0.40
codegen_flags: <defaults>
</compile_context>

<pallas_src>
import functools

import jax
import jax.numpy as jnp
from jax.experimental import pallas as pl
from jax.experimental.pallas import tpu as pltpu


def _convnet_kernel(p_ref, cw_ref, cb_ref, fw_ref, fb_ref, o_ref):
    # p_ref : (b_tile, n_win*wrows, kk) bf16 im2col patches, rows ordered
    #                                   (image, pool-window, in-window pos)
    # cw_ref: (kk, M)              bf16 conv weight, feature order (dh, dw, c)
    # cb_ref: (1, M)               f32  conv bias
    # fw_ref: (n_win, M, n_out_p)  bf16 fc weight regrouped per pool window,
    #                                   output columns zero-padded to 128
    # fb_ref: (1, n_out_p)         f32  fc bias (zero-padded)
    # o_ref : (b_tile, n_out_p)    f32  logits (lane-dense padded store)
    bt, rows, kk = p_ref.shape
    n_win, M, n_out_p = fw_ref.shape
    wrows = rows // n_win

    # Convolution as one big MXU matmul over every (image, window, position) row.
    p = p_ref[...].reshape(bt * rows, kk)                        # aligned, ~free
    conv = jnp.dot(p, cw_ref[...], preferred_element_type=jnp.float32)
    # Bias + ReLU, then drop to bf16 before the big intermediate is re-read by
    # the pooling (halves the dominant VMEM traffic; results unchanged).
    relu = jnp.maximum(conv + cb_ref[...], 0.0).astype(jnp.bfloat16)
    relu4 = relu.reshape(bt, n_win, wrows, M)                    # 16-row aligned

    # Max-pool per window + per-window slice of the Linear layer, accumulated
    # in registers; bias added once at the lane-dense store.
    acc = None
    for w in range(n_win):
        pooled = jnp.max(relu4[:, w], axis=1)                    # (bt, M) bf16
        part = jnp.dot(pooled, fw_ref[w],
                       preferred_element_type=jnp.float32)       # (bt, n_out_p)
        acc = part if acc is None else acc + part
    o_ref[...] = (acc + fb_ref[...]).astype(o_ref.dtype)


def convnet_forward(x_nchw, params, *, k=5, pool=14, max_batch_tile=16):
    """Pallas TPU forward pass matching the PyTorch ConvNet module.

    x_nchw: (B, Cin, H, W) float32 (PyTorch NCHW convention)
    params: (conv_w (M,Cin,k,k), conv_b (M,), fc_w (C, M*n*n), fc_b (C,))
    max_batch_tile: images per grid step; default 16 is sized for v7x's 64 MiB
                    VMEM — can be raised to 32-64 on v5e/v6e (128 MiB VMEM).
    """
    conv_w, conv_b, fc_w, fc_b = params
    B, cin, H, W = x_nchw.shape
    M = conv_w.shape[0]
    n_out = fc_w.shape[0]
    conv_out = H - k + 1                          # 28
    n_pool = conv_out // pool                     # 2 (MaxPool2d drops remainder)
    n_win = n_pool * n_pool                       # 4
    win_rows = pool * pool                        # 196
    wrows = ((win_rows + 15) // 16) * 16          # 208: bf16 (16,128) aligned
    rows = n_win * wrows                          # 832
    kk = k * k * cin                              # 75
    n_out_p = ((n_out + 127) // 128) * 128        # 128: lane-dense logits
    assert fc_w.shape[1] == M * n_win, "fc weight does not match pooled size"

    # ---- batch tiling: tiles are multiples of 8 (aligned blocks) and the grid
    #      has >= 2 steps whenever B >= 2 so both v7x TensorCores get work.
    mbt = max(8, (max_batch_tile // 8) * 8)
    half = -(-B // 2)
    b_tile = min(mbt, max(8, ((half + 7) // 8) * 8))
    b_pad = -(-B // b_tile) * b_tile
    if B >= 2:
        b_pad = max(b_pad, 2 * b_tile)            # >=2 grid steps (v7x 2 TCs)
    if b_pad != B:
        x_nchw = jnp.concatenate(
            [x_nchw, jnp.zeros((b_pad - B,) + x_nchw.shape[1:], x_nchw.dtype)], 0)

    # ---- glue: im2col + pool-window grouping (plain JAX, runs fused under jit).
    #      bf16 from the very first pass so every glue pass moves half the bytes.
    x = jnp.transpose(x_nchw, (0, 2, 3, 1)).astype(jnp.bfloat16)   # NHWC bf16
    patches = jnp.stack(
        [x[:, dh:dh + conv_out, dw:dw + conv_out, :]
         for dh in range(k) for dw in range(k)], axis=-2)
    patches = patches.reshape(b_pad, conv_out, conv_out, kk)       # (dh,dw,c)
    # drop remainder rows/cols (MaxPool2d semantics), then group by pool window
    patches = patches[:, :n_pool * pool, :n_pool * pool, :]
    patches = patches.reshape(b_pad, n_pool, pool, n_pool, pool, kk)
    patches = jnp.transpose(patches, (0, 1, 3, 2, 4, 5))
    patches = patches.reshape(b_pad, n_win, win_rows, kk)
    pad_rows = wrows - win_rows
    if pad_rows:
        # duplicate real in-window rows so the window max is unchanged
        patches = jnp.concatenate([patches, patches[:, :, :pad_rows, :]], axis=2)
    patches = patches.reshape(b_pad, rows, kk)

    cw = jnp.transpose(conv_w, (2, 3, 1, 0)).reshape(kk, M).astype(jnp.bfloat16)
    cb = conv_b.reshape(1, M).astype(jnp.float32)
    # PyTorch flatten of (M, n_pool, n_pool): feature = m*n_win + (ph*n_pool+pw)
    fw = jnp.transpose(fc_w.reshape(n_out, M, n_win), (2, 1, 0))   # (n_win,M,C)
    fw = jnp.pad(fw, ((0, 0), (0, 0), (0, n_out_p - n_out))).astype(jnp.bfloat16)
    fb = jnp.pad(fc_b.reshape(1, n_out),
                 ((0, 0), (0, n_out_p - n_out))).astype(jnp.float32)

    # ---- explicit VMEM budget (double-buffered patches + f32 conv + bf16 relu).
    est_vmem = (2 * b_tile * rows * kk * 2
                + b_tile * rows * M * (4 + 2)
                + 2 * (kk * M + n_win * M * n_out_p) * 2
                + 2 * b_tile * n_out_p * 4
                + (1 << 20))
    vmem_limit = int(min(100 << 20, max(32 << 20, 2 * est_vmem)))

    out = pl.pallas_call(
        _convnet_kernel,
        out_shape=jax.ShapeDtypeStruct((b_pad, n_out_p), jnp.float32),
        grid_spec=pltpu.PrefetchScalarGridSpec(
            num_scalar_prefetch=0,
            grid=(b_pad // b_tile,),
            in_specs=[
                pl.BlockSpec((b_tile, rows, kk), lambda i: (i, 0, 0)),
                pl.BlockSpec((kk, M), lambda i: (0, 0)),            # resident
                pl.BlockSpec((1, M), lambda i: (0, 0)),             # resident
                pl.BlockSpec((n_win, M, n_out_p), lambda i: (0, 0, 0)),
                pl.BlockSpec((1, n_out_p), lambda i: (0, 0)),
            ],
            out_specs=pl.BlockSpec((b_tile, n_out_p), lambda i: (i, 0)),
        ),
        compiler_params=pltpu.CompilerParams(
            dimension_semantics=("parallel",),      # batch tiles are independent
            vmem_limit_bytes=vmem_limit),
    )(patches, cw, cb, fw, fb)
    return out[:B, :n_out]


def _reference_forward(x_nchw, params, *, pool=14, bf16_inputs=False):
    """Pure-JAX reference with PyTorch ConvNet semantics (for validation)."""
    conv_w, conv_b, fc_w, fc_b = params
    if bf16_inputs:   # mirror the kernel's bf16 data path (f32 accumulation)
        x, w = x_nchw.astype(jnp.bfloat16), conv_w.astype(jnp.bfloat16)
    else:
        x, w = x_nchw, conv_w
    conv = jax.lax.conv_general_dilated(
        x, w, (1, 1), "VALID",
        dimension_numbers=("NCHW", "OIHW", "NCHW"),
        preferred_element_type=jnp.float32,
        precision=jax.lax.Precision.HIGHEST)
    conv = conv + conv_b[None, :, None, None]
    relu = jnp.maximum(conv, 0.0)
    B, M, co, _ = relu.shape
    n = co // pool
    relu = relu[:, :, :n * pool, :n * pool]
    pooled = relu.reshape(B, M, n, pool, n, pool).max(axis=(3, 5))  # (B,M,n,n)
    flat = pooled.reshape(B, M * n * n)
    if bf16_inputs:
        return jnp.dot(flat.astype(jnp.bfloat16), fc_w.T.astype(jnp.bfloat16),
                       preferred_element_type=jnp.float32) + fc_b
    return jnp.dot(flat, fc_w.T, precision=jax.lax.Precision.HIGHEST) + fc_b


if __name__ == "__main__":
    # Small shapes consistent with the module: the Linear layer hardcodes a
    # 32x32, 3-channel input; shrink M to keep the test tiny.
    B, Cin, H, W = 2, 3, 32, 32
    M, k, N = 16, 5, 14
    n_pool = (H - k + 1) // N

    key = jax.random.PRNGKey(0)
    k1, k2, k3, k4, k5 = jax.random.split(key, 5)
    x = jax.random.normal(k1, (B, Cin, H, W), jnp.float32)
    conv_w = jax.random.normal(k2, (M, Cin, k, k), jnp.float32) * 0.1
    conv_b = jax.random.normal(k3, (M,), jnp.float32) * 0.1
    fc_w = jax.random.normal(k4, (10, M * n_pool * n_pool), jnp.float32) * 0.1
    fc_b = jax.random.normal(k5, (10,), jnp.float32) * 0.1
    params = (conv_w, conv_b, fc_w, fc_b)

    fwd = jax.jit(functools.partial(convnet_forward, k=k, pool=N))
    out = jax.block_until_ready(fwd(x, params))
    assert out.shape == (B, 10), out.shape

    # Tight check vs. a reference that mirrors the kernel's bf16 data path.
    ref_bf16 = _reference_forward(x, params, pool=N, bf16_inputs=True)
    assert jnp.allclose(out, ref_bf16, atol=2e-3, rtol=2e-3), (out, ref_bf16)
    # Loose check vs. exact f32 PyTorch semantics (covers bf16 quantization).
    ref_f32 = _reference_forward(x, params, pool=N, bf16_inputs=False)
    assert jnp.allclose(out, ref_f32, atol=5e-2, rtol=5e-2), (out, ref_f32)

    print("KERNEL_OK")
</pallas_src>

<mosaic_0001>
module attributes {stable_mosaic.version = 11 : i64} {
  func.func @_convnet_kernel(%arg0: i32, %arg1: memref<8x832x75xbf16, #tpu.memory_space<vmem>>, %arg2: memref<75x16xbf16, #tpu.memory_space<vmem>>, %arg3: memref<1x16xf32, #tpu.memory_space<vmem>>, %arg4: memref<4x16x128xbf16, #tpu.memory_space<vmem>>, %arg5: memref<1x128xf32, #tpu.memory_space<vmem>>, %arg6: memref<8x128xf32, #tpu.memory_space<vmem>>) attributes {dimension_semantics = [#tpu.dimension_semantics<parallel>], iteration_bounds = array<i64: 2>, scalar_prefetch = 0 : i64, scratch_operands = 0 : i64, tpu.core_type = #tpu.core_type<tc>, window_params = [{transform_indices = @transform_0, window_bounds = array<i64: 8, 832, 75>}, {pipeline_mode = #tpu.pipeline_mode<synchronous>, transform_indices = @transform_1, window_bounds = array<i64: 75, 16>}, {pipeline_mode = #tpu.pipeline_mode<synchronous>, transform_indices = @transform_2, window_bounds = array<i64: 1, 16>}, {pipeline_mode = #tpu.pipeline_mode<synchronous>, transform_indices = @transform_3, window_bounds = array<i64: 4, 16, 128>}, {pipeline_mode = #tpu.pipeline_mode<synchronous>, transform_indices = @transform_4, window_bounds = array<i64: 1, 128>}, {transform_indices = @transform_5, window_bounds = array<i64: 8, 128>}]} {
    %c0 = arith.constant 0 : index
    %c0_0 = arith.constant 0 : index
    %c0_1 = arith.constant 0 : index
    %0 = vector.load %arg1[%c0, %c0_0, %c0_1] : memref<8x832x75xbf16, #tpu.memory_space<vmem>>, vector<8x832x75xbf16>
    %1 = vector.shape_cast %0 : vector<8x832x75xbf16> to vector<6656x75xbf16>
    %c0_2 = arith.constant 0 : index
    %c0_3 = arith.constant 0 : index
    %2 = vector.load %arg2[%c0_2, %c0_3] : memref<75x16xbf16, #tpu.memory_space<vmem>>, vector<75x16xbf16>
    %cst = arith.constant dense<0.000000e+00> : vector<6656x16xf32>
    %3 = tpu.matmul %1, %2, %cst {dimension_numbers = #tpu.dot_dimension_numbers<[1], [0], [0], [1], [0, 0, 1, 1], [], []>} : vector<6656x75xbf16>, vector<75x16xbf16>, vector<6656x16xf32> -> vector<6656x16xf32>
    %c0_4 = arith.constant 0 : index
    %c0_5 = arith.constant 0 : index
    %4 = vector.load %arg3[%c0_4, %c0_5] : memref<1x16xf32, #tpu.memory_space<vmem>>, vector<1x16xf32>
    %5 = vector.broadcast %4 : vector<1x16xf32> to vector<6656x16xf32>
    %6 = arith.addf %3, %5 : vector<6656x16xf32>
    %cst_6 = arith.constant 0.000000e+00 : f32
    %7 = vector.broadcast %cst_6 : f32 to vector<6656x16xf32>
    %8 = arith.maximumf %6, %7 : vector<6656x16xf32>
    %9 = arith.truncf %8 : vector<6656x16xf32> to vector<6656x16xbf16>
    %10 = vector.shape_cast %9 : vector<6656x16xbf16> to vector<8x4x208x16xbf16>
    %11 = vector.extract_strided_slice %10 {offsets = [0, 0, 0, 0], sizes = [8, 1, 208, 16], strides = [1, 1, 1, 1]} : vector<8x4x208x16xbf16> to vector<8x1x208x16xbf16>
    %12 = vector.shape_cast %11 : vector<8x1x208x16xbf16> to vector<8x208x16xbf16>
    %cst_7 = arith.constant dense<0xFF80> : vector<8x16xbf16>
    %13 = vector.multi_reduction <maximumf>, %12, %cst_7 [1] : vector<8x208x16xbf16> to vector<8x16xbf16>
    %c0_8 = arith.constant 0 : index
    %c0_9 = arith.constant 0 : index
    %c0_10 = arith.constant 0 : index
    %14 = vector.load %arg4[%c0_8, %c0_9, %c0_10] : memref<4x16x128xbf16, #tpu.memory_space<vmem>>, vector<1x16x128xbf16>
    %15 = vector.shape_cast %14 : vector<1x16x128xbf16> to vector<16x128xbf16>
    %cst_11 = arith.constant dense<0.000000e+00> : vector<8x128xf32>
    %16 = tpu.matmul %13, %15, %cst_11 {dimension_numbers = #tpu.dot_dimension_numbers<[1], [0], [0], [1], [0, 0, 1, 1], [], []>} : vector<8x16xbf16>, vector<16x128xbf16>, vector<8x128xf32> -> vector<8x128xf32>
    %17 = vector.extract_strided_slice %10 {offsets = [0, 1, 0, 0], sizes = [8, 1, 208, 16], strides = [1, 1, 1, 1]} : vector<8x4x208x16xbf16> to vector<8x1x208x16xbf16>
    %18 = vector.shape_cast %17 : vector<8x1x208x16xbf16> to vector<8x208x16xbf16>
    %cst_12 = arith.constant dense<0xFF80> : vector<8x16xbf16>
    %19 = vector.multi_reduction <maximumf>, %18, %cst_12 [1] : vector<8x208x16xbf16> to vector<8x16xbf16>
    %c1 = arith.constant 1 : index
    %c0_13 = arith.constant 0 : index
    %c0_14 = arith.constant 0 : index
    %20 = vector.load %arg4[%c1, %c0_13, %c0_14] : memref<4x16x128xbf16, #tpu.memory_space<vmem>>, vector<1x16x128xbf16>
    %21 = vector.shape_cast %20 : vector<1x16x128xbf16> to vector<16x128xbf16>
    %cst_15 = arith.constant dense<0.000000e+00> : vector<8x128xf32>
    %22 = tpu.matmul %19, %21, %cst_15 {dimension_numbers = #tpu.dot_dimension_numbers<[1], [0], [0], [1], [0, 0, 1, 1], [], []>} : vector<8x16xbf16>, vector<16x128xbf16>, vector<8x128xf32> -> vector<8x128xf32>
    %23 = arith.addf %16, %22 : vector<8x128xf32>
    %24 = vector.extract_strided_slice %10 {offsets = [0, 2, 0, 0], sizes = [8, 1, 208, 16], strides = [1, 1, 1, 1]} : vector<8x4x208x16xbf16> to vector<8x1x208x16xbf16>
    %25 = vector.shape_cast %24 : vector<8x1x208x16xbf16> to vector<8x208x16xbf16>
    %cst_16 = arith.constant dense<0xFF80> : vector<8x16xbf16>
    %26 = vector.multi_reduction <maximumf>, %25, %cst_16 [1] : vector<8x208x16xbf16> to vector<8x16xbf16>
    %c2 = arith.constant 2 : index
    %c0_17 = arith.constant 0 : index
    %c0_18 = arith.constant 0 : index
    %27 = vector.load %arg4[%c2, %c0_17, %c0_18] : memref<4x16x128xbf16, #tpu.memory_space<vmem>>, vector<1x16x128xbf16>
    %28 = vector.shape_cast %27 : vector<1x16x128xbf16> to vector<16x128xbf16>
    %cst_19 = arith.constant dense<0.000000e+00> : vector<8x128xf32>
    %29 = tpu.matmul %26, %28, %cst_19 {dimension_numbers = #tpu.dot_dimension_numbers<[1], [0], [0], [1], [0, 0, 1, 1], [], []>} : vector<8x16xbf16>, vector<16x128xbf16>, vector<8x128xf32> -> vector<8x128xf32>
    %30 = arith.addf %23, %29 : vector<8x128xf32>
    %31 = vector.extract_strided_slice %10 {offsets = [0, 3, 0, 0], sizes = [8, 1, 208, 16], strides = [1, 1, 1, 1]} : vector<8x4x208x16xbf16> to vector<8x1x208x16xbf16>
    %32 = vector.shape_cast %31 : vector<8x1x208x16xbf16> to vector<8x208x16xbf16>
    %cst_20 = arith.constant dense<0xFF80> : vector<8x16xbf16>
    %33 = vector.multi_reduction <maximumf>, %32, %cst_20 [1] : vector<8x208x16xbf16> to vector<8x16xbf16>
    %c3 = arith.constant 3 : index
    %c0_21 = arith.constant 0 : index
    %c0_22 = arith.constant 0 : index
    %34 = vector.load %arg4[%c3, %c0_21, %c0_22] : memref<4x16x128xbf16, #tpu.memory_space<vmem>>, vector<1x16x128xbf16>
    %35 = vector.shape_cast %34 : vector<1x16x128xbf16> to vector<16x128xbf16>
    %cst_23 = arith.constant dense<0.000000e+00> : vector<8x128xf32>
    %36 = tpu.matmul %33, %35, %cst_23 {dimension_numbers = #tpu.dot_dimension_numbers<[1], [0], [0], [1], [0, 0, 1, 1], [], []>} : vector<8x16xbf16>, vector<16x128xbf16>, vector<8x128xf32> -> vector<8x128xf32>
    %37 = arith.addf %30, %36 : vector<8x128xf32>
    %c0_24 = arith.constant 0 : index
    %c0_25 = arith.constant 0 : index
    %38 = vector.load %arg5[%c0_24, %c0_25] : memref<1x128xf32, #tpu.memory_space<vmem>>, vector<1x128xf32>
    %39 = vector.broadcast %38 : vector<1x128xf32> to vector<8x128xf32>
    %40 = arith.addf %37, %39 : vector<8x128xf32>
    %c0_26 = arith.constant 0 : index
    %c0_27 = arith.constant 0 : index
    %41 = vector.load %arg6[%c0_26, %c0_27] : memref<8x128xf32, #tpu.memory_space<vmem>>, vector<8x128xf32>
    tpu.vector_store %arg6[%c0_26, %c0_27], %40 {strides = array<i32>} : memref<8x128xf32, #tpu.memory_space<vmem>>, vector<8x128xf32>,
    return
  }
  func.func @transform_0(%arg0: i32) -> (i32, i32, i32) {
    %c0_i32 = arith.constant 0 : i32
    %c0_i32_0 = arith.constant 0 : i32
    %c0_i32_1 = arith.constant 0 : i32
    return %arg0, %c0_i32, %c0_i32_0 : i32, i32, i32
  }
  func.func @transform_1(%arg0: i32) -> (i32, i32) {
    %c0_i32 = arith.constant 0 : i32
    %c0_i32_0 = arith.constant 0 : i32
    %c0_i32_1 = arith.constant 0 : i32
    return %c0_i32, %c0_i32_0 : i32, i32
  }
  func.func @transform_2(%arg0: i32) -> (i32, i32) {
    %c0_i32 = arith.constant 0 : i32
    %c0_i32_0 = arith.constant 0 : i32
    %c0_i32_1 = arith.constant 0 : i32
    return %c0_i32, %c0_i32_0 : i32, i32
  }
  func.func @transform_3(%arg0: i32) -> (i32, i32, i32) {
    %c0_i32 = arith.constant 0 : i32
    %c0_i32_0 = arith.constant 0 : i32
    %c0_i32_1 = arith.constant 0 : i32
    %c0_i32_2 = arith.constant 0 : i32
    return %c0_i32, %c0_i32_0, %c0_i32_1 : i32, i32, i32
  }
  func.func @transform_4(%arg0: i32) -> (i32, i32) {
    %c0_i32 = arith.constant 0 : i32
    %c0_i32_0 = arith.constant 0 : i32
    %c0_i32_1 = arith.constant 0 : i32
    return %c0_i32, %c0_i32_0 : i32, i32
  }
  func.func @transform_5(%arg0: i32) -> (i32, i32) {
    %c0_i32 = arith.constant 0 : i32
    %c0_i32_0 = arith.constant 0 : i32
    return %arg0, %c0_i32 : i32, i32
  }
}

</mosaic_0001>

<bundles_post_ra>
// kernel: convnet_forward.1
= control target key start
LH: loop header
LB: loop body
LE: loop exit
PB: predicated region body
PF: predicated region fallthrough
CT: control target
= control target key end

     0   :  { %s13785_s18 = smov 0   ;;  %s17623_s0 = inlined_call_operand.vmem [shape: bf16[16,832,75], index: 0, kind: input, shape index: {}]   ;;  %s17624_s1 = inlined_call_operand.vmem [shape: bf16[75,16], index: 1, kind: input, shape index: {}]   ;;  %s17625_s2 = inlined_call_operand.vmem [shape: f32[1,16], index: 2, kind: input, shape index: {}]   ;;  %s17626_s3 = inlined_call_operand.vmem [shape: bf16[4,16,128], index: 3, kind: input, shape index: {}]   ;;  %s17627_s4 = inlined_call_operand.vmem [shape: f32[1,128], index: 4, kind: input, shape index: {}]   ;;  %s17628_s5 = inlined_call_operand.vmem [shape: f32[16,128], index: 5, kind: output, shape index: {}]  }
   0x1 LB: > { %s13791_s19 = sadd.s32 4294967295, %s13752_s18   ;;  %p11149_p0 = scmp.ge.s32.totalorder %s13752_s18, 1  ;;  %s13752_s18 = sphi %s13785_s18, %s15_s18  }
   0x2   : > { %p189_p1 = scmp.lt.s32.totalorder %s13752_s18, 3 }
   0x4   : > { %p190_p2 = pnand %p11149_p0, %p189_p1 }
   0x5   : > { %s11150_s24 = sshll.u32 (!%p190_p2), %s13791_s19, 3  ;;  %p224_p4 = scmp.lt.s32.totalorder (!%p190_p2), %s13791_s19, 1 }
   0x6   : > { %193 = sbr.rel (%p190_p2) target bundleno = 2012 (0x7dc), region = 40  ;;  %p218_p3 = scmp.lt.s32.totalorder (!%p190_p2), %s11150_s24, 15 }
   0xb   : > { %v12835_v0 = vld [vmem:[%s17624_s1 + $0x20] sm:$0xf]  ;;  %v13701_v1 = vld [vmem:[%s17624_s1 + $0x20] sm:$0x30]  ;;  %vm4433_vm0 = vcmask 1044480   ;;  %vm4434_vm1 = vcmask 1045504  }
   0xc   : > { %v12836_v2 = vor.u32 %v13701_v1, %v12835_v0  ;;  %v13754_v3 = vmov 65535   ;;  %v13700_v7 = vld [vmem:[%s17624_s1 + $0x18] sm:$0xff]  ;;  %v13699_v8 = vld [vmem:[%s17624_s1 + $0x10] sm:$0xff]  ;;  %s17630_s24 = smov (!%p218_p3, %s11150_s24), 15  ;;  %v13698_v9 = vld [vmem:[%s17624_s1 + $0x8] sm:$0xff]  ;;  %vm3184_vm2 = vcmask 613376  }
   0xd   : > { %v4435_v4 = vsel %vm4433_vm0, 4294967295, %v13754_v3  ;;  %s13721_s6 = smul.u32 416, %s17630_s24  ;;  %v13697_v10 = vld [vmem:[%s17624_s1] sm:$0xff]  ;;  %vm8401_vm3 = vcmask 130048   ;;  %vm9559_vm4 = vcmask 1041409   ;;  %vm9561_vm5 = vcmask 1042434  }
   0xe   : > { %v4436_v5 = vsel %vm4434_vm1, %v4435_v4, 0  ;;  %v13886_v43 = vld [vmem:[%s17625_s2] ss:$0 sm:$0xff]  ;;  %vm9563_vm6 = vcmask 1043459   ;;  %vm9565_vm7 = vcmask 1044484   ;;  %vm9567_vm8 = vcmask 1045509  }
   0xf   : > { %v4438_v6 = vand.u32 %v12836_v2, %v4436_v5  ;;  %s13817_s11 = scalar_lea.vmem %s17623_s0, %s13721_s6  ;;  %vm9569_vm9 = vcmask 1046534   ;;  %vm9571_vm10 = vcmask 1047559   ;;  %s17632_s19 = smov (!%p224_p4, %s13791_s19), 1 }
  0x10   : > { %v13281_v11 = vld [vmem:[%s13817_s11] sm:$0xff]  ;;  %v13386_v12 = vld [vmem:[%s13817_s11 + $0x348] sm:$0xff]  ;;  %v13387_v16 = vld [vmem:[%s13817_s11 + $0x350] sm:$0xff]  ;;  %s11152_s27 = sshll.u32 %s17632_s19, 3 }
  0x11   : > { %4443 = vmatpush.bf16.msra.mxu0 %v4438_v6  ;;  %13706 = vmatpush.bf16.msra.mxu1 %v4438_v6  ;;  %v13489_v13 = vld [vmem:[%s13817_s11 + $0x680] sm:$0xff]  ;;  %v13282_v15 = vld [vmem:[%s13817_s11 + $0x8] sm:$0xff]  ;;  %v13283_v19 = vld [vmem:[%s13817_s11 + $0x10] sm:$0xff]  ;;  %s227_s7 = scalar_lea.vmem %s17628_s5, %s11152_s27 }
  0x12   : > { %13707 = vmatpush.bf16.msra.mxu2 %v4438_v6  ;;  %13708 = vmatpush.bf16.msra.mxu3 %v4438_v6  ;;  %v13593_v14 = vld [vmem:[%s13817_s11 + $0x9c0] sm:$0xff]  ;;  %v13490_v17 = vld [vmem:[%s13817_s11 + $0x688] sm:$0xff]  ;;  %v13388_v20 = vld [vmem:[%s13817_s11 + $0x358] sm:$0xff] }
  0x13   : > { %v13594_v18 = vld [vmem:[%s13817_s11 + $0x9c8] sm:$0xff]  ;;  %v13491_v21 = vld [vmem:[%s13817_s11 + $0x690] sm:$0xff]  ;;  %v13284_v23 = vld [vmem:[%s13817_s11 + $0x18] sm:$0xff] }
  0x14   : > { %v13595_v22 = vld [vmem:[%s13817_s11 + $0x9d0] sm:$0xff]  ;;  %v13389_v24 = vld [vmem:[%s13817_s11 + $0x360] sm:$0xff]  ;;  %v13492_v25 = vld [vmem:[%s13817_s11 + $0x698] sm:$0xff] }
  0x15   : > { %4444 = vmatpush.bf16.msra.mxu0 %v13700_v7  ;;  %13709 = vmatpush.bf16.msra.mxu1 %v13700_v7  ;;  %v13596_v26 = vld [vmem:[%s13817_s11 + $0x9d8] sm:$0xff]  ;;  %v13285_v27 = vld [vmem:[%s13817_s11 + $0x20] sm:$0xff]  ;;  %v13390_v28 = vld [vmem:[%s13817_s11 + $0x368] sm:$0xff] }
  0x16   : > { %13710 = vmatpush.bf16.msra.mxu2 %v13700_v7  ;;  %13711 = vmatpush.bf16.msra.mxu3 %v13700_v7  ;;  %v13493_v29 = vld [vmem:[%s13817_s11 + $0x6a0] sm:$0xff]  ;;  %v13286_v31 = vld [vmem:[%s13817_s11 + $0x28] sm:$0xff]  ;;  %v13391_v32 = vld [vmem:[%s13817_s11 + $0x370] sm:$0xff] }
  0x17   : > { %v13597_v30 = vld [vmem:[%s13817_s11 + $0x9e0] sm:$0xff]  ;;  %v13494_v33 = vld [vmem:[%s13817_s11 + $0x6a8] sm:$0xff]  ;;  %v13287_v35 = vld [vmem:[%s13817_s11 + $0x30] sm:$0xff] }
  0x18   : > { %v13598_v34 = vld [vmem:[%s13817_s11 + $0x9e8] sm:$0xff]  ;;  %v13392_v36 = vld [vmem:[%s13817_s11 + $0x378] sm:$0xff]  ;;  %v13495_v37 = vld [vmem:[%s13817_s11 + $0x6b0] sm:$0xff] }
  0x19   : > { %4445 = vmatpush.bf16.msra.mxu0 %v13699_v8  ;;  %13712 = vmatpush.bf16.msra.mxu1 %v13699_v8  ;;  %v13599_v38 = vld [vmem:[%s13817_s11 + $0x9f0] sm:$0xff]  ;;  %v13288_v39 = vld [vmem:[%s13817_s11 + $0x38] sm:$0xff]  ;;  %v13393_v40 = vld [vmem:[%s13817_s11 + $0x380] sm:$0xff] }
  0x1a   : > { %13713 = vmatpush.bf16.msra.mxu2 %v13699_v8  ;;  %13714 = vmatpush.bf16.msra.mxu3 %v13699_v8  ;;  %v13496_v41 = vld [vmem:[%s13817_s11 + $0x6b8] sm:$0xff]  ;;  %v13289_v44 = vld [vmem:[%s13817_s11 + $0x40] sm:$0xff]  ;;  %v13394_v45 = vld [vmem:[%s13817_s11 + $0x388] sm:$0xff] }
  0x1b   : > { %v13600_v42 = vld [vmem:[%s13817_s11 + $0x9f8] sm:$0xff]  ;;  %v13497_v48 = vld [vmem:[%s13817_s11 + $0x6c0] sm:$0xff] }
  0x1c   : > { %v13601_v49 = vld [vmem:[%s13817_s11 + $0xa00] sm:$0xff] }
  0x1d   : > { %4446 = vmatpush.bf16.msra.mxu0 %v13698_v9  ;;  %13715 = vmatpush.bf16.msra.mxu1 %v13698_v9 }
  0x1e   : > { %13716 = vmatpush.bf16.msra.mxu2 %v13698_v9  ;;  %13717 = vmatpush.bf16.msra.mxu3 %v13698_v9 }
  0x21   : > { %4447 = vmatpush.bf16.msra.mxu0 %v13697_v10  ;;  %13718 = vmatpush.bf16.msra.mxu1 %v13697_v10 }
  0x22   : > { %13719 = vmatpush.bf16.msra.mxu2 %v13697_v10  ;;  %13720 = vmatpush.bf16.msra.mxu3 %v13697_v10 }
  0x24   : > { %12837 = vmatmul.msk.bf16.vlgmr.msra.gmra.mxu0 %vm3184_vm2, %v13281_v11  ;;  %12942 = vmatmul.msk.bf16.vlgmr.msra.gmra.mxu1 %vm3184_vm2, %v13386_v12 }
  0x25   : > { %13045 = vmatmul.msk.bf16.vlgmr.msra.gmra.mxu2 %vm3184_vm2, %v13489_v13  ;;  %13149 = vmatmul.msk.bf16.vlgmr.msra.gmra.mxu3 %vm3184_vm2, %v13593_v14 }
  0x34   : > { %12838 = vmatmul.msk.bf16.gmra.mxu0 %vm3184_vm2, %v13282_v15  ;;  %12943 = vmatmul.msk.bf16.gmra.mxu1 %vm3184_vm2, %v13387_v16  ;;  %v13290_v16 = vld [vmem:[%s13817_s11 + $0x48] sm:$0xff] }
  0x35   : > { %13046 = vmatmul.msk.bf16.gmra.mxu2 %vm3184_vm2, %v13490_v17  ;;  %13150 = vmatmul.msk.bf16.gmra.mxu3 %vm3184_vm2, %v13594_v18  ;;  %v13395_v17 = vld [vmem:[%s13817_s11 + $0x390] sm:$0xff] }
  0x44   : > { %12839 = vmatmul.msk.bf16.gmra.mxu0 %vm3184_vm2, %v13283_v19  ;;  %12944 = vmatmul.msk.bf16.gmra.mxu1 %vm3184_vm2, %v13388_v20 }
  0x45   : > { %13047 = vmatmul.msk.bf16.gmra.mxu2 %vm3184_vm2, %v13491_v21  ;;  %13151 = vmatmul.msk.bf16.gmra.mxu3 %vm3184_vm2, %v13595_v22 }
  0x54   : > { %12840 = vmatmul.msk.bf16.gmra.mxu0 %vm3184_vm2, %v13284_v23  ;;  %12945 = vmatmul.msk.bf16.gmra.mxu1 %vm3184_vm2, %v13389_v24  ;;  %v13498_v24 = vld [vmem:[%s13817_s11 + $0x6c8] sm:$0xff] }
  0x55   : > { %13048 = vmatmul.msk.bf16.gmra.mxu2 %vm3184_vm2, %v13492_v25  ;;  %13152 = vmatmul.msk.bf16.gmra.mxu3 %vm3184_vm2, %v13596_v26  ;;  %v13602_v25 = vld [vmem:[%s13817_s11 + $0xa08] sm:$0xff] }
  0x64   : > { %12841 = vmatmul.msk.bf16.gmra.mxu0 %vm3184_vm2, %v13285_v27  ;;  %12946 = vmatmul.msk.bf16.gmra.mxu1 %vm3184_vm2, %v13390_v28 }
  0x65   : > { %13049 = vmatmul.msk.bf16.gmra.mxu2 %vm3184_vm2, %v13493_v29  ;;  %13153 = vmatmul.msk.bf16.gmra.mxu3 %vm3184_vm2, %v13597_v30 }
  0x74   : > { %12842 = vmatmul.msk.bf16.gmra.mxu0 %vm3184_vm2, %v13286_v31  ;;  %12947 = vmatmul.msk.bf16.gmra.mxu1 %vm3184_vm2, %v13391_v32 }
  0x75   : > { %13050 = vmatmul.msk.bf16.gmra.mxu2 %vm3184_vm2, %v13494_v33  ;;  %13154 = vmatmul.msk.bf16.gmra.mxu3 %vm3184_vm2, %v13598_v34 }
  0x84   : > { %12843 = vmatmul.msk.bf16.gmra.mxu0 %vm3184_vm2, %v13287_v35  ;;  %12948 = vmatmul.msk.bf16.gmra.mxu1 %vm3184_vm2, %v13392_v36 }
  0x85   : > { %13051 = vmatmul.msk.bf16.gmra.mxu2 %vm3184_vm2, %v13495_v37  ;;  %13155 = vmatmul.msk.bf16.gmra.mxu3 %vm3184_vm2, %v13599_v38 }
  0x94   : > { %12844 = vmatmul.msk.bf16.gmra.mxu0 %vm3184_vm2, %v13288_v39  ;;  %12949 = vmatmul.msk.bf16.gmra.mxu1 %vm3184_vm2, %v13393_v40 }
  0x95   : > { %13052 = vmatmul.msk.bf16.gmra.mxu2 %vm3184_vm2, %v13496_v41  ;;  %13156 = vmatmul.msk.bf16.gmra.mxu3 %vm3184_vm2, %v13600_v42 }
  0xa1   : > { %v4449_v46 = vpop.f32.mrf.mxu0  ;;  %v4974_v47 = vpop.f32.mrf.mxu1 }
  0xa2   : > { %v4450_v50 = vadd.f32 %v13886_v43, %v4449_v46  ;;  %v4975_v51 = vadd.f32 %v13886_v43, %v4974_v47 }
  0xa4   : > { %v6529_v52 = vmax.f32 %v4450_v50, 0.0  ;;  %v6739_v53 = vmax.f32 %v4975_v51, 0.0  ;;  %12845 = vmatmul.msk.bf16.gmra.mxu0 %vm3184_vm2, %v13289_v44  ;;  %12950 = vmatmul.msk.bf16.gmra.mxu1 %vm3184_vm2, %v13394_v45 }
  0xa5   : > { %13053 = vmatmul.msk.bf16.gmra.mxu2 %vm3184_vm2, %v13497_v48  ;;  %13157 = vmatmul.msk.bf16.gmra.mxu3 %vm3184_vm2, %v13601_v49 }
  0xa6   : > { %v7361_v54 = vpack.c.bf16 %v6529_v52, %v6529_v52  ;;  %v7571_v55 = vpack.c.bf16 %v6739_v53, %v6739_v53 }
  0xa8   : > { %v5489_v56 = vpop.f32.mrf.mxu2  ;;  %v6009_v57 = vpop.f32.mrf.mxu3  ;;  %v8193_v2 = vunpack.c.l.bf16 %v7361_v54  ;;  %v8247_v3 = vunpack.c.l.bf16 %v7571_v55 }
  0xa9   : > { %v5490_v58 = vadd.f32 %v13886_v43, %v5489_v56  ;;  %v6010_v59 = vadd.f32 %v13886_v43, %v6009_v57  ;;  %v4451_v60 = vpop.f32.mrf.mxu0  ;;  %v4976_v61 = vpop.f32.mrf.mxu1 }
  0xaa   : > { %v4452_v62 = vadd.f32 %v13886_v43, %v4451_v60  ;;  %v4977_v63 = vadd.f32 %v13886_v43, %v4976_v61  ;;  %v8402_v10 = vsel %vm8401_vm3, %v8193_v2, -inf  ;;  %v8519_v11 = vsel %vm8401_vm3, %v8247_v3, -inf }
  0xab   : > { %v6945_v0 = vmax.f32 %v5490_v58, 0.0  ;;  %v7153_v1 = vmax.f32 %v6010_v59, 0.0 }
  0xac   : > { %v6530_v4 = vmax.f32 %v4452_v62, 0.0  ;;  %v6740_v5 = vmax.f32 %v4977_v63, 0.0 }
  0xad   : > { %v7777_v6 = vpack.c.bf16 %v6945_v0, %v6945_v0  ;;  %v7985_v7 = vpack.c.bf16 %v7153_v1, %v7153_v1 }
  0xae   : > { %v7362_v8 = vpack.c.bf16 %v6530_v4, %v6530_v4  ;;  %v7572_v9 = vpack.c.bf16 %v6740_v5, %v6740_v5 }
  0xaf   : > { %v8297_v18 = vunpack.c.l.bf16 %v7777_v6  ;;  %v8349_v19 = vunpack.c.l.bf16 %v7985_v7 }
  0xb0   : > { %v8194_v12 = vunpack.c.l.bf16 %v7362_v8  ;;  %v8248_v13 = vunpack.c.l.bf16 %v7572_v9  ;;  %v5491_v14 = vpop.f32.mrf.mxu2  ;;  %v6011_v15 = vpop.f32.mrf.mxu3 }
  0xb1   : > { %v5492_v20 = vadd.f32 %v13886_v43, %v5491_v14  ;;  %v6012_v21 = vadd.f32 %v13886_v43, %v6011_v15  ;;  %v4454_v22 = vpop.f32.mrf.mxu0  ;;  %v4979_v23 = vpop.f32.mrf.mxu1  ;;  %v8630_v40 = vsel %vm8401_vm3, %v8297_v18, -inf  ;;  %v8744_v41 = vsel %vm8401_vm3, %v8349_v19, -inf  ;;  %v13499_v19 = vld [vmem:[%s13817_s11 + $0x6d0] sm:$0xff] }
  0xb2   : > { %v8403_v26 = vsel %vm8401_vm3, %v8194_v12, -inf  ;;  %v8521_v27 = vsel %vm8401_vm3, %v8248_v13, -inf  ;;  %v4455_v28 = vadd.f32 %v13886_v43, %v4454_v22  ;;  %v4980_v29 = vadd.f32 %v13886_v43, %v4979_v23  ;;  %v13396_v12 = vld [vmem:[%s13817_s11 + $0x398] sm:$0xff] }
  0xb3   : > { %v8404_v30 = vmax.f32 %v8402_v10, %v8403_v26  ;;  %v8520_v31 = vmax.f32 %v8521_v27, %v8519_v11  ;;  %v6946_v32 = vmax.f32 %v5492_v20, 0.0  ;;  %v7154_v33 = vmax.f32 %v6012_v21, 0.0  ;;  %v13291_v11 = vld [vmem:[%s13817_s11 + $0x50] sm:$0xff] }
  0xb4   : > { %v6531_v34 = vmax.f32 %v4455_v28, 0.0  ;;  %v6741_v35 = vmax.f32 %v4980_v29, 0.0  ;;  %12846 = vmatmul.msk.bf16.gmra.mxu0 %vm3184_vm2, %v13290_v16  ;;  %12951 = vmatmul.msk.bf16.gmra.mxu1 %vm3184_vm2, %v13395_v17 }
  0xb5   : > { %v7778_v36 = vpack.c.bf16 %v6946_v32, %v6946_v32  ;;  %v7986_v37 = vpack.c.bf16 %v7154_v33, %v7154_v33  ;;  %13054 = vmatmul.msk.bf16.gmra.mxu2 %vm3184_vm2, %v13498_v24  ;;  %13158 = vmatmul.msk.bf16.gmra.mxu3 %vm3184_vm2, %v13602_v25  ;;  %v13603_v24 = vld [vmem:[%s13817_s11 + $0xa10] sm:$0xff] }
  0xb6   : > { %v7363_v38 = vpack.c.bf16 %v6531_v34, %v6531_v34  ;;  %v7573_v39 = vpack.c.bf16 %v6741_v35, %v6741_v35 }
  0xb7   : > { %v8298_v42 = vunpack.c.l.bf16 %v7778_v36  ;;  %v8350_v44 = vunpack.c.l.bf16 %v7986_v37 }
  0xb8   : > { %v8195_v45 = vunpack.c.l.bf16 %v7363_v38  ;;  %v8249_v46 = vunpack.c.l.bf16 %v7573_v39  ;;  %v5494_v47 = vpop.f32.mrf.mxu2  ;;  %v6014_v48 = vpop.f32.mrf.mxu3 }
  0xb9   : > { %v8631_v49 = vsel %vm8401_vm3, %v8298_v42, -inf  ;;  %v8745_v50 = vsel %vm8401_vm3, %v8350_v44, -inf  ;;  %v5495_v51 = vadd.f32 %v13886_v43, %v5494_v47  ;;  %v6015_v52 = vadd.f32 %v13886_v43, %v6014_v48  ;;  %v4456_v53 = vpop.f32.mrf.mxu0  ;;  %v4981_v54 = vpop.f32.mrf.mxu1 }
  0xba   : > { %v8632_v55 = vmax.f32 %v8630_v40, %v8631_v49  ;;  %v8746_v56 = vmax.f32 %v8744_v41, %v8745_v50  ;;  %v8405_v57 = vsel %vm8401_vm3, %v8195_v45, -inf  ;;  %v8523_v58 = vsel %vm8401_vm3, %v8249_v46, -inf }
  0xbb   : > { %v13926_v59 = vmax.f32 %v8404_v30, %v8405_v57  ;;  %v13928_v60 = vmax.f32 %v8520_v31, %v8523_v58  ;;  %v6947_v61 = vmax.f32 %v5495_v51, 0.0  ;;  %v7155_v62 = vmax.f32 %v6015_v52, 0.0 }
  0xbc   : > { %v4457_v63 = vadd.f32 %v13886_v43, %v4456_v53  ;;  %v4982_v0 = vadd.f32 %v13886_v43, %v4981_v54 }
  0xbd   : > { %v7779_v1 = vpack.c.bf16 %v6947_v61, %v6947_v61  ;;  %v7987_v2 = vpack.c.bf16 %v7155_v62, %v7155_v62 }
  0xbe   : > { %v6532_v3 = vmax.f32 %v4457_v63, 0.0  ;;  %v6742_v4 = vmax.f32 %v4982_v0, 0.0 }
  0xbf   : > { %v8299_v5 = vunpack.c.l.bf16 %v7779_v1  ;;  %v8351_v6 = vunpack.c.l.bf16 %v7987_v2 }
  0xc0   : > { %v7364_v7 = vpack.c.bf16 %v6532_v3, %v6532_v3  ;;  %v7574_v8 = vpack.c.bf16 %v6742_v4, %v6742_v4  ;;  %v5496_v9 = vpop.f32.mrf.mxu2  ;;  %v6016_v10 = vpop.f32.mrf.mxu3 }
  0xc1   : > { %v8633_v13 = vsel %vm8401_vm3, %v8299_v5, -inf  ;;  %v8747_v14 = vsel %vm8401_vm3, %v8351_v6, -inf  ;;  %v5497_v15 = vadd.f32 %v13886_v43, %v5496_v9  ;;  %v6017_v16 = vadd.f32 %v13886_v43, %v6016_v10  ;;  %v4459_v17 = vpop.f32.mrf.mxu0  ;;  %v4984_v18 = vpop.f32.mrf.mxu1  ;;  %v13397_v9 = vld [vmem:[%s13817_s11 + $0x3a0] sm:$0xff] }
  0xc2   : > { %v13939_v20 = vmax.f32 %v8632_v55, %v8633_v13  ;;  %v13941_v21 = vmax.f32 %v8746_v56, %v8747_v14  ;;  %v8196_v22 = vunpack.c.l.bf16 %v7364_v7  ;;  %v8250_v23 = vunpack.c.l.bf16 %v7574_v8  ;;  %v13292_v8 = vld [vmem:[%s13817_s11 + $0x58] sm:$0xff] }
  0xc3   : > { %v6948_v25 = vmax.f32 %v5497_v15, 0.0  ;;  %v7156_v26 = vmax.f32 %v6017_v16, 0.0  ;;  %v4460_v27 = vadd.f32 %v13886_v43, %v4459_v17  ;;  %v4985_v28 = vadd.f32 %v13886_v43, %v4984_v18  ;;  %v13500_v16 = vld [vmem:[%s13817_s11 + $0x6d8] sm:$0xff] }
  0xc4   : > { %v8407_v29 = vsel %vm8401_vm3, %v8196_v22, -inf  ;;  %v8525_v30 = vsel %vm8401_vm3, %v8250_v23, -inf  ;;  %12847 = vmatmul.msk.bf16.gmra.mxu0 %vm3184_vm2, %v13291_v11  ;;  %12952 = vmatmul.msk.bf16.gmra.mxu1 %vm3184_vm2, %v13396_v12 }
  0xc5   : > { %v8408_v31 = vmax.f32 %v13926_v59, %v8407_v29  ;;  %v8524_v32 = vmax.f32 %v13928_v60, %v8525_v30  ;;  %v7780_v33 = vpack.c.bf16 %v6948_v25, %v6948_v25  ;;  %v7988_v34 = vpack.c.bf16 %v7156_v26, %v7156_v26  ;;  %13055 = vmatmul.msk.bf16.gmra.mxu2 %vm3184_vm2, %v13499_v19 }
  0xc6   : > { %v6533_v35 = vmax.f32 %v4460_v27, 0.0  ;;  %v6743_v36 = vmax.f32 %v4985_v28, 0.0  ;;  %13159 = vmatmul.msk.bf16.gmra.mxu3 %vm3184_vm2, %v13603_v24 }
  0xc7   : > { %v8300_v37 = vunpack.c.l.bf16 %v7780_v33  ;;  %v8352_v38 = vunpack.c.l.bf16 %v7988_v34 }
  0xc8   : > { %v7365_v39 = vpack.c.bf16 %v6533_v35, %v6533_v35  ;;  %v7575_v40 = vpack.c.bf16 %v6743_v36, %v6743_v36  ;;  %v5499_v41 = vpop.f32.mrf.mxu2  ;;  %v6019_v42 = vpop.f32.mrf.mxu3 }
  0xc9   : > { %v8635_v44 = vsel %vm8401_vm3, %v8300_v37, -inf  ;;  %v8749_v45 = vsel %vm8401_vm3, %v8352_v38, -inf  ;;  %v5500_v46 = vadd.f32 %v13886_v43, %v5499_v41  ;;  %v6020_v47 = vadd.f32 %v13886_v43, %v6019_v42  ;;  %v4461_v48 = vpop.f32.mrf.mxu0  ;;  %v4986_v49 = vpop.f32.mrf.mxu1 }
  0xca   : > { %v8636_v50 = vmax.f32 %v13939_v20, %v8635_v44  ;;  %v8750_v51 = vmax.f32 %v13941_v21, %v8749_v45  ;;  %v8197_v52 = vunpack.c.l.bf16 %v7365_v39  ;;  %v8251_v53 = vunpack.c.l.bf16 %v7575_v40  ;;  %v13604_v21 = vld [vmem:[%s13817_s11 + $0xa18] sm:$0xff] }
  0xcb   : > { %v6949_v54 = vmax.f32 %v5500_v46, 0.0  ;;  %v7157_v55 = vmax.f32 %v6020_v47, 0.0  ;;  %v4462_v56 = vadd.f32 %v13886_v43, %v4461_v48  ;;  %v4987_v57 = vadd.f32 %v13886_v43, %v4986_v49 }
  0xcc   : > { %v8409_v58 = vsel %vm8401_vm3, %v8197_v52, -inf  ;;  %v8527_v59 = vsel %vm8401_vm3, %v8251_v53, -inf }
  0xcd   : > { %v13964_v60 = vmax.f32 %v8408_v31, %v8409_v58  ;;  %v13966_v61 = vmax.f32 %v8524_v32, %v8527_v59  ;;  %v7781_v62 = vpack.c.bf16 %v6949_v54, %v6949_v54  ;;  %v7989_v63 = vpack.c.bf16 %v7157_v55, %v7157_v55 }
  0xce   : > { %v6534_v0 = vmax.f32 %v4462_v56, 0.0  ;;  %v6744_v1 = vmax.f32 %v4987_v57, 0.0 }
  0xcf   : > { %v8301_v2 = vunpack.c.l.bf16 %v7781_v62  ;;  %v8353_v3 = vunpack.c.l.bf16 %v7989_v63 }
  0xd0   : > { %v7366_v4 = vpack.c.bf16 %v6534_v0, %v6534_v0  ;;  %v7576_v5 = vpack.c.bf16 %v6744_v1, %v6744_v1  ;;  %v5501_v6 = vpop.f32.mrf.mxu2  ;;  %v6021_v7 = vpop.f32.mrf.mxu3 }
  0xd1   : > { %v8637_v10 = vsel %vm8401_vm3, %v8301_v2, -inf  ;;  %v8751_v11 = vsel %vm8401_vm3, %v8353_v3, -inf  ;;  %v5502_v12 = vadd.f32 %v13886_v43, %v5501_v6  ;;  %v6022_v13 = vadd.f32 %v13886_v43, %v6021_v7  ;;  %v4464_v14 = vpop.f32.mrf.mxu0  ;;  %v4989_v15 = vpop.f32.mrf.mxu1  ;;  %v13398_v6 = vld [vmem:[%s13817_s11 + $0x3a8] sm:$0xff] }
  0xd2   : > { %v13975_v17 = vmax.f32 %v8636_v50, %v8637_v10  ;;  %v13977_v18 = vmax.f32 %v8750_v51, %v8751_v11  ;;  %v8198_v19 = vunpack.c.l.bf16 %v7366_v4  ;;  %v8252_v20 = vunpack.c.l.bf16 %v7576_v5  ;;  %v13293_v5 = vld [vmem:[%s13817_s11 + $0x60] sm:$0xff] }
  0xd3   : > { %v6950_v22 = vmax.f32 %v5502_v12, 0.0  ;;  %v7158_v23 = vmax.f32 %v6022_v13, 0.0  ;;  %v4465_v24 = vadd.f32 %v13886_v43, %v4464_v14  ;;  %v4990_v25 = vadd.f32 %v13886_v43, %v4989_v15  ;;  %v13501_v13 = vld [vmem:[%s13817_s11 + $0x6e0] sm:$0xff] }
  0xd4   : > { %v8411_v26 = vsel %vm8401_vm3, %v8198_v19, -inf  ;;  %v8529_v27 = vsel %vm8401_vm3, %v8252_v20, -inf  ;;  %12848 = vmatmul.msk.bf16.gmra.mxu0 %vm3184_vm2, %v13292_v8  ;;  %12953 = vmatmul.msk.bf16.gmra.mxu1 %vm3184_vm2, %v13397_v9 }
  0xd5   : > { %v8412_v28 = vmax.f32 %v13964_v60, %v8411_v26  ;;  %v8528_v29 = vmax.f32 %v13966_v61, %v8529_v27  ;;  %v7782_v30 = vpack.c.bf16 %v6950_v22, %v6950_v22  ;;  %v7990_v31 = vpack.c.bf16 %v7158_v23, %v7158_v23  ;;  %13056 = vmatmul.msk.bf16.gmra.mxu2 %vm3184_vm2, %v13500_v16 }
  0xd6   : > { %v6535_v32 = vmax.f32 %v4465_v24, 0.0  ;;  %v6745_v33 = vmax.f32 %v4990_v25, 0.0  ;;  %13160 = vmatmul.msk.bf16.gmra.mxu3 %vm3184_vm2, %v13604_v21 }
  0xd7   : > { %v8302_v34 = vunpack.c.l.bf16 %v7782_v30  ;;  %v8354_v35 = vunpack.c.l.bf16 %v7990_v31  ;;  %v13704_v30 = vld [vmem:[%s17626_s3 + $0x10] sm:$0xff] }
  0xd8   : > { %v7367_v36 = vpack.c.bf16 %v6535_v32, %v6535_v32  ;;  %v7577_v37 = vpack.c.bf16 %v6745_v33, %v6745_v33  ;;  %v5504_v38 = vpop.f32.mrf.mxu2  ;;  %v6024_v39 = vpop.f32.mrf.mxu3  ;;  %10357 = vmatpush.bf16.msrb.mxu3 %v13704_v30 }
  0xd9   : > { %v8639_v40 = vsel %vm8401_vm3, %v8302_v34, -inf  ;;  %v8753_v41 = vsel %vm8401_vm3, %v8354_v35, -inf  ;;  %v5505_v42 = vadd.f32 %v13886_v43, %v5504_v38  ;;  %v6025_v44 = vadd.f32 %v13886_v43, %v6024_v39  ;;  %v4466_v45 = vpop.f32.mrf.mxu0  ;;  %v4991_v46 = vpop.f32.mrf.mxu1 }
  0xda   : > { %v8640_v47 = vmax.f32 %v13975_v17, %v8639_v40  ;;  %v8754_v48 = vmax.f32 %v13977_v18, %v8753_v41  ;;  %v8199_v49 = vunpack.c.l.bf16 %v7367_v36  ;;  %v8253_v50 = vunpack.c.l.bf16 %v7577_v37  ;;  %v13605_v18 = vld [vmem:[%s13817_s11 + $0xa20] sm:$0xff] }
  0xdb   : > { %v6951_v51 = vmax.f32 %v5505_v42, 0.0  ;;  %v7159_v52 = vmax.f32 %v6025_v44, 0.0  ;;  %v4467_v53 = vadd.f32 %v13886_v43, %v4466_v45  ;;  %v4992_v54 = vadd.f32 %v13886_v43, %v4991_v46 }
  0xdc   : > { %v8413_v55 = vsel %vm8401_vm3, %v8199_v49, -inf  ;;  %v8531_v56 = vsel %vm8401_vm3, %v8253_v50, -inf }
  0xdd   : > { %v14000_v57 = vmax.f32 %v8412_v28, %v8413_v55  ;;  %v14002_v58 = vmax.f32 %v8528_v29, %v8531_v56  ;;  %v7783_v59 = vpack.c.bf16 %v6951_v51, %v6951_v51  ;;  %v7991_v60 = vpack.c.bf16 %v7159_v52, %v7159_v52  ;;  %v13702_v29 = vld [vmem:[%s17626_s3] sm:$0xff] }
  0xde   : > { %v6536_v61 = vmax.f32 %v4467_v53, 0.0  ;;  %v6746_v62 = vmax.f32 %v4992_v54, 0.0  ;;  %9636 = vmatpush.bf16.msrb.mxu2 %v13702_v29 }
  0xdf   : > { %v8303_v63 = vunpack.c.l.bf16 %v7783_v59  ;;  %v8355_v0 = vunpack.c.l.bf16 %v7991_v60  ;;  %v13703_v60 = vld [vmem:[%s17626_s3 + $0x8] sm:$0xff] }
  0xe0   : > { %v7368_v1 = vpack.c.bf16 %v6536_v61, %v6536_v61  ;;  %v7578_v2 = vpack.c.bf16 %v6746_v62, %v6746_v62  ;;  %v5506_v3 = vpop.f32.mrf.mxu2  ;;  %v6026_v4 = vpop.f32.mrf.mxu3  ;;  %9590 = vmatpush.bf16.msrb.mxu1 %v13703_v60 }
  0xe1   : > { %v8641_v7 = vsel %vm8401_vm3, %v8303_v63, -inf  ;;  %v8755_v8 = vsel %vm8401_vm3, %v8355_v0, -inf  ;;  %v5507_v9 = vadd.f32 %v13886_v43, %v5506_v3  ;;  %v6027_v10 = vadd.f32 %v13886_v43, %v6026_v4  ;;  %v4469_v11 = vpop.f32.mrf.mxu0  ;;  %v4994_v12 = vpop.f32.mrf.mxu1 }
  0xe2   : > { %v14011_v14 = vmax.f32 %v8640_v47, %v8641_v7  ;;  %v14013_v15 = vmax.f32 %v8754_v48, %v8755_v8  ;;  %v8200_v16 = vunpack.c.l.bf16 %v7368_v1  ;;  %v8254_v17 = vunpack.c.l.bf16 %v7578_v2 }
  0xe3   : > { %v6952_v19 = vmax.f32 %v5507_v9, 0.0  ;;  %v7160_v20 = vmax.f32 %v6027_v10, 0.0  ;;  %v4470_v21 = vadd.f32 %v13886_v43, %v4469_v11  ;;  %v4995_v22 = vadd.f32 %v13886_v43, %v4994_v12 }
  0xe4   : > { %v8415_v23 = vsel %vm8401_vm3, %v8200_v16, -inf  ;;  %v8533_v24 = vsel %vm8401_vm3, %v8254_v17, -inf  ;;  %12849 = vmatmul.msk.bf16.gmra.mxu0 %vm3184_vm2, %v13293_v5  ;;  %12954 = vmatmul.msk.bf16.gmra.mxu1 %vm3184_vm2, %v13398_v6  ;;  %v13294_v5 = vld [vmem:[%s13817_s11 + $0x68] sm:$0xff]  ;;  %v13399_v6 = vld [vmem:[%s13817_s11 + $0x3b0] sm:$0xff] }
  0xe5   : > { %v8416_v25 = vmax.f32 %v14000_v57, %v8415_v23  ;;  %v8532_v26 = vmax.f32 %v14002_v58, %v8533_v24  ;;  %v7784_v27 = vpack.c.bf16 %v6952_v19, %v6952_v19  ;;  %v7992_v28 = vpack.c.bf16 %v7160_v20, %v7160_v20  ;;  %13057 = vmatmul.msk.bf16.gmra.mxu2 %vm3184_vm2, %v13501_v13  ;;  %v13502_v13 = vld [vmem:[%s13817_s11 + $0x6e8] sm:$0xff] }
  0xe6   : > { %v6537_v31 = vmax.f32 %v4470_v21, 0.0  ;;  %v6747_v32 = vmax.f32 %v4995_v22, 0.0  ;;  %13161 = vmatmul.msk.bf16.gmra.mxu3 %vm3184_vm2, %v13605_v18  ;;  %v13606_v18 = vld [vmem:[%s13817_s11 + $0xa28] sm:$0xff] }
  0xe7   : > { %v8304_v33 = vunpack.c.l.bf16 %v7784_v27  ;;  %v8356_v34 = vunpack.c.l.bf16 %v7992_v28 }
  0xe8   : > { %v7369_v35 = vpack.c.bf16 %v6537_v31, %v6537_v31  ;;  %v7579_v36 = vpack.c.bf16 %v6747_v32, %v6747_v32  ;;  %v5509_v37 = vpop.f32.mrf.mxu2  ;;  %v6029_v38 = vpop.f32.mrf.mxu3 }
  0xe9   : > { %v8643_v39 = vsel %vm8401_vm3, %v8304_v33, -inf  ;;  %v8757_v40 = vsel %vm8401_vm3, %v8356_v34, -inf  ;;  %v5510_v41 = vadd.f32 %v13886_v43, %v5509_v37  ;;  %v6030_v42 = vadd.f32 %v13886_v43, %v6029_v38  ;;  %v4471_v44 = vpop.f32.mrf.mxu0  ;;  %v4996_v45 = vpop.f32.mrf.mxu1 }
  0xea   : > { %v8644_v46 = vmax.f32 %v14011_v14, %v8643_v39  ;;  %v8758_v47 = vmax.f32 %v14013_v15, %v8757_v40  ;;  %v8201_v48 = vunpack.c.l.bf16 %v7369_v35  ;;  %v8255_v49 = vunpack.c.l.bf16 %v7579_v36 }
  0xeb   : > { %v6953_v50 = vmax.f32 %v5510_v41, 0.0  ;;  %v7161_v51 = vmax.f32 %v6030_v42, 0.0  ;;  %v4472_v52 = vadd.f32 %v13886_v43, %v4471_v44  ;;  %v4997_v53 = vadd.f32 %v13886_v43, %v4996_v45 }
  0xec   : > { %v8417_v54 = vsel %vm8401_vm3, %v8201_v48, -inf  ;;  %v8535_v55 = vsel %vm8401_vm3, %v8255_v49, -inf }
  0xed   : > { %v14042_v56 = vmax.f32 %v8416_v25, %v8417_v54  ;;  %v14044_v57 = vmax.f32 %v8532_v26, %v8535_v55  ;;  %v7785_v58 = vpack.c.bf16 %v6953_v50, %v6953_v50  ;;  %v7993_v59 = vpack.c.bf16 %v7161_v51, %v7161_v51 }
  0xee   : > { %v6538_v61 = vmax.f32 %v4472_v52, 0.0  ;;  %v6748_v62 = vmax.f32 %v4997_v53, 0.0 }
  0xef   : > { %v8305_v63 = vunpack.c.l.bf16 %v7785_v58  ;;  %v8357_v0 = vunpack.c.l.bf16 %v7993_v59 }
  0xf0   : > { %v7370_v1 = vpack.c.bf16 %v6538_v61, %v6538_v61  ;;  %v7580_v2 = vpack.c.bf16 %v6748_v62, %v6748_v62  ;;  %v5511_v3 = vpop.f32.mrf.mxu2  ;;  %v6031_v4 = vpop.f32.mrf.mxu3 }
  0xf1   : > { %v8645_v7 = vsel %vm8401_vm3, %v8305_v63, -inf  ;;  %v8759_v8 = vsel %vm8401_vm3, %v8357_v0, -inf  ;;  %v5512_v9 = vadd.f32 %v13886_v43, %v5511_v3  ;;  %v6032_v10 = vadd.f32 %v13886_v43, %v6031_v4  ;;  %v4474_v11 = vpop.f32.mrf.mxu0  ;;  %v4999_v12 = vpop.f32.mrf.mxu1  ;;  %v13400_v3 = vld [vmem:[%s13817_s11 + $0x3b8] sm:$0xff] }
  0xf2   : > { %v14056_v14 = vmax.f32 %v8644_v46, %v8645_v7  ;;  %v14058_v15 = vmax.f32 %v8758_v47, %v8759_v8  ;;  %v8202_v16 = vunpack.c.l.bf16 %v7370_v1  ;;  %v8256_v17 = vunpack.c.l.bf16 %v7580_v2  ;;  %v13295_v2 = vld [vmem:[%s13817_s11 + $0x70] sm:$0xff] }
  0xf3   : > { %v6954_v19 = vmax.f32 %v5512_v9, 0.0  ;;  %v7162_v20 = vmax.f32 %v6032_v10, 0.0  ;;  %v4475_v21 = vadd.f32 %v13886_v43, %v4474_v11  ;;  %v5000_v22 = vadd.f32 %v13886_v43, %v4999_v12  ;;  %v13503_v10 = vld [vmem:[%s13817_s11 + $0x6f0] sm:$0xff] }
  0xf4   : > { %v8419_v23 = vsel %vm8401_vm3, %v8202_v16, -inf  ;;  %v8537_v24 = vsel %vm8401_vm3, %v8256_v17, -inf  ;;  %12850 = vmatmul.msk.bf16.gmra.mxu0 %vm3184_vm2, %v13294_v5  ;;  %12955 = vmatmul.msk.bf16.gmra.mxu1 %vm3184_vm2, %v13399_v6 }
  0xf5   : > { %v8420_v25 = vmax.f32 %v14042_v56, %v8419_v23  ;;  %v8536_v26 = vmax.f32 %v14044_v57, %v8537_v24  ;;  %v7786_v27 = vpack.c.bf16 %v6954_v19, %v6954_v19  ;;  %v7994_v28 = vpack.c.bf16 %v7162_v20, %v7162_v20  ;;  %13058 = vmatmul.msk.bf16.gmra.mxu2 %vm3184_vm2, %v13502_v13 }
  0xf6   : > { %v6539_v29 = vmax.f32 %v4475_v21, 0.0  ;;  %v6749_v30 = vmax.f32 %v5000_v22, 0.0  ;;  %13162 = vmatmul.msk.bf16.gmra.mxu3 %vm3184_vm2, %v13606_v18 }
  0xf7   : > { %v8306_v31 = vunpack.c.l.bf16 %v7786_v27  ;;  %v8358_v32 = vunpack.c.l.bf16 %v7994_v28 }
  0xf8   : > { %v7371_v33 = vpack.c.bf16 %v6539_v29, %v6539_v29  ;;  %v7581_v34 = vpack.c.bf16 %v6749_v30, %v6749_v30  ;;  %v5514_v35 = vpop.f32.mrf.mxu2  ;;  %v6034_v36 = vpop.f32.mrf.mxu3 }
  0xf9   : > { %v8647_v37 = vsel %vm8401_vm3, %v8306_v31, -inf  ;;  %v8761_v38 = vsel %vm8401_vm3, %v8358_v32, -inf  ;;  %v5515_v39 = vadd.f32 %v13886_v43, %v5514_v35  ;;  %v6035_v40 = vadd.f32 %v13886_v43, %v6034_v36  ;;  %v4476_v41 = vpop.f32.mrf.mxu0  ;;  %v5001_v42 = vpop.f32.mrf.mxu1 }
  0xfa   : > { %v8648_v44 = vmax.f32 %v14056_v14, %v8647_v37  ;;  %v8762_v45 = vmax.f32 %v14058_v15, %v8761_v38  ;;  %v8203_v46 = vunpack.c.l.bf16 %v7371_v33  ;;  %v8257_v47 = vunpack.c.l.bf16 %v7581_v34  ;;  %v13607_v15 = vld [vmem:[%s13817_s11 + $0xa30] sm:$0xff] }
  0xfb   : > { %v6955_v48 = vmax.f32 %v5515_v39, 0.0  ;;  %v7163_v49 = vmax.f32 %v6035_v40, 0.0  ;;  %v4477_v50 = vadd.f32 %v13886_v43, %v4476_v41  ;;  %v5002_v51 = vadd.f32 %v13886_v43, %v5001_v42 }
  0xfc   : > { %v8421_v52 = vsel %vm8401_vm3, %v8203_v46, -inf  ;;  %v8539_v53 = vsel %vm8401_vm3, %v8257_v47, -inf }
  0xfd   : > { %v14081_v54 = vmax.f32 %v8420_v25, %v8421_v52  ;;  %v14083_v55 = vmax.f32 %v8536_v26, %v8539_v53  ;;  %v7787_v56 = vpack.c.bf16 %v6955_v48, %v6955_v48  ;;  %v7995_v57 = vpack.c.bf16 %v7163_v49, %v7163_v49 }
  0xfe   : > { %v6540_v58 = vmax.f32 %v4477_v50, 0.0  ;;  %v6750_v59 = vmax.f32 %v5002_v51, 0.0 }
  0xff   : > { %v8307_v60 = vunpack.c.l.bf16 %v7787_v56  ;;  %v8359_v61 = vunpack.c.l.bf16 %v7995_v57 }
 0x100   : > { %v7372_v62 = vpack.c.bf16 %v6540_v58, %v6540_v58  ;;  %v7582_v63 = vpack.c.bf16 %v6750_v59, %v6750_v59  ;;  %v5516_v0 = vpop.f32.mrf.mxu2  ;;  %v6036_v1 = vpop.f32.mrf.mxu3 }
 0x101   : > { %v8649_v4 = vsel %vm8401_vm3, %v8307_v60, -inf  ;;  %v8763_v5 = vsel %vm8401_vm3, %v8359_v61, -inf  ;;  %v5517_v6 = vadd.f32 %v13886_v43, %v5516_v0  ;;  %v6037_v7 = vadd.f32 %v13886_v43, %v6036_v1  ;;  %v4479_v8 = vpop.f32.mrf.mxu0  ;;  %v5004_v9 = vpop.f32.mrf.mxu1  ;;  %v13401_v0 = vld [vmem:[%s13817_s11 + $0x3c0] sm:$0xff] }
 0x102   : > { %v14092_v11 = vmax.f32 %v8648_v44, %v8649_v4  ;;  %v14094_v12 = vmax.f32 %v8762_v45, %v8763_v5  ;;  %v8204_v13 = vunpack.c.l.bf16 %v7372_v62  ;;  %v8258_v14 = vunpack.c.l.bf16 %v7582_v63  ;;  %v13296_v63 = vld [vmem:[%s13817_s11 + $0x78] sm:$0xff] }
 0x103   : > { %v6956_v16 = vmax.f32 %v5517_v6, 0.0  ;;  %v7164_v17 = vmax.f32 %v6037_v7, 0.0  ;;  %v4480_v18 = vadd.f32 %v13886_v43, %v4479_v8  ;;  %v5005_v19 = vadd.f32 %v13886_v43, %v5004_v9  ;;  %v13504_v7 = vld [vmem:[%s13817_s11 + $0x6f8] sm:$0xff] }
 0x104   : > { %v8423_v20 = vsel %vm8401_vm3, %v8204_v13, -inf  ;;  %v8541_v21 = vsel %vm8401_vm3, %v8258_v14, -inf  ;;  %12851 = vmatmul.msk.bf16.gmra.mxu0 %vm3184_vm2, %v13295_v2  ;;  %12956 = vmatmul.msk.bf16.gmra.mxu1 %vm3184_vm2, %v13400_v3 }
 0x105   : > { %v8424_v22 = vmax.f32 %v14081_v54, %v8423_v20  ;;  %v8540_v23 = vmax.f32 %v14083_v55, %v8541_v21  ;;  %v7788_v24 = vpack.c.bf16 %v6956_v16, %v6956_v16  ;;  %v7996_v25 = vpack.c.bf16 %v7164_v17, %v7164_v17  ;;  %13059 = vmatmul.msk.bf16.gmra.mxu2 %vm3184_vm2, %v13503_v10 }
 0x106   : > { %v6541_v26 = vmax.f32 %v4480_v18, 0.0  ;;  %v6751_v27 = vmax.f32 %v5005_v19, 0.0  ;;  %13163 = vmatmul.msk.bf16.gmra.mxu3 %vm3184_vm2, %v13607_v15 }
 0x107   : > { %v8308_v28 = vunpack.c.l.bf16 %v7788_v24  ;;  %v8360_v29 = vunpack.c.l.bf16 %v7996_v25 }
 0x108   : > { %v7373_v30 = vpack.c.bf16 %v6541_v26, %v6541_v26  ;;  %v7583_v31 = vpack.c.bf16 %v6751_v27, %v6751_v27  ;;  %v5519_v32 = vpop.f32.mrf.mxu2  ;;  %v6039_v33 = vpop.f32.mrf.mxu3 }
 0x109   : > { %v8651_v34 = vsel %vm8401_vm3, %v8308_v28, -inf  ;;  %v8765_v35 = vsel %vm8401_vm3, %v8360_v29, -inf  ;;  %v5520_v36 = vadd.f32 %v13886_v43, %v5519_v32  ;;  %v6040_v37 = vadd.f32 %v13886_v43, %v6039_v33  ;;  %v4481_v38 = vpop.f32.mrf.mxu0  ;;  %v5006_v39 = vpop.f32.mrf.mxu1 }
 0x10a   : > { %v8652_v40 = vmax.f32 %v14092_v11, %v8651_v34  ;;  %v8766_v41 = vmax.f32 %v14094_v12, %v8765_v35  ;;  %v8205_v42 = vunpack.c.l.bf16 %v7373_v30  ;;  %v8259_v44 = vunpack.c.l.bf16 %v7583_v31  ;;  %v13608_v12 = vld [vmem:[%s13817_s11 + $0xa38] sm:$0xff] }
 0x10b   : > { %v6957_v45 = vmax.f32 %v5520_v36, 0.0  ;;  %v7165_v46 = vmax.f32 %v6040_v37, 0.0  ;;  %v4482_v47 = vadd.f32 %v13886_v43, %v4481_v38  ;;  %v5007_v48 = vadd.f32 %v13886_v43, %v5006_v39 }
 0x10c   : > { %v8425_v49 = vsel %vm8401_vm3, %v8205_v42, -inf  ;;  %v8543_v50 = vsel %vm8401_vm3, %v8259_v44, -inf }
 0x10d   : > { %v14117_v51 = vmax.f32 %v8424_v22, %v8425_v49  ;;  %v14119_v52 = vmax.f32 %v8540_v23, %v8543_v50  ;;  %v7789_v53 = vpack.c.bf16 %v6957_v45, %v6957_v45  ;;  %v7997_v54 = vpack.c.bf16 %v7165_v46, %v7165_v46 }
 0x10e   : > { %v6542_v55 = vmax.f32 %v4482_v47, 0.0  ;;  %v6752_v56 = vmax.f32 %v5007_v48, 0.0 }
 0x10f   : > { %v8309_v57 = vunpack.c.l.bf16 %v7789_v53  ;;  %v8361_v58 = vunpack.c.l.bf16 %v7997_v54 }
 0x110   : > { %v7374_v59 = vpack.c.bf16 %v6542_v55, %v6542_v55  ;;  %v7584_v60 = vpack.c.bf16 %v6752_v56, %v6752_v56  ;;  %v5521_v61 = vpop.f32.mrf.mxu2  ;;  %v6041_v62 = vpop.f32.mrf.mxu3 }
 0x111   : > { %v8653_v1 = vsel %vm8401_vm3, %v8309_v57, -inf  ;;  %v8767_v2 = vsel %vm8401_vm3, %v8361_v58, -inf  ;;  %v5522_v3 = vadd.f32 %v13886_v43, %v5521_v61  ;;  %v6042_v4 = vadd.f32 %v13886_v43, %v6041_v62  ;;  %v4484_v5 = vpop.f32.mrf.mxu0  ;;  %v5009_v6 = vpop.f32.mrf.mxu1  ;;  %v13402_v61 = vld [vmem:[%s13817_s11 + $0x3c8] sm:$0xff] }
 0x112   : > { %v14128_v8 = vmax.f32 %v8652_v40, %v8653_v1  ;;  %v14130_v9 = vmax.f32 %v8766_v41, %v8767_v2  ;;  %v8206_v10 = vunpack.c.l.bf16 %v7374_v59  ;;  %v8260_v11 = vunpack.c.l.bf16 %v7584_v60  ;;  %v13297_v60 = vld [vmem:[%s13817_s11 + $0x80] sm:$0xff] }
 0x113   : > { %v6958_v13 = vmax.f32 %v5522_v3, 0.0  ;;  %v7166_v14 = vmax.f32 %v6042_v4, 0.0  ;;  %v4485_v15 = vadd.f32 %v13886_v43, %v4484_v5  ;;  %v5010_v16 = vadd.f32 %v13886_v43, %v5009_v6  ;;  %v13505_v4 = vld [vmem:[%s13817_s11 + $0x700] sm:$0xff] }
 0x114   : > { %v8427_v17 = vsel %vm8401_vm3, %v8206_v10, -inf  ;;  %v8545_v18 = vsel %vm8401_vm3, %v8260_v11, -inf  ;;  %12852 = vmatmul.msk.bf16.gmra.mxu0 %vm3184_vm2, %v13296_v63  ;;  %12957 = vmatmul.msk.bf16.gmra.mxu1 %vm3184_vm2, %v13401_v0 }
 0x115   : > { %v8428_v19 = vmax.f32 %v14117_v51, %v8427_v17  ;;  %v8544_v20 = vmax.f32 %v14119_v52, %v8545_v18  ;;  %v7790_v21 = vpack.c.bf16 %v6958_v13, %v6958_v13  ;;  %v7998_v22 = vpack.c.bf16 %v7166_v14, %v7166_v14  ;;  %13060 = vmatmul.msk.bf16.gmra.mxu2 %vm3184_vm2, %v13504_v7 }
 0x116   : > { %v6543_v23 = vmax.f32 %v4485_v15, 0.0  ;;  %v6753_v24 = vmax.f32 %v5010_v16, 0.0  ;;  %13164 = vmatmul.msk.bf16.gmra.mxu3 %vm3184_vm2, %v13608_v12 }
 0x117   : > { %v8310_v25 = vunpack.c.l.bf16 %v7790_v21  ;;  %v8362_v26 = vunpack.c.l.bf16 %v7998_v22 }
 0x118   : > { %v7375_v27 = vpack.c.bf16 %v6543_v23, %v6543_v23  ;;  %v7585_v28 = vpack.c.bf16 %v6753_v24, %v6753_v24  ;;  %v5524_v29 = vpop.f32.mrf.mxu2  ;;  %v6044_v30 = vpop.f32.mrf.mxu3 }
 0x119   : > { %v8655_v31 = vsel %vm8401_vm3, %v8310_v25, -inf  ;;  %v8769_v32 = vsel %vm8401_vm3, %v8362_v26, -inf  ;;  %v5525_v33 = vadd.f32 %v13886_v43, %v5524_v29  ;;  %v6045_v34 = vadd.f32 %v13886_v43, %v6044_v30  ;;  %v4486_v35 = vpop.f32.mrf.mxu0  ;;  %v5011_v36 = vpop.f32.mrf.mxu1  ;;  %v14184_v29 = vld [vmem:[%s17625_s2] ss:$0 sm:$0xff] }
 0x11a   : > { %v8656_v37 = vmax.f32 %v14128_v8, %v8655_v31  ;;  %v8770_v38 = vmax.f32 %v14130_v9, %v8769_v32  ;;  %v8207_v39 = vunpack.c.l.bf16 %v7375_v27  ;;  %v8261_v40 = vunpack.c.l.bf16 %v7585_v28  ;;  %v13609_v9 = vld [vmem:[%s13817_s11 + $0xa40] sm:$0xff] }
 0x11b   : > { %v6959_v41 = vmax.f32 %v5525_v33, 0.0  ;;  %v7167_v42 = vmax.f32 %v6045_v34, 0.0  ;;  %v4487_v44 = vadd.f32 %v13886_v43, %v4486_v35  ;;  %v5012_v45 = vadd.f32 %v13886_v43, %v5011_v36 }
 0x11c   : > { %v8429_v46 = vsel %vm8401_vm3, %v8207_v39, -inf  ;;  %v8547_v47 = vsel %vm8401_vm3, %v8261_v40, -inf }
 0x11d   : > { %v14153_v48 = vmax.f32 %v8428_v19, %v8429_v46  ;;  %v14155_v49 = vmax.f32 %v8544_v20, %v8547_v47  ;;  %v7791_v50 = vpack.c.bf16 %v6959_v41, %v6959_v41  ;;  %v7999_v51 = vpack.c.bf16 %v7167_v42, %v7167_v42 }
 0x11e   : > { %v6544_v52 = vmax.f32 %v4487_v44, 0.0  ;;  %v6754_v53 = vmax.f32 %v5012_v45, 0.0 }
 0x11f   : > { %v8311_v54 = vunpack.c.l.bf16 %v7791_v50  ;;  %v8363_v55 = vunpack.c.l.bf16 %v7999_v51 }
 0x120   : > { %v7376_v56 = vpack.c.bf16 %v6544_v52, %v6544_v52  ;;  %v7586_v57 = vpack.c.bf16 %v6754_v53, %v6754_v53  ;;  %v5526_v58 = vpop.f32.mrf.mxu2  ;;  %v6046_v59 = vpop.f32.mrf.mxu3 }
 0x121   : > { %v8657_v62 = vsel %vm8401_vm3, %v8311_v54, -inf  ;;  %v8771_v63 = vsel %vm8401_vm3, %v8363_v55, -inf  ;;  %v5527_v0 = vadd.f32 %v13886_v43, %v5526_v58  ;;  %v6047_v1 = vadd.f32 %v13886_v43, %v6046_v59  ;;  %v4489_v2 = vpop.f32.mrf.mxu0  ;;  %v5014_v3 = vpop.f32.mrf.mxu1  ;;  %v13403_v58 = vld [vmem:[%s13817_s11 + $0x3d0] sm:$0xff] }
 0x122   : > { %v14164_v5 = vmax.f32 %v8656_v37, %v8657_v62  ;;  %v14166_v6 = vmax.f32 %v8770_v38, %v8771_v63  ;;  %v8208_v7 = vunpack.c.l.bf16 %v7376_v56  ;;  %v8262_v8 = vunpack.c.l.bf16 %v7586_v57  ;;  %v13298_v57 = vld [vmem:[%s13817_s11 + $0x88] sm:$0xff] }
 0x123   : > { %v6960_v10 = vmax.f32 %v5527_v0, 0.0  ;;  %v7168_v11 = vmax.f32 %v6047_v1, 0.0  ;;  %v4490_v12 = vadd.f32 %v13886_v43, %v4489_v2  ;;  %v5015_v13 = vadd.f32 %v13886_v43, %v5014_v3  ;;  %v13506_v1 = vld [vmem:[%s13817_s11 + $0x708] sm:$0xff] }
 0x124   : > { %v8431_v14 = vsel %vm8401_vm3, %v8208_v7, -inf  ;;  %v8549_v15 = vsel %vm8401_vm3, %v8262_v8, -inf  ;;  %12853 = vmatmul.msk.bf16.gmra.mxu0 %vm3184_vm2, %v13297_v60  ;;  %12958 = vmatmul.msk.bf16.gmra.mxu1 %vm3184_vm2, %v13402_v61 }
 0x125   : > { %v8432_v16 = vmax.f32 %v14153_v48, %v8431_v14  ;;  %v8548_v17 = vmax.f32 %v14155_v49, %v8549_v15  ;;  %v7792_v18 = vpack.c.bf16 %v6960_v10, %v6960_v10  ;;  %v8000_v19 = vpack.c.bf16 %v7168_v11, %v7168_v11  ;;  %13061 = vmatmul.msk.bf16.gmra.mxu2 %vm3184_vm2, %v13505_v4 }
 0x126   : > { %v6545_v20 = vmax.f32 %v4490_v12, 0.0  ;;  %v6755_v21 = vmax.f32 %v5015_v13, 0.0  ;;  %13165 = vmatmul.msk.bf16.gmra.mxu3 %vm3184_vm2, %v13609_v9 }
 0x127   : > { %v8312_v43 = vunpack.c.l.bf16 %v7792_v18  ;;  %v8364_v22 = vunpack.c.l.bf16 %v8000_v19 }
 0x128   : > { %v7377_v23 = vpack.c.bf16 %v6545_v20, %v6545_v20  ;;  %v7587_v24 = vpack.c.bf16 %v6755_v21, %v6755_v21  ;;  %v5529_v25 = vpop.f32.mrf.mxu2  ;;  %v6049_v26 = vpop.f32.mrf.mxu3 }
 0x129   : > { %v8659_v27 = vsel %vm8401_vm3, %v8312_v43, -inf  ;;  %v8773_v28 = vsel %vm8401_vm3, %v8364_v22, -inf  ;;  %v5530_v30 = vadd.f32 %v14184_v29, %v5529_v25  ;;  %v6050_v31 = vadd.f32 %v14184_v29, %v6049_v26  ;;  %v4491_v32 = vpop.f32.mrf.mxu0  ;;  %v5016_v33 = vpop.f32.mrf.mxu1 }
 0x12a   : > { %v8660_v34 = vmax.f32 %v14164_v5, %v8659_v27  ;;  %v8774_v35 = vmax.f32 %v14166_v6, %v8773_v28  ;;  %v8209_v36 = vunpack.c.l.bf16 %v7377_v23  ;;  %v8263_v37 = vunpack.c.l.bf16 %v7587_v24  ;;  %v13610_v6 = vld [vmem:[%s13817_s11 + $0xa48] sm:$0xff] }
 0x12b   : > { %v6961_v38 = vmax.f32 %v5530_v30, 0.0  ;;  %v7169_v39 = vmax.f32 %v6050_v31, 0.0  ;;  %v4492_v40 = vadd.f32 %v14184_v29, %v4491_v32  ;;  %v5017_v41 = vadd.f32 %v14184_v29, %v5016_v33 }
 0x12c   : > { %v8433_v42 = vsel %vm8401_vm3, %v8209_v36, -inf  ;;  %v8551_v44 = vsel %vm8401_vm3, %v8263_v37, -inf }
 0x12d   : > { %v14194_v45 = vmax.f32 %v8432_v16, %v8433_v42  ;;  %v14196_v46 = vmax.f32 %v8548_v17, %v8551_v44  ;;  %v7793_v47 = vpack.c.bf16 %v6961_v38, %v6961_v38  ;;  %v8001_v48 = vpack.c.bf16 %v7169_v39, %v7169_v39 }
 0x12e   : > { %v6546_v49 = vmax.f32 %v4492_v40, 0.0  ;;  %v6756_v50 = vmax.f32 %v5017_v41, 0.0 }
 0x12f   : > { %v8313_v51 = vunpack.c.l.bf16 %v7793_v47  ;;  %v8365_v52 = vunpack.c.l.bf16 %v8001_v48 }
 0x130   : > { %v7378_v53 = vpack.c.bf16 %v6546_v49, %v6546_v49  ;;  %v7588_v54 = vpack.c.bf16 %v6756_v50, %v6756_v50  ;;  %v5531_v55 = vpop.f32.mrf.mxu2  ;;  %v6051_v56 = vpop.f32.mrf.mxu3 }
 0x131   : > { %v8661_v59 = vsel %vm8401_vm3, %v8313_v51, -inf  ;;  %v8775_v60 = vsel %vm8401_vm3, %v8365_v52, -inf  ;;  %v5532_v61 = vadd.f32 %v14184_v29, %v5531_v55  ;;  %v6052_v62 = vadd.f32 %v14184_v29, %v6051_v56  ;;  %v4494_v63 = vpop.f32.mrf.mxu0  ;;  %v5019_v0 = vpop.f32.mrf.mxu1  ;;  %v13404_v55 = vld [vmem:[%s13817_s11 + $0x3d8] sm:$0xff] }
 0x132   : > { %v14205_v2 = vmax.f32 %v8660_v34, %v8661_v59  ;;  %v14207_v3 = vmax.f32 %v8774_v35, %v8775_v60  ;;  %v8210_v4 = vunpack.c.l.bf16 %v7378_v53  ;;  %v8264_v5 = vunpack.c.l.bf16 %v7588_v54  ;;  %v13299_v54 = vld [vmem:[%s13817_s11 + $0x90] sm:$0xff] }
 0x133   : > { %v6962_v7 = vmax.f32 %v5532_v61, 0.0  ;;  %v7170_v8 = vmax.f32 %v6052_v62, 0.0  ;;  %v4495_v9 = vadd.f32 %v14184_v29, %v4494_v63  ;;  %v5020_v10 = vadd.f32 %v14184_v29, %v5019_v0  ;;  %v13507_v62 = vld [vmem:[%s13817_s11 + $0x710] sm:$0xff] }
 0x134   : > { %v8435_v11 = vsel %vm8401_vm3, %v8210_v4, -inf  ;;  %v8553_v12 = vsel %vm8401_vm3, %v8264_v5, -inf  ;;  %12854 = vmatmul.msk.bf16.gmra.mxu0 %vm3184_vm2, %v13298_v57  ;;  %12959 = vmatmul.msk.bf16.gmra.mxu1 %vm3184_vm2, %v13403_v58 }
 0x135   : > { %v8436_v13 = vmax.f32 %v14194_v45, %v8435_v11  ;;  %v8552_v14 = vmax.f32 %v14196_v46, %v8553_v12  ;;  %v7794_v15 = vpack.c.bf16 %v6962_v7, %v6962_v7  ;;  %v8002_v16 = vpack.c.bf16 %v7170_v8, %v7170_v8  ;;  %13062 = vmatmul.msk.bf16.gmra.mxu2 %vm3184_vm2, %v13506_v1 }
 0x136   : > { %v6547_v17 = vmax.f32 %v4495_v9, 0.0  ;;  %v6757_v18 = vmax.f32 %v5020_v10, 0.0  ;;  %13166 = vmatmul.msk.bf16.gmra.mxu3 %vm3184_vm2, %v13610_v6 }
 0x137   : > { %v8314_v19 = vunpack.c.l.bf16 %v7794_v15  ;;  %v8366_v20 = vunpack.c.l.bf16 %v8002_v16 }
 0x138   : > { %v7379_v21 = vpack.c.bf16 %v6547_v17, %v6547_v17  ;;  %v7589_v43 = vpack.c.bf16 %v6757_v18, %v6757_v18  ;;  %v5534_v22 = vpop.f32.mrf.mxu2  ;;  %v6054_v23 = vpop.f32.mrf.mxu3 }
 0x139   : > { %v8663_v24 = vsel %vm8401_vm3, %v8314_v19, -inf  ;;  %v8777_v25 = vsel %vm8401_vm3, %v8366_v20, -inf  ;;  %v5535_v26 = vadd.f32 %v14184_v29, %v5534_v22  ;;  %v6055_v27 = vadd.f32 %v14184_v29, %v6054_v23  ;;  %v4496_v28 = vpop.f32.mrf.mxu0  ;;  %v5021_v30 = vpop.f32.mrf.mxu1 }
 0x13a   : > { %v8664_v31 = vmax.f32 %v14205_v2, %v8663_v24  ;;  %v8778_v32 = vmax.f32 %v14207_v3, %v8777_v25  ;;  %v8211_v33 = vunpack.c.l.bf16 %v7379_v21  ;;  %v8265_v34 = vunpack.c.l.bf16 %v7589_v43  ;;  %v13611_v3 = vld [vmem:[%s13817_s11 + $0xa50] sm:$0xff] }
 0x13b   : > { %v6963_v35 = vmax.f32 %v5535_v26, 0.0  ;;  %v7171_v36 = vmax.f32 %v6055_v27, 0.0  ;;  %v4497_v37 = vadd.f32 %v14184_v29, %v4496_v28  ;;  %v5022_v38 = vadd.f32 %v14184_v29, %v5021_v30 }
 0x13c   : > { %v8437_v39 = vsel %vm8401_vm3, %v8211_v33, -inf  ;;  %v8555_v40 = vsel %vm8401_vm3, %v8265_v34, -inf }
 0x13d   : > { %v14230_v41 = vmax.f32 %v8436_v13, %v8437_v39  ;;  %v14232_v42 = vmax.f32 %v8552_v14, %v8555_v40  ;;  %v7795_v44 = vpack.c.bf16 %v6963_v35, %v6963_v35  ;;  %v8003_v45 = vpack.c.bf16 %v7171_v36, %v7171_v36 }
 0x13e   : > { %v6548_v46 = vmax.f32 %v4497_v37, 0.0  ;;  %v6758_v47 = vmax.f32 %v5022_v38, 0.0 }
 0x13f   : > { %v8315_v48 = vunpack.c.l.bf16 %v7795_v44  ;;  %v8367_v49 = vunpack.c.l.bf16 %v8003_v45 }
 0x140   : > { %v7380_v50 = vpack.c.bf16 %v6548_v46, %v6548_v46  ;;  %v7590_v51 = vpack.c.bf16 %v6758_v47, %v6758_v47  ;;  %v5536_v52 = vpop.f32.mrf.mxu2  ;;  %v6056_v53 = vpop.f32.mrf.mxu3 }
 0x141   : > { %v8665_v56 = vsel %vm8401_vm3, %v8315_v48, -inf  ;;  %v8779_v57 = vsel %vm8401_vm3, %v8367_v49, -inf  ;;  %v5537_v58 = vadd.f32 %v14184_v29, %v5536_v52  ;;  %v6057_v59 = vadd.f32 %v14184_v29, %v6056_v53  ;;  %v4499_v60 = vpop.f32.mrf.mxu0  ;;  %v5024_v61 = vpop.f32.mrf.mxu1  ;;  %v13300_v49 = vld [vmem:[%s13817_s11 + $0x98] sm:$0xff] }
 0x142   : > { %v8666_v63 = vmax.f32 %v8664_v31, %v8665_v56  ;;  %v14241_v0 = vmax.f32 %v8778_v32, %v8779_v57  ;;  %v8212_v1 = vunpack.c.l.bf16 %v7380_v50  ;;  %v8266_v2 = vunpack.c.l.bf16 %v7590_v51  ;;  %v13405_v50 = vld [vmem:[%s13817_s11 + $0x3e0] sm:$0xff]  ;;  %v13508_v56 = vld [vmem:[%s13817_s11 + $0x718] sm:$0xff] }
 0x143   : > { %v6964_v4 = vmax.f32 %v5537_v58, 0.0  ;;  %v7172_v5 = vmax.f32 %v6057_v59, 0.0  ;;  %v4500_v6 = vadd.f32 %v14184_v29, %v4499_v60  ;;  %v5025_v7 = vadd.f32 %v14184_v29, %v5024_v61 }
 0x144   : > { %v8439_v8 = vsel %vm8401_vm3, %v8212_v1, -inf  ;;  %v8557_v9 = vsel %vm8401_vm3, %v8266_v2, -inf  ;;  %12855 = vmatmul.msk.bf16.gmra.mxu0 %vm3184_vm2, %v13299_v54  ;;  %12960 = vmatmul.msk.bf16.gmra.mxu1 %vm3184_vm2, %v13404_v55 }
 0x145   : > { %v8440_v10 = vmax.f32 %v14230_v41, %v8439_v8  ;;  %v8556_v11 = vmax.f32 %v14232_v42, %v8557_v9  ;;  %v7796_v12 = vpack.c.bf16 %v6964_v4, %v6964_v4  ;;  %v8004_v13 = vpack.c.bf16 %v7172_v5, %v7172_v5  ;;  %13063 = vmatmul.msk.bf16.gmra.mxu2 %vm3184_vm2, %v13507_v62  ;;  %v13612_v62 = vld [vmem:[%s13817_s11 + $0xa58] sm:$0xff] }
 0x146   : > { %v6549_v14 = vmax.f32 %v4500_v6, 0.0  ;;  %v6759_v15 = vmax.f32 %v5025_v7, 0.0  ;;  %13167 = vmatmul.msk.bf16.gmra.mxu3 %vm3184_vm2, %v13611_v3 }
 0x147   : > { %v8316_v16 = vunpack.c.l.bf16 %v7796_v12  ;;  %v8368_v17 = vunpack.c.l.bf16 %v8004_v13 }
 0x148   : > { %v7381_v18 = vpack.c.bf16 %v6549_v14, %v6549_v14  ;;  %v7591_v19 = vpack.c.bf16 %v6759_v15, %v6759_v15  ;;  %v5539_v20 = vpop.f32.mrf.mxu2 }
 0x149   : > { %v8667_v21 = vsel %vm8401_vm3, %v8316_v16, -inf  ;;  %v8781_v43 = vsel %vm8401_vm3, %v8368_v17, -inf  ;;  %v5540_v22 = vadd.f32 %v14184_v29, %v5539_v20  ;;  %v6059_v23 = vpop.f32.mrf.mxu3  ;;  %v4501_v24 = vpop.f32.mrf.mxu0 }
 0x14a   : > { %v8668_v25 = vmax.f32 %v8666_v63, %v8667_v21  ;;  %v8782_v26 = vmax.f32 %v14241_v0, %v8781_v43  ;;  %v8213_v27 = vunpack.c.l.bf16 %v7381_v18  ;;  %v8267_v28 = vunpack.c.l.bf16 %v7591_v19  ;;  %v5026_v30 = vpop.f32.mrf.mxu1 }
 0x14b   : > { %v6965_v31 = vmax.f32 %v5540_v22, 0.0  ;;  %v6060_v32 = vadd.f32 %v14184_v29, %v6059_v23  ;;  %v4502_v33 = vadd.f32 %v14184_v29, %v4501_v24  ;;  %v5027_v34 = vadd.f32 %v14184_v29, %v5026_v30 }
 0x14c   : > { %v8441_v35 = vsel %vm8401_vm3, %v8213_v27, -inf  ;;  %v8559_v36 = vsel %vm8401_vm3, %v8267_v28, -inf }
 0x14d   : > { %v14263_v37 = vmax.f32 %v8440_v10, %v8441_v35  ;;  %v14265_v38 = vmax.f32 %v8556_v11, %v8559_v36  ;;  %v7797_v39 = vpack.c.bf16 %v6965_v31, %v6965_v31  ;;  %v7173_v40 = vmax.f32 %v6060_v32, 0.0 }
 0x14e   : > { %v6550_v41 = vmax.f32 %v4502_v33, 0.0  ;;  %v6760_v42 = vmax.f32 %v5027_v34, 0.0 }
 0x14f   : > { %v8317_v44 = vunpack.c.l.bf16 %v7797_v39  ;;  %v8005_v45 = vpack.c.bf16 %v7173_v40, %v7173_v40 }
 0x150   : > { %v7382_v46 = vpack.c.bf16 %v6550_v41, %v6550_v41  ;;  %v7592_v47 = vpack.c.bf16 %v6760_v42, %v6760_v42  ;;  %v5541_v48 = vpop.f32.mrf.mxu2 }
 0x151   : > { %v8669_v51 = vsel %vm8401_vm3, %v8317_v44, -inf  ;;  %v8369_v52 = vunpack.c.l.bf16 %v8005_v45  ;;  %v5542_v53 = vadd.f32 %v14184_v29, %v5541_v48  ;;  %v6061_v54 = vpop.f32.mrf.mxu3  ;;  %v4504_v55 = vpop.f32.mrf.mxu0  ;;  %v13406_v48 = vld [vmem:[%s13817_s11 + $0x3e8] sm:$0xff] }
 0x152   : > { %v14272_v57 = vmax.f32 %v8668_v25, %v8669_v51  ;;  %v8214_v58 = vunpack.c.l.bf16 %v7382_v46  ;;  %v8268_v59 = vunpack.c.l.bf16 %v7592_v47  ;;  %v6062_v60 = vadd.f32 %v14184_v29, %v6061_v54  ;;  %v5029_v61 = vpop.f32.mrf.mxu1  ;;  %v13301_v47 = vld [vmem:[%s13817_s11 + $0xa0] sm:$0xff] }
 0x153   : > { %v8783_v63 = vsel %vm8401_vm3, %v8369_v52, -inf  ;;  %v6966_v0 = vmax.f32 %v5542_v53, 0.0  ;;  %v4505_v1 = vadd.f32 %v14184_v29, %v4504_v55  ;;  %v5030_v2 = vadd.f32 %v14184_v29, %v5029_v61  ;;  %v13509_v54 = vld [vmem:[%s13817_s11 + $0x720] sm:$0xff] }
 0x154   : > { %v8784_v3 = vmax.f32 %v8782_v26, %v8783_v63  ;;  %v8443_v4 = vsel %vm8401_vm3, %v8214_v58, -inf  ;;  %v8561_v5 = vsel %vm8401_vm3, %v8268_v59, -inf  ;;  %v7174_v6 = vmax.f32 %v6062_v60, 0.0  ;;  %12856 = vmatmul.msk.bf16.gmra.mxu0 %vm3184_vm2, %v13300_v49  ;;  %12961 = vmatmul.msk.bf16.gmra.mxu1 %vm3184_vm2, %v13405_v50  ;;  %v13613_v60 = vld [vmem:[%s13817_s11 + $0xa60] sm:$0xff] }
 0x155   : > { %v8444_v7 = vmax.f32 %v14263_v37, %v8443_v4  ;;  %v8560_v8 = vmax.f32 %v14265_v38, %v8561_v5  ;;  %v7798_v9 = vpack.c.bf16 %v6966_v0, %v6966_v0  ;;  %v6551_v10 = vmax.f32 %v4505_v1, 0.0  ;;  %13064 = vmatmul.msk.bf16.gmra.mxu2 %vm3184_vm2, %v13508_v56 }
 0x156   : > { %v8006_v11 = vpack.c.bf16 %v7174_v6, %v7174_v6  ;;  %v6761_v12 = vmax.f32 %v5030_v2, 0.0  ;;  %13168 = vmatmul.msk.bf16.gmra.mxu3 %vm3184_vm2, %v13612_v62 }
 0x157   : > { %v8318_v13 = vunpack.c.l.bf16 %v7798_v9  ;;  %v7383_v14 = vpack.c.bf16 %v6551_v10, %v6551_v10 }
 0x158   : > { %v8370_v15 = vunpack.c.l.bf16 %v8006_v11  ;;  %v7593_v16 = vpack.c.bf16 %v6761_v12, %v6761_v12  ;;  %v5544_v17 = vpop.f32.mrf.mxu2 }
 0x159   : > { %v8671_v18 = vsel %vm8401_vm3, %v8318_v13, -inf  ;;  %v8215_v19 = vunpack.c.l.bf16 %v7383_v14  ;;  %v5545_v20 = vadd.f32 %v14184_v29, %v5544_v17  ;;  %v6064_v21 = vpop.f32.mrf.mxu3  ;;  %v4506_v43 = vpop.f32.mrf.mxu0 }
 0x15a   : > { %v8672_v22 = vmax.f32 %v14272_v57, %v8671_v18  ;;  %v8785_v23 = vsel %vm8401_vm3, %v8370_v15, -inf  ;;  %v8269_v24 = vunpack.c.l.bf16 %v7593_v16  ;;  %v6065_v25 = vadd.f32 %v14184_v29, %v6064_v21  ;;  %v5031_v26 = vpop.f32.mrf.mxu1 }
 0x15b   : > { %v8786_v27 = vmax.f32 %v8784_v3, %v8785_v23  ;;  %v8445_v28 = vsel %vm8401_vm3, %v8215_v19, -inf  ;;  %v6967_v30 = vmax.f32 %v5545_v20, 0.0  ;;  %v4507_v31 = vadd.f32 %v14184_v29, %v4506_v43 }
 0x15c   : > { %v14294_v32 = vmax.f32 %v8444_v7, %v8445_v28  ;;  %v8563_v33 = vsel %vm8401_vm3, %v8269_v24, -inf  ;;  %v7175_v34 = vmax.f32 %v6065_v25, 0.0  ;;  %v5032_v35 = vadd.f32 %v14184_v29, %v5031_v26 }
 0x15d   : > { %v14298_v36 = vmax.f32 %v8560_v8, %v8563_v33  ;;  %v7799_v37 = vpack.c.bf16 %v6967_v30, %v6967_v30  ;;  %v6552_v38 = vmax.f32 %v4507_v31, 0.0 }
 0x15e   : > { %v8007_v39 = vpack.c.bf16 %v7175_v34, %v7175_v34  ;;  %v6762_v40 = vmax.f32 %v5032_v35, 0.0 }
 0x15f   : > { %v8319_v41 = vunpack.c.l.bf16 %v7799_v37  ;;  %v7384_v42 = vpack.c.bf16 %v6552_v38, %v6552_v38 }
 0x160   : > { %v8371_v44 = vunpack.c.l.bf16 %v8007_v39  ;;  %v7594_v45 = vpack.c.bf16 %v6762_v40, %v6762_v40  ;;  %v5546_v46 = vpop.f32.mrf.mxu2 }
 0x161   : > { %v8673_v49 = vsel %vm8401_vm3, %v8319_v41, -inf  ;;  %v8216_v50 = vunpack.c.l.bf16 %v7384_v42  ;;  %v5547_v51 = vadd.f32 %v14184_v29, %v5546_v46  ;;  %v6066_v52 = vpop.f32.mrf.mxu3  ;;  %v4509_v53 = vpop.f32.mrf.mxu0  ;;  %v13302_v42 = vld [vmem:[%s13817_s11 + $0xa8] sm:$0xff] }
 0x162   : > { %v14305_v55 = vmax.f32 %v8672_v22, %v8673_v49  ;;  %v8787_v56 = vsel %vm8401_vm3, %v8371_v44, -inf  ;;  %v8270_v57 = vunpack.c.l.bf16 %v7594_v45  ;;  %v6067_v58 = vadd.f32 %v14184_v29, %v6066_v52  ;;  %v5034_v59 = vpop.f32.mrf.mxu1  ;;  %v13407_v44 = vld [vmem:[%s13817_s11 + $0x3f0] sm:$0xff] }
 0x163   : > { %v14310_v61 = vmax.f32 %v8786_v27, %v8787_v56  ;;  %v8447_v62 = vsel %vm8401_vm3, %v8216_v50, -inf  ;;  %v6968_v63 = vmax.f32 %v5547_v51, 0.0  ;;  %v4510_v0 = vadd.f32 %v14184_v29, %v4509_v53  ;;  %v13510_v51 = vld [vmem:[%s13817_s11 + $0x728] sm:$0xff] }
 0x164   : > { %v8448_v1 = vmax.f32 %v14294_v32, %v8447_v62  ;;  %v14316_v2 = vsel %vm8401_vm3, %v8270_v57, -inf  ;;  %v7176_v3 = vmax.f32 %v6067_v58, 0.0  ;;  %v5035_v4 = vadd.f32 %v14184_v29, %v5034_v59  ;;  %12857 = vmatmul.msk.bf16.gmra.mxu0 %vm3184_vm2, %v13301_v47  ;;  %12962 = vmatmul.msk.bf16.gmra.mxu1 %vm3184_vm2, %v13406_v48  ;;  %v13614_v57 = vld [vmem:[%s13817_s11 + $0xa68] sm:$0xff] }
 0x165   : > { %v8564_v5 = vmax.f32 %v14298_v36, %v14316_v2  ;;  %v7800_v6 = vpack.c.bf16 %v6968_v63, %v6968_v63  ;;  %v6553_v7 = vmax.f32 %v4510_v0, 0.0  ;;  %13065 = vmatmul.msk.bf16.gmra.mxu2 %vm3184_vm2, %v13509_v54 }
 0x166   : > { %v8008_v8 = vpack.c.bf16 %v7176_v3, %v7176_v3  ;;  %v6763_v9 = vmax.f32 %v5035_v4, 0.0  ;;  %13169 = vmatmul.msk.bf16.gmra.mxu3 %vm3184_vm2, %v13613_v60 }
 0x167   : > { %v8320_v10 = vunpack.c.l.bf16 %v7800_v6  ;;  %v7385_v11 = vpack.c.bf16 %v6553_v7, %v6553_v7 }
 0x168   : > { %v8372_v12 = vunpack.c.l.bf16 %v8008_v8  ;;  %v5549_v13 = vpop.f32.mrf.mxu2  ;;  %v7595_v16 = vpack.c.bf16 %v6763_v9, %v6763_v9 }
 0x169   : > { %v8675_v14 = vsel %vm8401_vm3, %v8320_v10, -inf  ;;  %v8217_v15 = vunpack.c.l.bf16 %v7385_v11  ;;  %v5550_v17 = vadd.f32 %v14184_v29, %v5549_v13  ;;  %v6069_v18 = vpop.f32.mrf.mxu3  ;;  %v4511_v19 = vpop.f32.mrf.mxu0 }
 0x16a   : > { %v8676_v20 = vmax.f32 %v14305_v55, %v8675_v14  ;;  %v8789_v21 = vsel %vm8401_vm3, %v8372_v12, -inf  ;;  %v6070_v43 = vadd.f32 %v14184_v29, %v6069_v18  ;;  %v5036_v22 = vpop.f32.mrf.mxu1  ;;  %v4512_v26 = vadd.f32 %v14184_v29, %v4511_v19 }
 0x16b   : > { %v8790_v23 = vmax.f32 %v14310_v61, %v8789_v21  ;;  %v8449_v24 = vsel %vm8401_vm3, %v8217_v15, -inf  ;;  %v6969_v25 = vmax.f32 %v5550_v17, 0.0  ;;  %v5037_v30 = vadd.f32 %v14184_v29, %v5036_v22 }
 0x16c   : > { %v8450_v27 = vmax.f32 %v8448_v1, %v8449_v24  ;;  %v7177_v28 = vmax.f32 %v6070_v43, 0.0  ;;  %v8920_v31 = vunpack.c.l.bf16 %v7595_v16  ;;  %v6554_v33 = vmax.f32 %v4512_v26, 0.0 }
 0x16d   : > { %v7801_v32 = vpack.c.bf16 %v6969_v25, %v6969_v25  ;;  %v6764_v35 = vmax.f32 %v5037_v30, 0.0 }
 0x16e   : > { %v8009_v34 = vpack.c.bf16 %v7177_v28, %v7177_v28  ;;  %v7386_v38 = vpack.c.bf16 %v6554_v33, %v6554_v33  ;;  %v9190_v45 = vsel %vm8401_vm3, %v8920_v31, -inf }
 0x16f   : > { %v8321_v37 = vunpack.c.l.bf16 %v7801_v32  ;;  %v7596_v40 = vpack.c.bf16 %v6764_v35, %v6764_v35 }
 0x170   : > { %v8373_v39 = vunpack.c.l.bf16 %v8009_v34  ;;  %v5551_v41 = vpop.f32.mrf.mxu2  ;;  %v8218_v47 = vunpack.c.l.bf16 %v7386_v38  ;;  %v13408_v38 = vld [vmem:[%s13817_s11 + $0x3f8] sm:$0xff] }
 0x171   : > { %v8677_v46 = vsel %vm8401_vm3, %v8321_v37, -inf  ;;  %v5552_v48 = vadd.f32 %v14184_v29, %v5551_v41  ;;  %v6071_v49 = vpop.f32.mrf.mxu3  ;;  %v4514_v50 = vpop.f32.mrf.mxu0  ;;  %v8921_v54 = vunpack.c.l.bf16 %v7596_v40  ;;  %v13303_v37 = vld [vmem:[%s13817_s11 + $0xb0] sm:$0xff] }
 0x172   : > { %v8678_v52 = vmax.f32 %v8676_v20, %v8677_v46  ;;  %v8791_v53 = vsel %vm8401_vm3, %v8373_v39, -inf  ;;  %v6072_v55 = vadd.f32 %v14184_v29, %v6071_v49  ;;  %v5039_v56 = vpop.f32.mrf.mxu1  ;;  %v8451_v59 = vsel %vm8401_vm3, %v8218_v47, -inf }
 0x173   : > { %v8792_v58 = vmax.f32 %v8790_v23, %v8791_v53  ;;  %v6970_v60 = vmax.f32 %v5552_v48, 0.0  ;;  %v4515_v61 = vadd.f32 %v14184_v29, %v4514_v50  ;;  %v14345_v62 = vmax.f32 %v8450_v27, %v8451_v59  ;;  %v13615_v48 = vld [vmem:[%s13817_s11 + $0xa70] sm:$0xff] }
 0x174   : > { %v9191_v63 = vsel %vm8401_vm3, %v8921_v54, -inf  ;;  %v7178_v0 = vmax.f32 %v6072_v55, 0.0  ;;  %v5040_v1 = vadd.f32 %v14184_v29, %v5039_v56  ;;  %12858 = vmatmul.msk.bf16.gmra.mxu0 %vm3184_vm2, %v13302_v42  ;;  %12963 = vmatmul.msk.bf16.gmra.mxu1 %vm3184_vm2, %v13407_v44  ;;  %v13511_v44 = vld [vmem:[%s13817_s11 + $0x730] sm:$0xff] }
 0x175   : > { %v9192_v3 = vmax.f32 %v9190_v45, %v9191_v63  ;;  %v7802_v4 = vpack.c.bf16 %v6970_v60, %v6970_v60  ;;  %13066 = vmatmul.msk.bf16.gmra.mxu2 %vm3184_vm2, %v13510_v51  ;;  %v6555_v10 = vmax.f32 %v4515_v61, 0.0 }
 0x176   : > { %v8010_v6 = vpack.c.bf16 %v7178_v0, %v7178_v0  ;;  %v6765_v7 = vmax.f32 %v5040_v1, 0.0  ;;  %13170 = vmatmul.msk.bf16.gmra.mxu3 %vm3184_vm2, %v13614_v57 }
 0x177   : > { %v8322_v8 = vunpack.c.l.bf16 %v7802_v4  ;;  %v7387_v23 = vpack.c.bf16 %v6555_v10, %v6555_v10 }
 0x178   : > { %v8374_v9 = vunpack.c.l.bf16 %v8010_v6  ;;  %v7597_v11 = vpack.c.bf16 %v6765_v7, %v6765_v7  ;;  %v5554_v12 = vpop.f32.mrf.mxu2 }
 0x179   : > { %v8679_v13 = vsel %vm8401_vm3, %v8322_v8, -inf  ;;  %v5555_v14 = vadd.f32 %v14184_v29, %v5554_v12  ;;  %v6074_v15 = vpop.f32.mrf.mxu3  ;;  %v4516_v16 = vpop.f32.mrf.mxu0  ;;  %v8868_v32 = vunpack.c.l.bf16 %v7387_v23 }
 0x17a   : > { %v14355_v17 = vmax.f32 %v8678_v52, %v8679_v13  ;;  %v8793_v18 = vsel %vm8401_vm3, %v8374_v9, -inf  ;;  %v8922_v19 = vunpack.c.l.bf16 %v7597_v11  ;;  %v5041_v20 = vpop.f32.mrf.mxu1  ;;  %v6075_v22 = vadd.f32 %v14184_v29, %v6074_v15 }
 0x17b   : > { %v14358_v21 = vmax.f32 %v8792_v58, %v8793_v18  ;;  %v6971_v43 = vmax.f32 %v5555_v14, 0.0  ;;  %v4517_v25 = vadd.f32 %v14184_v29, %v4516_v16  ;;  %v5042_v30 = vadd.f32 %v14184_v29, %v5041_v20 }
 0x17c   : > { %v9193_v24 = vsel %vm8401_vm3, %v8922_v19, -inf  ;;  %v7179_v27 = vmax.f32 %v6075_v22, 0.0  ;;  %v9076_v52 = vsel %vm8401_vm3, %v8868_v32, -inf }
 0x17d   : > { %v14363_v26 = vmax.f32 %v9192_v3, %v9193_v24  ;;  %v6556_v28 = vmax.f32 %v4517_v25, 0.0  ;;  %v7803_v31 = vpack.c.bf16 %v6971_v43, %v6971_v43  ;;  %v6766_v34 = vmax.f32 %v5042_v30, 0.0 }
 0x17e   : > { %v8011_v39 = vpack.c.bf16 %v7179_v27, %v7179_v27 }
 0x17f   : > { %v7388_v33 = vpack.c.bf16 %v6556_v28, %v6556_v28  ;;  %v7598_v46 = vpack.c.bf16 %v6766_v34, %v6766_v34  ;;  %v8972_v49 = vunpack.c.l.bf16 %v7803_v31 }
 0x180   : > { %v5556_v35 = vpop.f32.mrf.mxu2  ;;  %v9024_v55 = vunpack.c.l.bf16 %v8011_v39 }
 0x181   : > { %v5557_v40 = vadd.f32 %v14184_v29, %v5556_v35  ;;  %v6076_v41 = vpop.f32.mrf.mxu3  ;;  %v4519_v42 = vpop.f32.mrf.mxu0  ;;  %v8869_v45 = vunpack.c.l.bf16 %v7388_v33  ;;  %v8923_v54 = vunpack.c.l.bf16 %v7598_v46  ;;  %v9304_v63 = vsel %vm8401_vm3, %v8972_v49, -inf  ;;  %v13512_v49 = vld [vmem:[%s13817_s11 + $0x738] sm:$0xff] }
 0x182   : > { %v5044_v47 = vpop.f32.mrf.mxu1  ;;  %v6077_v51 = vadd.f32 %v14184_v29, %v6076_v41  ;;  %v4520_v60 = vadd.f32 %v14184_v29, %v4519_v42  ;;  %v9418_v8 = vsel %vm8401_vm3, %v9024_v55, -inf  ;;  %v13304_v41 = vld [vmem:[%s13817_s11 + $0xb8] sm:$0xff]  ;;  %v13409_v42 = vld [vmem:[%s13817_s11 + $0x400] sm:$0xff] }
 0x183   : > { %v6972_v50 = vmax.f32 %v5557_v40, 0.0  ;;  %v9077_v53 = vsel %vm8401_vm3, %v8869_v45, -inf  ;;  %v9195_v59 = vsel %vm8401_vm3, %v8923_v54, -inf  ;;  %v5045_v61 = vadd.f32 %v14184_v29, %v5044_v47  ;;  %v13616_v55 = vld [vmem:[%s13817_s11 + $0xa78] sm:$0xff] }
 0x184   : > { %12859 = vmatmul.msk.bf16.gmra.mxu0 %vm3184_vm2, %v13303_v37  ;;  %12964 = vmatmul.msk.bf16.gmra.mxu1 %vm3184_vm2, %v13408_v38  ;;  %v9078_v56 = vmax.f32 %v9076_v52, %v9077_v53  ;;  %v7180_v58 = vmax.f32 %v6077_v51, 0.0  ;;  %v9196_v0 = vmax.f32 %v14363_v26, %v9195_v59  ;;  %v6557_v4 = vmax.f32 %v4520_v60, 0.0 }
 0x185   : > { %v7804_v57 = vpack.c.bf16 %v6972_v50, %v6972_v50  ;;  %13067 = vmatmul.msk.bf16.gmra.mxu2 %vm3184_vm2, %v13511_v44  ;;  %v6767_v6 = vmax.f32 %v5045_v61, 0.0 }
 0x186   : > { %13171 = vmatmul.msk.bf16.gmra.mxu3 %vm3184_vm2, %v13615_v48  ;;  %v8012_v3 = vpack.c.bf16 %v7180_v58, %v7180_v58  ;;  %v7389_v15 = vpack.c.bf16 %v6557_v4, %v6557_v4 }
 0x187   : > { %v8973_v1 = vunpack.c.l.bf16 %v7804_v57  ;;  %v7599_v16 = vpack.c.bf16 %v6767_v6, %v6767_v6 }
 0x188   : > { %v5559_v7 = vpop.f32.mrf.mxu2  ;;  %v9025_v10 = vunpack.c.l.bf16 %v8012_v3  ;;  %v8870_v23 = vunpack.c.l.bf16 %v7389_v15 }
 0x189   : > { %v9305_v9 = vsel %vm8401_vm3, %v8973_v1, -inf  ;;  %v5560_v11 = vadd.f32 %v14184_v29, %v5559_v7  ;;  %v6079_v12 = vpop.f32.mrf.mxu3  ;;  %v4521_v13 = vpop.f32.mrf.mxu0  ;;  %v8924_v24 = vunpack.c.l.bf16 %v7599_v16 }
 0x18a   : > { %v9306_v14 = vmax.f32 %v9304_v63, %v9305_v9  ;;  %v5046_v18 = vpop.f32.mrf.mxu1  ;;  %v9419_v19 = vsel %vm8401_vm3, %v9025_v10, -inf  ;;  %v6080_v43 = vadd.f32 %v14184_v29, %v6079_v12  ;;  %v4522_v25 = vadd.f32 %v14184_v29, %v4521_v13 }
 0x18b   : > { %v6973_v20 = vmax.f32 %v5560_v11, 0.0  ;;  %v9420_v22 = vmax.f32 %v9418_v8, %v9419_v19  ;;  %v5047_v28 = vadd.f32 %v14184_v29, %v5046_v18  ;;  %v9079_v30 = vsel %vm8401_vm3, %v8870_v23, -inf }
 0x18c   : > { %v7181_v27 = vmax.f32 %v6080_v43, 0.0  ;;  %v9197_v31 = vsel %vm8401_vm3, %v8924_v24, -inf  ;;  %v6558_v32 = vmax.f32 %v4522_v25, 0.0  ;;  %v9080_v33 = vmax.f32 %v9078_v56, %v9079_v30 }
 0x18d   : > { %v7805_v26 = vpack.c.bf16 %v6973_v20, %v6973_v20  ;;  %v9198_v34 = vmax.f32 %v9196_v0, %v9197_v31  ;;  %v6768_v39 = vmax.f32 %v5047_v28, 0.0 }
 0x18e   : > { %v8013_v37 = vpack.c.bf16 %v7181_v27, %v7181_v27  ;;  %v7390_v38 = vpack.c.bf16 %v6558_v32, %v6558_v32 }
 0x18f   : > { %v8974_v35 = vunpack.c.l.bf16 %v7805_v26  ;;  %v7600_v52 = vpack.c.bf16 %v6768_v39, %v6768_v39 }
 0x190   : > { %v5561_v40 = vpop.f32.mrf.mxu2  ;;  %v9026_v45 = vunpack.c.l.bf16 %v8013_v37  ;;  %v8871_v51 = vunpack.c.l.bf16 %v7390_v38 }
 0x191   : > { %v9307_v44 = vsel %vm8401_vm3, %v8974_v35, -inf  ;;  %v5562_v46 = vadd.f32 %v14184_v29, %v5561_v40  ;;  %v6081_v47 = vpop.f32.mrf.mxu3  ;;  %v4524_v48 = vpop.f32.mrf.mxu0  ;;  %v8925_v63 = vunpack.c.l.bf16 %v7600_v52 }
 0x192   : > { %v14397_v50 = vmax.f32 %v9306_v14, %v9307_v44  ;;  %v6082_v53 = vadd.f32 %v14184_v29, %v6081_v47  ;;  %v5049_v54 = vpop.f32.mrf.mxu1  ;;  %v9421_v56 = vsel %vm8401_vm3, %v9026_v45, -inf  ;;  %v4525_v58 = vadd.f32 %v14184_v29, %v4524_v48  ;;  %v13305_v47 = vld [vmem:[%s13817_s11 + $0xc0] sm:$0xff]  ;;  %v13410_v48 = vld [vmem:[%s13817_s11 + $0x408] sm:$0xff] }
 0x193   : > { %v6974_v57 = vmax.f32 %v5562_v46, 0.0  ;;  %v5050_v59 = vadd.f32 %v14184_v29, %v5049_v54  ;;  %v14404_v60 = vmax.f32 %v9420_v22, %v9421_v56  ;;  %v9081_v61 = vsel %vm8401_vm3, %v8871_v51, -inf  ;;  %v13513_v54 = vld [vmem:[%s13817_s11 + $0x740] sm:$0xff] }
 0x194   : > { %v7182_v0 = vmax.f32 %v6082_v53, 0.0  ;;  %12860 = vmatmul.msk.bf16.gmra.mxu0 %vm3184_vm2, %v13304_v41  ;;  %12965 = vmatmul.msk.bf16.gmra.mxu1 %vm3184_vm2, %v13409_v42  ;;  %v9082_v1 = vmax.f32 %v9080_v33, %v9081_v61  ;;  %v6559_v4 = vmax.f32 %v4525_v58, 0.0  ;;  %v9199_v7 = vsel %vm8401_vm3, %v8925_v63, -inf }
 0x195   : > { %v7806_v3 = vpack.c.bf16 %v6974_v57, %v6974_v57  ;;  %v6769_v6 = vmax.f32 %v5050_v59, 0.0  ;;  %13068 = vmatmul.msk.bf16.gmra.mxu2 %vm3184_vm2, %v13512_v49  ;;  %v9200_v9 = vmax.f32 %v9198_v34, %v9199_v7 }
 0x196   : > { %v8014_v8 = vpack.c.bf16 %v7182_v0, %v7182_v0  ;;  %13172 = vmatmul.msk.bf16.gmra.mxu3 %vm3184_vm2, %v13616_v55  ;;  %v7391_v11 = vpack.c.bf16 %v6559_v4, %v6559_v4 }
 0x197   : > { %v8975_v10 = vunpack.c.l.bf16 %v7806_v3  ;;  %v7601_v12 = vpack.c.bf16 %v6769_v6, %v6769_v6 }
 0x198   : > { %v9027_v13 = vunpack.c.l.bf16 %v8014_v8  ;;  %v5564_v14 = vpop.f32.mrf.mxu2  ;;  %v8872_v16 = vunpack.c.l.bf16 %v7391_v11 }
 0x199   : > { %v9309_v15 = vsel %vm8401_vm3, %v8975_v10, -inf  ;;  %v8926_v18 = vunpack.c.l.bf16 %v7601_v12  ;;  %v5565_v19 = vadd.f32 %v14184_v29, %v5564_v14  ;;  %v6084_v20 = vpop.f32.mrf.mxu3  ;;  %v4526_v43 = vpop.f32.mrf.mxu0 }
 0x19a   : > { %v9310_v22 = vmax.f32 %v14397_v50, %v9309_v15  ;;  %v9423_v23 = vsel %vm8401_vm3, %v9027_v13, -inf  ;;  %v6085_v24 = vadd.f32 %v14184_v29, %v6084_v20  ;;  %v4527_v25 = vadd.f32 %v14184_v29, %v4526_v43  ;;  %v5051_v26 = vpop.f32.mrf.mxu1 }
 0x19b   : > { %v9424_v27 = vmax.f32 %v14404_v60, %v9423_v23  ;;  %v9083_v28 = vsel %vm8401_vm3, %v8872_v16, -inf  ;;  %v9201_v30 = vsel %vm8401_vm3, %v8926_v18, -inf  ;;  %v6975_v31 = vmax.f32 %v5565_v19, 0.0  ;;  %v13617_v60 = vld [vmem:[%s13817_s11 + $0xa80] sm:$0xff] }
 0x19c   : > { %v14421_v32 = vmax.f32 %v9082_v1, %v9083_v28  ;;  %v14423_v33 = vmax.f32 %v9200_v9, %v9201_v30  ;;  %v7183_v34 = vmax.f32 %v6085_v24, 0.0  ;;  %v6560_v35 = vmax.f32 %v4527_v25, 0.0 }
 0x19d   : > { %v7807_v37 = vpack.c.bf16 %v6975_v31, %v6975_v31  ;;  %v5052_v38 = vadd.f32 %v14184_v29, %v5051_v26  ;;  %v14456_v31 = vld [vmem:[%s17625_s2] ss:$0 sm:$0xff] }
 0x19e   : > { %v8015_v39 = vpack.c.bf16 %v7183_v34, %v7183_v34  ;;  %v7392_v40 = vpack.c.bf16 %v6560_v35, %v6560_v35 }
 0x19f   : > { %v8976_v41 = vunpack.c.l.bf16 %v7807_v37  ;;  %v6770_v42 = vmax.f32 %v5052_v38, 0.0 }
 0x1a0   : > { %v9028_v44 = vunpack.c.l.bf16 %v8015_v39  ;;  %v8873_v45 = vunpack.c.l.bf16 %v7392_v40  ;;  %v5566_v46 = vpop.f32.mrf.mxu2 }
 0x1a1   : > { %v9311_v49 = vsel %vm8401_vm3, %v8976_v41, -inf  ;;  %v7602_v50 = vpack.c.bf16 %v6770_v42, %v6770_v42  ;;  %v5567_v51 = vadd.f32 %v14184_v29, %v5566_v46  ;;  %v6086_v52 = vpop.f32.mrf.mxu3  ;;  %v4529_v53 = vpop.f32.mrf.mxu0 }
 0x1a2   : > { %v14431_v55 = vmax.f32 %v9310_v22, %v9311_v49  ;;  %v9425_v56 = vsel %vm8401_vm3, %v9028_v44, -inf  ;;  %v9085_v57 = vsel %vm8401_vm3, %v8873_v45, -inf  ;;  %v6087_v58 = vadd.f32 %v14184_v29, %v6086_v52  ;;  %v5054_v59 = vpop.f32.mrf.mxu1  ;;  %v13306_v49 = vld [vmem:[%s13817_s11 + $0xc8] sm:$0xff] }
 0x1a3   : > { %v14437_v61 = vmax.f32 %v9424_v27, %v9425_v56  ;;  %v9086_v63 = vmax.f32 %v14421_v32, %v9085_v57  ;;  %v8927_v0 = vunpack.c.l.bf16 %v7602_v50  ;;  %v6976_v1 = vmax.f32 %v5567_v51, 0.0  ;;  %v13411_v50 = vld [vmem:[%s13817_s11 + $0x410] sm:$0xff]  ;;  %v13514_v56 = vld [vmem:[%s13817_s11 + $0x748] sm:$0xff] }
 0x1a4   : > { %v7184_v3 = vmax.f32 %v6087_v58, 0.0  ;;  %v4530_v4 = vadd.f32 %v14184_v29, %v4529_v53  ;;  %v5055_v6 = vadd.f32 %v14184_v29, %v5054_v59  ;;  %12861 = vmatmul.msk.bf16.gmra.mxu0 %vm3184_vm2, %v13305_v47  ;;  %12966 = vmatmul.msk.bf16.gmra.mxu1 %vm3184_vm2, %v13410_v48 }
 0x1a5   : > { %v9203_v7 = vsel %vm8401_vm3, %v8927_v0, -inf  ;;  %v7808_v8 = vpack.c.bf16 %v6976_v1, %v6976_v1  ;;  %13069 = vmatmul.msk.bf16.gmra.mxu2 %vm3184_vm2, %v13513_v54 }
 0x1a6   : > { %v9204_v9 = vmax.f32 %v14423_v33, %v9203_v7  ;;  %v8016_v10 = vpack.c.bf16 %v7184_v3, %v7184_v3  ;;  %v6561_v11 = vmax.f32 %v4530_v4, 0.0  ;;  %v6771_v12 = vmax.f32 %v5055_v6, 0.0  ;;  %13173 = vmatmul.msk.bf16.gmra.mxu3 %vm3184_vm2, %v13617_v60 }
 0x1a7   : > { %v8977_v13 = vunpack.c.l.bf16 %v7808_v8 }
 0x1a8   : > { %v9029_v14 = vunpack.c.l.bf16 %v8016_v10  ;;  %v7393_v15 = vpack.c.bf16 %v6561_v11, %v6561_v11  ;;  %v7603_v16 = vpack.c.bf16 %v6771_v12, %v6771_v12  ;;  %v5569_v18 = vpop.f32.mrf.mxu2 }
 0x1a9   : > { %v9313_v19 = vsel %vm8401_vm3, %v8977_v13, -inf  ;;  %v5570_v20 = vadd.f32 %v14184_v29, %v5569_v18  ;;  %v6089_v43 = vpop.f32.mrf.mxu3  ;;  %v4531_v22 = vpop.f32.mrf.mxu0 }
 0x1aa   : > { %v9314_v23 = vmax.f32 %v14431_v55, %v9313_v19  ;;  %v9427_v24 = vsel %vm8401_vm3, %v9029_v14, -inf  ;;  %v8874_v25 = vunpack.c.l.bf16 %v7393_v15  ;;  %v8928_v26 = vunpack.c.l.bf16 %v7603_v16  ;;  %v5056_v27 = vpop.f32.mrf.mxu1 }
 0x1ab   : > { %v9428_v28 = vmax.f32 %v14437_v61, %v9427_v24  ;;  %v6977_v30 = vmax.f32 %v5570_v20, 0.0  ;;  %v6090_v32 = vadd.f32 %v14456_v31, %v6089_v43  ;;  %v4532_v29 = vadd.f32 %v14456_v31, %v4531_v22 }
 0x1ac   : > { %v9087_v33 = vsel %vm8401_vm3, %v8874_v25, -inf  ;;  %v9205_v34 = vsel %vm8401_vm3, %v8928_v26, -inf  ;;  %v5057_v35 = vadd.f32 %v14456_v31, %v5056_v27 }
 0x1ad   : > { %v14463_v37 = vmax.f32 %v9086_v63, %v9087_v33  ;;  %v14465_v38 = vmax.f32 %v9204_v9, %v9205_v34  ;;  %v7809_v39 = vpack.c.bf16 %v6977_v30, %v6977_v30  ;;  %v7185_v40 = vmax.f32 %v6090_v32, 0.0  ;;  %v13618_v63 = vld [vmem:[%s13817_s11 + $0xa88] sm:$0xff] }
 0x1ae   : > { %v6562_v41 = vmax.f32 %v4532_v29, 0.0  ;;  %v6772_v42 = vmax.f32 %v5057_v35, 0.0 }
 0x1af   : > { %v8978_v44 = vunpack.c.l.bf16 %v7809_v39  ;;  %v8017_v45 = vpack.c.bf16 %v7185_v40, %v7185_v40 }
 0x1b0   : > { %v7394_v46 = vpack.c.bf16 %v6562_v41, %v6562_v41  ;;  %v7604_v47 = vpack.c.bf16 %v6772_v42, %v6772_v42  ;;  %v5571_v48 = vpop.f32.mrf.mxu2 }
 0x1b1   : > { %v9315_v51 = vsel %vm8401_vm3, %v8978_v44, -inf  ;;  %v9030_v52 = vunpack.c.l.bf16 %v8017_v45  ;;  %v5572_v53 = vadd.f32 %v14456_v31, %v5571_v48  ;;  %v6091_v54 = vpop.f32.mrf.mxu3  ;;  %v4534_v55 = vpop.f32.mrf.mxu0 }
 0x1b2   : > { %v14472_v57 = vmax.f32 %v9314_v23, %v9315_v51  ;;  %v8875_v58 = vunpack.c.l.bf16 %v7394_v46  ;;  %v8929_v59 = vunpack.c.l.bf16 %v7604_v47  ;;  %v6092_v60 = vadd.f32 %v14456_v31, %v6091_v54  ;;  %v5059_v61 = vpop.f32.mrf.mxu1  ;;  %v13412_v54 = vld [vmem:[%s13817_s11 + $0x418] sm:$0xff] }
 0x1b3   : > { %v9429_v0 = vsel %vm8401_vm3, %v9030_v52, -inf  ;;  %v6978_v1 = vmax.f32 %v5572_v53, 0.0  ;;  %v4535_v3 = vadd.f32 %v14456_v31, %v4534_v55  ;;  %v5060_v4 = vadd.f32 %v14456_v31, %v5059_v61  ;;  %v13307_v53 = vld [vmem:[%s13817_s11 + $0xd0] sm:$0xff] }
 0x1b4   : > { %v9430_v6 = vmax.f32 %v9428_v28, %v9429_v0  ;;  %v9089_v7 = vsel %vm8401_vm3, %v8875_v58, -inf  ;;  %v9207_v8 = vsel %vm8401_vm3, %v8929_v59, -inf  ;;  %v7186_v9 = vmax.f32 %v6092_v60, 0.0  ;;  %12862 = vmatmul.msk.bf16.gmra.mxu0 %vm3184_vm2, %v13306_v49  ;;  %12967 = vmatmul.msk.bf16.gmra.mxu1 %vm3184_vm2, %v13411_v50  ;;  %v13515_v60 = vld [vmem:[%s13817_s11 + $0x750] sm:$0xff] }
 0x1b5   : > { %v9090_v10 = vmax.f32 %v14463_v37, %v9089_v7  ;;  %v9208_v11 = vmax.f32 %v14465_v38, %v9207_v8  ;;  %v7810_v12 = vpack.c.bf16 %v6978_v1, %v6978_v1  ;;  %v6563_v13 = vmax.f32 %v4535_v3, 0.0  ;;  %13070 = vmatmul.msk.bf16.gmra.mxu2 %vm3184_vm2, %v13514_v56 }
 0x1b6   : > { %v8018_v14 = vpack.c.bf16 %v7186_v9, %v7186_v9  ;;  %v6773_v15 = vmax.f32 %v5060_v4, 0.0  ;;  %13174 = vmatmul.msk.bf16.gmra.mxu3 %vm3184_vm2, %v13618_v63  ;;  %v13619_v4 = vld [vmem:[%s13817_s11 + $0xa90] sm:$0xff] }
 0x1b7   : > { %v8979_v16 = vunpack.c.l.bf16 %v7810_v12  ;;  %v7395_v18 = vpack.c.bf16 %v6563_v13, %v6563_v13 }
 0x1b8   : > { %v9031_v19 = vunpack.c.l.bf16 %v8018_v14  ;;  %v7605_v20 = vpack.c.bf16 %v6773_v15, %v6773_v15  ;;  %v5574_v43 = vpop.f32.mrf.mxu2 }
 0x1b9   : > { %v9317_v22 = vsel %vm8401_vm3, %v8979_v16, -inf  ;;  %v8876_v23 = vunpack.c.l.bf16 %v7395_v18  ;;  %v5575_v24 = vadd.f32 %v14456_v31, %v5574_v43  ;;  %v6094_v25 = vpop.f32.mrf.mxu3  ;;  %v4536_v26 = vpop.f32.mrf.mxu0 }
 0x1ba   : > { %v9318_v27 = vmax.f32 %v14472_v57, %v9317_v22  ;;  %v9431_v28 = vsel %vm8401_vm3, %v9031_v19, -inf  ;;  %v8930_v30 = vunpack.c.l.bf16 %v7605_v20  ;;  %v6095_v32 = vadd.f32 %v14456_v31, %v6094_v25  ;;  %v5061_v29 = vpop.f32.mrf.mxu1 }
 0x1bb   : > { %v9432_v33 = vmax.f32 %v9430_v6, %v9431_v28  ;;  %v9091_v34 = vsel %vm8401_vm3, %v8876_v23, -inf  ;;  %v6979_v35 = vmax.f32 %v5575_v24, 0.0  ;;  %v4537_v37 = vadd.f32 %v14456_v31, %v4536_v26 }
 0x1bc   : > { %v14494_v38 = vmax.f32 %v9090_v10, %v9091_v34  ;;  %v9209_v39 = vsel %vm8401_vm3, %v8930_v30, -inf  ;;  %v7187_v40 = vmax.f32 %v6095_v32, 0.0  ;;  %v5062_v41 = vadd.f32 %v14456_v31, %v5061_v29 }
 0x1bd   : > { %v14498_v42 = vmax.f32 %v9208_v11, %v9209_v39  ;;  %v7811_v44 = vpack.c.bf16 %v6979_v35, %v6979_v35  ;;  %v6564_v45 = vmax.f32 %v4537_v37, 0.0 }
 0x1be   : > { %v8019_v46 = vpack.c.bf16 %v7187_v40, %v7187_v40  ;;  %v6774_v47 = vmax.f32 %v5062_v41, 0.0 }
 0x1bf   : > { %v8980_v48 = vunpack.c.l.bf16 %v7811_v44  ;;  %v7396_v49 = vpack.c.bf16 %v6564_v45, %v6564_v45 }
 0x1c0   : > { %v9032_v50 = vunpack.c.l.bf16 %v8019_v46  ;;  %v7606_v51 = vpack.c.bf16 %v6774_v47, %v6774_v47  ;;  %v5576_v52 = vpop.f32.mrf.mxu2 }
 0x1c1   : > { %v9319_v55 = vsel %vm8401_vm3, %v8980_v48, -inf  ;;  %v8877_v56 = vunpack.c.l.bf16 %v7396_v49  ;;  %v5577_v57 = vadd.f32 %v14456_v31, %v5576_v52  ;;  %v6096_v58 = vpop.f32.mrf.mxu3  ;;  %v4539_v59 = vpop.f32.mrf.mxu0 }
 0x1c2   : > { %v14505_v61 = vmax.f32 %v9318_v27, %v9319_v55  ;;  %v9433_v63 = vsel %vm8401_vm3, %v9032_v50, -inf  ;;  %v8931_v0 = vunpack.c.l.bf16 %v7606_v51  ;;  %v6097_v1 = vadd.f32 %v14456_v31, %v6096_v58  ;;  %v5064_v3 = vpop.f32.mrf.mxu1 }
 0x1c3   : > { %v14510_v6 = vmax.f32 %v9432_v33, %v9433_v63  ;;  %v9093_v7 = vsel %vm8401_vm3, %v8877_v56, -inf  ;;  %v6980_v8 = vmax.f32 %v5577_v57, 0.0  ;;  %v4540_v9 = vadd.f32 %v14456_v31, %v4539_v59  ;;  %v13308_v56 = vld [vmem:[%s13817_s11 + $0xd8] sm:$0xff]  ;;  %v13413_v57 = vld [vmem:[%s13817_s11 + $0x420] sm:$0xff] }
 0x1c4   : > { %v9094_v10 = vmax.f32 %v14494_v38, %v9093_v7  ;;  %v9211_v11 = vsel %vm8401_vm3, %v8931_v0, -inf  ;;  %v7188_v12 = vmax.f32 %v6097_v1, 0.0  ;;  %v5065_v13 = vadd.f32 %v14456_v31, %v5064_v3  ;;  %12863 = vmatmul.msk.bf16.gmra.mxu0 %vm3184_vm2, %v13307_v53  ;;  %12968 = vmatmul.msk.bf16.gmra.mxu1 %vm3184_vm2, %v13412_v54  ;;  %v13516_v0 = vld [vmem:[%s13817_s11 + $0x758] sm:$0xff] }
 0x1c5   : > { %v9212_v14 = vmax.f32 %v14498_v42, %v9211_v11  ;;  %v7812_v15 = vpack.c.bf16 %v6980_v8, %v6980_v8  ;;  %v6565_v16 = vmax.f32 %v4540_v9, 0.0  ;;  %13071 = vmatmul.msk.bf16.gmra.mxu2 %vm3184_vm2, %v13515_v60  ;;  %v13620_v8 = vld [vmem:[%s13817_s11 + $0xa98] sm:$0xff] }
 0x1c6   : > { %v8020_v18 = vpack.c.bf16 %v7188_v12, %v7188_v12  ;;  %v6775_v19 = vmax.f32 %v5065_v13, 0.0  ;;  %13175 = vmatmul.msk.bf16.gmra.mxu3 %vm3184_vm2, %v13619_v4 }
 0x1c7   : > { %v8981_v20 = vunpack.c.l.bf16 %v7812_v15  ;;  %v7397_v43 = vpack.c.bf16 %v6565_v16, %v6565_v16 }
 0x1c8   : > { %v9033_v22 = vunpack.c.l.bf16 %v8020_v18  ;;  %v7607_v23 = vpack.c.bf16 %v6775_v19, %v6775_v19  ;;  %v5579_v24 = vpop.f32.mrf.mxu2 }
 0x1c9   : > { %v9321_v25 = vsel %vm8401_vm3, %v8981_v20, -inf  ;;  %v8878_v26 = vunpack.c.l.bf16 %v7397_v43  ;;  %v5580_v27 = vadd.f32 %v14456_v31, %v5579_v24  ;;  %v6099_v28 = vpop.f32.mrf.mxu3  ;;  %v4541_v30 = vpop.f32.mrf.mxu0 }
 0x1ca   : > { %v9322_v32 = vmax.f32 %v14505_v61, %v9321_v25  ;;  %v9435_v29 = vsel %vm8401_vm3, %v9033_v22, -inf  ;;  %v8932_v33 = vunpack.c.l.bf16 %v7607_v23  ;;  %v6100_v34 = vadd.f32 %v14456_v31, %v6099_v28  ;;  %v5066_v35 = vpop.f32.mrf.mxu1 }
 0x1cb   : > { %v9436_v37 = vmax.f32 %v14510_v6, %v9435_v29  ;;  %v9095_v38 = vsel %vm8401_vm3, %v8878_v26, -inf  ;;  %v6981_v39 = vmax.f32 %v5580_v27, 0.0  ;;  %v4542_v40 = vadd.f32 %v14456_v31, %v4541_v30 }
 0x1cc   : > { %v14530_v41 = vmax.f32 %v9094_v10, %v9095_v38  ;;  %v9213_v42 = vsel %vm8401_vm3, %v8932_v33, -inf  ;;  %v7189_v44 = vmax.f32 %v6100_v34, 0.0  ;;  %v5067_v45 = vadd.f32 %v14456_v31, %v5066_v35 }
 0x1cd   : > { %v14534_v46 = vmax.f32 %v9212_v14, %v9213_v42  ;;  %v7813_v47 = vpack.c.bf16 %v6981_v39, %v6981_v39  ;;  %v6566_v48 = vmax.f32 %v4542_v40, 0.0 }
 0x1ce   : > { %v8021_v49 = vpack.c.bf16 %v7189_v44, %v7189_v44  ;;  %v6776_v50 = vmax.f32 %v5067_v45, 0.0 }
 0x1cf   : > { %v8982_v51 = vunpack.c.l.bf16 %v7813_v47  ;;  %v7398_v52 = vpack.c.bf16 %v6566_v48, %v6566_v48 }
 0x1d0   : > { %v9034_v53 = vunpack.c.l.bf16 %v8021_v49  ;;  %v7608_v54 = vpack.c.bf16 %v6776_v50, %v6776_v50  ;;  %v5581_v55 = vpop.f32.mrf.mxu2 }
 0x1d1   : > { %v9323_v58 = vsel %vm8401_vm3, %v8982_v51, -inf  ;;  %v8879_v59 = vunpack.c.l.bf16 %v7398_v52  ;;  %v5582_v60 = vadd.f32 %v14456_v31, %v5581_v55  ;;  %v6101_v61 = vpop.f32.mrf.mxu3  ;;  %v4544_v63 = vpop.f32.mrf.mxu0 }
 0x1d2   : > { %v14541_v1 = vmax.f32 %v9322_v32, %v9323_v58  ;;  %v9437_v3 = vsel %vm8401_vm3, %v9034_v53, -inf  ;;  %v8933_v4 = vunpack.c.l.bf16 %v7608_v54  ;;  %v6102_v6 = vadd.f32 %v14456_v31, %v6101_v61  ;;  %v5069_v7 = vpop.f32.mrf.mxu1 }
 0x1d3   : > { %v14546_v9 = vmax.f32 %v9436_v37, %v9437_v3  ;;  %v9097_v10 = vsel %vm8401_vm3, %v8879_v59, -inf  ;;  %v6982_v11 = vmax.f32 %v5582_v60, 0.0  ;;  %v4545_v12 = vadd.f32 %v14456_v31, %v4544_v63  ;;  %v13309_v59 = vld [vmem:[%s13817_s11 + $0xe0] sm:$0xff]  ;;  %v13414_v60 = vld [vmem:[%s13817_s11 + $0x428] sm:$0xff] }
 0x1d4   : > { %v9098_v13 = vmax.f32 %v14530_v41, %v9097_v10  ;;  %v9215_v14 = vsel %vm8401_vm3, %v8933_v4, -inf  ;;  %v7190_v15 = vmax.f32 %v6102_v6, 0.0  ;;  %v5070_v16 = vadd.f32 %v14456_v31, %v5069_v7  ;;  %12864 = vmatmul.msk.bf16.gmra.mxu0 %vm3184_vm2, %v13308_v56  ;;  %12969 = vmatmul.msk.bf16.gmra.mxu1 %vm3184_vm2, %v13413_v57  ;;  %v13517_v4 = vld [vmem:[%s13817_s11 + $0x760] sm:$0xff] }
 0x1d5   : > { %v9216_v18 = vmax.f32 %v14534_v46, %v9215_v14  ;;  %v7814_v19 = vpack.c.bf16 %v6982_v11, %v6982_v11  ;;  %v6567_v20 = vmax.f32 %v4545_v12, 0.0  ;;  %13072 = vmatmul.msk.bf16.gmra.mxu2 %vm3184_vm2, %v13516_v0  ;;  %v13621_v11 = vld [vmem:[%s13817_s11 + $0xaa0] sm:$0xff] }
 0x1d6   : > { %v8022_v43 = vpack.c.bf16 %v7190_v15, %v7190_v15  ;;  %v6777_v22 = vmax.f32 %v5070_v16, 0.0  ;;  %13176 = vmatmul.msk.bf16.gmra.mxu3 %vm3184_vm2, %v13620_v8 }
 0x1d7   : > { %v8983_v23 = vunpack.c.l.bf16 %v7814_v19  ;;  %v7399_v24 = vpack.c.bf16 %v6567_v20, %v6567_v20 }
 0x1d8   : > { %v9035_v25 = vunpack.c.l.bf16 %v8022_v43  ;;  %v7609_v26 = vpack.c.bf16 %v6777_v22, %v6777_v22  ;;  %v5584_v27 = vpop.f32.mrf.mxu2 }
 0x1d9   : > { %v9325_v28 = vsel %vm8401_vm3, %v8983_v23, -inf  ;;  %v8880_v30 = vunpack.c.l.bf16 %v7399_v24  ;;  %v5585_v32 = vadd.f32 %v14456_v31, %v5584_v27  ;;  %v6104_v29 = vpop.f32.mrf.mxu3  ;;  %v4546_v33 = vpop.f32.mrf.mxu0 }
 0x1da   : > { %v9326_v34 = vmax.f32 %v14541_v1, %v9325_v28  ;;  %v9439_v35 = vsel %vm8401_vm3, %v9035_v25, -inf  ;;  %v8934_v37 = vunpack.c.l.bf16 %v7609_v26  ;;  %v6105_v38 = vadd.f32 %v14456_v31, %v6104_v29  ;;  %v5071_v39 = vpop.f32.mrf.mxu1 }
 0x1db   : > { %v9440_v40 = vmax.f32 %v14546_v9, %v9439_v35  ;;  %v9099_v41 = vsel %vm8401_vm3, %v8880_v30, -inf  ;;  %v6983_v42 = vmax.f32 %v5585_v32, 0.0  ;;  %v4547_v44 = vadd.f32 %v14456_v31, %v4546_v33 }
 0x1dc   : > { %v14566_v45 = vmax.f32 %v9098_v13, %v9099_v41  ;;  %v9217_v46 = vsel %vm8401_vm3, %v8934_v37, -inf  ;;  %v7191_v47 = vmax.f32 %v6105_v38, 0.0  ;;  %v5072_v48 = vadd.f32 %v14456_v31, %v5071_v39 }
 0x1dd   : > { %v14570_v49 = vmax.f32 %v9216_v18, %v9217_v46  ;;  %v7815_v50 = vpack.c.bf16 %v6983_v42, %v6983_v42  ;;  %v6568_v51 = vmax.f32 %v4547_v44, 0.0 }
 0x1de   : > { %v8023_v52 = vpack.c.bf16 %v7191_v47, %v7191_v47  ;;  %v6778_v53 = vmax.f32 %v5072_v48, 0.0 }
 0x1df   : > { %v8984_v54 = vunpack.c.l.bf16 %v7815_v50  ;;  %v7400_v55 = vpack.c.bf16 %v6568_v51, %v6568_v51 }
 0x1e0   : > { %v9036_v56 = vunpack.c.l.bf16 %v8023_v52  ;;  %v7610_v57 = vpack.c.bf16 %v6778_v53, %v6778_v53  ;;  %v5586_v58 = vpop.f32.mrf.mxu2 }
 0x1e1   : > { %v9327_v61 = vsel %vm8401_vm3, %v8984_v54, -inf  ;;  %v8881_v63 = vunpack.c.l.bf16 %v7400_v55  ;;  %v5587_v0 = vadd.f32 %v14456_v31, %v5586_v58  ;;  %v6106_v1 = vpop.f32.mrf.mxu3  ;;  %v4549_v3 = vpop.f32.mrf.mxu0 }
 0x1e2   : > { %v14577_v6 = vmax.f32 %v9326_v34, %v9327_v61  ;;  %v9441_v7 = vsel %vm8401_vm3, %v9036_v56, -inf  ;;  %v8935_v8 = vunpack.c.l.bf16 %v7610_v57  ;;  %v6107_v9 = vadd.f32 %v14456_v31, %v6106_v1  ;;  %v5074_v10 = vpop.f32.mrf.mxu1 }
 0x1e3   : > { %v14582_v12 = vmax.f32 %v9440_v40, %v9441_v7  ;;  %v9101_v13 = vsel %vm8401_vm3, %v8881_v63, -inf  ;;  %v6984_v14 = vmax.f32 %v5587_v0, 0.0  ;;  %v4550_v15 = vadd.f32 %v14456_v31, %v4549_v3  ;;  %v13310_v63 = vld [vmem:[%s13817_s11 + $0xe8] sm:$0xff]  ;;  %v13415_v0 = vld [vmem:[%s13817_s11 + $0x430] sm:$0xff] }
 0x1e4   : > { %v9102_v16 = vmax.f32 %v14566_v45, %v9101_v13  ;;  %v9219_v18 = vsel %vm8401_vm3, %v8935_v8, -inf  ;;  %v7192_v19 = vmax.f32 %v6107_v9, 0.0  ;;  %v5075_v20 = vadd.f32 %v14456_v31, %v5074_v10  ;;  %12865 = vmatmul.msk.bf16.gmra.mxu0 %vm3184_vm2, %v13309_v59  ;;  %12970 = vmatmul.msk.bf16.gmra.mxu1 %vm3184_vm2, %v13414_v60  ;;  %v13518_v8 = vld [vmem:[%s13817_s11 + $0x768] sm:$0xff] }
 0x1e5   : > { %v9220_v43 = vmax.f32 %v14570_v49, %v9219_v18  ;;  %v7816_v22 = vpack.c.bf16 %v6984_v14, %v6984_v14  ;;  %v6569_v23 = vmax.f32 %v4550_v15, 0.0  ;;  %13073 = vmatmul.msk.bf16.gmra.mxu2 %vm3184_vm2, %v13517_v4  ;;  %v13622_v14 = vld [vmem:[%s13817_s11 + $0xaa8] sm:$0xff] }
 0x1e6   : > { %v8024_v24 = vpack.c.bf16 %v7192_v19, %v7192_v19  ;;  %v6779_v25 = vmax.f32 %v5075_v20, 0.0  ;;  %13177 = vmatmul.msk.bf16.gmra.mxu3 %vm3184_vm2, %v13621_v11 }
 0x1e7   : > { %v8985_v26 = vunpack.c.l.bf16 %v7816_v22  ;;  %v7401_v27 = vpack.c.bf16 %v6569_v23, %v6569_v23 }
 0x1e8   : > { %v9037_v28 = vunpack.c.l.bf16 %v8024_v24  ;;  %v7611_v30 = vpack.c.bf16 %v6779_v25, %v6779_v25  ;;  %v5589_v32 = vpop.f32.mrf.mxu2 }
 0x1e9   : > { %v9329_v29 = vsel %vm8401_vm3, %v8985_v26, -inf  ;;  %v8882_v33 = vunpack.c.l.bf16 %v7401_v27  ;;  %v5590_v34 = vadd.f32 %v14456_v31, %v5589_v32  ;;  %v6109_v35 = vpop.f32.mrf.mxu3  ;;  %v4551_v37 = vpop.f32.mrf.mxu0 }
 0x1ea   : > { %v9330_v38 = vmax.f32 %v14577_v6, %v9329_v29  ;;  %v9443_v39 = vsel %vm8401_vm3, %v9037_v28, -inf  ;;  %v8936_v40 = vunpack.c.l.bf16 %v7611_v30  ;;  %v6110_v41 = vadd.f32 %v14456_v31, %v6109_v35  ;;  %v5076_v42 = vpop.f32.mrf.mxu1 }
 0x1eb   : > { %v9444_v44 = vmax.f32 %v14582_v12, %v9443_v39  ;;  %v9103_v45 = vsel %vm8401_vm3, %v8882_v33, -inf  ;;  %v6985_v46 = vmax.f32 %v5590_v34, 0.0  ;;  %v4552_v47 = vadd.f32 %v14456_v31, %v4551_v37 }
 0x1ec   : > { %v14602_v48 = vmax.f32 %v9102_v16, %v9103_v45  ;;  %v9221_v49 = vsel %vm8401_vm3, %v8936_v40, -inf  ;;  %v7193_v50 = vmax.f32 %v6110_v41, 0.0  ;;  %v5077_v51 = vadd.f32 %v14456_v31, %v5076_v42 }
 0x1ed   : > { %v14606_v52 = vmax.f32 %v9220_v43, %v9221_v49  ;;  %v7817_v53 = vpack.c.bf16 %v6985_v46, %v6985_v46  ;;  %v6570_v54 = vmax.f32 %v4552_v47, 0.0 }
 0x1ee   : > { %v8025_v55 = vpack.c.bf16 %v7193_v50, %v7193_v50  ;;  %v6780_v56 = vmax.f32 %v5077_v51, 0.0 }
 0x1ef   : > { %v8986_v57 = vunpack.c.l.bf16 %v7817_v53  ;;  %v7402_v58 = vpack.c.bf16 %v6570_v54, %v6570_v54 }
 0x1f0   : > { %v9038_v59 = vunpack.c.l.bf16 %v8025_v55  ;;  %v7612_v60 = vpack.c.bf16 %v6780_v56, %v6780_v56  ;;  %v5591_v61 = vpop.f32.mrf.mxu2 }
 0x1f1   : > { %v9331_v1 = vsel %vm8401_vm3, %v8986_v57, -inf  ;;  %v8883_v3 = vunpack.c.l.bf16 %v7402_v58  ;;  %v5592_v4 = vadd.f32 %v14456_v31, %v5591_v61  ;;  %v6111_v6 = vpop.f32.mrf.mxu3  ;;  %v4554_v7 = vpop.f32.mrf.mxu0 }
 0x1f2   : > { %v14613_v9 = vmax.f32 %v9330_v38, %v9331_v1  ;;  %v9445_v10 = vsel %vm8401_vm3, %v9038_v59, -inf  ;;  %v8937_v11 = vunpack.c.l.bf16 %v7612_v60  ;;  %v6112_v12 = vadd.f32 %v14456_v31, %v6111_v6  ;;  %v5079_v13 = vpop.f32.mrf.mxu1 }
 0x1f3   : > { %v14618_v15 = vmax.f32 %v9444_v44, %v9445_v10  ;;  %v9105_v16 = vsel %vm8401_vm3, %v8883_v3, -inf  ;;  %v6986_v18 = vmax.f32 %v5592_v4, 0.0  ;;  %v4555_v19 = vadd.f32 %v14456_v31, %v4554_v7  ;;  %v13311_v3 = vld [vmem:[%s13817_s11 + $0xf0] sm:$0xff]  ;;  %v13416_v4 = vld [vmem:[%s13817_s11 + $0x438] sm:$0xff] }
 0x1f4   : > { %v9106_v20 = vmax.f32 %v14602_v48, %v9105_v16  ;;  %v9223_v43 = vsel %vm8401_vm3, %v8937_v11, -inf  ;;  %v7194_v22 = vmax.f32 %v6112_v12, 0.0  ;;  %v5080_v23 = vadd.f32 %v14456_v31, %v5079_v13  ;;  %12866 = vmatmul.msk.bf16.gmra.mxu0 %vm3184_vm2, %v13310_v63  ;;  %12971 = vmatmul.msk.bf16.gmra.mxu1 %vm3184_vm2, %v13415_v0  ;;  %v13519_v11 = vld [vmem:[%s13817_s11 + $0x770] sm:$0xff] }
 0x1f5   : > { %v9224_v24 = vmax.f32 %v14606_v52, %v9223_v43  ;;  %v7818_v25 = vpack.c.bf16 %v6986_v18, %v6986_v18  ;;  %v6571_v26 = vmax.f32 %v4555_v19, 0.0  ;;  %13074 = vmatmul.msk.bf16.gmra.mxu2 %vm3184_vm2, %v13518_v8  ;;  %v13623_v18 = vld [vmem:[%s13817_s11 + $0xab0] sm:$0xff] }
 0x1f6   : > { %v8026_v27 = vpack.c.bf16 %v7194_v22, %v7194_v22  ;;  %v6781_v28 = vmax.f32 %v5080_v23, 0.0  ;;  %13178 = vmatmul.msk.bf16.gmra.mxu3 %vm3184_vm2, %v13622_v14 }
 0x1f7   : > { %v8987_v30 = vunpack.c.l.bf16 %v7818_v25  ;;  %v7403_v32 = vpack.c.bf16 %v6571_v26, %v6571_v26 }
 0x1f8   : > { %v9039_v29 = vunpack.c.l.bf16 %v8026_v27  ;;  %v7613_v33 = vpack.c.bf16 %v6781_v28, %v6781_v28  ;;  %v5594_v34 = vpop.f32.mrf.mxu2 }
 0x1f9   : > { %v9333_v35 = vsel %vm8401_vm3, %v8987_v30, -inf  ;;  %v8884_v37 = vunpack.c.l.bf16 %v7403_v32  ;;  %v5595_v38 = vadd.f32 %v14456_v31, %v5594_v34  ;;  %v6114_v39 = vpop.f32.mrf.mxu3  ;;  %v4556_v40 = vpop.f32.mrf.mxu0 }
 0x1fa   : > { %v9334_v41 = vmax.f32 %v14613_v9, %v9333_v35  ;;  %v9447_v42 = vsel %vm8401_vm3, %v9039_v29, -inf  ;;  %v8938_v44 = vunpack.c.l.bf16 %v7613_v33  ;;  %v6115_v45 = vadd.f32 %v14456_v31, %v6114_v39  ;;  %v5081_v46 = vpop.f32.mrf.mxu1 }
 0x1fb   : > { %v9448_v47 = vmax.f32 %v14618_v15, %v9447_v42  ;;  %v9107_v48 = vsel %vm8401_vm3, %v8884_v37, -inf  ;;  %v6987_v49 = vmax.f32 %v5595_v38, 0.0  ;;  %v4557_v50 = vadd.f32 %v14456_v31, %v4556_v40 }
 0x1fc   : > { %v14638_v51 = vmax.f32 %v9106_v20, %v9107_v48  ;;  %v9225_v52 = vsel %vm8401_vm3, %v8938_v44, -inf  ;;  %v7195_v53 = vmax.f32 %v6115_v45, 0.0  ;;  %v5082_v54 = vadd.f32 %v14456_v31, %v5081_v46 }
 0x1fd   : > { %v14642_v55 = vmax.f32 %v9224_v24, %v9225_v52  ;;  %v7819_v56 = vpack.c.bf16 %v6987_v49, %v6987_v49  ;;  %v6572_v57 = vmax.f32 %v4557_v50, 0.0 }
 0x1fe   : > { %v8027_v58 = vpack.c.bf16 %v7195_v53, %v7195_v53  ;;  %v6782_v59 = vmax.f32 %v5082_v54, 0.0 }
 0x1ff   : > { %v8988_v60 = vunpack.c.l.bf16 %v7819_v56  ;;  %v7404_v61 = vpack.c.bf16 %v6572_v57, %v6572_v57 }
 0x200   : > { %v9040_v63 = vunpack.c.l.bf16 %v8027_v58  ;;  %v7614_v0 = vpack.c.bf16 %v6782_v59, %v6782_v59  ;;  %v5596_v1 = vpop.f32.mrf.mxu2 }
 0x201   : > { %v9335_v6 = vsel %vm8401_vm3, %v8988_v60, -inf  ;;  %v8885_v7 = vunpack.c.l.bf16 %v7404_v61  ;;  %v5597_v8 = vadd.f32 %v14456_v31, %v5596_v1  ;;  %v6116_v9 = vpop.f32.mrf.mxu3  ;;  %v4559_v10 = vpop.f32.mrf.mxu0 }
 0x202   : > { %v14649_v12 = vmax.f32 %v9334_v41, %v9335_v6  ;;  %v9449_v13 = vsel %vm8401_vm3, %v9040_v63, -inf  ;;  %v8939_v14 = vunpack.c.l.bf16 %v7614_v0  ;;  %v6117_v15 = vadd.f32 %v14456_v31, %v6116_v9  ;;  %v5084_v16 = vpop.f32.mrf.mxu1 }
 0x203   : > { %v14654_v19 = vmax.f32 %v9448_v47, %v9449_v13  ;;  %v9109_v20 = vsel %vm8401_vm3, %v8885_v7, -inf  ;;  %v6988_v43 = vmax.f32 %v5597_v8, 0.0  ;;  %v4560_v22 = vadd.f32 %v14456_v31, %v4559_v10  ;;  %v13312_v7 = vld [vmem:[%s13817_s11 + $0xf8] sm:$0xff]  ;;  %v13417_v8 = vld [vmem:[%s13817_s11 + $0x440] sm:$0xff] }
 0x204   : > { %v9110_v23 = vmax.f32 %v14638_v51, %v9109_v20  ;;  %v9227_v24 = vsel %vm8401_vm3, %v8939_v14, -inf  ;;  %v7196_v25 = vmax.f32 %v6117_v15, 0.0  ;;  %v5085_v26 = vadd.f32 %v14456_v31, %v5084_v16  ;;  %12867 = vmatmul.msk.bf16.gmra.mxu0 %vm3184_vm2, %v13311_v3  ;;  %12972 = vmatmul.msk.bf16.gmra.mxu1 %vm3184_vm2, %v13416_v4  ;;  %v13520_v14 = vld [vmem:[%s13817_s11 + $0x778] sm:$0xff] }
 0x205   : > { %v9228_v27 = vmax.f32 %v14642_v55, %v9227_v24  ;;  %v7820_v28 = vpack.c.bf16 %v6988_v43, %v6988_v43  ;;  %v6573_v30 = vmax.f32 %v4560_v22, 0.0  ;;  %13075 = vmatmul.msk.bf16.gmra.mxu2 %vm3184_vm2, %v13519_v11  ;;  %v13624_v43 = vld [vmem:[%s13817_s11 + $0xab8] sm:$0xff] }
 0x206   : > { %v8028_v32 = vpack.c.bf16 %v7196_v25, %v7196_v25  ;;  %v6783_v29 = vmax.f32 %v5085_v26, 0.0  ;;  %13179 = vmatmul.msk.bf16.gmra.mxu3 %vm3184_vm2, %v13623_v18 }
 0x207   : > { %v8989_v33 = vunpack.c.l.bf16 %v7820_v28  ;;  %v7405_v34 = vpack.c.bf16 %v6573_v30, %v6573_v30 }
 0x208   : > { %v9041_v35 = vunpack.c.l.bf16 %v8028_v32  ;;  %v7615_v37 = vpack.c.bf16 %v6783_v29, %v6783_v29  ;;  %v5599_v38 = vpop.f32.mrf.mxu2 }
 0x209   : > { %v9337_v39 = vsel %vm8401_vm3, %v8989_v33, -inf  ;;  %v8886_v40 = vunpack.c.l.bf16 %v7405_v34  ;;  %v5600_v41 = vadd.f32 %v14456_v31, %v5599_v38  ;;  %v6119_v42 = vpop.f32.mrf.mxu3  ;;  %v4561_v44 = vpop.f32.mrf.mxu0 }
 0x20a   : > { %v9338_v45 = vmax.f32 %v14649_v12, %v9337_v39  ;;  %v9451_v46 = vsel %vm8401_vm3, %v9041_v35, -inf  ;;  %v8940_v47 = vunpack.c.l.bf16 %v7615_v37  ;;  %v6120_v48 = vadd.f32 %v14456_v31, %v6119_v42  ;;  %v5086_v49 = vpop.f32.mrf.mxu1 }
 0x20b   : > { %v9452_v50 = vmax.f32 %v14654_v19, %v9451_v46  ;;  %v9111_v51 = vsel %vm8401_vm3, %v8886_v40, -inf  ;;  %v6989_v52 = vmax.f32 %v5600_v41, 0.0  ;;  %v4562_v53 = vadd.f32 %v14456_v31, %v4561_v44 }
 0x20c   : > { %v14674_v54 = vmax.f32 %v9110_v23, %v9111_v51  ;;  %v9229_v55 = vsel %vm8401_vm3, %v8940_v47, -inf  ;;  %v7197_v56 = vmax.f32 %v6120_v48, 0.0  ;;  %v5087_v57 = vadd.f32 %v14456_v31, %v5086_v49 }
 0x20d   : > { %v14678_v58 = vmax.f32 %v9228_v27, %v9229_v55  ;;  %v7821_v59 = vpack.c.bf16 %v6989_v52, %v6989_v52  ;;  %v6574_v60 = vmax.f32 %v4562_v53, 0.0 }
 0x20e   : > { %v8029_v61 = vpack.c.bf16 %v7197_v56, %v7197_v56  ;;  %v6784_v63 = vmax.f32 %v5087_v57, 0.0 }
 0x20f   : > { %v8990_v0 = vunpack.c.l.bf16 %v7821_v59  ;;  %v7406_v1 = vpack.c.bf16 %v6574_v60, %v6574_v60 }
 0x210   : > { %v9042_v3 = vunpack.c.l.bf16 %v8029_v61  ;;  %v7616_v4 = vpack.c.bf16 %v6784_v63, %v6784_v63  ;;  %v5601_v6 = vpop.f32.mrf.mxu2 }
 0x211   : > { %v9339_v9 = vsel %vm8401_vm3, %v8990_v0, -inf  ;;  %v8887_v10 = vunpack.c.l.bf16 %v7406_v1  ;;  %v5602_v11 = vadd.f32 %v14456_v31, %v5601_v6  ;;  %v6121_v12 = vpop.f32.mrf.mxu3  ;;  %v4564_v13 = vpop.f32.mrf.mxu0 }
 0x212   : > { %v14685_v15 = vmax.f32 %v9338_v45, %v9339_v9  ;;  %v9453_v16 = vsel %vm8401_vm3, %v9042_v3, -inf  ;;  %v8941_v18 = vunpack.c.l.bf16 %v7616_v4  ;;  %v6122_v19 = vadd.f32 %v14456_v31, %v6121_v12  ;;  %v5089_v20 = vpop.f32.mrf.mxu1 }
 0x213   : > { %v14690_v22 = vmax.f32 %v9452_v50, %v9453_v16  ;;  %v9113_v23 = vsel %vm8401_vm3, %v8887_v10, -inf  ;;  %v6990_v24 = vmax.f32 %v5602_v11, 0.0  ;;  %v4565_v25 = vadd.f32 %v14456_v31, %v4564_v13  ;;  %v13313_v10 = vld [vmem:[%s13817_s11 + $0x100] sm:$0xff]  ;;  %v13418_v11 = vld [vmem:[%s13817_s11 + $0x448] sm:$0xff] }
 0x214   : > { %v9114_v26 = vmax.f32 %v14674_v54, %v9113_v23  ;;  %v9231_v27 = vsel %vm8401_vm3, %v8941_v18, -inf  ;;  %v7198_v28 = vmax.f32 %v6122_v19, 0.0  ;;  %v5090_v30 = vadd.f32 %v14456_v31, %v5089_v20  ;;  %12868 = vmatmul.msk.bf16.gmra.mxu0 %vm3184_vm2, %v13312_v7  ;;  %12973 = vmatmul.msk.bf16.gmra.mxu1 %vm3184_vm2, %v13417_v8  ;;  %v13521_v18 = vld [vmem:[%s13817_s11 + $0x780] sm:$0xff] }
 0x215   : > { %v9232_v32 = vmax.f32 %v14678_v58, %v9231_v27  ;;  %v7822_v29 = vpack.c.bf16 %v6990_v24, %v6990_v24  ;;  %v6575_v33 = vmax.f32 %v4565_v25, 0.0  ;;  %13076 = vmatmul.msk.bf16.gmra.mxu2 %vm3184_vm2, %v13520_v14  ;;  %v13625_v24 = vld [vmem:[%s13817_s11 + $0xac0] sm:$0xff] }
 0x216   : > { %v8030_v34 = vpack.c.bf16 %v7198_v28, %v7198_v28  ;;  %v6785_v35 = vmax.f32 %v5090_v30, 0.0  ;;  %13180 = vmatmul.msk.bf16.gmra.mxu3 %vm3184_vm2, %v13624_v43 }
 0x217   : > { %v8991_v37 = vunpack.c.l.bf16 %v7822_v29  ;;  %v7407_v38 = vpack.c.bf16 %v6575_v33, %v6575_v33 }
 0x218   : > { %v9043_v39 = vunpack.c.l.bf16 %v8030_v34  ;;  %v7617_v40 = vpack.c.bf16 %v6785_v35, %v6785_v35  ;;  %v5604_v41 = vpop.f32.mrf.mxu2 }
 0x219   : > { %v9341_v42 = vsel %vm8401_vm3, %v8991_v37, -inf  ;;  %v8888_v44 = vunpack.c.l.bf16 %v7407_v38  ;;  %v5605_v45 = vadd.f32 %v14456_v31, %v5604_v41  ;;  %v6124_v46 = vpop.f32.mrf.mxu3  ;;  %v4566_v47 = vpop.f32.mrf.mxu0 }
 0x21a   : > { %v9342_v48 = vmax.f32 %v14685_v15, %v9341_v42  ;;  %v9455_v49 = vsel %vm8401_vm3, %v9043_v39, -inf  ;;  %v8942_v50 = vunpack.c.l.bf16 %v7617_v40  ;;  %v6125_v51 = vadd.f32 %v14456_v31, %v6124_v46  ;;  %v5091_v52 = vpop.f32.mrf.mxu1 }
 0x21b   : > { %v9456_v53 = vmax.f32 %v14690_v22, %v9455_v49  ;;  %v9115_v54 = vsel %vm8401_vm3, %v8888_v44, -inf  ;;  %v6991_v55 = vmax.f32 %v5605_v45, 0.0  ;;  %v4567_v56 = vadd.f32 %v14456_v31, %v4566_v47 }
 0x21c   : > { %v14710_v57 = vmax.f32 %v9114_v26, %v9115_v54  ;;  %v9233_v58 = vsel %vm8401_vm3, %v8942_v50, -inf  ;;  %v7199_v59 = vmax.f32 %v6125_v51, 0.0  ;;  %v5092_v60 = vadd.f32 %v14456_v31, %v5091_v52 }
 0x21d   : > { %v14714_v61 = vmax.f32 %v9232_v32, %v9233_v58  ;;  %v7823_v63 = vpack.c.bf16 %v6991_v55, %v6991_v55  ;;  %v6576_v0 = vmax.f32 %v4567_v56, 0.0 }
 0x21e   : > { %v8031_v1 = vpack.c.bf16 %v7199_v59, %v7199_v59  ;;  %v6786_v3 = vmax.f32 %v5092_v60, 0.0  ;;  %v14748_v59 = vld [vmem:[%s17625_s2] ss:$0 sm:$0xff] }
 0x21f   : > { %v8992_v4 = vunpack.c.l.bf16 %v7823_v63  ;;  %v7408_v6 = vpack.c.bf16 %v6576_v0, %v6576_v0 }
 0x220   : > { %v9044_v7 = vunpack.c.l.bf16 %v8031_v1  ;;  %v7618_v8 = vpack.c.bf16 %v6786_v3, %v6786_v3  ;;  %v5606_v9 = vpop.f32.mrf.mxu2 }
 0x221   : > { %v9343_v12 = vsel %vm8401_vm3, %v8992_v4, -inf  ;;  %v8889_v13 = vunpack.c.l.bf16 %v7408_v6  ;;  %v5607_v14 = vadd.f32 %v14456_v31, %v5606_v9  ;;  %v6126_v15 = vpop.f32.mrf.mxu3  ;;  %v4569_v16 = vpop.f32.mrf.mxu0 }
 0x222   : > { %v14721_v19 = vmax.f32 %v9342_v48, %v9343_v12  ;;  %v9457_v20 = vsel %vm8401_vm3, %v9044_v7, -inf  ;;  %v8943_v43 = vunpack.c.l.bf16 %v7618_v8  ;;  %v6127_v22 = vadd.f32 %v14456_v31, %v6126_v15  ;;  %v5094_v23 = vpop.f32.mrf.mxu1 }
 0x223   : > { %v14726_v25 = vmax.f32 %v9456_v53, %v9457_v20  ;;  %v9117_v26 = vsel %vm8401_vm3, %v8889_v13, -inf  ;;  %v6992_v27 = vmax.f32 %v5607_v14, 0.0  ;;  %v4570_v28 = vadd.f32 %v14456_v31, %v4569_v16  ;;  %v13314_v13 = vld [vmem:[%s13817_s11 + $0x108] sm:$0xff]  ;;  %v13419_v14 = vld [vmem:[%s13817_s11 + $0x450] sm:$0xff] }
 0x224   : > { %v9118_v30 = vmax.f32 %v14710_v57, %v9117_v26  ;;  %v9235_v32 = vsel %vm8401_vm3, %v8943_v43, -inf  ;;  %v7200_v29 = vmax.f32 %v6127_v22, 0.0  ;;  %v5095_v33 = vadd.f32 %v14456_v31, %v5094_v23  ;;  %12869 = vmatmul.msk.bf16.gmra.mxu0 %vm3184_vm2, %v13313_v10  ;;  %12974 = vmatmul.msk.bf16.gmra.mxu1 %vm3184_vm2, %v13418_v11  ;;  %v13522_v43 = vld [vmem:[%s13817_s11 + $0x788] sm:$0xff] }
 0x225   : > { %v9236_v34 = vmax.f32 %v14714_v61, %v9235_v32  ;;  %v7824_v35 = vpack.c.bf16 %v6992_v27, %v6992_v27  ;;  %v6577_v37 = vmax.f32 %v4570_v28, 0.0  ;;  %13077 = vmatmul.msk.bf16.gmra.mxu2 %vm3184_vm2, %v13521_v18  ;;  %v13626_v27 = vld [vmem:[%s13817_s11 + $0xac8] sm:$0xff] }
 0x226   : > { %v8032_v38 = vpack.c.bf16 %v7200_v29, %v7200_v29  ;;  %v6787_v39 = vmax.f32 %v5095_v33, 0.0  ;;  %13181 = vmatmul.msk.bf16.gmra.mxu3 %vm3184_vm2, %v13625_v24 }
 0x227   : > { %v8993_v40 = vunpack.c.l.bf16 %v7824_v35  ;;  %v7409_v41 = vpack.c.bf16 %v6577_v37, %v6577_v37 }
 0x228   : > { %v9045_v42 = vunpack.c.l.bf16 %v8032_v38  ;;  %v7619_v44 = vpack.c.bf16 %v6787_v39, %v6787_v39  ;;  %v5609_v45 = vpop.f32.mrf.mxu2 }
 0x229   : > { %v9345_v46 = vsel %vm8401_vm3, %v8993_v40, -inf  ;;  %v8890_v47 = vunpack.c.l.bf16 %v7409_v41  ;;  %v5610_v48 = vadd.f32 %v14456_v31, %v5609_v45  ;;  %v6129_v49 = vpop.f32.mrf.mxu3  ;;  %v4571_v50 = vpop.f32.mrf.mxu0 }
 0x22a   : > { %v9346_v51 = vmax.f32 %v14721_v19, %v9345_v46  ;;  %v9459_v52 = vsel %vm8401_vm3, %v9045_v42, -inf  ;;  %v8944_v53 = vunpack.c.l.bf16 %v7619_v44  ;;  %v6130_v54 = vadd.f32 %v14456_v31, %v6129_v49  ;;  %v5096_v55 = vpop.f32.mrf.mxu1 }
 0x22b   : > { %v9460_v56 = vmax.f32 %v14726_v25, %v9459_v52  ;;  %v9119_v57 = vsel %vm8401_vm3, %v8890_v47, -inf  ;;  %v6993_v58 = vmax.f32 %v5610_v48, 0.0  ;;  %v4572_v60 = vadd.f32 %v14748_v59, %v4571_v50 }
 0x22c   : > { %v14751_v61 = vmax.f32 %v9118_v30, %v9119_v57  ;;  %v9237_v63 = vsel %vm8401_vm3, %v8944_v53, -inf  ;;  %v7201_v31 = vmax.f32 %v6130_v54, 0.0  ;;  %v5097_v0 = vadd.f32 %v14748_v59, %v5096_v55 }
 0x22d   : > { %v9238_v1 = vmax.f32 %v9236_v34, %v9237_v63  ;;  %v7825_v3 = vpack.c.bf16 %v6993_v58, %v6993_v58  ;;  %v6578_v4 = vmax.f32 %v4572_v60, 0.0 }
 0x22e   : > { %v8033_v6 = vpack.c.bf16 %v7201_v31, %v7201_v31  ;;  %v6788_v7 = vmax.f32 %v5097_v0, 0.0 }
 0x22f   : > { %v8994_v8 = vunpack.c.l.bf16 %v7825_v3  ;;  %v7410_v9 = vpack.c.bf16 %v6578_v4, %v6578_v4 }
 0x230   : > { %v9046_v10 = vunpack.c.l.bf16 %v8033_v6  ;;  %v7620_v11 = vpack.c.bf16 %v6788_v7, %v6788_v7  ;;  %v5611_v12 = vpop.f32.mrf.mxu2 }
 0x231   : > { %v9347_v15 = vsel %vm8401_vm3, %v8994_v8, -inf  ;;  %v8891_v16 = vunpack.c.l.bf16 %v7410_v9  ;;  %v5612_v18 = vadd.f32 %v14748_v59, %v5611_v12  ;;  %v6131_v19 = vpop.f32.mrf.mxu3  ;;  %v4574_v20 = vpop.f32.mrf.mxu0 }
 0x232   : > { %v9348_v22 = vmax.f32 %v9346_v51, %v9347_v15  ;;  %v9461_v23 = vsel %vm8401_vm3, %v9046_v10, -inf  ;;  %v8945_v24 = vunpack.c.l.bf16 %v7620_v11  ;;  %v6132_v25 = vadd.f32 %v14748_v59, %v6131_v19  ;;  %v5099_v26 = vpop.f32.mrf.mxu1 }
 0x233   : > { %v14763_v28 = vmax.f32 %v9460_v56, %v9461_v23  ;;  %v9121_v30 = vsel %vm8401_vm3, %v8891_v16, -inf  ;;  %v6994_v32 = vmax.f32 %v5612_v18, 0.0  ;;  %v4575_v29 = vadd.f32 %v14748_v59, %v4574_v20 }
 0x234   : > { %v9122_v33 = vmax.f32 %v14751_v61, %v9121_v30  ;;  %v9239_v34 = vsel %vm8401_vm3, %v8945_v24, -inf  ;;  %v7202_v35 = vmax.f32 %v6132_v25, 0.0  ;;  %v5100_v37 = vadd.f32 %v14748_v59, %v5099_v26  ;;  %12870 = vmatmul.msk.bf16.gmra.mxu0 %vm3184_vm2, %v13314_v13  ;;  %12975 = vmatmul.msk.bf16.gmra.mxu1 %vm3184_vm2, %v13419_v14  ;;  %v13315_v13 = vld [vmem:[%s13817_s11 + $0x110] sm:$0xff]  ;;  %v13420_v14 = vld [vmem:[%s13817_s11 + $0x458] sm:$0xff] }
 0x235   : > { %v14772_v38 = vmax.f32 %v9238_v1, %v9239_v34  ;;  %v7826_v39 = vpack.c.bf16 %v6994_v32, %v6994_v32  ;;  %v6579_v40 = vmax.f32 %v4575_v29, 0.0  ;;  %13078 = vmatmul.msk.bf16.gmra.mxu2 %vm3184_vm2, %v13522_v43  ;;  %v13523_v43 = vld [vmem:[%s13817_s11 + $0x790] sm:$0xff] }
 0x236   : > { %v8034_v41 = vpack.c.bf16 %v7202_v35, %v7202_v35  ;;  %13182 = vmatmul.msk.bf16.gmra.mxu3 %vm3184_vm2, %v13626_v27  ;;  %v6789_v45 = vmax.f32 %v5100_v37, 0.0  ;;  %v13627_v27 = vld [vmem:[%s13817_s11 + $0xad0] sm:$0xff] }
 0x237   : > { %v8995_v42 = vunpack.c.l.bf16 %v7826_v39  ;;  %v7411_v44 = vpack.c.bf16 %v6579_v40, %v6579_v40 }
 0x238   : > { %v9047_v46 = vunpack.c.l.bf16 %v8034_v41  ;;  %v5614_v47 = vpop.f32.mrf.mxu2  ;;  %v7621_v60 = vpack.c.bf16 %v6789_v45, %v6789_v45 }
 0x239   : > { %v9349_v48 = vsel %vm8401_vm3, %v8995_v42, -inf  ;;  %v8892_v49 = vunpack.c.l.bf16 %v7411_v44  ;;  %v5615_v50 = vadd.f32 %v14748_v59, %v5614_v47  ;;  %v6134_v51 = vpop.f32.mrf.mxu3  ;;  %v4576_v52 = vpop.f32.mrf.mxu0 }
 0x23a   : > { %v9350_v53 = vmax.f32 %v9348_v22, %v9349_v48  ;;  %v9463_v54 = vsel %vm8401_vm3, %v9047_v46, -inf  ;;  %v6135_v55 = vadd.f32 %v14748_v59, %v6134_v51  ;;  %v5101_v56 = vpop.f32.mrf.mxu1  ;;  %v4577_v0 = vadd.f32 %v14748_v59, %v4576_v52 }
 0x23b   : > { %v9464_v57 = vmax.f32 %v14763_v28, %v9463_v54  ;;  %v9123_v58 = vsel %vm8401_vm3, %v8892_v49, -inf  ;;  %v6995_v61 = vmax.f32 %v5615_v50, 0.0  ;;  %v5102_v3 = vadd.f32 %v14748_v59, %v5101_v56 }
 0x23c   : > { %v9124_v63 = vmax.f32 %v9122_v33, %v9123_v58  ;;  %v7203_v31 = vmax.f32 %v6135_v55, 0.0  ;;  %v6580_v6 = vmax.f32 %v4577_v0, 0.0  ;;  %v9694_v7 = vunpack.c.l.bf16 %v7621_v60 }
 0x23d   : > { %v7827_v1 = vpack.c.bf16 %v6995_v61, %v6995_v61  ;;  %v6790_v9 = vmax.f32 %v5102_v3, 0.0 }
 0x23e   : > { %v8035_v4 = vpack.c.bf16 %v7203_v31, %v7203_v31  ;;  %v7412_v11 = vpack.c.bf16 %v6580_v6, %v6580_v6  ;;  %v9964_v28 = vsel %vm8401_vm3, %v9694_v7, -inf }
 0x23f   : > { %v8996_v8 = vunpack.c.l.bf16 %v7827_v1  ;;  %v7622_v16 = vpack.c.bf16 %v6790_v9, %v6790_v9 }
 0x240   : > { %v9048_v10 = vunpack.c.l.bf16 %v8035_v4  ;;  %v5616_v12 = vpop.f32.mrf.mxu2  ;;  %v8893_v24 = vunpack.c.l.bf16 %v7412_v11 }
 0x241   : > { %v9351_v15 = vsel %vm8401_vm3, %v8996_v8, -inf  ;;  %v5617_v18 = vadd.f32 %v14748_v59, %v5616_v12  ;;  %v6136_v19 = vpop.f32.mrf.mxu3  ;;  %v4579_v20 = vpop.f32.mrf.mxu0  ;;  %v9695_v32 = vunpack.c.l.bf16 %v7622_v16 }
 0x242   : > { %v9352_v22 = vmax.f32 %v9350_v53, %v9351_v15  ;;  %v9465_v23 = vsel %vm8401_vm3, %v9048_v10, -inf  ;;  %v6137_v25 = vadd.f32 %v14748_v59, %v6136_v19  ;;  %v5104_v26 = vpop.f32.mrf.mxu1  ;;  %v9125_v33 = vsel %vm8401_vm3, %v8893_v24, -inf  ;;  %v13524_v19 = vld [vmem:[%s13817_s11 + $0x798] sm:$0xff] }
 0x243   : > { %v9466_v30 = vmax.f32 %v9464_v57, %v9465_v23  ;;  %v6996_v29 = vmax.f32 %v5617_v18, 0.0  ;;  %v4580_v35 = vadd.f32 %v14748_v59, %v4579_v20  ;;  %v5105_v37 = vadd.f32 %v14748_v59, %v5104_v26  ;;  %v13628_v24 = vld [vmem:[%s13817_s11 + $0xad8] sm:$0xff] }
 0x244   : > { %v7204_v34 = vmax.f32 %v6137_v25, 0.0  ;;  %12871 = vmatmul.msk.bf16.gmra.mxu0 %vm3184_vm2, %v13315_v13  ;;  %12976 = vmatmul.msk.bf16.gmra.mxu1 %vm3184_vm2, %v13420_v14  ;;  %v14798_v39 = vmax.f32 %v9124_v63, %v9125_v33  ;;  %v9965_v40 = vsel %vm8401_vm3, %v9695_v32, -inf  ;;  %v13316_v13 = vld [vmem:[%s13817_s11 + $0x118] sm:$0xff]  ;;  %v13421_v14 = vld [vmem:[%s13817_s11 + $0x460] sm:$0xff] }
 0x245   : > { %v7828_v41 = vpack.c.bf16 %v6996_v29, %v6996_v29  ;;  %13079 = vmatmul.msk.bf16.gmra.mxu2 %vm3184_vm2, %v13523_v43  ;;  %v9966_v42 = vmax.f32 %v9964_v28, %v9965_v40  ;;  %v6791_v45 = vmax.f32 %v5105_v37, 0.0  ;;  %v6581_v48 = vmax.f32 %v4580_v35, 0.0 }
 0x246   : > { %v8036_v44 = vpack.c.bf16 %v7204_v34, %v7204_v34  ;;  %13183 = vmatmul.msk.bf16.gmra.mxu3 %vm3184_vm2, %v13627_v27 }
 0x247   : > { %v8997_v46 = vunpack.c.l.bf16 %v7828_v41  ;;  %v7623_v49 = vpack.c.bf16 %v6791_v45, %v6791_v45  ;;  %v7413_v31 = vpack.c.bf16 %v6581_v48, %v6581_v48 }
 0x248   : > { %v9049_v47 = vunpack.c.l.bf16 %v8036_v44  ;;  %v5619_v50 = vpop.f32.mrf.mxu2 }
 0x249   : > { %v9353_v51 = vsel %vm8401_vm3, %v8997_v46, -inf  ;;  %v5620_v52 = vadd.f32 %v14748_v59, %v5619_v50  ;;  %v6139_v53 = vpop.f32.mrf.mxu3  ;;  %v4581_v54 = vpop.f32.mrf.mxu0  ;;  %v9696_v57 = vunpack.c.l.bf16 %v7623_v49  ;;  %v9642_v9 = vunpack.c.l.bf16 %v7413_v31 }
 0x24a   : > { %v14805_v55 = vmax.f32 %v9352_v22, %v9353_v51  ;;  %v9467_v56 = vsel %vm8401_vm3, %v9049_v47, -inf  ;;  %v5106_v58 = vpop.f32.mrf.mxu1  ;;  %v6140_v63 = vadd.f32 %v14748_v59, %v6139_v53  ;;  %v4582_v1 = vadd.f32 %v14748_v59, %v4581_v54 }
 0x24b   : > { %v14808_v60 = vmax.f32 %v9466_v30, %v9467_v56  ;;  %v6997_v61 = vmax.f32 %v5620_v52, 0.0  ;;  %v9967_v0 = vsel %vm8401_vm3, %v9696_v57, -inf  ;;  %v5107_v7 = vadd.f32 %v14748_v59, %v5106_v58 }
 0x24c   : > { %v14813_v3 = vmax.f32 %v9966_v42, %v9967_v0  ;;  %v7205_v4 = vmax.f32 %v6140_v63, 0.0  ;;  %v6582_v6 = vmax.f32 %v4582_v1, 0.0  ;;  %v9850_v28 = vsel %vm8401_vm3, %v9642_v9, -inf }
 0x24d   : > { %v7829_v8 = vpack.c.bf16 %v6997_v61, %v6997_v61  ;;  %v6792_v11 = vmax.f32 %v5107_v7, 0.0 }
 0x24e   : > { %v7414_v10 = vpack.c.bf16 %v6582_v6, %v6582_v6  ;;  %v8037_v20 = vpack.c.bf16 %v7205_v4, %v7205_v4 }
 0x24f   : > { %v7624_v22 = vpack.c.bf16 %v6792_v11, %v6792_v11  ;;  %v9746_v25 = vunpack.c.l.bf16 %v7829_v8 }
 0x250   : > { %v5621_v12 = vpop.f32.mrf.mxu2  ;;  %v9643_v43 = vunpack.c.l.bf16 %v7414_v10  ;;  %v9798_v34 = vunpack.c.l.bf16 %v8037_v20 }
 0x251   : > { %v5622_v15 = vadd.f32 %v14748_v59, %v5621_v12  ;;  %v6141_v16 = vpop.f32.mrf.mxu3  ;;  %v4584_v18 = vpop.f32.mrf.mxu0  ;;  %v9697_v32 = vunpack.c.l.bf16 %v7624_v22  ;;  %v10078_v41 = vsel %vm8401_vm3, %v9746_v25, -inf }
 0x252   : > { %v5109_v23 = vpop.f32.mrf.mxu1  ;;  %v6142_v27 = vadd.f32 %v14748_v59, %v6141_v16  ;;  %v9851_v30 = vsel %vm8401_vm3, %v9643_v43, -inf  ;;  %v4585_v40 = vadd.f32 %v14748_v59, %v4584_v18  ;;  %v10192_v54 = vsel %vm8401_vm3, %v9798_v34, -inf }
 0x253   : > { %v6998_v26 = vmax.f32 %v5622_v15, 0.0  ;;  %v9852_v29 = vmax.f32 %v9850_v28, %v9851_v30  ;;  %v9969_v35 = vsel %vm8401_vm3, %v9697_v32, -inf  ;;  %v5110_v45 = vadd.f32 %v14748_v59, %v5109_v23  ;;  %v13317_v23 = vld [vmem:[%s13817_s11 + $0x120] sm:$0xff] }
 0x254   : > { %12872 = vmatmul.msk.bf16.gmra.mxu0 %vm3184_vm2, %v13316_v13  ;;  %12977 = vmatmul.msk.bf16.gmra.mxu1 %vm3184_vm2, %v13421_v14  ;;  %v7206_v37 = vmax.f32 %v6142_v27, 0.0  ;;  %v9970_v42 = vmax.f32 %v14813_v3, %v9969_v35  ;;  %v6583_v47 = vmax.f32 %v4585_v40, 0.0  ;;  %v13525_v32 = vld [vmem:[%s13817_s11 + $0x7a0] sm:$0xff] }
 0x255   : > { %v7830_v33 = vpack.c.bf16 %v6998_v26, %v6998_v26  ;;  %13080 = vmatmul.msk.bf16.gmra.mxu2 %vm3184_vm2, %v13524_v19  ;;  %v6793_v50 = vmax.f32 %v5110_v45, 0.0  ;;  %v13629_v40 = vld [vmem:[%s13817_s11 + $0xae0] sm:$0xff] }
 0x256   : > { %13184 = vmatmul.msk.bf16.gmra.mxu3 %vm3184_vm2, %v13628_v24  ;;  %v8038_v46 = vpack.c.bf16 %v7206_v37, %v7206_v37  ;;  %v7415_v58 = vpack.c.bf16 %v6583_v47, %v6583_v47  ;;  %v13422_v24 = vld [vmem:[%s13817_s11 + $0x468] sm:$0xff] }
 0x257   : > { %v9747_v44 = vunpack.c.l.bf16 %v7830_v33  ;;  %v7625_v63 = vpack.c.bf16 %v6793_v50, %v6793_v50 }
 0x258   : > { %v5624_v48 = vpop.f32.mrf.mxu2  ;;  %v9799_v57 = vunpack.c.l.bf16 %v8038_v46  ;;  %v9644_v3 = vunpack.c.l.bf16 %v7415_v58 }
 0x259   : > { %v10079_v49 = vsel %vm8401_vm3, %v9747_v44, -inf  ;;  %v5625_v51 = vadd.f32 %v14748_v59, %v5624_v48  ;;  %v6144_v52 = vpop.f32.mrf.mxu3  ;;  %v4586_v53 = vpop.f32.mrf.mxu0  ;;  %v9698_v8 = vunpack.c.l.bf16 %v7625_v63 }
 0x25a   : > { %v10080_v56 = vmax.f32 %v10078_v41, %v10079_v49  ;;  %v5111_v61 = vpop.f32.mrf.mxu1  ;;  %v6145_v0 = vadd.f32 %v14748_v59, %v6144_v52  ;;  %v10193_v1 = vsel %vm8401_vm3, %v9799_v57, -inf  ;;  %v4587_v4 = vadd.f32 %v14748_v59, %v4586_v53 }
 0x25b   : > { %v6999_v31 = vmax.f32 %v5625_v51, 0.0  ;;  %v5112_v6 = vadd.f32 %v14748_v59, %v5111_v61  ;;  %v10194_v7 = vmax.f32 %v10192_v54, %v10193_v1  ;;  %v9853_v11 = vsel %vm8401_vm3, %v9644_v3, -inf }
 0x25c   : > { %v7207_v10 = vmax.f32 %v6145_v0, 0.0  ;;  %v6584_v12 = vmax.f32 %v4587_v4, 0.0  ;;  %v9854_v14 = vmax.f32 %v9852_v29, %v9853_v11  ;;  %v9971_v15 = vsel %vm8401_vm3, %v9698_v8, -inf }
 0x25d   : > { %v7831_v9 = vpack.c.bf16 %v6999_v31, %v6999_v31  ;;  %v6794_v13 = vmax.f32 %v5112_v6, 0.0  ;;  %v9972_v19 = vmax.f32 %v9970_v42, %v9971_v15 }
 0x25e   : > { %v8039_v18 = vpack.c.bf16 %v7207_v10, %v7207_v10  ;;  %v7416_v20 = vpack.c.bf16 %v6584_v12, %v6584_v12 }
 0x25f   : > { %v9748_v16 = vunpack.c.l.bf16 %v7831_v9  ;;  %v7626_v43 = vpack.c.bf16 %v6794_v13, %v6794_v13 }
 0x260   : > { %v5626_v22 = vpop.f32.mrf.mxu2  ;;  %v9800_v26 = vunpack.c.l.bf16 %v8039_v18  ;;  %v9645_v33 = vunpack.c.l.bf16 %v7416_v20 }
 0x261   : > { %v10081_v25 = vsel %vm8401_vm3, %v9748_v16, -inf  ;;  %v5627_v27 = vadd.f32 %v14748_v59, %v5626_v22  ;;  %v6146_v28 = vpop.f32.mrf.mxu3  ;;  %v4589_v30 = vpop.f32.mrf.mxu0  ;;  %v9699_v34 = vunpack.c.l.bf16 %v7626_v43 }
 0x262   : > { %v14847_v29 = vmax.f32 %v10080_v56, %v10081_v25  ;;  %v6147_v35 = vadd.f32 %v14748_v59, %v6146_v28  ;;  %v5114_v37 = vpop.f32.mrf.mxu1  ;;  %v10195_v41 = vsel %vm8401_vm3, %v9800_v26, -inf  ;;  %v4590_v44 = vadd.f32 %v14748_v59, %v4589_v30 }
 0x263   : > { %v7000_v42 = vmax.f32 %v5627_v27, 0.0  ;;  %v5115_v45 = vadd.f32 %v14748_v59, %v5114_v37  ;;  %v10196_v46 = vmax.f32 %v10194_v7, %v10195_v41  ;;  %v9855_v47 = vsel %vm8401_vm3, %v9645_v33, -inf  ;;  %v13423_v33 = vld [vmem:[%s13817_s11 + $0x470] sm:$0xff] }
 0x264   : > { %v9973_v48 = vsel %vm8401_vm3, %v9699_v34, -inf  ;;  %v7208_v49 = vmax.f32 %v6147_v35, 0.0  ;;  %12873 = vmatmul.msk.bf16.gmra.mxu0 %vm3184_vm2, %v13317_v23  ;;  %12978 = vmatmul.msk.bf16.gmra.mxu1 %vm3184_vm2, %v13422_v24  ;;  %v9856_v50 = vmax.f32 %v9854_v14, %v9855_v47  ;;  %v6585_v53 = vmax.f32 %v4590_v44, 0.0 }
 0x265   : > { %v9974_v51 = vmax.f32 %v9972_v19, %v9973_v48  ;;  %v7832_v52 = vpack.c.bf16 %v7000_v42, %v7000_v42  ;;  %13081 = vmatmul.msk.bf16.gmra.mxu2 %vm3184_vm2, %v13525_v32  ;;  %v6795_v56 = vmax.f32 %v5115_v45, 0.0  ;;  %v13526_v42 = vld [vmem:[%s13817_s11 + $0x7a8] sm:$0xff] }
 0x266   : > { %v8040_v54 = vpack.c.bf16 %v7208_v49, %v7208_v49  ;;  %13185 = vmatmul.msk.bf16.gmra.mxu3 %vm3184_vm2, %v13629_v40  ;;  %v7417_v58 = vpack.c.bf16 %v6585_v53, %v6585_v53  ;;  %v13630_v49 = vld [vmem:[%s13817_s11 + $0xae8] sm:$0xff] }
 0x267   : > { %v9749_v57 = vunpack.c.l.bf16 %v7832_v52  ;;  %v7627_v63 = vpack.c.bf16 %v6795_v56, %v6795_v56 }
 0x268   : > { %v9801_v61 = vunpack.c.l.bf16 %v8040_v54  ;;  %v5629_v31 = vpop.f32.mrf.mxu2  ;;  %v9646_v1 = vunpack.c.l.bf16 %v7417_v58 }
 0x269   : > { %v10083_v0 = vsel %vm8401_vm3, %v9749_v57, -inf  ;;  %v5630_v3 = vadd.f32 %v14748_v59, %v5629_v31  ;;  %v6149_v4 = vpop.f32.mrf.mxu3  ;;  %v4591_v6 = vpop.f32.mrf.mxu0  ;;  %v9700_v9 = vunpack.c.l.bf16 %v7627_v63 }
 0x26a   : > { %v10084_v7 = vmax.f32 %v14847_v29, %v10083_v0  ;;  %v10197_v8 = vsel %vm8401_vm3, %v9801_v61, -inf  ;;  %v6150_v10 = vadd.f32 %v14748_v59, %v6149_v4  ;;  %v5116_v11 = vpop.f32.mrf.mxu1  ;;  %v9857_v13 = vsel %vm8401_vm3, %v9646_v1, -inf  ;;  %v13318_v29 = vld [vmem:[%s13817_s11 + $0x128] sm:$0xff] }
 0x26b   : > { %v10198_v12 = vmax.f32 %v10196_v46, %v10197_v8  ;;  %v7001_v14 = vmax.f32 %v5630_v3, 0.0  ;;  %v4592_v15 = vadd.f32 %v14748_v59, %v4591_v6  ;;  %v14867_v16 = vmax.f32 %v9856_v50, %v9857_v13 }
 0x26c   : > { %v9975_v18 = vsel %vm8401_vm3, %v9700_v9, -inf  ;;  %v7209_v19 = vmax.f32 %v6150_v10, 0.0  ;;  %v5117_v20 = vadd.f32 %v14748_v59, %v5116_v11 }
 0x26d   : > { %v14871_v43 = vmax.f32 %v9974_v51, %v9975_v18  ;;  %v7833_v22 = vpack.c.bf16 %v7001_v14, %v7001_v14  ;;  %v6586_v23 = vmax.f32 %v4592_v15, 0.0 }
 0x26e   : > { %v8041_v24 = vpack.c.bf16 %v7209_v19, %v7209_v19  ;;  %v6796_v25 = vmax.f32 %v5117_v20, 0.0 }
 0x26f   : > { %v9750_v26 = vunpack.c.l.bf16 %v7833_v22  ;;  %v7418_v27 = vpack.c.bf16 %v6586_v23, %v6586_v23 }
 0x270   : > { %v9802_v28 = vunpack.c.l.bf16 %v8041_v24  ;;  %v7628_v30 = vpack.c.bf16 %v6796_v25, %v6796_v25  ;;  %v5631_v32 = vpop.f32.mrf.mxu2 }
 0x271   : > { %v10085_v34 = vsel %vm8401_vm3, %v9750_v26, -inf  ;;  %v9647_v35 = vunpack.c.l.bf16 %v7418_v27  ;;  %v5632_v37 = vadd.f32 %v14748_v59, %v5631_v32  ;;  %v6151_v40 = vpop.f32.mrf.mxu3  ;;  %v4594_v41 = vpop.f32.mrf.mxu0 }
 0x272   : > { %v14878_v44 = vmax.f32 %v10084_v7, %v10085_v34  ;;  %v10199_v45 = vsel %vm8401_vm3, %v9802_v28, -inf  ;;  %v9701_v46 = vunpack.c.l.bf16 %v7628_v30  ;;  %v6152_v47 = vadd.f32 %v14748_v59, %v6151_v40  ;;  %v5119_v48 = vpop.f32.mrf.mxu1 }
 0x273   : > { %v14883_v50 = vmax.f32 %v10198_v12, %v10199_v45  ;;  %v9859_v51 = vsel %vm8401_vm3, %v9647_v35, -inf  ;;  %v7002_v52 = vmax.f32 %v5632_v37, 0.0  ;;  %v4595_v53 = vadd.f32 %v14748_v59, %v4594_v41 }
 0x274   : > { %v9860_v54 = vmax.f32 %v14867_v16, %v9859_v51  ;;  %v9977_v56 = vsel %vm8401_vm3, %v9701_v46, -inf  ;;  %v7210_v57 = vmax.f32 %v6152_v47, 0.0  ;;  %v5120_v58 = vadd.f32 %v14748_v59, %v5119_v48  ;;  %12874 = vmatmul.msk.bf16.gmra.mxu0 %vm3184_vm2, %v13318_v29  ;;  %12979 = vmatmul.msk.bf16.gmra.mxu1 %vm3184_vm2, %v13423_v33 }
 0x275   : > { %v9978_v61 = vmax.f32 %v14871_v43, %v9977_v56  ;;  %v7834_v63 = vpack.c.bf16 %v7002_v52, %v7002_v52  ;;  %v6587_v31 = vmax.f32 %v4595_v53, 0.0  ;;  %13082 = vmatmul.msk.bf16.gmra.mxu2 %vm3184_vm2, %v13526_v42  ;;  %v13319_v42 = vld [vmem:[%s13817_s11 + $0x130] sm:$0xff] }
 0x276   : > { %v8042_v0 = vpack.c.bf16 %v7210_v57, %v7210_v57  ;;  %v6797_v1 = vmax.f32 %v5120_v58, 0.0  ;;  %13186 = vmatmul.msk.bf16.gmra.mxu3 %vm3184_vm2, %v13630_v49  ;;  %v13631_v57 = vld [vmem:[%s13817_s11 + $0xaf0] sm:$0xff] }
 0x277   : > { %v9751_v3 = vunpack.c.l.bf16 %v7834_v63  ;;  %v7419_v4 = vpack.c.bf16 %v6587_v31, %v6587_v31 }
 0x278   : > { %v9803_v6 = vunpack.c.l.bf16 %v8042_v0  ;;  %v7629_v7 = vpack.c.bf16 %v6797_v1, %v6797_v1  ;;  %v5634_v8 = vpop.f32.mrf.mxu2 }
 0x279   : > { %v10087_v9 = vsel %vm8401_vm3, %v9751_v3, -inf  ;;  %v9648_v10 = vunpack.c.l.bf16 %v7419_v4  ;;  %v5635_v11 = vadd.f32 %v14748_v59, %v5634_v8  ;;  %v6154_v12 = vpop.f32.mrf.mxu3  ;;  %v4596_v13 = vpop.f32.mrf.mxu0 }
 0x27a   : > { %v10088_v14 = vmax.f32 %v14878_v44, %v10087_v9  ;;  %v10201_v15 = vsel %vm8401_vm3, %v9803_v6, -inf  ;;  %v9702_v16 = vunpack.c.l.bf16 %v7629_v7  ;;  %v6155_v18 = vadd.f32 %v14748_v59, %v6154_v12  ;;  %v5121_v19 = vpop.f32.mrf.mxu1  ;;  %v13424_v44 = vld [vmem:[%s13817_s11 + $0x478] sm:$0xff] }
 0x27b   : > { %v10202_v20 = vmax.f32 %v14883_v50, %v10201_v15  ;;  %v9861_v43 = vsel %vm8401_vm3, %v9648_v10, -inf  ;;  %v7003_v22 = vmax.f32 %v5635_v11, 0.0  ;;  %v4597_v23 = vadd.f32 %v14748_v59, %v4596_v13  ;;  %v13527_v50 = vld [vmem:[%s13817_s11 + $0x7b0] sm:$0xff] }
 0x27c   : > { %v14903_v24 = vmax.f32 %v9860_v54, %v9861_v43  ;;  %v9979_v25 = vsel %vm8401_vm3, %v9702_v16, -inf  ;;  %v7211_v26 = vmax.f32 %v6155_v18, 0.0  ;;  %v5122_v27 = vadd.f32 %v14748_v59, %v5121_v19 }
 0x27d   : > { %v14907_v28 = vmax.f32 %v9978_v61, %v9979_v25  ;;  %v7835_v30 = vpack.c.bf16 %v7003_v22, %v7003_v22  ;;  %v6588_v32 = vmax.f32 %v4597_v23, 0.0 }
 0x27e   : > { %v8043_v29 = vpack.c.bf16 %v7211_v26, %v7211_v26  ;;  %v6798_v33 = vmax.f32 %v5122_v27, 0.0 }
 0x27f   : > { %v9752_v34 = vunpack.c.l.bf16 %v7835_v30  ;;  %v7420_v35 = vpack.c.bf16 %v6588_v32, %v6588_v32 }
 0x280   : > { %v9804_v37 = vunpack.c.l.bf16 %v8043_v29  ;;  %v7630_v40 = vpack.c.bf16 %v6798_v33, %v6798_v33  ;;  %v5636_v41 = vpop.f32.mrf.mxu2 }
 0x281   : > { %v10089_v45 = vsel %vm8401_vm3, %v9752_v34, -inf  ;;  %v9649_v46 = vunpack.c.l.bf16 %v7420_v35  ;;  %v5637_v47 = vadd.f32 %v14748_v59, %v5636_v41  ;;  %v6156_v48 = vpop.f32.mrf.mxu3  ;;  %v4599_v49 = vpop.f32.mrf.mxu0 }
 0x282   : > { %v14914_v51 = vmax.f32 %v10088_v14, %v10089_v45  ;;  %v10203_v52 = vsel %vm8401_vm3, %v9804_v37, -inf  ;;  %v9703_v53 = vunpack.c.l.bf16 %v7630_v40  ;;  %v6157_v54 = vadd.f32 %v14748_v59, %v6156_v48  ;;  %v5124_v56 = vpop.f32.mrf.mxu1 }
 0x283   : > { %v14919_v58 = vmax.f32 %v10202_v20, %v10203_v52  ;;  %v9863_v61 = vsel %vm8401_vm3, %v9649_v46, -inf  ;;  %v7004_v63 = vmax.f32 %v5637_v47, 0.0  ;;  %v4600_v31 = vadd.f32 %v14748_v59, %v4599_v49 }
 0x284   : > { %v9864_v0 = vmax.f32 %v14903_v24, %v9863_v61  ;;  %v9981_v1 = vsel %vm8401_vm3, %v9703_v53, -inf  ;;  %v7212_v3 = vmax.f32 %v6157_v54, 0.0  ;;  %v5125_v4 = vadd.f32 %v14748_v59, %v5124_v56  ;;  %12875 = vmatmul.msk.bf16.gmra.mxu0 %vm3184_vm2, %v13319_v42  ;;  %12980 = vmatmul.msk.bf16.gmra.mxu1 %vm3184_vm2, %v13424_v44 }
 0x285   : > { %v9982_v6 = vmax.f32 %v14907_v28, %v9981_v1  ;;  %v7836_v7 = vpack.c.bf16 %v7004_v63, %v7004_v63  ;;  %v6589_v8 = vmax.f32 %v4600_v31, 0.0  ;;  %13083 = vmatmul.msk.bf16.gmra.mxu2 %vm3184_vm2, %v13527_v50  ;;  %v13320_v50 = vld [vmem:[%s13817_s11 + $0x138] sm:$0xff] }
 0x286   : > { %v8044_v9 = vpack.c.bf16 %v7212_v3, %v7212_v3  ;;  %v6799_v10 = vmax.f32 %v5125_v4, 0.0  ;;  %13187 = vmatmul.msk.bf16.gmra.mxu3 %vm3184_vm2, %v13631_v57  ;;  %v13632_v3 = vld [vmem:[%s13817_s11 + $0xaf8] sm:$0xff] }
 0x287   : > { %v9753_v11 = vunpack.c.l.bf16 %v7836_v7  ;;  %v7421_v12 = vpack.c.bf16 %v6589_v8, %v6589_v8 }
 0x288   : > { %v9805_v13 = vunpack.c.l.bf16 %v8044_v9  ;;  %v7631_v14 = vpack.c.bf16 %v6799_v10, %v6799_v10  ;;  %v5639_v15 = vpop.f32.mrf.mxu2 }
 0x289   : > { %v10091_v16 = vsel %vm8401_vm3, %v9753_v11, -inf  ;;  %v9650_v18 = vunpack.c.l.bf16 %v7421_v12  ;;  %v5640_v19 = vadd.f32 %v14748_v59, %v5639_v15  ;;  %v6159_v20 = vpop.f32.mrf.mxu3  ;;  %v4601_v43 = vpop.f32.mrf.mxu0 }
 0x28a   : > { %v10092_v22 = vmax.f32 %v14914_v51, %v10091_v16  ;;  %v10205_v23 = vsel %vm8401_vm3, %v9805_v13, -inf  ;;  %v9704_v24 = vunpack.c.l.bf16 %v7631_v14  ;;  %v6160_v25 = vadd.f32 %v14748_v59, %v6159_v20  ;;  %v5126_v26 = vpop.f32.mrf.mxu1  ;;  %v13425_v51 = vld [vmem:[%s13817_s11 + $0x480] sm:$0xff] }
 0x28b   : > { %v10206_v27 = vmax.f32 %v14919_v58, %v10205_v23  ;;  %v9865_v28 = vsel %vm8401_vm3, %v9650_v18, -inf  ;;  %v7005_v30 = vmax.f32 %v5640_v19, 0.0  ;;  %v4602_v32 = vadd.f32 %v14748_v59, %v4601_v43  ;;  %v13528_v58 = vld [vmem:[%s13817_s11 + $0x7b8] sm:$0xff] }
 0x28c   : > { %v14939_v29 = vmax.f32 %v9864_v0, %v9865_v28  ;;  %v9983_v33 = vsel %vm8401_vm3, %v9704_v24, -inf  ;;  %v7213_v34 = vmax.f32 %v6160_v25, 0.0  ;;  %v5127_v35 = vadd.f32 %v14748_v59, %v5126_v26 }
 0x28d   : > { %v14943_v37 = vmax.f32 %v9982_v6, %v9983_v33  ;;  %v7837_v40 = vpack.c.bf16 %v7005_v30, %v7005_v30  ;;  %v6590_v41 = vmax.f32 %v4602_v32, 0.0 }
 0x28e   : > { %v8045_v42 = vpack.c.bf16 %v7213_v34, %v7213_v34  ;;  %v6800_v44 = vmax.f32 %v5127_v35, 0.0 }
 0x28f   : > { %v9754_v45 = vunpack.c.l.bf16 %v7837_v40  ;;  %v7422_v46 = vpack.c.bf16 %v6590_v41, %v6590_v41 }
 0x290   : > { %v9806_v47 = vunpack.c.l.bf16 %v8045_v42  ;;  %v7632_v48 = vpack.c.bf16 %v6800_v44, %v6800_v44  ;;  %v5641_v49 = vpop.f32.mrf.mxu2 }
 0x291   : > { %v10093_v52 = vsel %vm8401_vm3, %v9754_v45, -inf  ;;  %v9651_v53 = vunpack.c.l.bf16 %v7422_v46  ;;  %v5642_v54 = vadd.f32 %v14748_v59, %v5641_v49  ;;  %v6161_v56 = vpop.f32.mrf.mxu3  ;;  %v4604_v57 = vpop.f32.mrf.mxu0 }
 0x292   : > { %v14950_v61 = vmax.f32 %v10092_v22, %v10093_v52  ;;  %v10207_v63 = vsel %vm8401_vm3, %v9806_v47, -inf  ;;  %v9705_v31 = vunpack.c.l.bf16 %v7632_v48  ;;  %v6162_v0 = vadd.f32 %v14748_v59, %v6161_v56  ;;  %v5129_v1 = vpop.f32.mrf.mxu1 }
 0x293   : > { %v14955_v4 = vmax.f32 %v10206_v27, %v10207_v63  ;;  %v9867_v6 = vsel %vm8401_vm3, %v9651_v53, -inf  ;;  %v7006_v7 = vmax.f32 %v5642_v54, 0.0  ;;  %v4605_v8 = vadd.f32 %v14748_v59, %v4604_v57 }
 0x294   : > { %v9868_v9 = vmax.f32 %v14939_v29, %v9867_v6  ;;  %v9985_v10 = vsel %vm8401_vm3, %v9705_v31, -inf  ;;  %v7214_v11 = vmax.f32 %v6162_v0, 0.0  ;;  %v5130_v12 = vadd.f32 %v14748_v59, %v5129_v1  ;;  %12876 = vmatmul.msk.bf16.gmra.mxu0 %vm3184_vm2, %v13320_v50  ;;  %12981 = vmatmul.msk.bf16.gmra.mxu1 %vm3184_vm2, %v13425_v51 }
 0x295   : > { %v9986_v13 = vmax.f32 %v14943_v37, %v9985_v10  ;;  %v7838_v14 = vpack.c.bf16 %v7006_v7, %v7006_v7  ;;  %v6591_v15 = vmax.f32 %v4605_v8, 0.0  ;;  %13084 = vmatmul.msk.bf16.gmra.mxu2 %vm3184_vm2, %v13528_v58  ;;  %v13321_v58 = vld [vmem:[%s13817_s11 + $0x140] sm:$0xff] }
 0x296   : > { %v8046_v16 = vpack.c.bf16 %v7214_v11, %v7214_v11  ;;  %v6801_v18 = vmax.f32 %v5130_v12, 0.0  ;;  %13188 = vmatmul.msk.bf16.gmra.mxu3 %vm3184_vm2, %v13632_v3  ;;  %v13633_v11 = vld [vmem:[%s13817_s11 + $0xb00] sm:$0xff] }
 0x297   : > { %v9755_v19 = vunpack.c.l.bf16 %v7838_v14  ;;  %v7423_v20 = vpack.c.bf16 %v6591_v15, %v6591_v15 }
 0x298   : > { %v9807_v43 = vunpack.c.l.bf16 %v8046_v16  ;;  %v7633_v22 = vpack.c.bf16 %v6801_v18, %v6801_v18  ;;  %v5644_v23 = vpop.f32.mrf.mxu2 }
 0x299   : > { %v10095_v24 = vsel %vm8401_vm3, %v9755_v19, -inf  ;;  %v9652_v25 = vunpack.c.l.bf16 %v7423_v20  ;;  %v5645_v26 = vadd.f32 %v14748_v59, %v5644_v23  ;;  %v6164_v27 = vpop.f32.mrf.mxu3  ;;  %v4606_v28 = vpop.f32.mrf.mxu0 }
 0x29a   : > { %v10096_v30 = vmax.f32 %v14950_v61, %v10095_v24  ;;  %v10209_v32 = vsel %vm8401_vm3, %v9807_v43, -inf  ;;  %v9706_v29 = vunpack.c.l.bf16 %v7633_v22  ;;  %v6165_v33 = vadd.f32 %v14748_v59, %v6164_v27  ;;  %v5131_v34 = vpop.f32.mrf.mxu1  ;;  %v13426_v61 = vld [vmem:[%s13817_s11 + $0x488] sm:$0xff] }
 0x29b   : > { %v10210_v35 = vmax.f32 %v14955_v4, %v10209_v32  ;;  %v9869_v37 = vsel %vm8401_vm3, %v9652_v25, -inf  ;;  %v7007_v40 = vmax.f32 %v5645_v26, 0.0  ;;  %v4607_v41 = vadd.f32 %v14748_v59, %v4606_v28  ;;  %v13529_v4 = vld [vmem:[%s13817_s11 + $0x7c0] sm:$0xff] }
 0x29c   : > { %v14975_v42 = vmax.f32 %v9868_v9, %v9869_v37  ;;  %v9987_v44 = vsel %vm8401_vm3, %v9706_v29, -inf  ;;  %v7215_v45 = vmax.f32 %v6165_v33, 0.0  ;;  %v5132_v46 = vadd.f32 %v14748_v59, %v5131_v34 }
 0x29d   : > { %v14979_v47 = vmax.f32 %v9986_v13, %v9987_v44  ;;  %v7839_v48 = vpack.c.bf16 %v7007_v40, %v7007_v40  ;;  %v6592_v49 = vmax.f32 %v4607_v41, 0.0 }
 0x29e   : > { %v8047_v50 = vpack.c.bf16 %v7215_v45, %v7215_v45  ;;  %v6802_v51 = vmax.f32 %v5132_v46, 0.0 }
 0x29f   : > { %v9756_v52 = vunpack.c.l.bf16 %v7839_v48  ;;  %v7424_v53 = vpack.c.bf16 %v6592_v49, %v6592_v49 }
 0x2a0   : > { %v9808_v54 = vunpack.c.l.bf16 %v8047_v50  ;;  %v7634_v56 = vpack.c.bf16 %v6802_v51, %v6802_v51  ;;  %v5646_v57 = vpop.f32.mrf.mxu2 }
 0x2a1   : > { %v10097_v63 = vsel %vm8401_vm3, %v9756_v52, -inf  ;;  %v9653_v31 = vunpack.c.l.bf16 %v7424_v53  ;;  %v5647_v0 = vadd.f32 %v14748_v59, %v5646_v57  ;;  %v6166_v1 = vpop.f32.mrf.mxu3  ;;  %v4609_v3 = vpop.f32.mrf.mxu0  ;;  %v15017_v53 = vld [vmem:[%s17625_s2] ss:$0 sm:$0xff] }
 0x2a2   : > { %v14986_v6 = vmax.f32 %v10096_v30, %v10097_v63  ;;  %v10211_v7 = vsel %vm8401_vm3, %v9808_v54, -inf  ;;  %v9707_v8 = vunpack.c.l.bf16 %v7634_v56  ;;  %v6167_v9 = vadd.f32 %v14748_v59, %v6166_v1  ;;  %v5134_v10 = vpop.f32.mrf.mxu1 }
 0x2a3   : > { %v14991_v12 = vmax.f32 %v10210_v35, %v10211_v7  ;;  %v9871_v13 = vsel %vm8401_vm3, %v9653_v31, -inf  ;;  %v7008_v14 = vmax.f32 %v5647_v0, 0.0  ;;  %v4610_v15 = vadd.f32 %v14748_v59, %v4609_v3 }
 0x2a4   : > { %v9872_v16 = vmax.f32 %v14975_v42, %v9871_v13  ;;  %v9989_v18 = vsel %vm8401_vm3, %v9707_v8, -inf  ;;  %v7216_v19 = vmax.f32 %v6167_v9, 0.0  ;;  %v5135_v20 = vadd.f32 %v14748_v59, %v5134_v10  ;;  %12877 = vmatmul.msk.bf16.gmra.mxu0 %vm3184_vm2, %v13321_v58  ;;  %12982 = vmatmul.msk.bf16.gmra.mxu1 %vm3184_vm2, %v13426_v61 }
 0x2a5   : > { %v9990_v43 = vmax.f32 %v14979_v47, %v9989_v18  ;;  %v7840_v22 = vpack.c.bf16 %v7008_v14, %v7008_v14  ;;  %v6593_v23 = vmax.f32 %v4610_v15, 0.0  ;;  %13085 = vmatmul.msk.bf16.gmra.mxu2 %vm3184_vm2, %v13529_v4  ;;  %v13322_v4 = vld [vmem:[%s13817_s11 + $0x148] sm:$0xff] }
 0x2a6   : > { %v8048_v24 = vpack.c.bf16 %v7216_v19, %v7216_v19  ;;  %v6803_v25 = vmax.f32 %v5135_v20, 0.0  ;;  %13189 = vmatmul.msk.bf16.gmra.mxu3 %vm3184_vm2, %v13633_v11  ;;  %v13634_v19 = vld [vmem:[%s13817_s11 + $0xb08] sm:$0xff] }
 0x2a7   : > { %v9757_v26 = vunpack.c.l.bf16 %v7840_v22  ;;  %v7425_v27 = vpack.c.bf16 %v6593_v23, %v6593_v23 }
 0x2a8   : > { %v9809_v28 = vunpack.c.l.bf16 %v8048_v24  ;;  %v7635_v30 = vpack.c.bf16 %v6803_v25, %v6803_v25  ;;  %v5649_v32 = vpop.f32.mrf.mxu2 }
 0x2a9   : > { %v10099_v29 = vsel %vm8401_vm3, %v9757_v26, -inf  ;;  %v9654_v33 = vunpack.c.l.bf16 %v7425_v27  ;;  %v5650_v34 = vadd.f32 %v14748_v59, %v5649_v32  ;;  %v6169_v35 = vpop.f32.mrf.mxu3  ;;  %v4611_v37 = vpop.f32.mrf.mxu0 }
 0x2aa   : > { %v10100_v40 = vmax.f32 %v14986_v6, %v10099_v29  ;;  %v10213_v41 = vsel %vm8401_vm3, %v9809_v28, -inf  ;;  %v9708_v42 = vunpack.c.l.bf16 %v7635_v30  ;;  %v6170_v44 = vadd.f32 %v14748_v59, %v6169_v35  ;;  %v5136_v45 = vpop.f32.mrf.mxu1  ;;  %v13427_v6 = vld [vmem:[%s13817_s11 + $0x490] sm:$0xff] }
 0x2ab   : > { %v10214_v46 = vmax.f32 %v14991_v12, %v10213_v41  ;;  %v9873_v47 = vsel %vm8401_vm3, %v9654_v33, -inf  ;;  %v7009_v48 = vmax.f32 %v5650_v34, 0.0  ;;  %v4612_v49 = vadd.f32 %v14748_v59, %v4611_v37  ;;  %v13530_v12 = vld [vmem:[%s13817_s11 + $0x7c8] sm:$0xff] }
 0x2ac   : > { %v15011_v50 = vmax.f32 %v9872_v16, %v9873_v47  ;;  %v9991_v51 = vsel %vm8401_vm3, %v9708_v42, -inf  ;;  %v7217_v52 = vmax.f32 %v6170_v44, 0.0  ;;  %v5137_v54 = vadd.f32 %v15017_v53, %v5136_v45 }
 0x2ad   : > { %v15020_v56 = vmax.f32 %v9990_v43, %v9991_v51  ;;  %v7841_v57 = vpack.c.bf16 %v7009_v48, %v7009_v48  ;;  %v6594_v58 = vmax.f32 %v4612_v49, 0.0 }
 0x2ae   : > { %v8049_v59 = vpack.c.bf16 %v7217_v52, %v7217_v52  ;;  %v6804_v61 = vmax.f32 %v5137_v54, 0.0 }
 0x2af   : > { %v9758_v63 = vunpack.c.l.bf16 %v7841_v57  ;;  %v7426_v31 = vpack.c.bf16 %v6594_v58, %v6594_v58 }
 0x2b0   : > { %v9810_v0 = vunpack.c.l.bf16 %v8049_v59  ;;  %v7636_v1 = vpack.c.bf16 %v6804_v61, %v6804_v61  ;;  %v5651_v3 = vpop.f32.mrf.mxu2 }
 0x2b1   : > { %v10101_v7 = vsel %vm8401_vm3, %v9758_v63, -inf  ;;  %v9655_v8 = vunpack.c.l.bf16 %v7426_v31  ;;  %v5652_v9 = vadd.f32 %v15017_v53, %v5651_v3  ;;  %v6171_v10 = vpop.f32.mrf.mxu3  ;;  %v4614_v11 = vpop.f32.mrf.mxu0 }
 0x2b2   : > { %v15027_v13 = vmax.f32 %v10100_v40, %v10101_v7  ;;  %v10215_v14 = vsel %vm8401_vm3, %v9810_v0, -inf  ;;  %v9709_v15 = vunpack.c.l.bf16 %v7636_v1  ;;  %v6172_v16 = vadd.f32 %v15017_v53, %v6171_v10  ;;  %v5139_v18 = vpop.f32.mrf.mxu1 }
 0x2b3   : > { %v15032_v20 = vmax.f32 %v10214_v46, %v10215_v14  ;;  %v9875_v43 = vsel %vm8401_vm3, %v9655_v8, -inf  ;;  %v7010_v22 = vmax.f32 %v5652_v9, 0.0  ;;  %v4615_v23 = vadd.f32 %v15017_v53, %v4614_v11 }
 0x2b4   : > { %v9876_v24 = vmax.f32 %v15011_v50, %v9875_v43  ;;  %v9993_v25 = vsel %vm8401_vm3, %v9709_v15, -inf  ;;  %v7218_v26 = vmax.f32 %v6172_v16, 0.0  ;;  %v5140_v27 = vadd.f32 %v15017_v53, %v5139_v18  ;;  %12878 = vmatmul.msk.bf16.gmra.mxu0 %vm3184_vm2, %v13322_v4  ;;  %12983 = vmatmul.msk.bf16.gmra.mxu1 %vm3184_vm2, %v13427_v6 }
 0x2b5   : > { %v9994_v28 = vmax.f32 %v15020_v56, %v9993_v25  ;;  %v7842_v30 = vpack.c.bf16 %v7010_v22, %v7010_v22  ;;  %v6595_v32 = vmax.f32 %v4615_v23, 0.0  ;;  %13086 = vmatmul.msk.bf16.gmra.mxu2 %vm3184_vm2, %v13530_v12  ;;  %v13323_v12 = vld [vmem:[%s13817_s11 + $0x150] sm:$0xff] }
 0x2b6   : > { %v8050_v29 = vpack.c.bf16 %v7218_v26, %v7218_v26  ;;  %v6805_v33 = vmax.f32 %v5140_v27, 0.0  ;;  %13190 = vmatmul.msk.bf16.gmra.mxu3 %vm3184_vm2, %v13634_v19  ;;  %v13635_v26 = vld [vmem:[%s13817_s11 + $0xb10] sm:$0xff] }
 0x2b7   : > { %v9759_v34 = vunpack.c.l.bf16 %v7842_v30  ;;  %v7427_v35 = vpack.c.bf16 %v6595_v32, %v6595_v32 }
 0x2b8   : > { %v9811_v37 = vunpack.c.l.bf16 %v8050_v29  ;;  %v7637_v40 = vpack.c.bf16 %v6805_v33, %v6805_v33  ;;  %v5654_v41 = vpop.f32.mrf.mxu2 }
 0x2b9   : > { %v10103_v42 = vsel %vm8401_vm3, %v9759_v34, -inf  ;;  %v9656_v44 = vunpack.c.l.bf16 %v7427_v35  ;;  %v5655_v45 = vadd.f32 %v15017_v53, %v5654_v41  ;;  %v6174_v46 = vpop.f32.mrf.mxu3  ;;  %v4616_v47 = vpop.f32.mrf.mxu0 }
 0x2ba   : > { %v10104_v48 = vmax.f32 %v15027_v13, %v10103_v42  ;;  %v10217_v49 = vsel %vm8401_vm3, %v9811_v37, -inf  ;;  %v9710_v50 = vunpack.c.l.bf16 %v7637_v40  ;;  %v6175_v51 = vadd.f32 %v15017_v53, %v6174_v46  ;;  %v5141_v52 = vpop.f32.mrf.mxu1  ;;  %v13428_v13 = vld [vmem:[%s13817_s11 + $0x498] sm:$0xff] }
 0x2bb   : > { %v10218_v54 = vmax.f32 %v15032_v20, %v10217_v49  ;;  %v9877_v56 = vsel %vm8401_vm3, %v9656_v44, -inf  ;;  %v7011_v57 = vmax.f32 %v5655_v45, 0.0  ;;  %v4617_v58 = vadd.f32 %v15017_v53, %v4616_v47  ;;  %v13531_v20 = vld [vmem:[%s13817_s11 + $0x7d0] sm:$0xff] }
 0x2bc   : > { %v15052_v59 = vmax.f32 %v9876_v24, %v9877_v56  ;;  %v9995_v61 = vsel %vm8401_vm3, %v9710_v50, -inf  ;;  %v7219_v63 = vmax.f32 %v6175_v51, 0.0  ;;  %v5142_v31 = vadd.f32 %v15017_v53, %v5141_v52 }
 0x2bd   : > { %v15056_v0 = vmax.f32 %v9994_v28, %v9995_v61  ;;  %v7843_v1 = vpack.c.bf16 %v7011_v57, %v7011_v57  ;;  %v6596_v3 = vmax.f32 %v4617_v58, 0.0 }
 0x2be   : > { %v8051_v4 = vpack.c.bf16 %v7219_v63, %v7219_v63  ;;  %v6806_v6 = vmax.f32 %v5142_v31, 0.0 }
 0x2bf   : > { %v9760_v7 = vunpack.c.l.bf16 %v7843_v1  ;;  %v7428_v8 = vpack.c.bf16 %v6596_v3, %v6596_v3 }
 0x2c0   : > { %v9812_v9 = vunpack.c.l.bf16 %v8051_v4  ;;  %v7638_v10 = vpack.c.bf16 %v6806_v6, %v6806_v6  ;;  %v5656_v11 = vpop.f32.mrf.mxu2 }
 0x2c1   : > { %v10105_v14 = vsel %vm8401_vm3, %v9760_v7, -inf  ;;  %v9657_v15 = vunpack.c.l.bf16 %v7428_v8  ;;  %v5657_v16 = vadd.f32 %v15017_v53, %v5656_v11  ;;  %v6176_v18 = vpop.f32.mrf.mxu3  ;;  %v4619_v19 = vpop.f32.mrf.mxu0 }
 0x2c2   : > { %v15063_v43 = vmax.f32 %v10104_v48, %v10105_v14  ;;  %v10219_v22 = vsel %vm8401_vm3, %v9812_v9, -inf  ;;  %v9711_v23 = vunpack.c.l.bf16 %v7638_v10  ;;  %v6177_v24 = vadd.f32 %v15017_v53, %v6176_v18  ;;  %v5144_v25 = vpop.f32.mrf.mxu1 }
 0x2c3   : > { %v15068_v27 = vmax.f32 %v10218_v54, %v10219_v22  ;;  %v9879_v28 = vsel %vm8401_vm3, %v9657_v15, -inf  ;;  %v7012_v30 = vmax.f32 %v5657_v16, 0.0  ;;  %v4620_v32 = vadd.f32 %v15017_v53, %v4619_v19 }
 0x2c4   : > { %v9880_v29 = vmax.f32 %v15052_v59, %v9879_v28  ;;  %v9997_v33 = vsel %vm8401_vm3, %v9711_v23, -inf  ;;  %v7220_v34 = vmax.f32 %v6177_v24, 0.0  ;;  %v5145_v35 = vadd.f32 %v15017_v53, %v5144_v25  ;;  %12879 = vmatmul.msk.bf16.gmra.mxu0 %vm3184_vm2, %v13323_v12  ;;  %12984 = vmatmul.msk.bf16.gmra.mxu1 %vm3184_vm2, %v13428_v13 }
 0x2c5   : > { %v9998_v37 = vmax.f32 %v15056_v0, %v9997_v33  ;;  %v7844_v40 = vpack.c.bf16 %v7012_v30, %v7012_v30  ;;  %v6597_v41 = vmax.f32 %v4620_v32, 0.0  ;;  %13087 = vmatmul.msk.bf16.gmra.mxu2 %vm3184_vm2, %v13531_v20  ;;  %v13324_v20 = vld [vmem:[%s13817_s11 + $0x158] sm:$0xff] }
 0x2c6   : > { %v8052_v42 = vpack.c.bf16 %v7220_v34, %v7220_v34  ;;  %v6807_v44 = vmax.f32 %v5145_v35, 0.0  ;;  %13191 = vmatmul.msk.bf16.gmra.mxu3 %vm3184_vm2, %v13635_v26  ;;  %v13636_v34 = vld [vmem:[%s13817_s11 + $0xb18] sm:$0xff] }
 0x2c7   : > { %v9761_v45 = vunpack.c.l.bf16 %v7844_v40  ;;  %v7429_v46 = vpack.c.bf16 %v6597_v41, %v6597_v41 }
 0x2c8   : > { %v9813_v47 = vunpack.c.l.bf16 %v8052_v42  ;;  %v7639_v48 = vpack.c.bf16 %v6807_v44, %v6807_v44  ;;  %v5659_v49 = vpop.f32.mrf.mxu2 }
 0x2c9   : > { %v10107_v50 = vsel %vm8401_vm3, %v9761_v45, -inf  ;;  %v9658_v51 = vunpack.c.l.bf16 %v7429_v46  ;;  %v5660_v52 = vadd.f32 %v15017_v53, %v5659_v49  ;;  %v6179_v54 = vpop.f32.mrf.mxu3  ;;  %v4621_v56 = vpop.f32.mrf.mxu0 }
 0x2ca   : > { %v10108_v57 = vmax.f32 %v15063_v43, %v10107_v50  ;;  %v10221_v58 = vsel %vm8401_vm3, %v9813_v47, -inf  ;;  %v9712_v59 = vunpack.c.l.bf16 %v7639_v48  ;;  %v6180_v61 = vadd.f32 %v15017_v53, %v6179_v54  ;;  %v5146_v63 = vpop.f32.mrf.mxu1  ;;  %v13429_v43 = vld [vmem:[%s13817_s11 + $0x4a0] sm:$0xff] }
 0x2cb   : > { %v10222_v31 = vmax.f32 %v15068_v27, %v10221_v58  ;;  %v9881_v0 = vsel %vm8401_vm3, %v9658_v51, -inf  ;;  %v7013_v1 = vmax.f32 %v5660_v52, 0.0  ;;  %v4622_v3 = vadd.f32 %v15017_v53, %v4621_v56  ;;  %v13532_v27 = vld [vmem:[%s13817_s11 + $0x7d8] sm:$0xff] }
 0x2cc   : > { %v15088_v4 = vmax.f32 %v9880_v29, %v9881_v0  ;;  %v9999_v6 = vsel %vm8401_vm3, %v9712_v59, -inf  ;;  %v7221_v7 = vmax.f32 %v6180_v61, 0.0  ;;  %v5147_v8 = vadd.f32 %v15017_v53, %v5146_v63 }
 0x2cd   : > { %v15092_v9 = vmax.f32 %v9998_v37, %v9999_v6  ;;  %v7845_v10 = vpack.c.bf16 %v7013_v1, %v7013_v1  ;;  %v6598_v11 = vmax.f32 %v4622_v3, 0.0 }
 0x2ce   : > { %v8053_v12 = vpack.c.bf16 %v7221_v7, %v7221_v7  ;;  %v6808_v13 = vmax.f32 %v5147_v8, 0.0 }
 0x2cf   : > { %v9762_v14 = vunpack.c.l.bf16 %v7845_v10  ;;  %v7430_v15 = vpack.c.bf16 %v6598_v11, %v6598_v11 }
 0x2d0   : > { %v9814_v16 = vunpack.c.l.bf16 %v8053_v12  ;;  %v7640_v18 = vpack.c.bf16 %v6808_v13, %v6808_v13  ;;  %v5661_v19 = vpop.f32.mrf.mxu2 }
 0x2d1   : > { %v10109_v22 = vsel %vm8401_vm3, %v9762_v14, -inf  ;;  %v9659_v23 = vunpack.c.l.bf16 %v7430_v15  ;;  %v5662_v24 = vadd.f32 %v15017_v53, %v5661_v19  ;;  %v6181_v25 = vpop.f32.mrf.mxu3  ;;  %v4624_v26 = vpop.f32.mrf.mxu0 }
 0x2d2   : > { %v15099_v28 = vmax.f32 %v10108_v57, %v10109_v22  ;;  %v10223_v30 = vsel %vm8401_vm3, %v9814_v16, -inf  ;;  %v9713_v32 = vunpack.c.l.bf16 %v7640_v18  ;;  %v6182_v29 = vadd.f32 %v15017_v53, %v6181_v25  ;;  %v5149_v33 = vpop.f32.mrf.mxu1 }
 0x2d3   : > { %v15104_v35 = vmax.f32 %v10222_v31, %v10223_v30  ;;  %v9883_v37 = vsel %vm8401_vm3, %v9659_v23, -inf  ;;  %v7014_v40 = vmax.f32 %v5662_v24, 0.0  ;;  %v4625_v41 = vadd.f32 %v15017_v53, %v4624_v26 }
 0x2d4   : > { %v9884_v42 = vmax.f32 %v15088_v4, %v9883_v37  ;;  %v10001_v44 = vsel %vm8401_vm3, %v9713_v32, -inf  ;;  %v7222_v45 = vmax.f32 %v6182_v29, 0.0  ;;  %v5150_v46 = vadd.f32 %v15017_v53, %v5149_v33  ;;  %12880 = vmatmul.msk.bf16.gmra.mxu0 %vm3184_vm2, %v13324_v20  ;;  %12985 = vmatmul.msk.bf16.gmra.mxu1 %vm3184_vm2, %v13429_v43 }
 0x2d5   : > { %v10002_v47 = vmax.f32 %v15092_v9, %v10001_v44  ;;  %v7846_v48 = vpack.c.bf16 %v7014_v40, %v7014_v40  ;;  %v6599_v49 = vmax.f32 %v4625_v41, 0.0  ;;  %13088 = vmatmul.msk.bf16.gmra.mxu2 %vm3184_vm2, %v13532_v27  ;;  %v13325_v27 = vld [vmem:[%s13817_s11 + $0x160] sm:$0xff] }
 0x2d6   : > { %v8054_v50 = vpack.c.bf16 %v7222_v45, %v7222_v45  ;;  %v6809_v51 = vmax.f32 %v5150_v46, 0.0  ;;  %13192 = vmatmul.msk.bf16.gmra.mxu3 %vm3184_vm2, %v13636_v34  ;;  %v13637_v45 = vld [vmem:[%s13817_s11 + $0xb20] sm:$0xff] }
 0x2d7   : > { %v9763_v52 = vunpack.c.l.bf16 %v7846_v48  ;;  %v7431_v54 = vpack.c.bf16 %v6599_v49, %v6599_v49 }
 0x2d8   : > { %v9815_v56 = vunpack.c.l.bf16 %v8054_v50  ;;  %v7641_v57 = vpack.c.bf16 %v6809_v51, %v6809_v51  ;;  %v5664_v58 = vpop.f32.mrf.mxu2 }
 0x2d9   : > { %v10111_v59 = vsel %vm8401_vm3, %v9763_v52, -inf  ;;  %v9660_v61 = vunpack.c.l.bf16 %v7431_v54  ;;  %v5665_v63 = vadd.f32 %v15017_v53, %v5664_v58  ;;  %v6184_v31 = vpop.f32.mrf.mxu3  ;;  %v4626_v0 = vpop.f32.mrf.mxu0 }
 0x2da   : > { %v10112_v1 = vmax.f32 %v15099_v28, %v10111_v59  ;;  %v10225_v3 = vsel %vm8401_vm3, %v9815_v56, -inf  ;;  %v9714_v4 = vunpack.c.l.bf16 %v7641_v57  ;;  %v6185_v6 = vadd.f32 %v15017_v53, %v6184_v31  ;;  %v5151_v7 = vpop.f32.mrf.mxu1  ;;  %v13430_v28 = vld [vmem:[%s13817_s11 + $0x4a8] sm:$0xff] }
 0x2db   : > { %v10226_v8 = vmax.f32 %v15104_v35, %v10225_v3  ;;  %v9885_v9 = vsel %vm8401_vm3, %v9660_v61, -inf  ;;  %v7015_v10 = vmax.f32 %v5665_v63, 0.0  ;;  %v4627_v11 = vadd.f32 %v15017_v53, %v4626_v0  ;;  %v13533_v35 = vld [vmem:[%s13817_s11 + $0x7e0] sm:$0xff] }
 0x2dc   : > { %v15124_v12 = vmax.f32 %v9884_v42, %v9885_v9  ;;  %v10003_v13 = vsel %vm8401_vm3, %v9714_v4, -inf  ;;  %v7223_v14 = vmax.f32 %v6185_v6, 0.0  ;;  %v5152_v15 = vadd.f32 %v15017_v53, %v5151_v7 }
 0x2dd   : > { %v15128_v16 = vmax.f32 %v10002_v47, %v10003_v13  ;;  %v7847_v18 = vpack.c.bf16 %v7015_v10, %v7015_v10  ;;  %v6600_v19 = vmax.f32 %v4627_v11, 0.0 }
 0x2de   : > { %v8055_v20 = vpack.c.bf16 %v7223_v14, %v7223_v14  ;;  %v6810_v43 = vmax.f32 %v5152_v15, 0.0 }
 0x2df   : > { %v9764_v22 = vunpack.c.l.bf16 %v7847_v18  ;;  %v7432_v23 = vpack.c.bf16 %v6600_v19, %v6600_v19 }
 0x2e0   : > { %v9816_v24 = vunpack.c.l.bf16 %v8055_v20  ;;  %v7642_v25 = vpack.c.bf16 %v6810_v43, %v6810_v43  ;;  %v5666_v26 = vpop.f32.mrf.mxu2 }
 0x2e1   : > { %v10113_v30 = vsel %vm8401_vm3, %v9764_v22, -inf  ;;  %v9661_v32 = vunpack.c.l.bf16 %v7432_v23  ;;  %v5667_v29 = vadd.f32 %v15017_v53, %v5666_v26  ;;  %v6186_v33 = vpop.f32.mrf.mxu3  ;;  %v4629_v34 = vpop.f32.mrf.mxu0 }
 0x2e2   : > { %v15135_v37 = vmax.f32 %v10112_v1, %v10113_v30  ;;  %v10227_v40 = vsel %vm8401_vm3, %v9816_v24, -inf  ;;  %v9715_v41 = vunpack.c.l.bf16 %v7642_v25  ;;  %v6187_v42 = vadd.f32 %v15017_v53, %v6186_v33  ;;  %v5154_v44 = vpop.f32.mrf.mxu1 }
 0x2e3   : > { %v15140_v46 = vmax.f32 %v10226_v8, %v10227_v40  ;;  %v9887_v47 = vsel %vm8401_vm3, %v9661_v32, -inf  ;;  %v7016_v48 = vmax.f32 %v5667_v29, 0.0  ;;  %v4630_v49 = vadd.f32 %v15017_v53, %v4629_v34 }
 0x2e4   : > { %v9888_v50 = vmax.f32 %v15124_v12, %v9887_v47  ;;  %v10005_v51 = vsel %vm8401_vm3, %v9715_v41, -inf  ;;  %v7224_v52 = vmax.f32 %v6187_v42, 0.0  ;;  %v5155_v54 = vadd.f32 %v15017_v53, %v5154_v44  ;;  %12881 = vmatmul.msk.bf16.gmra.mxu0 %vm3184_vm2, %v13325_v27  ;;  %12986 = vmatmul.msk.bf16.gmra.mxu1 %vm3184_vm2, %v13430_v28 }
 0x2e5   : > { %v10006_v56 = vmax.f32 %v15128_v16, %v10005_v51  ;;  %v7848_v57 = vpack.c.bf16 %v7016_v48, %v7016_v48  ;;  %v6601_v58 = vmax.f32 %v4630_v49, 0.0  ;;  %13089 = vmatmul.msk.bf16.gmra.mxu2 %vm3184_vm2, %v13533_v35  ;;  %v13326_v35 = vld [vmem:[%s13817_s11 + $0x168] sm:$0xff] }
 0x2e6   : > { %v8056_v59 = vpack.c.bf16 %v7224_v52, %v7224_v52  ;;  %v6811_v61 = vmax.f32 %v5155_v54, 0.0  ;;  %13193 = vmatmul.msk.bf16.gmra.mxu3 %vm3184_vm2, %v13637_v45  ;;  %v13638_v52 = vld [vmem:[%s13817_s11 + $0xb28] sm:$0xff] }
 0x2e7   : > { %v9765_v63 = vunpack.c.l.bf16 %v7848_v57  ;;  %v7433_v31 = vpack.c.bf16 %v6601_v58, %v6601_v58 }
 0x2e8   : > { %v9817_v0 = vunpack.c.l.bf16 %v8056_v59  ;;  %v7643_v1 = vpack.c.bf16 %v6811_v61, %v6811_v61  ;;  %v5669_v3 = vpop.f32.mrf.mxu2 }
 0x2e9   : > { %v10115_v4 = vsel %vm8401_vm3, %v9765_v63, -inf  ;;  %v9662_v6 = vunpack.c.l.bf16 %v7433_v31  ;;  %v5670_v7 = vadd.f32 %v15017_v53, %v5669_v3  ;;  %v6189_v8 = vpop.f32.mrf.mxu3  ;;  %v4631_v9 = vpop.f32.mrf.mxu0 }
 0x2ea   : > { %v10116_v10 = vmax.f32 %v15135_v37, %v10115_v4  ;;  %v10229_v11 = vsel %vm8401_vm3, %v9817_v0, -inf  ;;  %v9716_v12 = vunpack.c.l.bf16 %v7643_v1  ;;  %v6190_v13 = vadd.f32 %v15017_v53, %v6189_v8  ;;  %v5156_v14 = vpop.f32.mrf.mxu1  ;;  %v13431_v37 = vld [vmem:[%s13817_s11 + $0x4b0] sm:$0xff] }
 0x2eb   : > { %v10230_v15 = vmax.f32 %v15140_v46, %v10229_v11  ;;  %v9889_v16 = vsel %vm8401_vm3, %v9662_v6, -inf  ;;  %v7017_v18 = vmax.f32 %v5670_v7, 0.0  ;;  %v4632_v19 = vadd.f32 %v15017_v53, %v4631_v9  ;;  %v13534_v46 = vld [vmem:[%s13817_s11 + $0x7e8] sm:$0xff] }
 0x2ec   : > { %v15160_v20 = vmax.f32 %v9888_v50, %v9889_v16  ;;  %v10007_v43 = vsel %vm8401_vm3, %v9716_v12, -inf  ;;  %v7225_v22 = vmax.f32 %v6190_v13, 0.0  ;;  %v5157_v23 = vadd.f32 %v15017_v53, %v5156_v14 }
 0x2ed   : > { %v15164_v24 = vmax.f32 %v10006_v56, %v10007_v43  ;;  %v7849_v25 = vpack.c.bf16 %v7017_v18, %v7017_v18  ;;  %v6602_v26 = vmax.f32 %v4632_v19, 0.0 }
 0x2ee   : > { %v8057_v27 = vpack.c.bf16 %v7225_v22, %v7225_v22  ;;  %v6812_v28 = vmax.f32 %v5157_v23, 0.0 }
 0x2ef   : > { %v9766_v30 = vunpack.c.l.bf16 %v7849_v25  ;;  %v7434_v32 = vpack.c.bf16 %v6602_v26, %v6602_v26 }
 0x2f0   : > { %v9818_v29 = vunpack.c.l.bf16 %v8057_v27  ;;  %v7644_v33 = vpack.c.bf16 %v6812_v28, %v6812_v28  ;;  %v5671_v34 = vpop.f32.mrf.mxu2 }
 0x2f1   : > { %v10117_v40 = vsel %vm8401_vm3, %v9766_v30, -inf  ;;  %v9663_v41 = vunpack.c.l.bf16 %v7434_v32  ;;  %v5672_v42 = vadd.f32 %v15017_v53, %v5671_v34  ;;  %v6191_v44 = vpop.f32.mrf.mxu3  ;;  %v4634_v45 = vpop.f32.mrf.mxu0 }
 0x2f2   : > { %v15171_v47 = vmax.f32 %v10116_v10, %v10117_v40  ;;  %v10231_v48 = vsel %vm8401_vm3, %v9818_v29, -inf  ;;  %v9717_v49 = vunpack.c.l.bf16 %v7644_v33  ;;  %v6192_v50 = vadd.f32 %v15017_v53, %v6191_v44  ;;  %v5159_v51 = vpop.f32.mrf.mxu1 }
 0x2f3   : > { %v15176_v54 = vmax.f32 %v10230_v15, %v10231_v48  ;;  %v9891_v56 = vsel %vm8401_vm3, %v9663_v41, -inf  ;;  %v7018_v57 = vmax.f32 %v5672_v42, 0.0  ;;  %v4635_v58 = vadd.f32 %v15017_v53, %v4634_v45 }
 0x2f4   : > { %v9892_v59 = vmax.f32 %v15160_v20, %v9891_v56  ;;  %v10009_v61 = vsel %vm8401_vm3, %v9717_v49, -inf  ;;  %v7226_v63 = vmax.f32 %v6192_v50, 0.0  ;;  %v5160_v31 = vadd.f32 %v15017_v53, %v5159_v51  ;;  %12882 = vmatmul.msk.bf16.gmra.mxu0 %vm3184_vm2, %v13326_v35  ;;  %12987 = vmatmul.msk.bf16.gmra.mxu1 %vm3184_vm2, %v13431_v37 }
 0x2f5   : > { %v10010_v0 = vmax.f32 %v15164_v24, %v10009_v61  ;;  %v7850_v1 = vpack.c.bf16 %v7018_v57, %v7018_v57  ;;  %v6603_v3 = vmax.f32 %v4635_v58, 0.0  ;;  %13090 = vmatmul.msk.bf16.gmra.mxu2 %vm3184_vm2, %v13534_v46  ;;  %v13327_v46 = vld [vmem:[%s13817_s11 + $0x170] sm:$0xff] }
 0x2f6   : > { %v8058_v4 = vpack.c.bf16 %v7226_v63, %v7226_v63  ;;  %v6813_v6 = vmax.f32 %v5160_v31, 0.0  ;;  %13194 = vmatmul.msk.bf16.gmra.mxu3 %vm3184_vm2, %v13638_v52  ;;  %v13639_v63 = vld [vmem:[%s13817_s11 + $0xb30] sm:$0xff] }
 0x2f7   : > { %v9767_v7 = vunpack.c.l.bf16 %v7850_v1  ;;  %v7435_v8 = vpack.c.bf16 %v6603_v3, %v6603_v3 }
 0x2f8   : > { %v9819_v9 = vunpack.c.l.bf16 %v8058_v4  ;;  %v7645_v10 = vpack.c.bf16 %v6813_v6, %v6813_v6  ;;  %v5674_v11 = vpop.f32.mrf.mxu2 }
 0x2f9   : > { %v10119_v12 = vsel %vm8401_vm3, %v9767_v7, -inf  ;;  %v9664_v13 = vunpack.c.l.bf16 %v7435_v8  ;;  %v5675_v14 = vadd.f32 %v15017_v53, %v5674_v11  ;;  %v6194_v15 = vpop.f32.mrf.mxu3  ;;  %v4636_v16 = vpop.f32.mrf.mxu0 }
 0x2fa   : > { %v10120_v18 = vmax.f32 %v15171_v47, %v10119_v12  ;;  %v10233_v19 = vsel %vm8401_vm3, %v9819_v9, -inf  ;;  %v9718_v20 = vunpack.c.l.bf16 %v7645_v10  ;;  %v6195_v43 = vadd.f32 %v15017_v53, %v6194_v15  ;;  %v5161_v22 = vpop.f32.mrf.mxu1  ;;  %v13432_v47 = vld [vmem:[%s13817_s11 + $0x4b8] sm:$0xff] }
 0x2fb   : > { %v10234_v23 = vmax.f32 %v15176_v54, %v10233_v19  ;;  %v9893_v24 = vsel %vm8401_vm3, %v9664_v13, -inf  ;;  %v7019_v25 = vmax.f32 %v5675_v14, 0.0  ;;  %v4637_v26 = vadd.f32 %v15017_v53, %v4636_v16  ;;  %v13535_v54 = vld [vmem:[%s13817_s11 + $0x7f0] sm:$0xff] }
 0x2fc   : > { %v15196_v27 = vmax.f32 %v9892_v59, %v9893_v24  ;;  %v10011_v28 = vsel %vm8401_vm3, %v9718_v20, -inf  ;;  %v7227_v30 = vmax.f32 %v6195_v43, 0.0  ;;  %v5162_v32 = vadd.f32 %v15017_v53, %v5161_v22 }
 0x2fd   : > { %v10012_v29 = vmax.f32 %v10010_v0, %v10011_v28  ;;  %v7851_v33 = vpack.c.bf16 %v7019_v25, %v7019_v25  ;;  %v6604_v34 = vmax.f32 %v4637_v26, 0.0 }
 0x2fe   : > { %v8059_v35 = vpack.c.bf16 %v7227_v30, %v7227_v30  ;;  %v6814_v37 = vmax.f32 %v5162_v32, 0.0 }
 0x2ff   : > { %v9768_v40 = vunpack.c.l.bf16 %v7851_v33  ;;  %v7436_v41 = vpack.c.bf16 %v6604_v34, %v6604_v34 }
 0x300   : > { %v9820_v42 = vunpack.c.l.bf16 %v8059_v35  ;;  %v7646_v44 = vpack.c.bf16 %v6814_v37, %v6814_v37  ;;  %v5676_v45 = vpop.f32.mrf.mxu2 }
 0x301   : > { %v10121_v48 = vsel %vm8401_vm3, %v9768_v40, -inf  ;;  %v9665_v49 = vunpack.c.l.bf16 %v7436_v41  ;;  %v5677_v50 = vadd.f32 %v15017_v53, %v5676_v45  ;;  %v6196_v51 = vpop.f32.mrf.mxu3  ;;  %v4639_v52 = vpop.f32.mrf.mxu0 }
 0x302   : > { %v10122_v56 = vmax.f32 %v10120_v18, %v10121_v48  ;;  %v10235_v57 = vsel %vm8401_vm3, %v9820_v42, -inf  ;;  %v9719_v58 = vunpack.c.l.bf16 %v7646_v44  ;;  %v6197_v59 = vadd.f32 %v15017_v53, %v6196_v51  ;;  %v5164_v61 = vpop.f32.mrf.mxu1  ;;  %v13433_v51 = vld [vmem:[%s13817_s11 + $0x4c0] sm:$0xff] }
 0x303   : > { %v15208_v31 = vmax.f32 %v10234_v23, %v10235_v57  ;;  %v9895_v0 = vsel %vm8401_vm3, %v9665_v49, -inf  ;;  %v7020_v1 = vmax.f32 %v5677_v50, 0.0  ;;  %v4640_v3 = vadd.f32 %v15017_v53, %v4639_v52  ;;  %v13328_v50 = vld [vmem:[%s13817_s11 + $0x178] sm:$0xff] }
 0x304   : > { %v9896_v4 = vmax.f32 %v15196_v27, %v9895_v0  ;;  %v10013_v6 = vsel %vm8401_vm3, %v9719_v58, -inf  ;;  %v7228_v7 = vmax.f32 %v6197_v59, 0.0  ;;  %v5165_v8 = vadd.f32 %v15017_v53, %v5164_v61  ;;  %12883 = vmatmul.msk.bf16.gmra.mxu0 %vm3184_vm2, %v13327_v46  ;;  %12988 = vmatmul.msk.bf16.gmra.mxu1 %vm3184_vm2, %v13432_v47  ;;  %v13536_v59 = vld [vmem:[%s13817_s11 + $0x7f8] sm:$0xff] }
 0x305   : > { %v15217_v9 = vmax.f32 %v10012_v29, %v10013_v6  ;;  %v7852_v10 = vpack.c.bf16 %v7020_v1, %v7020_v1  ;;  %v6605_v11 = vmax.f32 %v4640_v3, 0.0  ;;  %13091 = vmatmul.msk.bf16.gmra.mxu2 %vm3184_vm2, %v13535_v54  ;;  %v13640_v3 = vld [vmem:[%s13817_s11 + $0xb38] sm:$0xff] }
 0x306   : > { %v8060_v12 = vpack.c.bf16 %v7228_v7, %v7228_v7  ;;  %13195 = vmatmul.msk.bf16.gmra.mxu3 %vm3184_vm2, %v13639_v63  ;;  %v6815_v15 = vmax.f32 %v5165_v8, 0.0 }
 0x307   : > { %v9769_v13 = vunpack.c.l.bf16 %v7852_v10  ;;  %v7437_v14 = vpack.c.bf16 %v6605_v11, %v6605_v11 }
 0x308   : > { %v9821_v16 = vunpack.c.l.bf16 %v8060_v12  ;;  %v5679_v18 = vpop.f32.mrf.mxu2  ;;  %v7647_v32 = vpack.c.bf16 %v6815_v15, %v6815_v15 }
 0x309   : > { %v10123_v19 = vsel %vm8401_vm3, %v9769_v13, -inf  ;;  %v9666_v20 = vunpack.c.l.bf16 %v7437_v14  ;;  %v5680_v43 = vadd.f32 %v15017_v53, %v5679_v18  ;;  %v6199_v22 = vpop.f32.mrf.mxu3  ;;  %v4641_v23 = vpop.f32.mrf.mxu0 }
 0x30a   : > { %v10124_v24 = vmax.f32 %v10122_v56, %v10123_v19  ;;  %v10237_v25 = vsel %vm8401_vm3, %v9821_v16, -inf  ;;  %v6200_v26 = vadd.f32 %v15017_v53, %v6199_v22  ;;  %v5166_v27 = vpop.f32.mrf.mxu1  ;;  %v4642_v35 = vadd.f32 %v15017_v53, %v4641_v23 }
 0x30b   : > { %v10238_v28 = vmax.f32 %v15208_v31, %v10237_v25  ;;  %v9897_v30 = vsel %vm8401_vm3, %v9666_v20, -inf  ;;  %v7021_v29 = vmax.f32 %v5680_v43, 0.0  ;;  %v5167_v40 = vadd.f32 %v15017_v53, %v5166_v27 }
 0x30c   : > { %v9898_v33 = vmax.f32 %v9896_v4, %v9897_v30  ;;  %v7229_v34 = vmax.f32 %v6200_v26, 0.0  ;;  %v6606_v42 = vmax.f32 %v4642_v35, 0.0  ;;  %v10416_v44 = vunpack.c.l.bf16 %v7647_v32 }
 0x30d   : > { %v7853_v37 = vpack.c.bf16 %v7021_v29, %v7021_v29  ;;  %v6816_v46 = vmax.f32 %v5167_v40, 0.0 }
 0x30e   : > { %v8061_v41 = vpack.c.bf16 %v7229_v34, %v7229_v34  ;;  %v7438_v48 = vpack.c.bf16 %v6606_v42, %v6606_v42  ;;  %v10686_v4 = vsel %vm8401_vm3, %v10416_v44, -inf }
 0x30f   : > { %v9770_v45 = vunpack.c.l.bf16 %v7853_v37  ;;  %v7648_v54 = vpack.c.bf16 %v6816_v46, %v6816_v46 }
 0x310   : > { %v9822_v47 = vunpack.c.l.bf16 %v8061_v41  ;;  %v5681_v49 = vpop.f32.mrf.mxu2  ;;  %v9667_v31 = vunpack.c.l.bf16 %v7438_v48 }
 0x311   : > { %v10125_v52 = vsel %vm8401_vm3, %v9770_v45, -inf  ;;  %v5682_v56 = vadd.f32 %v15017_v53, %v5681_v49  ;;  %v6201_v57 = vpop.f32.mrf.mxu3  ;;  %v4644_v58 = vpop.f32.mrf.mxu0  ;;  %v10417_v7 = vunpack.c.l.bf16 %v7648_v54 }
 0x312   : > { %v10126_v61 = vmax.f32 %v10124_v24, %v10125_v52  ;;  %v10239_v63 = vsel %vm8401_vm3, %v9822_v47, -inf  ;;  %v6202_v0 = vadd.f32 %v15017_v53, %v6201_v57  ;;  %v5169_v1 = vpop.f32.mrf.mxu1  ;;  %v9899_v10 = vsel %vm8401_vm3, %v9667_v31, -inf  ;;  %v13434_v57 = vld [vmem:[%s13817_s11 + $0x4c8] sm:$0xff] }
 0x313   : > { %v10240_v6 = vmax.f32 %v10238_v28, %v10239_v63  ;;  %v7022_v8 = vmax.f32 %v5682_v56, 0.0  ;;  %v4645_v12 = vadd.f32 %v15017_v53, %v4644_v58  ;;  %v5170_v13 = vadd.f32 %v15017_v53, %v5169_v1  ;;  %v13329_v56 = vld [vmem:[%s13817_s11 + $0x180] sm:$0xff] }
 0x314   : > { %v7230_v11 = vmax.f32 %v6202_v0, 0.0  ;;  %12884 = vmatmul.msk.bf16.gmra.mxu0 %vm3184_vm2, %v13328_v50  ;;  %12989 = vmatmul.msk.bf16.gmra.mxu1 %vm3184_vm2, %v13433_v51  ;;  %v15243_v14 = vmax.f32 %v9898_v33, %v9899_v10  ;;  %v10687_v15 = vsel %vm8401_vm3, %v10417_v7, -inf  ;;  %v13537_v63 = vld [vmem:[%s13817_s11 + $0x800] sm:$0xff] }
 0x315   : > { %v7854_v16 = vpack.c.bf16 %v7022_v8, %v7022_v8  ;;  %13092 = vmatmul.msk.bf16.gmra.mxu2 %vm3184_vm2, %v13536_v59  ;;  %v10688_v18 = vmax.f32 %v10686_v4, %v10687_v15  ;;  %v6817_v20 = vmax.f32 %v5170_v13, 0.0  ;;  %v6607_v23 = vmax.f32 %v4645_v12, 0.0  ;;  %v13641_v4 = vld [vmem:[%s13817_s11 + $0xb40] sm:$0xff] }
 0x316   : > { %v8062_v19 = vpack.c.bf16 %v7230_v11, %v7230_v11  ;;  %13196 = vmatmul.msk.bf16.gmra.mxu3 %vm3184_vm2, %v13640_v3 }
 0x317   : > { %v9771_v43 = vunpack.c.l.bf16 %v7854_v16  ;;  %v7649_v24 = vpack.c.bf16 %v6817_v20, %v6817_v20  ;;  %v7439_v41 = vpack.c.bf16 %v6607_v23, %v6607_v23 }
 0x318   : > { %v9823_v22 = vunpack.c.l.bf16 %v8062_v19  ;;  %v5684_v25 = vpop.f32.mrf.mxu2 }
 0x319   : > { %v10127_v26 = vsel %vm8401_vm3, %v9771_v43, -inf  ;;  %v5685_v27 = vadd.f32 %v15017_v53, %v5684_v25  ;;  %v6204_v28 = vpop.f32.mrf.mxu3  ;;  %v4646_v30 = vpop.f32.mrf.mxu0  ;;  %v10418_v33 = vunpack.c.l.bf16 %v7649_v24  ;;  %v10364_v50 = vunpack.c.l.bf16 %v7439_v41 }
 0x31a   : > { %v15250_v32 = vmax.f32 %v10126_v61, %v10127_v26  ;;  %v10241_v29 = vsel %vm8401_vm3, %v9823_v22, -inf  ;;  %v5171_v34 = vpop.f32.mrf.mxu1  ;;  %v6205_v40 = vadd.f32 %v15017_v53, %v6204_v28  ;;  %v4647_v44 = vadd.f32 %v15017_v53, %v4646_v30 }
 0x31b   : > { %v15253_v35 = vmax.f32 %v10240_v6, %v10241_v29  ;;  %v7023_v37 = vmax.f32 %v5685_v27, 0.0  ;;  %v10689_v42 = vsel %vm8401_vm3, %v10418_v33, -inf  ;;  %v5172_v48 = vadd.f32 %v15017_v53, %v5171_v34 }
 0x31c   : > { %v15258_v45 = vmax.f32 %v10688_v18, %v10689_v42  ;;  %v7231_v46 = vmax.f32 %v6205_v40, 0.0  ;;  %v6608_v47 = vmax.f32 %v4647_v44, 0.0  ;;  %v10572_v10 = vsel %vm8401_vm3, %v10364_v50, -inf }
 0x31d   : > { %v7855_v49 = vpack.c.bf16 %v7023_v37, %v7023_v37  ;;  %v6818_v52 = vmax.f32 %v5172_v48, 0.0 }
 0x31e   : > { %v7440_v51 = vpack.c.bf16 %v6608_v47, %v6608_v47  ;;  %v8063_v31 = vpack.c.bf16 %v7231_v46, %v7231_v46 }
 0x31f   : > { %v7650_v1 = vpack.c.bf16 %v6818_v52, %v6818_v52  ;;  %v10468_v6 = vunpack.c.l.bf16 %v7855_v49 }
 0x320   : > { %v5686_v54 = vpop.f32.mrf.mxu2  ;;  %v10365_v0 = vunpack.c.l.bf16 %v7440_v51  ;;  %v10520_v16 = vunpack.c.l.bf16 %v8063_v31 }
 0x321   : > { %v5687_v58 = vadd.f32 %v15017_v53, %v5686_v54  ;;  %v6206_v59 = vpop.f32.mrf.mxu3  ;;  %v4649_v61 = vpop.f32.mrf.mxu0  ;;  %v10419_v12 = vunpack.c.l.bf16 %v7650_v1  ;;  %v10800_v43 = vsel %vm8401_vm3, %v10468_v6, -inf }
 0x322   : > { %v5174_v3 = vpop.f32.mrf.mxu1  ;;  %v6207_v8 = vadd.f32 %v15017_v53, %v6206_v59  ;;  %v10573_v11 = vsel %vm8401_vm3, %v10365_v0, -inf  ;;  %v4650_v20 = vadd.f32 %v15017_v53, %v4649_v61  ;;  %v10914_v37 = vsel %vm8401_vm3, %v10520_v16, -inf }
 0x323   : > { %v7024_v7 = vmax.f32 %v5687_v58, 0.0  ;;  %v10574_v13 = vmax.f32 %v10572_v10, %v10573_v11  ;;  %v10691_v18 = vsel %vm8401_vm3, %v10419_v12, -inf  ;;  %v5175_v24 = vadd.f32 %v15017_v53, %v5174_v3  ;;  %v15293_v12 = vld [vmem:[%s17625_s2] ss:$0 sm:$0xff] }
 0x324   : > { %12885 = vmatmul.msk.bf16.gmra.mxu0 %vm3184_vm2, %v13329_v56  ;;  %12990 = vmatmul.msk.bf16.gmra.mxu1 %vm3184_vm2, %v13434_v57  ;;  %v7232_v19 = vmax.f32 %v6207_v8, 0.0  ;;  %v10692_v22 = vmax.f32 %v15258_v45, %v10691_v18  ;;  %v6609_v26 = vmax.f32 %v4650_v20, 0.0  ;;  %v13435_v8 = vld [vmem:[%s13817_s11 + $0x4d0] sm:$0xff]  ;;  %v13538_v18 = vld [vmem:[%s13817_s11 + $0x808] sm:$0xff] }
 0x325   : > { %v7856_v15 = vpack.c.bf16 %v7024_v7, %v7024_v7  ;;  %13093 = vmatmul.msk.bf16.gmra.mxu2 %vm3184_vm2, %v13537_v63  ;;  %v6819_v30 = vmax.f32 %v5175_v24, 0.0  ;;  %v13330_v7 = vld [vmem:[%s13817_s11 + $0x188] sm:$0xff] }
 0x326   : > { %13197 = vmatmul.msk.bf16.gmra.mxu3 %vm3184_vm2, %v13641_v4  ;;  %v8064_v25 = vpack.c.bf16 %v7232_v19, %v7232_v19  ;;  %v7441_v42 = vpack.c.bf16 %v6609_v26, %v6609_v26  ;;  %v13642_v24 = vld [vmem:[%s13817_s11 + $0xb48] sm:$0xff] }
 0x327   : > { %v10469_v23 = vunpack.c.l.bf16 %v7856_v15  ;;  %v7651_v45 = vpack.c.bf16 %v6819_v30, %v6819_v30 }
 0x328   : > { %v5689_v27 = vpop.f32.mrf.mxu2  ;;  %v10521_v41 = vunpack.c.l.bf16 %v8064_v25  ;;  %v10366_v49 = vunpack.c.l.bf16 %v7441_v42 }
 0x329   : > { %v10801_v28 = vsel %vm8401_vm3, %v10469_v23, -inf  ;;  %v5690_v29 = vadd.f32 %v15017_v53, %v5689_v27  ;;  %v6209_v33 = vpop.f32.mrf.mxu3  ;;  %v4651_v34 = vpop.f32.mrf.mxu0  ;;  %v10420_v54 = vunpack.c.l.bf16 %v7651_v45 }
 0x32a   : > { %v10802_v40 = vmax.f32 %v10800_v43, %v10801_v28  ;;  %v5176_v44 = vpop.f32.mrf.mxu1  ;;  %v6210_v47 = vadd.f32 %v15017_v53, %v6209_v33  ;;  %v10915_v48 = vsel %vm8401_vm3, %v10521_v41, -inf  ;;  %v4652_v50 = vadd.f32 %v15017_v53, %v4651_v34 }
 0x32b   : > { %v7025_v46 = vmax.f32 %v5690_v29, 0.0  ;;  %v5177_v51 = vadd.f32 %v15017_v53, %v5176_v44  ;;  %v10916_v52 = vmax.f32 %v10914_v37, %v10915_v48  ;;  %v10575_v58 = vsel %vm8401_vm3, %v10366_v49, -inf }
 0x32c   : > { %v7233_v57 = vmax.f32 %v6210_v47, 0.0  ;;  %v6610_v59 = vmax.f32 %v4652_v50, 0.0  ;;  %v10576_v63 = vmax.f32 %v10574_v13, %v10575_v58  ;;  %v10693_v31 = vsel %vm8401_vm3, %v10420_v54, -inf }
 0x32d   : > { %v7857_v56 = vpack.c.bf16 %v7025_v46, %v7025_v46  ;;  %v6820_v61 = vmax.f32 %v5177_v51, 0.0  ;;  %v10694_v3 = vmax.f32 %v10692_v22, %v10693_v31 }
 0x32e   : > { %v8065_v1 = vpack.c.bf16 %v7233_v57, %v7233_v57  ;;  %v7442_v4 = vpack.c.bf16 %v6610_v59, %v6610_v59 }
 0x32f   : > { %v10470_v0 = vunpack.c.l.bf16 %v7857_v56  ;;  %v7652_v6 = vpack.c.bf16 %v6820_v61, %v6820_v61 }
 0x330   : > { %v5691_v53 = vpop.f32.mrf.mxu2  ;;  %v10522_v11 = vunpack.c.l.bf16 %v8065_v1  ;;  %v10367_v20 = vunpack.c.l.bf16 %v7442_v4 }
 0x331   : > { %v10803_v10 = vsel %vm8401_vm3, %v10470_v0, -inf  ;;  %v5692_v13 = vadd.f32 %v15293_v12, %v5691_v53  ;;  %v6211_v15 = vpop.f32.mrf.mxu3  ;;  %v4654_v16 = vpop.f32.mrf.mxu0  ;;  %v10421_v43 = vunpack.c.l.bf16 %v7652_v6 }
 0x332   : > { %v15297_v19 = vmax.f32 %v10802_v40, %v10803_v10  ;;  %v6212_v22 = vadd.f32 %v15293_v12, %v6211_v15  ;;  %v5179_v23 = vpop.f32.mrf.mxu1  ;;  %v10917_v25 = vsel %vm8401_vm3, %v10522_v11, -inf  ;;  %v4655_v27 = vadd.f32 %v15293_v12, %v4654_v16 }
 0x333   : > { %v7026_v26 = vmax.f32 %v5692_v13, 0.0  ;;  %v5180_v28 = vadd.f32 %v15293_v12, %v5179_v23  ;;  %v10918_v30 = vmax.f32 %v10916_v52, %v10917_v25  ;;  %v10577_v29 = vsel %vm8401_vm3, %v10367_v20, -inf  ;;  %v13331_v23 = vld [vmem:[%s13817_s11 + $0x190] sm:$0xff] }
 0x334   : > { %v10695_v33 = vsel %vm8401_vm3, %v10421_v43, -inf  ;;  %v7234_v34 = vmax.f32 %v6212_v22, 0.0  ;;  %12886 = vmatmul.msk.bf16.gmra.mxu0 %vm3184_vm2, %v13330_v7  ;;  %12991 = vmatmul.msk.bf16.gmra.mxu1 %vm3184_vm2, %v13435_v8  ;;  %v10578_v37 = vmax.f32 %v10576_v63, %v10577_v29  ;;  %v6611_v42 = vmax.f32 %v4655_v27, 0.0  ;;  %v13539_v29 = vld [vmem:[%s13817_s11 + $0x810] sm:$0xff] }
 0x335   : > { %v10696_v40 = vmax.f32 %v10694_v3, %v10695_v33  ;;  %v7858_v41 = vpack.c.bf16 %v7026_v26, %v7026_v26  ;;  %13094 = vmatmul.msk.bf16.gmra.mxu2 %vm3184_vm2, %v13538_v18  ;;  %v6821_v45 = vmax.f32 %v5180_v28, 0.0 }
 0x336   : > { %v8066_v44 = vpack.c.bf16 %v7234_v34, %v7234_v34  ;;  %13198 = vmatmul.msk.bf16.gmra.mxu3 %vm3184_vm2, %v13642_v24  ;;  %v7443_v47 = vpack.c.bf16 %v6611_v42, %v6611_v42  ;;  %v13436_v24 = vld [vmem:[%s13817_s11 + $0x4d8] sm:$0xff]  ;;  %v13643_v42 = vld [vmem:[%s13817_s11 + $0xb50] sm:$0xff] }
 0x337   : > { %v10471_v46 = vunpack.c.l.bf16 %v7858_v41  ;;  %v7653_v49 = vpack.c.bf16 %v6821_v45, %v6821_v45 }
 0x338   : > { %v10523_v48 = vunpack.c.l.bf16 %v8066_v44  ;;  %v5694_v50 = vpop.f32.mrf.mxu2  ;;  %v10368_v52 = vunpack.c.l.bf16 %v7443_v47 }
 0x339   : > { %v10805_v51 = vsel %vm8401_vm3, %v10471_v46, -inf  ;;  %v5695_v54 = vadd.f32 %v15293_v12, %v5694_v50  ;;  %v6214_v56 = vpop.f32.mrf.mxu3  ;;  %v4656_v57 = vpop.f32.mrf.mxu0  ;;  %v10422_v61 = vunpack.c.l.bf16 %v7653_v49 }
 0x33a   : > { %v10806_v58 = vmax.f32 %v15297_v19, %v10805_v51  ;;  %v10919_v59 = vsel %vm8401_vm3, %v10523_v48, -inf  ;;  %v6215_v63 = vadd.f32 %v15293_v12, %v6214_v56  ;;  %v5181_v31 = vpop.f32.mrf.mxu1  ;;  %v10579_v1 = vsel %vm8401_vm3, %v10368_v52, -inf }
 0x33b   : > { %v10920_v0 = vmax.f32 %v10918_v30, %v10919_v59  ;;  %v7027_v3 = vmax.f32 %v5695_v54, 0.0  ;;  %v4657_v4 = vadd.f32 %v15293_v12, %v4656_v57  ;;  %v15317_v6 = vmax.f32 %v10578_v37, %v10579_v1 }
 0x33c   : > { %v10697_v53 = vsel %vm8401_vm3, %v10422_v61, -inf  ;;  %v7235_v7 = vmax.f32 %v6215_v63, 0.0  ;;  %v5182_v8 = vadd.f32 %v15293_v12, %v5181_v31 }
 0x33d   : > { %v15321_v10 = vmax.f32 %v10696_v40, %v10697_v53  ;;  %v7859_v11 = vpack.c.bf16 %v7027_v3, %v7027_v3  ;;  %v6612_v13 = vmax.f32 %v4657_v4, 0.0 }
 0x33e   : > { %v8067_v15 = vpack.c.bf16 %v7235_v7, %v7235_v7  ;;  %v6822_v16 = vmax.f32 %v5182_v8, 0.0 }
 0x33f   : > { %v10472_v18 = vunpack.c.l.bf16 %v7859_v11  ;;  %v7444_v19 = vpack.c.bf16 %v6612_v13, %v6612_v13 }
 0x340   : > { %v10524_v20 = vunpack.c.l.bf16 %v8067_v15  ;;  %v7654_v43 = vpack.c.bf16 %v6822_v16, %v6822_v16  ;;  %v5696_v22 = vpop.f32.mrf.mxu2 }
 0x341   : > { %v10807_v25 = vsel %vm8401_vm3, %v10472_v18, -inf  ;;  %v10369_v26 = vunpack.c.l.bf16 %v7444_v19  ;;  %v5697_v27 = vadd.f32 %v15293_v12, %v5696_v22  ;;  %v6216_v28 = vpop.f32.mrf.mxu3  ;;  %v4659_v30 = vpop.f32.mrf.mxu0 }
 0x342   : > { %v15328_v33 = vmax.f32 %v10806_v58, %v10807_v25  ;;  %v10921_v34 = vsel %vm8401_vm3, %v10524_v20, -inf  ;;  %v10423_v37 = vunpack.c.l.bf16 %v7654_v43  ;;  %v6217_v40 = vadd.f32 %v15293_v12, %v6216_v28  ;;  %v5184_v41 = vpop.f32.mrf.mxu1 }
 0x343   : > { %v15333_v44 = vmax.f32 %v10920_v0, %v10921_v34  ;;  %v10581_v45 = vsel %vm8401_vm3, %v10369_v26, -inf  ;;  %v7028_v46 = vmax.f32 %v5697_v27, 0.0  ;;  %v4660_v47 = vadd.f32 %v15293_v12, %v4659_v30 }
 0x344   : > { %v10582_v48 = vmax.f32 %v15317_v6, %v10581_v45  ;;  %v10699_v49 = vsel %vm8401_vm3, %v10423_v37, -inf  ;;  %v7236_v50 = vmax.f32 %v6217_v40, 0.0  ;;  %v5185_v51 = vadd.f32 %v15293_v12, %v5184_v41  ;;  %12887 = vmatmul.msk.bf16.gmra.mxu0 %vm3184_vm2, %v13331_v23  ;;  %12992 = vmatmul.msk.bf16.gmra.mxu1 %vm3184_vm2, %v13436_v24  ;;  %v13332_v40 = vld [vmem:[%s13817_s11 + $0x198] sm:$0xff]  ;;  %v13437_v41 = vld [vmem:[%s13817_s11 + $0x4e0] sm:$0xff] }
 0x345   : > { %v10700_v52 = vmax.f32 %v15321_v10, %v10699_v49  ;;  %v7860_v54 = vpack.c.bf16 %v7028_v46, %v7028_v46  ;;  %v6613_v56 = vmax.f32 %v4660_v47, 0.0  ;;  %13095 = vmatmul.msk.bf16.gmra.mxu2 %vm3184_vm2, %v13539_v29 }
 0x346   : > { %v8068_v57 = vpack.c.bf16 %v7236_v50, %v7236_v50  ;;  %v6823_v58 = vmax.f32 %v5185_v51, 0.0  ;;  %13199 = vmatmul.msk.bf16.gmra.mxu3 %vm3184_vm2, %v13643_v42 }
 0x347   : > { %v10473_v59 = vunpack.c.l.bf16 %v7860_v54  ;;  %v7445_v61 = vpack.c.bf16 %v6613_v56, %v6613_v56  ;;  %v13644_v56 = vld [vmem:[%s13817_s11 + $0xb58] sm:$0xff] }
 0x348   : > { %v10525_v63 = vunpack.c.l.bf16 %v8068_v57  ;;  %v7655_v31 = vpack.c.bf16 %v6823_v58, %v6823_v58  ;;  %v5699_v0 = vpop.f32.mrf.mxu2 }
 0x349   : > { %v10809_v1 = vsel %vm8401_vm3, %v10473_v59, -inf  ;;  %v10370_v3 = vunpack.c.l.bf16 %v7445_v61  ;;  %v5700_v4 = vadd.f32 %v15293_v12, %v5699_v0  ;;  %v6219_v6 = vpop.f32.mrf.mxu3  ;;  %v4661_v53 = vpop.f32.mrf.mxu0 }
 0x34a   : > { %v10810_v7 = vmax.f32 %v15328_v33, %v10809_v1  ;;  %v10923_v8 = vsel %vm8401_vm3, %v10525_v63, -inf  ;;  %v10424_v10 = vunpack.c.l.bf16 %v7655_v31  ;;  %v6220_v11 = vadd.f32 %v15293_v12, %v6219_v6  ;;  %v5186_v13 = vpop.f32.mrf.mxu1 }
 0x34b   : > { %v10924_v15 = vmax.f32 %v15333_v44, %v10923_v8  ;;  %v10583_v16 = vsel %vm8401_vm3, %v10370_v3, -inf  ;;  %v7029_v18 = vmax.f32 %v5700_v4, 0.0  ;;  %v4662_v19 = vadd.f32 %v15293_v12, %v4661_v53 }
 0x34c   : > { %v15353_v20 = vmax.f32 %v10582_v48, %v10583_v16  ;;  %v10701_v43 = vsel %vm8401_vm3, %v10424_v10, -inf  ;;  %v7237_v22 = vmax.f32 %v6220_v11, 0.0  ;;  %v5187_v23 = vadd.f32 %v15293_v12, %v5186_v13  ;;  %v13540_v48 = vld [vmem:[%s13817_s11 + $0x818] sm:$0xff] }
 0x34d   : > { %v15357_v24 = vmax.f32 %v10700_v52, %v10701_v43  ;;  %v7861_v25 = vpack.c.bf16 %v7029_v18, %v7029_v18  ;;  %v6614_v26 = vmax.f32 %v4662_v19, 0.0 }
 0x34e   : > { %v8069_v27 = vpack.c.bf16 %v7237_v22, %v7237_v22  ;;  %v6824_v28 = vmax.f32 %v5187_v23, 0.0 }
 0x34f   : > { %v10474_v30 = vunpack.c.l.bf16 %v7861_v25  ;;  %v7446_v29 = vpack.c.bf16 %v6614_v26, %v6614_v26 }
 0x350   : > { %v10526_v33 = vunpack.c.l.bf16 %v8069_v27  ;;  %v7656_v34 = vpack.c.bf16 %v6824_v28, %v6824_v28  ;;  %v5701_v37 = vpop.f32.mrf.mxu2 }
 0x351   : > { %v10811_v42 = vsel %vm8401_vm3, %v10474_v30, -inf  ;;  %v10371_v44 = vunpack.c.l.bf16 %v7446_v29  ;;  %v5702_v45 = vadd.f32 %v15293_v12, %v5701_v37  ;;  %v6221_v46 = vpop.f32.mrf.mxu3  ;;  %v4664_v47 = vpop.f32.mrf.mxu0 }
 0x352   : > { %v15364_v49 = vmax.f32 %v10810_v7, %v10811_v42  ;;  %v10925_v50 = vsel %vm8401_vm3, %v10526_v33, -inf  ;;  %v10425_v51 = vunpack.c.l.bf16 %v7656_v34  ;;  %v6222_v52 = vadd.f32 %v15293_v12, %v6221_v46  ;;  %v5189_v54 = vpop.f32.mrf.mxu1 }
 0x353   : > { %v15369_v57 = vmax.f32 %v10924_v15, %v10925_v50  ;;  %v10585_v58 = vsel %vm8401_vm3, %v10371_v44, -inf  ;;  %v7030_v59 = vmax.f32 %v5702_v45, 0.0  ;;  %v4665_v61 = vadd.f32 %v15293_v12, %v4664_v47 }
 0x354   : > { %v10586_v63 = vmax.f32 %v15353_v20, %v10585_v58  ;;  %v10703_v31 = vsel %vm8401_vm3, %v10425_v51, -inf  ;;  %v7238_v0 = vmax.f32 %v6222_v52, 0.0  ;;  %v5190_v1 = vadd.f32 %v15293_v12, %v5189_v54  ;;  %12888 = vmatmul.msk.bf16.gmra.mxu0 %vm3184_vm2, %v13332_v40  ;;  %12993 = vmatmul.msk.bf16.gmra.mxu1 %vm3184_vm2, %v13437_v41  ;;  %v13333_v52 = vld [vmem:[%s13817_s11 + $0x1a0] sm:$0xff]  ;;  %v13438_v54 = vld [vmem:[%s13817_s11 + $0x4e8] sm:$0xff] }
 0x355   : > { %v10704_v3 = vmax.f32 %v15357_v24, %v10703_v31  ;;  %v7862_v4 = vpack.c.bf16 %v7030_v59, %v7030_v59  ;;  %v6615_v6 = vmax.f32 %v4665_v61, 0.0  ;;  %13096 = vmatmul.msk.bf16.gmra.mxu2 %vm3184_vm2, %v13540_v48 }
 0x356   : > { %v8070_v53 = vpack.c.bf16 %v7238_v0, %v7238_v0  ;;  %v6825_v7 = vmax.f32 %v5190_v1, 0.0  ;;  %13200 = vmatmul.msk.bf16.gmra.mxu3 %vm3184_vm2, %v13644_v56 }
 0x357   : > { %v10475_v8 = vunpack.c.l.bf16 %v7862_v4  ;;  %v7447_v10 = vpack.c.bf16 %v6615_v6, %v6615_v6  ;;  %v13645_v6 = vld [vmem:[%s13817_s11 + $0xb60] sm:$0xff] }
 0x358   : > { %v10527_v11 = vunpack.c.l.bf16 %v8070_v53  ;;  %v7657_v13 = vpack.c.bf16 %v6825_v7, %v6825_v7  ;;  %v5704_v15 = vpop.f32.mrf.mxu2 }
 0x359   : > { %v10813_v16 = vsel %vm8401_vm3, %v10475_v8, -inf  ;;  %v10372_v18 = vunpack.c.l.bf16 %v7447_v10  ;;  %v5705_v19 = vadd.f32 %v15293_v12, %v5704_v15  ;;  %v6224_v20 = vpop.f32.mrf.mxu3  ;;  %v4666_v43 = vpop.f32.mrf.mxu0 }
 0x35a   : > { %v10814_v22 = vmax.f32 %v15364_v49, %v10813_v16  ;;  %v10927_v23 = vsel %vm8401_vm3, %v10527_v11, -inf  ;;  %v10426_v24 = vunpack.c.l.bf16 %v7657_v13  ;;  %v6225_v25 = vadd.f32 %v15293_v12, %v6224_v20  ;;  %v5191_v26 = vpop.f32.mrf.mxu1 }
 0x35b   : > { %v10928_v27 = vmax.f32 %v15369_v57, %v10927_v23  ;;  %v10587_v28 = vsel %vm8401_vm3, %v10372_v18, -inf  ;;  %v7031_v30 = vmax.f32 %v5705_v19, 0.0  ;;  %v4667_v29 = vadd.f32 %v15293_v12, %v4666_v43 }
 0x35c   : > { %v15389_v33 = vmax.f32 %v10586_v63, %v10587_v28  ;;  %v10705_v34 = vsel %vm8401_vm3, %v10426_v24, -inf  ;;  %v7239_v37 = vmax.f32 %v6225_v25, 0.0  ;;  %v5192_v40 = vadd.f32 %v15293_v12, %v5191_v26  ;;  %v13541_v63 = vld [vmem:[%s13817_s11 + $0x820] sm:$0xff] }
 0x35d   : > { %v15393_v41 = vmax.f32 %v10704_v3, %v10705_v34  ;;  %v7863_v42 = vpack.c.bf16 %v7031_v30, %v7031_v30  ;;  %v6616_v44 = vmax.f32 %v4667_v29, 0.0 }
 0x35e   : > { %v8071_v45 = vpack.c.bf16 %v7239_v37, %v7239_v37  ;;  %v6826_v46 = vmax.f32 %v5192_v40, 0.0 }
 0x35f   : > { %v10476_v47 = vunpack.c.l.bf16 %v7863_v42  ;;  %v7448_v48 = vpack.c.bf16 %v6616_v44, %v6616_v44 }
 0x360   : > { %v10528_v49 = vunpack.c.l.bf16 %v8071_v45  ;;  %v7658_v50 = vpack.c.bf16 %v6826_v46, %v6826_v46  ;;  %v5706_v51 = vpop.f32.mrf.mxu2 }
 0x361   : > { %v10815_v56 = vsel %vm8401_vm3, %v10476_v47, -inf  ;;  %v10373_v57 = vunpack.c.l.bf16 %v7448_v48  ;;  %v5707_v58 = vadd.f32 %v15293_v12, %v5706_v51  ;;  %v6226_v59 = vpop.f32.mrf.mxu3  ;;  %v4669_v61 = vpop.f32.mrf.mxu0 }
 0x362   : > { %v15400_v31 = vmax.f32 %v10814_v22, %v10815_v56  ;;  %v10929_v0 = vsel %vm8401_vm3, %v10528_v49, -inf  ;;  %v10427_v1 = vunpack.c.l.bf16 %v7658_v50  ;;  %v6227_v3 = vadd.f32 %v15293_v12, %v6226_v59  ;;  %v5194_v4 = vpop.f32.mrf.mxu1 }
 0x363   : > { %v15405_v53 = vmax.f32 %v10928_v27, %v10929_v0  ;;  %v10589_v7 = vsel %vm8401_vm3, %v10373_v57, -inf  ;;  %v7032_v8 = vmax.f32 %v5707_v58, 0.0  ;;  %v4670_v10 = vadd.f32 %v15293_v12, %v4669_v61 }
 0x364   : > { %v10590_v11 = vmax.f32 %v15389_v33, %v10589_v7  ;;  %v10707_v13 = vsel %vm8401_vm3, %v10427_v1, -inf  ;;  %v7240_v15 = vmax.f32 %v6227_v3, 0.0  ;;  %v5195_v16 = vadd.f32 %v15293_v12, %v5194_v4  ;;  %12889 = vmatmul.msk.bf16.gmra.mxu0 %vm3184_vm2, %v13333_v52  ;;  %12994 = vmatmul.msk.bf16.gmra.mxu1 %vm3184_vm2, %v13438_v54  ;;  %v13334_v3 = vld [vmem:[%s13817_s11 + $0x1a8] sm:$0xff]  ;;  %v13439_v4 = vld [vmem:[%s13817_s11 + $0x4f0] sm:$0xff] }
 0x365   : > { %v10708_v18 = vmax.f32 %v15393_v41, %v10707_v13  ;;  %v7864_v19 = vpack.c.bf16 %v7032_v8, %v7032_v8  ;;  %v6617_v20 = vmax.f32 %v4670_v10, 0.0  ;;  %13097 = vmatmul.msk.bf16.gmra.mxu2 %vm3184_vm2, %v13541_v63 }
 0x366   : > { %v8072_v43 = vpack.c.bf16 %v7240_v15, %v7240_v15  ;;  %v6827_v22 = vmax.f32 %v5195_v16, 0.0  ;;  %13201 = vmatmul.msk.bf16.gmra.mxu3 %vm3184_vm2, %v13645_v6 }
 0x367   : > { %v10477_v23 = vunpack.c.l.bf16 %v7864_v19  ;;  %v7449_v24 = vpack.c.bf16 %v6617_v20, %v6617_v20  ;;  %v13646_v20 = vld [vmem:[%s13817_s11 + $0xb68] sm:$0xff] }
 0x368   : > { %v10529_v25 = vunpack.c.l.bf16 %v8072_v43  ;;  %v7659_v26 = vpack.c.bf16 %v6827_v22, %v6827_v22  ;;  %v5709_v27 = vpop.f32.mrf.mxu2 }
 0x369   : > { %v10817_v28 = vsel %vm8401_vm3, %v10477_v23, -inf  ;;  %v10374_v30 = vunpack.c.l.bf16 %v7449_v24  ;;  %v5710_v29 = vadd.f32 %v15293_v12, %v5709_v27  ;;  %v6229_v33 = vpop.f32.mrf.mxu3  ;;  %v4671_v34 = vpop.f32.mrf.mxu0 }
 0x36a   : > { %v10818_v37 = vmax.f32 %v15400_v31, %v10817_v28  ;;  %v10931_v40 = vsel %vm8401_vm3, %v10529_v25, -inf  ;;  %v10428_v41 = vunpack.c.l.bf16 %v7659_v26  ;;  %v6230_v42 = vadd.f32 %v15293_v12, %v6229_v33  ;;  %v5196_v44 = vpop.f32.mrf.mxu1 }
 0x36b   : > { %v10932_v45 = vmax.f32 %v15405_v53, %v10931_v40  ;;  %v10591_v46 = vsel %vm8401_vm3, %v10374_v30, -inf  ;;  %v7033_v47 = vmax.f32 %v5710_v29, 0.0  ;;  %v4672_v48 = vadd.f32 %v15293_v12, %v4671_v34 }
 0x36c   : > { %v15425_v49 = vmax.f32 %v10590_v11, %v10591_v46  ;;  %v10709_v50 = vsel %vm8401_vm3, %v10428_v41, -inf  ;;  %v7241_v51 = vmax.f32 %v6230_v42, 0.0  ;;  %v5197_v52 = vadd.f32 %v15293_v12, %v5196_v44  ;;  %v13542_v11 = vld [vmem:[%s13817_s11 + $0x828] sm:$0xff] }
 0x36d   : > { %v15429_v54 = vmax.f32 %v10708_v18, %v10709_v50  ;;  %v7865_v56 = vpack.c.bf16 %v7033_v47, %v7033_v47  ;;  %v6618_v57 = vmax.f32 %v4672_v48, 0.0 }
 0x36e   : > { %v8073_v58 = vpack.c.bf16 %v7241_v51, %v7241_v51  ;;  %v6828_v59 = vmax.f32 %v5197_v52, 0.0 }
 0x36f   : > { %v10478_v61 = vunpack.c.l.bf16 %v7865_v56  ;;  %v7450_v63 = vpack.c.bf16 %v6618_v57, %v6618_v57 }
 0x370   : > { %v10530_v31 = vunpack.c.l.bf16 %v8073_v58  ;;  %v7660_v0 = vpack.c.bf16 %v6828_v59, %v6828_v59  ;;  %v5711_v1 = vpop.f32.mrf.mxu2 }
 0x371   : > { %v10819_v6 = vsel %vm8401_vm3, %v10478_v61, -inf  ;;  %v10375_v53 = vunpack.c.l.bf16 %v7450_v63  ;;  %v5712_v7 = vadd.f32 %v15293_v12, %v5711_v1  ;;  %v6231_v8 = vpop.f32.mrf.mxu3  ;;  %v4674_v10 = vpop.f32.mrf.mxu0 }
 0x372   : > { %v15436_v13 = vmax.f32 %v10818_v37, %v10819_v6  ;;  %v10933_v15 = vsel %vm8401_vm3, %v10530_v31, -inf  ;;  %v10429_v16 = vunpack.c.l.bf16 %v7660_v0  ;;  %v6232_v18 = vadd.f32 %v15293_v12, %v6231_v8  ;;  %v5199_v19 = vpop.f32.mrf.mxu1 }
 0x373   : > { %v15441_v43 = vmax.f32 %v10932_v45, %v10933_v15  ;;  %v10593_v22 = vsel %vm8401_vm3, %v10375_v53, -inf  ;;  %v7034_v23 = vmax.f32 %v5712_v7, 0.0  ;;  %v4675_v24 = vadd.f32 %v15293_v12, %v4674_v10 }
 0x374   : > { %v10594_v25 = vmax.f32 %v15425_v49, %v10593_v22  ;;  %v10711_v26 = vsel %vm8401_vm3, %v10429_v16, -inf  ;;  %v7242_v27 = vmax.f32 %v6232_v18, 0.0  ;;  %v5200_v28 = vadd.f32 %v15293_v12, %v5199_v19  ;;  %12890 = vmatmul.msk.bf16.gmra.mxu0 %vm3184_vm2, %v13334_v3  ;;  %12995 = vmatmul.msk.bf16.gmra.mxu1 %vm3184_vm2, %v13439_v4  ;;  %v13335_v18 = vld [vmem:[%s13817_s11 + $0x1b0] sm:$0xff]  ;;  %v13440_v19 = vld [vmem:[%s13817_s11 + $0x4f8] sm:$0xff] }
 0x375   : > { %v10712_v30 = vmax.f32 %v15429_v54, %v10711_v26  ;;  %v7866_v29 = vpack.c.bf16 %v7034_v23, %v7034_v23  ;;  %v6619_v33 = vmax.f32 %v4675_v24, 0.0  ;;  %13098 = vmatmul.msk.bf16.gmra.mxu2 %vm3184_vm2, %v13542_v11 }
 0x376   : > { %v8074_v34 = vpack.c.bf16 %v7242_v27, %v7242_v27  ;;  %v6829_v37 = vmax.f32 %v5200_v28, 0.0  ;;  %13202 = vmatmul.msk.bf16.gmra.mxu3 %vm3184_vm2, %v13646_v20 }
 0x377   : > { %v10479_v40 = vunpack.c.l.bf16 %v7866_v29  ;;  %v7451_v41 = vpack.c.bf16 %v6619_v33, %v6619_v33  ;;  %v13647_v33 = vld [vmem:[%s13817_s11 + $0xb70] sm:$0xff] }
 0x378   : > { %v10531_v42 = vunpack.c.l.bf16 %v8074_v34  ;;  %v7661_v44 = vpack.c.bf16 %v6829_v37, %v6829_v37  ;;  %v5714_v45 = vpop.f32.mrf.mxu2 }
 0x379   : > { %v10821_v46 = vsel %vm8401_vm3, %v10479_v40, -inf  ;;  %v10376_v47 = vunpack.c.l.bf16 %v7451_v41  ;;  %v5715_v48 = vadd.f32 %v15293_v12, %v5714_v45  ;;  %v6234_v49 = vpop.f32.mrf.mxu3  ;;  %v4676_v50 = vpop.f32.mrf.mxu0 }
 0x37a   : > { %v10822_v51 = vmax.f32 %v15436_v13, %v10821_v46  ;;  %v10935_v52 = vsel %vm8401_vm3, %v10531_v42, -inf  ;;  %v10430_v54 = vunpack.c.l.bf16 %v7661_v44  ;;  %v6235_v56 = vadd.f32 %v15293_v12, %v6234_v49  ;;  %v5201_v57 = vpop.f32.mrf.mxu1 }
 0x37b   : > { %v10936_v58 = vmax.f32 %v15441_v43, %v10935_v52  ;;  %v10595_v59 = vsel %vm8401_vm3, %v10376_v47, -inf  ;;  %v7035_v61 = vmax.f32 %v5715_v48, 0.0  ;;  %v4677_v63 = vadd.f32 %v15293_v12, %v4676_v50 }
 0x37c   : > { %v15461_v31 = vmax.f32 %v10594_v25, %v10595_v59  ;;  %v10713_v0 = vsel %vm8401_vm3, %v10430_v54, -inf  ;;  %v7243_v1 = vmax.f32 %v6235_v56, 0.0  ;;  %v5202_v3 = vadd.f32 %v15293_v12, %v5201_v57  ;;  %v13543_v25 = vld [vmem:[%s13817_s11 + $0x830] sm:$0xff] }
 0x37d   : > { %v15465_v4 = vmax.f32 %v10712_v30, %v10713_v0  ;;  %v7867_v6 = vpack.c.bf16 %v7035_v61, %v7035_v61  ;;  %v6620_v53 = vmax.f32 %v4677_v63, 0.0 }
 0x37e   : > { %v8075_v7 = vpack.c.bf16 %v7243_v1, %v7243_v1  ;;  %v6830_v8 = vmax.f32 %v5202_v3, 0.0 }
 0x37f   : > { %v10480_v10 = vunpack.c.l.bf16 %v7867_v6  ;;  %v7452_v11 = vpack.c.bf16 %v6620_v53, %v6620_v53 }
 0x380   : > { %v10532_v13 = vunpack.c.l.bf16 %v8075_v7  ;;  %v7662_v15 = vpack.c.bf16 %v6830_v8, %v6830_v8  ;;  %v5716_v16 = vpop.f32.mrf.mxu2 }
 0x381   : > { %v10823_v20 = vsel %vm8401_vm3, %v10480_v10, -inf  ;;  %v10377_v43 = vunpack.c.l.bf16 %v7452_v11  ;;  %v5717_v22 = vadd.f32 %v15293_v12, %v5716_v16  ;;  %v6236_v23 = vpop.f32.mrf.mxu3  ;;  %v4679_v24 = vpop.f32.mrf.mxu0 }
 0x382   : > { %v15472_v26 = vmax.f32 %v10822_v51, %v10823_v20  ;;  %v10937_v27 = vsel %vm8401_vm3, %v10532_v13, -inf  ;;  %v10431_v28 = vunpack.c.l.bf16 %v7662_v15  ;;  %v6237_v30 = vadd.f32 %v15293_v12, %v6236_v23  ;;  %v5204_v29 = vpop.f32.mrf.mxu1 }
 0x383   : > { %v15477_v34 = vmax.f32 %v10936_v58, %v10937_v27  ;;  %v10597_v37 = vsel %vm8401_vm3, %v10377_v43, -inf  ;;  %v7036_v40 = vmax.f32 %v5717_v22, 0.0  ;;  %v4680_v41 = vadd.f32 %v15293_v12, %v4679_v24 }
 0x384   : > { %v10598_v42 = vmax.f32 %v15461_v31, %v10597_v37  ;;  %v10715_v44 = vsel %vm8401_vm3, %v10431_v28, -inf  ;;  %v7244_v45 = vmax.f32 %v6237_v30, 0.0  ;;  %v5205_v46 = vadd.f32 %v15293_v12, %v5204_v29  ;;  %12891 = vmatmul.msk.bf16.gmra.mxu0 %vm3184_vm2, %v13335_v18  ;;  %12996 = vmatmul.msk.bf16.gmra.mxu1 %vm3184_vm2, %v13440_v19  ;;  %v13336_v30 = vld [vmem:[%s13817_s11 + $0x1b8] sm:$0xff]  ;;  %v13441_v29 = vld [vmem:[%s13817_s11 + $0x500] sm:$0xff] }
 0x385   : > { %v10716_v47 = vmax.f32 %v15465_v4, %v10715_v44  ;;  %v7868_v48 = vpack.c.bf16 %v7036_v40, %v7036_v40  ;;  %v6621_v49 = vmax.f32 %v4680_v41, 0.0  ;;  %13099 = vmatmul.msk.bf16.gmra.mxu2 %vm3184_vm2, %v13543_v25 }
 0x386   : > { %v8076_v50 = vpack.c.bf16 %v7244_v45, %v7244_v45  ;;  %v6831_v51 = vmax.f32 %v5205_v46, 0.0  ;;  %13203 = vmatmul.msk.bf16.gmra.mxu3 %vm3184_vm2, %v13647_v33 }
 0x387   : > { %v10481_v52 = vunpack.c.l.bf16 %v7868_v48  ;;  %v7453_v54 = vpack.c.bf16 %v6621_v49, %v6621_v49  ;;  %v13648_v49 = vld [vmem:[%s13817_s11 + $0xb78] sm:$0xff] }
 0x388   : > { %v10533_v56 = vunpack.c.l.bf16 %v8076_v50  ;;  %v7663_v57 = vpack.c.bf16 %v6831_v51, %v6831_v51  ;;  %v5719_v58 = vpop.f32.mrf.mxu2 }
 0x389   : > { %v10825_v59 = vsel %vm8401_vm3, %v10481_v52, -inf  ;;  %v10378_v61 = vunpack.c.l.bf16 %v7453_v54  ;;  %v5720_v63 = vadd.f32 %v15293_v12, %v5719_v58  ;;  %v6239_v31 = vpop.f32.mrf.mxu3  ;;  %v4681_v0 = vpop.f32.mrf.mxu0 }
 0x38a   : > { %v10826_v1 = vmax.f32 %v15472_v26, %v10825_v59  ;;  %v10939_v3 = vsel %vm8401_vm3, %v10533_v56, -inf  ;;  %v10432_v4 = vunpack.c.l.bf16 %v7663_v57  ;;  %v6240_v6 = vadd.f32 %v15293_v12, %v6239_v31  ;;  %v5206_v53 = vpop.f32.mrf.mxu1 }
 0x38b   : > { %v10940_v7 = vmax.f32 %v15477_v34, %v10939_v3  ;;  %v10599_v8 = vsel %vm8401_vm3, %v10378_v61, -inf  ;;  %v7037_v10 = vmax.f32 %v5720_v63, 0.0  ;;  %v4682_v11 = vadd.f32 %v15293_v12, %v4681_v0 }
 0x38c   : > { %v15497_v13 = vmax.f32 %v10598_v42, %v10599_v8  ;;  %v10717_v15 = vsel %vm8401_vm3, %v10432_v4, -inf  ;;  %v7245_v16 = vmax.f32 %v6240_v6, 0.0  ;;  %v5207_v18 = vadd.f32 %v15293_v12, %v5206_v53  ;;  %v13544_v42 = vld [vmem:[%s13817_s11 + $0x838] sm:$0xff] }
 0x38d   : > { %v15501_v19 = vmax.f32 %v10716_v47, %v10717_v15  ;;  %v7869_v20 = vpack.c.bf16 %v7037_v10, %v7037_v10  ;;  %v6622_v43 = vmax.f32 %v4682_v11, 0.0 }
 0x38e   : > { %v8077_v22 = vpack.c.bf16 %v7245_v16, %v7245_v16  ;;  %v6832_v23 = vmax.f32 %v5207_v18, 0.0 }
 0x38f   : > { %v10482_v24 = vunpack.c.l.bf16 %v7869_v20  ;;  %v7454_v25 = vpack.c.bf16 %v6622_v43, %v6622_v43 }
 0x390   : > { %v10534_v26 = vunpack.c.l.bf16 %v8077_v22  ;;  %v7664_v27 = vpack.c.bf16 %v6832_v23, %v6832_v23  ;;  %v5721_v28 = vpop.f32.mrf.mxu2 }
 0x391   : > { %v10827_v33 = vsel %vm8401_vm3, %v10482_v24, -inf  ;;  %v10379_v34 = vunpack.c.l.bf16 %v7454_v25  ;;  %v5722_v37 = vadd.f32 %v15293_v12, %v5721_v28  ;;  %v6241_v40 = vpop.f32.mrf.mxu3  ;;  %v4684_v41 = vpop.f32.mrf.mxu0 }
 0x392   : > { %v15508_v44 = vmax.f32 %v10826_v1, %v10827_v33  ;;  %v10941_v45 = vsel %vm8401_vm3, %v10534_v26, -inf  ;;  %v10433_v46 = vunpack.c.l.bf16 %v7664_v27  ;;  %v6242_v47 = vadd.f32 %v15293_v12, %v6241_v40  ;;  %v5209_v48 = vpop.f32.mrf.mxu1 }
 0x393   : > { %v15513_v50 = vmax.f32 %v10940_v7, %v10941_v45  ;;  %v10601_v51 = vsel %vm8401_vm3, %v10379_v34, -inf  ;;  %v7038_v52 = vmax.f32 %v5722_v37, 0.0  ;;  %v4685_v54 = vadd.f32 %v15293_v12, %v4684_v41 }
 0x394   : > { %v10602_v56 = vmax.f32 %v15497_v13, %v10601_v51  ;;  %v10719_v57 = vsel %vm8401_vm3, %v10433_v46, -inf  ;;  %v7246_v58 = vmax.f32 %v6242_v47, 0.0  ;;  %v5210_v59 = vadd.f32 %v15293_v12, %v5209_v48  ;;  %12892 = vmatmul.msk.bf16.gmra.mxu0 %vm3184_vm2, %v13336_v30  ;;  %12997 = vmatmul.msk.bf16.gmra.mxu1 %vm3184_vm2, %v13441_v29  ;;  %v13337_v47 = vld [vmem:[%s13817_s11 + $0x1c0] sm:$0xff]  ;;  %v13442_v48 = vld [vmem:[%s13817_s11 + $0x508] sm:$0xff] }
 0x395   : > { %v10720_v61 = vmax.f32 %v15501_v19, %v10719_v57  ;;  %v7870_v63 = vpack.c.bf16 %v7038_v52, %v7038_v52  ;;  %v6623_v31 = vmax.f32 %v4685_v54, 0.0  ;;  %13100 = vmatmul.msk.bf16.gmra.mxu2 %vm3184_vm2, %v13544_v42 }
 0x396   : > { %v8078_v0 = vpack.c.bf16 %v7246_v58, %v7246_v58  ;;  %v6833_v1 = vmax.f32 %v5210_v59, 0.0  ;;  %13204 = vmatmul.msk.bf16.gmra.mxu3 %vm3184_vm2, %v13648_v49 }
 0x397   : > { %v10483_v3 = vunpack.c.l.bf16 %v7870_v63  ;;  %v7455_v4 = vpack.c.bf16 %v6623_v31, %v6623_v31  ;;  %v13649_v31 = vld [vmem:[%s13817_s11 + $0xb80] sm:$0xff] }
 0x398   : > { %v10535_v6 = vunpack.c.l.bf16 %v8078_v0  ;;  %v7665_v53 = vpack.c.bf16 %v6833_v1, %v6833_v1  ;;  %v5724_v7 = vpop.f32.mrf.mxu2 }
 0x399   : > { %v10829_v8 = vsel %vm8401_vm3, %v10483_v3, -inf  ;;  %v10380_v10 = vunpack.c.l.bf16 %v7455_v4  ;;  %v5725_v11 = vadd.f32 %v15293_v12, %v5724_v7  ;;  %v6244_v13 = vpop.f32.mrf.mxu3  ;;  %v4686_v15 = vpop.f32.mrf.mxu0 }
 0x39a   : > { %v10830_v16 = vmax.f32 %v15508_v44, %v10829_v8  ;;  %v10943_v18 = vsel %vm8401_vm3, %v10535_v6, -inf  ;;  %v10434_v19 = vunpack.c.l.bf16 %v7665_v53  ;;  %v6245_v20 = vadd.f32 %v15293_v12, %v6244_v13  ;;  %v5211_v43 = vpop.f32.mrf.mxu1 }
 0x39b   : > { %v10944_v22 = vmax.f32 %v15513_v50, %v10943_v18  ;;  %v10603_v23 = vsel %vm8401_vm3, %v10380_v10, -inf  ;;  %v7039_v24 = vmax.f32 %v5725_v11, 0.0  ;;  %v4687_v25 = vadd.f32 %v15293_v12, %v4686_v15 }
 0x39c   : > { %v15533_v26 = vmax.f32 %v10602_v56, %v10603_v23  ;;  %v10721_v27 = vsel %vm8401_vm3, %v10434_v19, -inf  ;;  %v7247_v28 = vmax.f32 %v6245_v20, 0.0  ;;  %v5212_v30 = vadd.f32 %v15293_v12, %v5211_v43  ;;  %v13545_v56 = vld [vmem:[%s13817_s11 + $0x840] sm:$0xff] }
 0x39d   : > { %v15537_v29 = vmax.f32 %v10720_v61, %v10721_v27  ;;  %v7871_v33 = vpack.c.bf16 %v7039_v24, %v7039_v24  ;;  %v6624_v34 = vmax.f32 %v4687_v25, 0.0 }
 0x39e   : > { %v8079_v37 = vpack.c.bf16 %v7247_v28, %v7247_v28  ;;  %v6834_v40 = vmax.f32 %v5212_v30, 0.0 }
 0x39f   : > { %v10484_v41 = vunpack.c.l.bf16 %v7871_v33  ;;  %v7456_v42 = vpack.c.bf16 %v6624_v34, %v6624_v34 }
 0x3a0   : > { %v10536_v44 = vunpack.c.l.bf16 %v8079_v37  ;;  %v7666_v45 = vpack.c.bf16 %v6834_v40, %v6834_v40  ;;  %v5726_v46 = vpop.f32.mrf.mxu2 }
 0x3a1   : > { %v10831_v49 = vsel %vm8401_vm3, %v10484_v41, -inf  ;;  %v10381_v50 = vunpack.c.l.bf16 %v7456_v42  ;;  %v5727_v51 = vadd.f32 %v15293_v12, %v5726_v46  ;;  %v6246_v52 = vpop.f32.mrf.mxu3  ;;  %v4689_v54 = vpop.f32.mrf.mxu0 }
 0x3a2   : > { %v15544_v57 = vmax.f32 %v10830_v16, %v10831_v49  ;;  %v10945_v58 = vsel %vm8401_vm3, %v10536_v44, -inf  ;;  %v10435_v59 = vunpack.c.l.bf16 %v7666_v45  ;;  %v6247_v61 = vadd.f32 %v15293_v12, %v6246_v52  ;;  %v5214_v63 = vpop.f32.mrf.mxu1 }
 0x3a3   : > { %v15549_v0 = vmax.f32 %v10944_v22, %v10945_v58  ;;  %v10605_v1 = vsel %vm8401_vm3, %v10381_v50, -inf  ;;  %v7040_v3 = vmax.f32 %v5727_v51, 0.0  ;;  %v4690_v4 = vadd.f32 %v15293_v12, %v4689_v54 }
 0x3a4   : > { %v10606_v6 = vmax.f32 %v15533_v26, %v10605_v1  ;;  %v10723_v53 = vsel %vm8401_vm3, %v10435_v59, -inf  ;;  %v7248_v7 = vmax.f32 %v6247_v61, 0.0  ;;  %v5215_v8 = vadd.f32 %v15293_v12, %v5214_v63  ;;  %12893 = vmatmul.msk.bf16.gmra.mxu0 %vm3184_vm2, %v13337_v47  ;;  %12998 = vmatmul.msk.bf16.gmra.mxu1 %vm3184_vm2, %v13442_v48  ;;  %v13338_v61 = vld [vmem:[%s13817_s11 + $0x1c8] sm:$0xff]  ;;  %v13443_v63 = vld [vmem:[%s13817_s11 + $0x510] sm:$0xff] }
 0x3a5   : > { %v10724_v10 = vmax.f32 %v15537_v29, %v10723_v53  ;;  %v7872_v11 = vpack.c.bf16 %v7040_v3, %v7040_v3  ;;  %v6625_v13 = vmax.f32 %v4690_v4, 0.0  ;;  %13101 = vmatmul.msk.bf16.gmra.mxu2 %vm3184_vm2, %v13545_v56 }
 0x3a6   : > { %v8080_v15 = vpack.c.bf16 %v7248_v7, %v7248_v7  ;;  %v6835_v16 = vmax.f32 %v5215_v8, 0.0  ;;  %13205 = vmatmul.msk.bf16.gmra.mxu3 %vm3184_vm2, %v13649_v31 }
 0x3a7   : > { %v10485_v18 = vunpack.c.l.bf16 %v7872_v11  ;;  %v7457_v19 = vpack.c.bf16 %v6625_v13, %v6625_v13  ;;  %v13650_v13 = vld [vmem:[%s13817_s11 + $0xb88] sm:$0xff] }
 0x3a8   : > { %v10537_v20 = vunpack.c.l.bf16 %v8080_v15  ;;  %v7667_v43 = vpack.c.bf16 %v6835_v16, %v6835_v16  ;;  %v5729_v22 = vpop.f32.mrf.mxu2 }
 0x3a9   : > { %v10833_v23 = vsel %vm8401_vm3, %v10485_v18, -inf  ;;  %v10382_v24 = vunpack.c.l.bf16 %v7457_v19  ;;  %v5730_v25 = vadd.f32 %v15293_v12, %v5729_v22  ;;  %v6249_v26 = vpop.f32.mrf.mxu3  ;;  %v4691_v27 = vpop.f32.mrf.mxu0 }
 0x3aa   : > { %v10834_v28 = vmax.f32 %v15544_v57, %v10833_v23  ;;  %v10947_v30 = vsel %vm8401_vm3, %v10537_v20, -inf  ;;  %v10436_v29 = vunpack.c.l.bf16 %v7667_v43  ;;  %v6250_v33 = vadd.f32 %v15293_v12, %v6249_v26  ;;  %v5216_v34 = vpop.f32.mrf.mxu1 }
 0x3ab   : > { %v10948_v37 = vmax.f32 %v15549_v0, %v10947_v30  ;;  %v10607_v40 = vsel %vm8401_vm3, %v10382_v24, -inf  ;;  %v7041_v41 = vmax.f32 %v5730_v25, 0.0  ;;  %v4692_v42 = vadd.f32 %v15293_v12, %v4691_v27 }
 0x3ac   : > { %v15569_v44 = vmax.f32 %v10606_v6, %v10607_v40  ;;  %v10725_v45 = vsel %vm8401_vm3, %v10436_v29, -inf  ;;  %v7249_v46 = vmax.f32 %v6250_v33, 0.0  ;;  %v5217_v47 = vadd.f32 %v15293_v12, %v5216_v34  ;;  %v15581_v12 = vld [vmem:[%s17625_s2] ss:$0 sm:$0xff]  ;;  %v13546_v6 = vld [vmem:[%s13817_s11 + $0x848] sm:$0xff] }
 0x3ad   : > { %v15573_v48 = vmax.f32 %v10724_v10, %v10725_v45  ;;  %v7873_v49 = vpack.c.bf16 %v7041_v41, %v7041_v41  ;;  %v6626_v50 = vmax.f32 %v4692_v42, 0.0 }
 0x3ae   : > { %v8081_v51 = vpack.c.bf16 %v7249_v46, %v7249_v46  ;;  %v6836_v52 = vmax.f32 %v5217_v47, 0.0 }
 0x3af   : > { %v10486_v54 = vunpack.c.l.bf16 %v7873_v49  ;;  %v7458_v56 = vpack.c.bf16 %v6626_v50, %v6626_v50 }
 0x3b0   : > { %v10538_v57 = vunpack.c.l.bf16 %v8081_v51  ;;  %v7668_v58 = vpack.c.bf16 %v6836_v52, %v6836_v52  ;;  %v5731_v59 = vpop.f32.mrf.mxu2 }
 0x3b1   : > { %v10835_v31 = vsel %vm8401_vm3, %v10486_v54, -inf  ;;  %v10383_v0 = vunpack.c.l.bf16 %v7458_v56  ;;  %v5732_v1 = vadd.f32 %v15581_v12, %v5731_v59  ;;  %v6251_v3 = vpop.f32.mrf.mxu3  ;;  %v4694_v4 = vpop.f32.mrf.mxu0 }
 0x3b2   : > { %v15585_v53 = vmax.f32 %v10834_v28, %v10835_v31  ;;  %v10949_v7 = vsel %vm8401_vm3, %v10538_v57, -inf  ;;  %v10437_v8 = vunpack.c.l.bf16 %v7668_v58  ;;  %v6252_v10 = vadd.f32 %v15581_v12, %v6251_v3  ;;  %v5219_v11 = vpop.f32.mrf.mxu1 }
 0x3b3   : > { %v15590_v15 = vmax.f32 %v10948_v37, %v10949_v7  ;;  %v10609_v16 = vsel %vm8401_vm3, %v10383_v0, -inf  ;;  %v7042_v18 = vmax.f32 %v5732_v1, 0.0  ;;  %v4695_v19 = vadd.f32 %v15581_v12, %v4694_v4 }
 0x3b4   : > { %v10610_v20 = vmax.f32 %v15569_v44, %v10609_v16  ;;  %v10727_v43 = vsel %vm8401_vm3, %v10437_v8, -inf  ;;  %v7250_v22 = vmax.f32 %v6252_v10, 0.0  ;;  %v5220_v23 = vadd.f32 %v15581_v12, %v5219_v11  ;;  %12894 = vmatmul.msk.bf16.gmra.mxu0 %vm3184_vm2, %v13338_v61  ;;  %12999 = vmatmul.msk.bf16.gmra.mxu1 %vm3184_vm2, %v13443_v63  ;;  %v13339_v10 = vld [vmem:[%s13817_s11 + $0x1d0] sm:$0xff]  ;;  %v13444_v11 = vld [vmem:[%s13817_s11 + $0x518] sm:$0xff] }
 0x3b5   : > { %v10728_v24 = vmax.f32 %v15573_v48, %v10727_v43  ;;  %v7874_v25 = vpack.c.bf16 %v7042_v18, %v7042_v18  ;;  %v6627_v26 = vmax.f32 %v4695_v19, 0.0  ;;  %13102 = vmatmul.msk.bf16.gmra.mxu2 %vm3184_vm2, %v13546_v6 }
 0x3b6   : > { %v8082_v27 = vpack.c.bf16 %v7250_v22, %v7250_v22  ;;  %v6837_v28 = vmax.f32 %v5220_v23, 0.0  ;;  %13206 = vmatmul.msk.bf16.gmra.mxu3 %vm3184_vm2, %v13650_v13 }
 0x3b7   : > { %v10487_v30 = vunpack.c.l.bf16 %v7874_v25  ;;  %v7459_v29 = vpack.c.bf16 %v6627_v26, %v6627_v26  ;;  %v13651_v26 = vld [vmem:[%s13817_s11 + $0xb90] sm:$0xff] }
 0x3b8   : > { %v10539_v33 = vunpack.c.l.bf16 %v8082_v27  ;;  %v7669_v34 = vpack.c.bf16 %v6837_v28, %v6837_v28  ;;  %v5734_v37 = vpop.f32.mrf.mxu2 }
 0x3b9   : > { %v10837_v40 = vsel %vm8401_vm3, %v10487_v30, -inf  ;;  %v10384_v41 = vunpack.c.l.bf16 %v7459_v29  ;;  %v5735_v42 = vadd.f32 %v15581_v12, %v5734_v37  ;;  %v6254_v44 = vpop.f32.mrf.mxu3  ;;  %v4696_v45 = vpop.f32.mrf.mxu0 }
 0x3ba   : > { %v10838_v46 = vmax.f32 %v15585_v53, %v10837_v40  ;;  %v10951_v47 = vsel %vm8401_vm3, %v10539_v33, -inf  ;;  %v10438_v48 = vunpack.c.l.bf16 %v7669_v34  ;;  %v6255_v49 = vadd.f32 %v15581_v12, %v6254_v44  ;;  %v5221_v50 = vpop.f32.mrf.mxu1 }
 0x3bb   : > { %v10952_v51 = vmax.f32 %v15590_v15, %v10951_v47  ;;  %v10611_v52 = vsel %vm8401_vm3, %v10384_v41, -inf  ;;  %v7043_v54 = vmax.f32 %v5735_v42, 0.0  ;;  %v4697_v56 = vadd.f32 %v15581_v12, %v4696_v45 }
 0x3bc   : > { %v15610_v57 = vmax.f32 %v10610_v20, %v10611_v52  ;;  %v10729_v58 = vsel %vm8401_vm3, %v10438_v48, -inf  ;;  %v7251_v59 = vmax.f32 %v6255_v49, 0.0  ;;  %v5222_v61 = vadd.f32 %v15581_v12, %v5221_v50  ;;  %v13547_v20 = vld [vmem:[%s13817_s11 + $0x850] sm:$0xff] }
 0x3bd   : > { %v15614_v63 = vmax.f32 %v10728_v24, %v10729_v58  ;;  %v7875_v31 = vpack.c.bf16 %v7043_v54, %v7043_v54  ;;  %v6628_v0 = vmax.f32 %v4697_v56, 0.0 }
 0x3be   : > { %v8083_v1 = vpack.c.bf16 %v7251_v59, %v7251_v59  ;;  %v6838_v3 = vmax.f32 %v5222_v61, 0.0 }
 0x3bf   : > { %v10488_v4 = vunpack.c.l.bf16 %v7875_v31  ;;  %v7460_v6 = vpack.c.bf16 %v6628_v0, %v6628_v0 }
 0x3c0   : > { %v10540_v53 = vunpack.c.l.bf16 %v8083_v1  ;;  %v7670_v7 = vpack.c.bf16 %v6838_v3, %v6838_v3  ;;  %v5736_v8 = vpop.f32.mrf.mxu2 }
 0x3c1   : > { %v10839_v13 = vsel %vm8401_vm3, %v10488_v4, -inf  ;;  %v10385_v15 = vunpack.c.l.bf16 %v7460_v6  ;;  %v5737_v16 = vadd.f32 %v15581_v12, %v5736_v8  ;;  %v6256_v18 = vpop.f32.mrf.mxu3  ;;  %v4699_v19 = vpop.f32.mrf.mxu0 }
 0x3c2   : > { %v15621_v43 = vmax.f32 %v10838_v46, %v10839_v13  ;;  %v10953_v22 = vsel %vm8401_vm3, %v10540_v53, -inf  ;;  %v10439_v23 = vunpack.c.l.bf16 %v7670_v7  ;;  %v6257_v24 = vadd.f32 %v15581_v12, %v6256_v18  ;;  %v5224_v25 = vpop.f32.mrf.mxu1 }
 0x3c3   : > { %v15626_v27 = vmax.f32 %v10952_v51, %v10953_v22  ;;  %v10613_v28 = vsel %vm8401_vm3, %v10385_v15, -inf  ;;  %v7044_v30 = vmax.f32 %v5737_v16, 0.0  ;;  %v4700_v29 = vadd.f32 %v15581_v12, %v4699_v19 }
 0x3c4   : > { %v10614_v33 = vmax.f32 %v15610_v57, %v10613_v28  ;;  %v10731_v34 = vsel %vm8401_vm3, %v10439_v23, -inf  ;;  %v7252_v37 = vmax.f32 %v6257_v24, 0.0  ;;  %v5225_v40 = vadd.f32 %v15581_v12, %v5224_v25  ;;  %12895 = vmatmul.msk.bf16.gmra.mxu0 %vm3184_vm2, %v13339_v10  ;;  %13000 = vmatmul.msk.bf16.gmra.mxu1 %vm3184_vm2, %v13444_v11  ;;  %v13340_v24 = vld [vmem:[%s13817_s11 + $0x1d8] sm:$0xff]  ;;  %v13445_v25 = vld [vmem:[%s13817_s11 + $0x520] sm:$0xff] }
 0x3c5   : > { %v10732_v41 = vmax.f32 %v15614_v63, %v10731_v34  ;;  %v7876_v42 = vpack.c.bf16 %v7044_v30, %v7044_v30  ;;  %v6629_v44 = vmax.f32 %v4700_v29, 0.0  ;;  %13103 = vmatmul.msk.bf16.gmra.mxu2 %vm3184_vm2, %v13547_v20 }
 0x3c6   : > { %v8084_v45 = vpack.c.bf16 %v7252_v37, %v7252_v37  ;;  %v6839_v46 = vmax.f32 %v5225_v40, 0.0  ;;  %13207 = vmatmul.msk.bf16.gmra.mxu3 %vm3184_vm2, %v13651_v26 }
 0x3c7   : > { %v10489_v47 = vunpack.c.l.bf16 %v7876_v42  ;;  %v7461_v48 = vpack.c.bf16 %v6629_v44, %v6629_v44  ;;  %v13652_v44 = vld [vmem:[%s13817_s11 + $0xb98] sm:$0xff] }
 0x3c8   : > { %v10541_v49 = vunpack.c.l.bf16 %v8084_v45  ;;  %v7671_v50 = vpack.c.bf16 %v6839_v46, %v6839_v46  ;;  %v5739_v51 = vpop.f32.mrf.mxu2 }
 0x3c9   : > { %v10841_v52 = vsel %vm8401_vm3, %v10489_v47, -inf  ;;  %v10386_v54 = vunpack.c.l.bf16 %v7461_v48  ;;  %v5740_v56 = vadd.f32 %v15581_v12, %v5739_v51  ;;  %v6259_v57 = vpop.f32.mrf.mxu3  ;;  %v4701_v58 = vpop.f32.mrf.mxu0 }
 0x3ca   : > { %v10842_v59 = vmax.f32 %v15621_v43, %v10841_v52  ;;  %v10955_v61 = vsel %vm8401_vm3, %v10541_v49, -inf  ;;  %v10440_v63 = vunpack.c.l.bf16 %v7671_v50  ;;  %v6260_v31 = vadd.f32 %v15581_v12, %v6259_v57  ;;  %v5226_v0 = vpop.f32.mrf.mxu1 }
 0x3cb   : > { %v10956_v1 = vmax.f32 %v15626_v27, %v10955_v61  ;;  %v10615_v3 = vsel %vm8401_vm3, %v10386_v54, -inf  ;;  %v7045_v4 = vmax.f32 %v5740_v56, 0.0  ;;  %v4702_v6 = vadd.f32 %v15581_v12, %v4701_v58 }
 0x3cc   : > { %v15646_v53 = vmax.f32 %v10614_v33, %v10615_v3  ;;  %v10733_v7 = vsel %vm8401_vm3, %v10440_v63, -inf  ;;  %v7253_v8 = vmax.f32 %v6260_v31, 0.0  ;;  %v5227_v10 = vadd.f32 %v15581_v12, %v5226_v0  ;;  %v13548_v33 = vld [vmem:[%s13817_s11 + $0x858] sm:$0xff] }
 0x3cd   : > { %v10734_v11 = vmax.f32 %v10732_v41, %v10733_v7  ;;  %v7877_v13 = vpack.c.bf16 %v7045_v4, %v7045_v4  ;;  %v6630_v15 = vmax.f32 %v4702_v6, 0.0 }
 0x3ce   : > { %v8085_v16 = vpack.c.bf16 %v7253_v8, %v7253_v8  ;;  %v6840_v18 = vmax.f32 %v5227_v10, 0.0 }
 0x3cf   : > { %v10490_v19 = vunpack.c.l.bf16 %v7877_v13  ;;  %v7462_v20 = vpack.c.bf16 %v6630_v15, %v6630_v15 }
 0x3d0   : > { %v10542_v43 = vunpack.c.l.bf16 %v8085_v16  ;;  %v7672_v22 = vpack.c.bf16 %v6840_v18, %v6840_v18  ;;  %v5741_v23 = vpop.f32.mrf.mxu2 }
 0x3d1   : > { %v10843_v26 = vsel %vm8401_vm3, %v10490_v19, -inf  ;;  %v10387_v27 = vunpack.c.l.bf16 %v7462_v20  ;;  %v5742_v28 = vadd.f32 %v15581_v12, %v5741_v23  ;;  %v6261_v30 = vpop.f32.mrf.mxu3  ;;  %v4704_v29 = vpop.f32.mrf.mxu0 }
 0x3d2   : > { %v10844_v34 = vmax.f32 %v10842_v59, %v10843_v26  ;;  %v10957_v37 = vsel %vm8401_vm3, %v10542_v43, -inf  ;;  %v10441_v40 = vunpack.c.l.bf16 %v7672_v22  ;;  %v6262_v41 = vadd.f32 %v15581_v12, %v6261_v30  ;;  %v5229_v42 = vpop.f32.mrf.mxu1 }
 0x3d3   : > { %v15658_v45 = vmax.f32 %v10956_v1, %v10957_v37  ;;  %v10617_v46 = vsel %vm8401_vm3, %v10387_v27, -inf  ;;  %v7046_v47 = vmax.f32 %v5742_v28, 0.0  ;;  %v4705_v48 = vadd.f32 %v15581_v12, %v4704_v29  ;;  %v13446_v37 = vld [vmem:[%s13817_s11 + $0x528] sm:$0xff] }
 0x3d4   : > { %v10618_v49 = vmax.f32 %v15646_v53, %v10617_v46  ;;  %v10735_v50 = vsel %vm8401_vm3, %v10441_v40, -inf  ;;  %v7254_v51 = vmax.f32 %v6262_v41, 0.0  ;;  %v5230_v52 = vadd.f32 %v15581_v12, %v5229_v42  ;;  %12896 = vmatmul.msk.bf16.gmra.mxu0 %vm3184_vm2, %v13340_v24  ;;  %13001 = vmatmul.msk.bf16.gmra.mxu1 %vm3184_vm2, %v13445_v25  ;;  %v13549_v46 = vld [vmem:[%s13817_s11 + $0x860] sm:$0xff] }
 0x3d5   : > { %v15667_v54 = vmax.f32 %v10734_v11, %v10735_v50  ;;  %v7878_v56 = vpack.c.bf16 %v7046_v47, %v7046_v47  ;;  %v6631_v57 = vmax.f32 %v4705_v48, 0.0  ;;  %13104 = vmatmul.msk.bf16.gmra.mxu2 %vm3184_vm2, %v13548_v33 }
 0x3d6   : > { %v8086_v58 = vpack.c.bf16 %v7254_v51, %v7254_v51  ;;  %13208 = vmatmul.msk.bf16.gmra.mxu3 %vm3184_vm2, %v13652_v44  ;;  %v6841_v63 = vmax.f32 %v5230_v52, 0.0  ;;  %v13653_v52 = vld [vmem:[%s13817_s11 + $0xba0] sm:$0xff] }
 0x3d7   : > { %v10491_v59 = vunpack.c.l.bf16 %v7878_v56  ;;  %v7463_v61 = vpack.c.bf16 %v6631_v57, %v6631_v57 }
 0x3d8   : > { %v10543_v31 = vunpack.c.l.bf16 %v8086_v58  ;;  %v5744_v0 = vpop.f32.mrf.mxu2  ;;  %v7673_v16 = vpack.c.bf16 %v6841_v63, %v6841_v63 }
 0x3d9   : > { %v10845_v1 = vsel %vm8401_vm3, %v10491_v59, -inf  ;;  %v10388_v3 = vunpack.c.l.bf16 %v7463_v61  ;;  %v5745_v4 = vadd.f32 %v15581_v12, %v5744_v0  ;;  %v6264_v6 = vpop.f32.mrf.mxu3  ;;  %v4706_v53 = vpop.f32.mrf.mxu0 }
 0x3da   : > { %v10846_v7 = vmax.f32 %v10844_v34, %v10845_v1  ;;  %v10959_v8 = vsel %vm8401_vm3, %v10543_v31, -inf  ;;  %v6265_v10 = vadd.f32 %v15581_v12, %v6264_v6  ;;  %v5231_v11 = vpop.f32.mrf.mxu1  ;;  %v4707_v43 = vadd.f32 %v15581_v12, %v4706_v53  ;;  %v13341_v34 = vld [vmem:[%s13817_s11 + $0x1e0] sm:$0xff] }
 0x3db   : > { %v10960_v13 = vmax.f32 %v15658_v45, %v10959_v8  ;;  %v10619_v15 = vsel %vm8401_vm3, %v10388_v3, -inf  ;;  %v7047_v18 = vmax.f32 %v5745_v4, 0.0  ;;  %v5232_v23 = vadd.f32 %v15581_v12, %v5231_v11 }
 0x3dc   : > { %v10620_v19 = vmax.f32 %v10618_v49, %v10619_v15  ;;  %v7255_v20 = vmax.f32 %v6265_v10, 0.0  ;;  %v6632_v25 = vmax.f32 %v4707_v43, 0.0  ;;  %v8271_v26 = vunpack.c.l.bf16 %v7673_v16 }
 0x3dd   : > { %v7879_v22 = vpack.c.bf16 %v7047_v18, %v7047_v18  ;;  %v6842_v28 = vmax.f32 %v5232_v23, 0.0 }
 0x3de   : > { %v8087_v24 = vpack.c.bf16 %v7255_v20, %v7255_v20  ;;  %v7464_v29 = vpack.c.bf16 %v6632_v25, %v6632_v25  ;;  %v8573_v56 = vsel %vm8401_vm3, %v8271_v26, -inf }
 0x3df   : > { %v10492_v27 = vunpack.c.l.bf16 %v7879_v22  ;;  %v7674_v41 = vpack.c.bf16 %v6842_v28, %v6842_v28 }
 0x3e0   : > { %v10544_v30 = vunpack.c.l.bf16 %v8087_v24  ;;  %v5746_v33 = vpop.f32.mrf.mxu2  ;;  %v10389_v49 = vunpack.c.l.bf16 %v7464_v29 }
 0x3e1   : > { %v10847_v40 = vsel %vm8401_vm3, %v10492_v27, -inf  ;;  %v5747_v42 = vadd.f32 %v15581_v12, %v5746_v33  ;;  %v6266_v44 = vpop.f32.mrf.mxu3  ;;  %v4709_v45 = vpop.f32.mrf.mxu0  ;;  %v8272_v58 = vunpack.c.l.bf16 %v7674_v41 }
 0x3e2   : > { %v10848_v47 = vmax.f32 %v10846_v7, %v10847_v40  ;;  %v10961_v48 = vsel %vm8401_vm3, %v10544_v30, -inf  ;;  %v6267_v50 = vadd.f32 %v15581_v12, %v6266_v44  ;;  %v5234_v51 = vpop.f32.mrf.mxu1  ;;  %v10621_v61 = vsel %vm8401_vm3, %v10389_v49, -inf }
 0x3e3   : > { %v10962_v57 = vmax.f32 %v10960_v13, %v10961_v48  ;;  %v7048_v59 = vmax.f32 %v5747_v42, 0.0  ;;  %v4710_v31 = vadd.f32 %v15581_v12, %v4709_v45  ;;  %v5235_v0 = vadd.f32 %v15581_v12, %v5234_v51  ;;  %v13447_v48 = vld [vmem:[%s13817_s11 + $0x530] sm:$0xff] }
 0x3e4   : > { %v7256_v63 = vmax.f32 %v6267_v50, 0.0  ;;  %12897 = vmatmul.msk.bf16.gmra.mxu0 %vm3184_vm2, %v13341_v34  ;;  %13002 = vmatmul.msk.bf16.gmra.mxu1 %vm3184_vm2, %v13446_v37  ;;  %v15693_v1 = vmax.f32 %v10620_v19, %v10621_v61  ;;  %v8574_v3 = vsel %vm8401_vm3, %v8272_v58, -inf  ;;  %v13654_v61 = vld [vmem:[%s13817_s11 + $0xba8] sm:$0xff] }
 0x3e5   : > { %v7880_v4 = vpack.c.bf16 %v7048_v59, %v7048_v59  ;;  %13105 = vmatmul.msk.bf16.gmra.mxu2 %vm3184_vm2, %v13549_v46  ;;  %v8575_v6 = vmax.f32 %v8573_v56, %v8574_v3  ;;  %v6843_v7 = vmax.f32 %v5235_v0, 0.0  ;;  %v6633_v11 = vmax.f32 %v4710_v31, 0.0 }
 0x3e6   : > { %v8088_v53 = vpack.c.bf16 %v7256_v63, %v7256_v63  ;;  %13209 = vmatmul.msk.bf16.gmra.mxu3 %vm3184_vm2, %v13653_v52  ;;  %v13550_v52 = vld [vmem:[%s13817_s11 + $0x868] sm:$0xff] }
 0x3e7   : > { %v10493_v8 = vunpack.c.l.bf16 %v7880_v4  ;;  %v7675_v13 = vpack.c.bf16 %v6843_v7, %v6843_v7  ;;  %v7465_v28 = vpack.c.bf16 %v6633_v11, %v6633_v11 }
 0x3e8   : > { %v10545_v10 = vunpack.c.l.bf16 %v8088_v53  ;;  %v5749_v15 = vpop.f32.mrf.mxu2 }
 0x3e9   : > { %v10849_v16 = vsel %vm8401_vm3, %v10493_v8, -inf  ;;  %v5750_v18 = vadd.f32 %v15581_v12, %v5749_v15  ;;  %v6269_v19 = vpop.f32.mrf.mxu3  ;;  %v4711_v20 = vpop.f32.mrf.mxu0  ;;  %v8273_v23 = vunpack.c.l.bf16 %v7675_v13  ;;  %v8219_v42 = vunpack.c.l.bf16 %v7465_v28 }
 0x3ea   : > { %v15700_v43 = vmax.f32 %v10848_v47, %v10849_v16  ;;  %v10963_v22 = vsel %vm8401_vm3, %v10545_v10, -inf  ;;  %v5236_v24 = vpop.f32.mrf.mxu1  ;;  %v6270_v27 = vadd.f32 %v15581_v12, %v6269_v19  ;;  %v4712_v29 = vadd.f32 %v15581_v12, %v4711_v20  ;;  %v13342_v47 = vld [vmem:[%s13817_s11 + $0x1e8] sm:$0xff] }
 0x3eb   : > { %v15703_v25 = vmax.f32 %v10962_v57, %v10963_v22  ;;  %v7049_v26 = vmax.f32 %v5750_v18, 0.0  ;;  %v8576_v30 = vsel %vm8401_vm3, %v8273_v23, -inf  ;;  %v5237_v40 = vadd.f32 %v15581_v12, %v5236_v24 }
 0x3ec   : > { %v15708_v33 = vmax.f32 %v8575_v6, %v8576_v30  ;;  %v7257_v34 = vmax.f32 %v6270_v27, 0.0  ;;  %v6634_v37 = vmax.f32 %v4712_v29, 0.0  ;;  %v8459_v3 = vsel %vm8401_vm3, %v8219_v42, -inf }
 0x3ed   : > { %v7881_v41 = vpack.c.bf16 %v7049_v26, %v7049_v26  ;;  %v6844_v45 = vmax.f32 %v5237_v40, 0.0 }
 0x3ee   : > { %v7466_v44 = vpack.c.bf16 %v6634_v37, %v6634_v37  ;;  %v8089_v56 = vpack.c.bf16 %v7257_v34, %v7257_v34 }
 0x3ef   : > { %v7676_v58 = vpack.c.bf16 %v6844_v45, %v6844_v45  ;;  %v8323_v63 = vunpack.c.l.bf16 %v7881_v41 }
 0x3f0   : > { %v5751_v46 = vpop.f32.mrf.mxu2  ;;  %v8220_v57 = vunpack.c.l.bf16 %v7466_v44  ;;  %v8375_v8 = vunpack.c.l.bf16 %v8089_v56 }
 0x3f1   : > { %v5752_v49 = vadd.f32 %v15581_v12, %v5751_v46  ;;  %v6271_v50 = vpop.f32.mrf.mxu3  ;;  %v4714_v51 = vpop.f32.mrf.mxu0  ;;  %v8274_v6 = vunpack.c.l.bf16 %v7676_v58  ;;  %v8687_v15 = vsel %vm8401_vm3, %v8323_v63, -inf }
 0x3f2   : > { %v5239_v59 = vpop.f32.mrf.mxu1  ;;  %v6272_v0 = vadd.f32 %v15581_v12, %v6271_v50  ;;  %v8460_v4 = vsel %vm8401_vm3, %v8220_v57, -inf  ;;  %v4715_v13 = vadd.f32 %v15581_v12, %v4714_v51  ;;  %v8801_v29 = vsel %vm8401_vm3, %v8375_v8, -inf  ;;  %v13448_v8 = vld [vmem:[%s13817_s11 + $0x538] sm:$0xff] }
 0x3f3   : > { %v7050_v31 = vmax.f32 %v5752_v49, 0.0  ;;  %v8461_v53 = vmax.f32 %v8459_v3, %v8460_v4  ;;  %v8578_v10 = vsel %vm8401_vm3, %v8274_v6, -inf  ;;  %v5240_v19 = vadd.f32 %v15581_v12, %v5239_v59 }
 0x3f4   : > { %12898 = vmatmul.msk.bf16.gmra.mxu0 %vm3184_vm2, %v13342_v47  ;;  %13003 = vmatmul.msk.bf16.gmra.mxu1 %vm3184_vm2, %v13447_v48  ;;  %v7258_v11 = vmax.f32 %v6272_v0, 0.0  ;;  %v8579_v16 = vmax.f32 %v15708_v33, %v8578_v10  ;;  %v6635_v22 = vmax.f32 %v4715_v13, 0.0 }
 0x3f5   : > { %v7882_v7 = vpack.c.bf16 %v7050_v31, %v7050_v31  ;;  %13106 = vmatmul.msk.bf16.gmra.mxu2 %vm3184_vm2, %v13550_v52  ;;  %v6845_v26 = vmax.f32 %v5240_v19, 0.0  ;;  %v13551_v19 = vld [vmem:[%s13817_s11 + $0x870] sm:$0xff] }
 0x3f6   : > { %13210 = vmatmul.msk.bf16.gmra.mxu3 %vm3184_vm2, %v13654_v61  ;;  %v8090_v20 = vpack.c.bf16 %v7258_v11, %v7258_v11  ;;  %v7467_v40 = vpack.c.bf16 %v6635_v22, %v6635_v22 }
 0x3f7   : > { %v8324_v18 = vunpack.c.l.bf16 %v7882_v7  ;;  %v7677_v33 = vpack.c.bf16 %v6845_v26, %v6845_v26  ;;  %v13343_v7 = vld [vmem:[%s13817_s11 + $0x1f0] sm:$0xff] }
 0x3f8   : > { %v5754_v23 = vpop.f32.mrf.mxu2  ;;  %v8376_v37 = vunpack.c.l.bf16 %v8090_v20  ;;  %v8221_v46 = vunpack.c.l.bf16 %v7467_v40 }
 0x3f9   : > { %v8688_v24 = vsel %vm8401_vm3, %v8324_v18, -inf  ;;  %v5755_v27 = vadd.f32 %v15581_v12, %v5754_v23  ;;  %v6274_v28 = vpop.f32.mrf.mxu3  ;;  %v4716_v30 = vpop.f32.mrf.mxu0  ;;  %v8275_v50 = vunpack.c.l.bf16 %v7677_v33 }
 0x3fa   : > { %v8689_v34 = vmax.f32 %v8687_v15, %v8688_v24  ;;  %v5241_v41 = vpop.f32.mrf.mxu1  ;;  %v6275_v44 = vadd.f32 %v15581_v12, %v6274_v28  ;;  %v8802_v45 = vsel %vm8401_vm3, %v8376_v37, -inf  ;;  %v4717_v47 = vadd.f32 %v15581_v12, %v4716_v30  ;;  %v13655_v24 = vld [vmem:[%s13817_s11 + $0xbb0] sm:$0xff] }
 0x3fb   : > { %v7051_v42 = vmax.f32 %v5755_v27, 0.0  ;;  %v5242_v48 = vadd.f32 %v15581_v12, %v5241_v41  ;;  %v8803_v49 = vmax.f32 %v8801_v29, %v8802_v45  ;;  %v8462_v56 = vsel %vm8401_vm3, %v8221_v46, -inf }
 0x3fc   : > { %v7259_v52 = vmax.f32 %v6275_v44, 0.0  ;;  %v6636_v57 = vmax.f32 %v4717_v47, 0.0  ;;  %v8463_v59 = vmax.f32 %v8461_v53, %v8462_v56  ;;  %v8580_v61 = vsel %vm8401_vm3, %v8275_v50, -inf }
 0x3fd   : > { %v7883_v51 = vpack.c.bf16 %v7051_v42, %v7051_v42  ;;  %v6846_v58 = vmax.f32 %v5242_v48, 0.0  ;;  %v8581_v0 = vmax.f32 %v8579_v16, %v8580_v61 }
 0x3fe   : > { %v8091_v31 = vpack.c.bf16 %v7259_v52, %v7259_v52  ;;  %v7468_v3 = vpack.c.bf16 %v6636_v57, %v6636_v57 }
 0x3ff   : > { %v8325_v63 = vunpack.c.l.bf16 %v7883_v51  ;;  %v7678_v4 = vpack.c.bf16 %v6846_v58, %v6846_v58 }
 0x400   : > { %v5756_v6 = vpop.f32.mrf.mxu2  ;;  %v8377_v11 = vunpack.c.l.bf16 %v8091_v31  ;;  %v8222_v20 = vunpack.c.l.bf16 %v7468_v3 }
 0x401   : > { %v8690_v10 = vsel %vm8401_vm3, %v8325_v63, -inf  ;;  %v5757_v13 = vadd.f32 %v15581_v12, %v5756_v6  ;;  %v6276_v15 = vpop.f32.mrf.mxu3  ;;  %v4719_v18 = vpop.f32.mrf.mxu0  ;;  %v8276_v22 = vunpack.c.l.bf16 %v7678_v4 }
 0x402   : > { %v15742_v53 = vmax.f32 %v8689_v34, %v8690_v10  ;;  %v6277_v16 = vadd.f32 %v15581_v12, %v6276_v15  ;;  %v5244_v23 = vpop.f32.mrf.mxu1  ;;  %v8804_v26 = vsel %vm8401_vm3, %v8377_v11, -inf  ;;  %v4720_v28 = vadd.f32 %v15581_v12, %v4719_v18 }
 0x403   : > { %v7052_v27 = vmax.f32 %v5757_v13, 0.0  ;;  %v5245_v30 = vadd.f32 %v15581_v12, %v5244_v23  ;;  %v8805_v29 = vmax.f32 %v8803_v49, %v8804_v26  ;;  %v8464_v37 = vsel %vm8401_vm3, %v8222_v20, -inf }
 0x404   : > { %v8582_v40 = vsel %vm8401_vm3, %v8276_v22, -inf  ;;  %v7260_v34 = vmax.f32 %v6277_v16, 0.0  ;;  %12899 = vmatmul.msk.bf16.gmra.mxu0 %vm3184_vm2, %v13343_v7  ;;  %13004 = vmatmul.msk.bf16.gmra.mxu1 %vm3184_vm2, %v13448_v8  ;;  %v8465_v41 = vmax.f32 %v8463_v59, %v8464_v37  ;;  %v6637_v44 = vmax.f32 %v4720_v28, 0.0  ;;  %v13344_v28 = vld [vmem:[%s13817_s11 + $0x1f8] sm:$0xff] }
 0x405   : > { %v8583_v33 = vmax.f32 %v8581_v0, %v8582_v40  ;;  %v7884_v42 = vpack.c.bf16 %v7052_v27, %v7052_v27  ;;  %13107 = vmatmul.msk.bf16.gmra.mxu2 %vm3184_vm2, %v13551_v19  ;;  %v6847_v46 = vmax.f32 %v5245_v30, 0.0  ;;  %v13449_v30 = vld [vmem:[%s13817_s11 + $0x540] sm:$0xff] }
 0x406   : > { %v8092_v45 = vpack.c.bf16 %v7260_v34, %v7260_v34  ;;  %13211 = vmatmul.msk.bf16.gmra.mxu3 %vm3184_vm2, %v13655_v24  ;;  %v7469_v48 = vpack.c.bf16 %v6637_v44, %v6637_v44 }
 0x407   : > { %v8326_v47 = vunpack.c.l.bf16 %v7884_v42  ;;  %v7679_v50 = vpack.c.bf16 %v6847_v46, %v6847_v46 }
 0x408   : > { %v8378_v49 = vunpack.c.l.bf16 %v8092_v45  ;;  %v5759_v51 = vpop.f32.mrf.mxu2  ;;  %v8223_v56 = vunpack.c.l.bf16 %v7469_v48  ;;  %v13656_v48 = vld [vmem:[%s13817_s11 + $0xbb8] sm:$0xff] }
 0x409   : > { %v8692_v52 = vsel %vm8401_vm3, %v8326_v47, -inf  ;;  %v5760_v57 = vadd.f32 %v15581_v12, %v5759_v51  ;;  %v6279_v58 = vpop.f32.mrf.mxu3  ;;  %v4721_v59 = vpop.f32.mrf.mxu0  ;;  %v8277_v31 = vunpack.c.l.bf16 %v7679_v50 }
 0x40a   : > { %v8693_v61 = vmax.f32 %v15742_v53, %v8692_v52  ;;  %v8806_v63 = vsel %vm8401_vm3, %v8378_v49, -inf  ;;  %v6280_v0 = vadd.f32 %v15581_v12, %v6279_v58  ;;  %v5246_v3 = vpop.f32.mrf.mxu1  ;;  %v8466_v6 = vsel %vm8401_vm3, %v8223_v56, -inf }
 0x40b   : > { %v8807_v4 = vmax.f32 %v8805_v29, %v8806_v63  ;;  %v7053_v7 = vmax.f32 %v5760_v57, 0.0  ;;  %v4722_v8 = vadd.f32 %v15581_v12, %v4721_v59  ;;  %v15762_v10 = vmax.f32 %v8465_v41, %v8466_v6 }
 0x40c   : > { %v8584_v11 = vsel %vm8401_vm3, %v8277_v31, -inf  ;;  %v7261_v13 = vmax.f32 %v6280_v0, 0.0  ;;  %v5247_v15 = vadd.f32 %v15581_v12, %v5246_v3 }
 0x40d   : > { %v15766_v18 = vmax.f32 %v8583_v33, %v8584_v11  ;;  %v7885_v19 = vpack.c.bf16 %v7053_v7, %v7053_v7  ;;  %v6638_v53 = vmax.f32 %v4722_v8, 0.0  ;;  %v13552_v33 = vld [vmem:[%s13817_s11 + $0x878] sm:$0xff] }
 0x40e   : > { %v8093_v20 = vpack.c.bf16 %v7261_v13, %v7261_v13  ;;  %v6848_v22 = vmax.f32 %v5247_v15, 0.0 }
 0x40f   : > { %v8327_v16 = vunpack.c.l.bf16 %v7885_v19  ;;  %v7470_v23 = vpack.c.bf16 %v6638_v53, %v6638_v53 }
 0x410   : > { %v8379_v24 = vunpack.c.l.bf16 %v8093_v20  ;;  %v7680_v26 = vpack.c.bf16 %v6848_v22, %v6848_v22  ;;  %v5761_v27 = vpop.f32.mrf.mxu2 }
 0x411   : > { %v8694_v29 = vsel %vm8401_vm3, %v8327_v16, -inf  ;;  %v8224_v37 = vunpack.c.l.bf16 %v7470_v23  ;;  %v5762_v40 = vadd.f32 %v15581_v12, %v5761_v27  ;;  %v6281_v34 = vpop.f32.mrf.mxu3  ;;  %v4724_v41 = vpop.f32.mrf.mxu0 }
 0x412   : > { %v15773_v42 = vmax.f32 %v8693_v61, %v8694_v29  ;;  %v8808_v44 = vsel %vm8401_vm3, %v8379_v24, -inf  ;;  %v8278_v45 = vunpack.c.l.bf16 %v7680_v26  ;;  %v6282_v46 = vadd.f32 %v15581_v12, %v6281_v34  ;;  %v5249_v47 = vpop.f32.mrf.mxu1 }
 0x413   : > { %v15778_v49 = vmax.f32 %v8807_v4, %v8808_v44  ;;  %v8468_v50 = vsel %vm8401_vm3, %v8224_v37, -inf  ;;  %v7054_v51 = vmax.f32 %v5762_v40, 0.0  ;;  %v4725_v52 = vadd.f32 %v15581_v12, %v4724_v41 }
 0x414   : > { %v8469_v56 = vmax.f32 %v15762_v10, %v8468_v50  ;;  %v8586_v57 = vsel %vm8401_vm3, %v8278_v45, -inf  ;;  %v7262_v58 = vmax.f32 %v6282_v46, 0.0  ;;  %v5250_v59 = vadd.f32 %v15581_v12, %v5249_v47  ;;  %12900 = vmatmul.msk.bf16.gmra.mxu0 %vm3184_vm2, %v13344_v28  ;;  %13005 = vmatmul.msk.bf16.gmra.mxu1 %vm3184_vm2, %v13449_v30  ;;  %v13345_v50 = vld [vmem:[%s13817_s11 + $0x200] sm:$0xff] }
 0x415   : > { %v8587_v61 = vmax.f32 %v15766_v18, %v8586_v57  ;;  %v7886_v63 = vpack.c.bf16 %v7054_v51, %v7054_v51  ;;  %v6639_v31 = vmax.f32 %v4725_v52, 0.0  ;;  %13108 = vmatmul.msk.bf16.gmra.mxu2 %vm3184_vm2, %v13552_v33  ;;  %v13450_v51 = vld [vmem:[%s13817_s11 + $0x548] sm:$0xff] }
 0x416   : > { %v8094_v0 = vpack.c.bf16 %v7262_v58, %v7262_v58  ;;  %v6849_v3 = vmax.f32 %v5250_v59, 0.0  ;;  %13212 = vmatmul.msk.bf16.gmra.mxu3 %vm3184_vm2, %v13656_v48 }
 0x417   : > { %v8328_v4 = vunpack.c.l.bf16 %v7886_v63  ;;  %v7471_v6 = vpack.c.bf16 %v6639_v31, %v6639_v31 }
 0x418   : > { %v8380_v7 = vunpack.c.l.bf16 %v8094_v0  ;;  %v7681_v8 = vpack.c.bf16 %v6849_v3, %v6849_v3  ;;  %v5764_v10 = vpop.f32.mrf.mxu2 }
 0x419   : > { %v8696_v11 = vsel %vm8401_vm3, %v8328_v4, -inf  ;;  %v8225_v13 = vunpack.c.l.bf16 %v7471_v6  ;;  %v5765_v15 = vadd.f32 %v15581_v12, %v5764_v10  ;;  %v6284_v19 = vpop.f32.mrf.mxu3  ;;  %v4726_v18 = vpop.f32.mrf.mxu0  ;;  %v13657_v6 = vld [vmem:[%s13817_s11 + $0xbc0] sm:$0xff] }
 0x41a   : > { %v8697_v53 = vmax.f32 %v15773_v42, %v8696_v11  ;;  %v8810_v20 = vsel %vm8401_vm3, %v8380_v7, -inf  ;;  %v8279_v22 = vunpack.c.l.bf16 %v7681_v8  ;;  %v6285_v16 = vadd.f32 %v15581_v12, %v6284_v19  ;;  %v5251_v23 = vpop.f32.mrf.mxu1 }
 0x41b   : > { %v8811_v24 = vmax.f32 %v15778_v49, %v8810_v20  ;;  %v8470_v26 = vsel %vm8401_vm3, %v8225_v13, -inf  ;;  %v7055_v27 = vmax.f32 %v5765_v15, 0.0  ;;  %v4727_v28 = vadd.f32 %v15581_v12, %v4726_v18 }
 0x41c   : > { %v15798_v30 = vmax.f32 %v8469_v56, %v8470_v26  ;;  %v8588_v29 = vsel %vm8401_vm3, %v8279_v22, -inf  ;;  %v7263_v37 = vmax.f32 %v6285_v16, 0.0  ;;  %v5252_v40 = vadd.f32 %v15581_v12, %v5251_v23 }
 0x41d   : > { %v15802_v34 = vmax.f32 %v8587_v61, %v8588_v29  ;;  %v7887_v41 = vpack.c.bf16 %v7055_v27, %v7055_v27  ;;  %v6640_v33 = vmax.f32 %v4727_v28, 0.0  ;;  %v13553_v61 = vld [vmem:[%s13817_s11 + $0x880] sm:$0xff] }
 0x41e   : > { %v8095_v42 = vpack.c.bf16 %v7263_v37, %v7263_v37  ;;  %v6850_v44 = vmax.f32 %v5252_v40, 0.0 }
 0x41f   : > { %v8329_v45 = vunpack.c.l.bf16 %v7887_v41  ;;  %v7472_v46 = vpack.c.bf16 %v6640_v33, %v6640_v33 }
 0x420   : > { %v8381_v47 = vunpack.c.l.bf16 %v8095_v42  ;;  %v7682_v48 = vpack.c.bf16 %v6850_v44, %v6850_v44  ;;  %v5766_v49 = vpop.f32.mrf.mxu2 }
 0x421   : > { %v8698_v52 = vsel %vm8401_vm3, %v8329_v45, -inf  ;;  %v8226_v56 = vunpack.c.l.bf16 %v7472_v46  ;;  %v5767_v57 = vadd.f32 %v15581_v12, %v5766_v49  ;;  %v6286_v58 = vpop.f32.mrf.mxu3  ;;  %v4729_v59 = vpop.f32.mrf.mxu0 }
 0x422   : > { %v15809_v63 = vmax.f32 %v8697_v53, %v8698_v52  ;;  %v8812_v31 = vsel %vm8401_vm3, %v8381_v47, -inf  ;;  %v8280_v0 = vunpack.c.l.bf16 %v7682_v48  ;;  %v6287_v3 = vadd.f32 %v15581_v12, %v6286_v58  ;;  %v5254_v4 = vpop.f32.mrf.mxu1 }
 0x423   : > { %v15814_v7 = vmax.f32 %v8811_v24, %v8812_v31  ;;  %v8472_v8 = vsel %vm8401_vm3, %v8226_v56, -inf  ;;  %v7056_v10 = vmax.f32 %v5767_v57, 0.0  ;;  %v4730_v11 = vadd.f32 %v15581_v12, %v4729_v59 }
 0x424   : > { %v8473_v13 = vmax.f32 %v15798_v30, %v8472_v8  ;;  %v8590_v15 = vsel %vm8401_vm3, %v8280_v0, -inf  ;;  %v7264_v19 = vmax.f32 %v6287_v3, 0.0  ;;  %v5255_v18 = vadd.f32 %v15581_v12, %v5254_v4  ;;  %12901 = vmatmul.msk.bf16.gmra.mxu0 %vm3184_vm2, %v13345_v50  ;;  %13006 = vmatmul.msk.bf16.gmra.mxu1 %vm3184_vm2, %v13450_v51  ;;  %v13346_v8 = vld [vmem:[%s13817_s11 + $0x208] sm:$0xff] }
 0x425   : > { %v8591_v53 = vmax.f32 %v15802_v34, %v8590_v15  ;;  %v7888_v20 = vpack.c.bf16 %v7056_v10, %v7056_v10  ;;  %v6641_v22 = vmax.f32 %v4730_v11, 0.0  ;;  %13109 = vmatmul.msk.bf16.gmra.mxu2 %vm3184_vm2, %v13553_v61  ;;  %v13451_v10 = vld [vmem:[%s13817_s11 + $0x550] sm:$0xff] }
 0x426   : > { %v8096_v16 = vpack.c.bf16 %v7264_v19, %v7264_v19  ;;  %v6851_v23 = vmax.f32 %v5255_v18, 0.0  ;;  %13213 = vmatmul.msk.bf16.gmra.mxu3 %vm3184_vm2, %v13657_v6 }
 0x427   : > { %v8330_v24 = vunpack.c.l.bf16 %v7888_v20  ;;  %v7473_v26 = vpack.c.bf16 %v6641_v22, %v6641_v22 }
 0x428   : > { %v8382_v27 = vunpack.c.l.bf16 %v8096_v16  ;;  %v7683_v28 = vpack.c.bf16 %v6851_v23, %v6851_v23  ;;  %v5769_v30 = vpop.f32.mrf.mxu2  ;;  %v15851_v23 = vld [vmem:[%s17625_s2] ss:$0 sm:$0xff] }
 0x429   : > { %v8700_v29 = vsel %vm8401_vm3, %v8330_v24, -inf  ;;  %v8227_v37 = vunpack.c.l.bf16 %v7473_v26  ;;  %v5770_v40 = vadd.f32 %v15581_v12, %v5769_v30  ;;  %v6289_v41 = vpop.f32.mrf.mxu3  ;;  %v4731_v34 = vpop.f32.mrf.mxu0 }
 0x42a   : > { %v8701_v33 = vmax.f32 %v15809_v63, %v8700_v29  ;;  %v8814_v42 = vsel %vm8401_vm3, %v8382_v27, -inf  ;;  %v8281_v44 = vunpack.c.l.bf16 %v7683_v28  ;;  %v6290_v45 = vadd.f32 %v15581_v12, %v6289_v41  ;;  %v5256_v46 = vpop.f32.mrf.mxu1  ;;  %v13658_v27 = vld [vmem:[%s13817_s11 + $0xbc8] sm:$0xff] }
 0x42b   : > { %v8815_v47 = vmax.f32 %v15814_v7, %v8814_v42  ;;  %v8474_v48 = vsel %vm8401_vm3, %v8227_v37, -inf  ;;  %v7057_v49 = vmax.f32 %v5770_v40, 0.0  ;;  %v4732_v50 = vadd.f32 %v15581_v12, %v4731_v34 }
 0x42c   : > { %v15834_v51 = vmax.f32 %v8473_v13, %v8474_v48  ;;  %v8592_v52 = vsel %vm8401_vm3, %v8281_v44, -inf  ;;  %v7265_v56 = vmax.f32 %v6290_v45, 0.0  ;;  %v5257_v57 = vadd.f32 %v15581_v12, %v5256_v46 }
 0x42d   : > { %v15838_v58 = vmax.f32 %v8591_v53, %v8592_v52  ;;  %v7889_v59 = vpack.c.bf16 %v7057_v49, %v7057_v49  ;;  %v6642_v61 = vmax.f32 %v4732_v50, 0.0  ;;  %v13554_v53 = vld [vmem:[%s13817_s11 + $0x888] sm:$0xff] }
 0x42e   : > { %v8097_v63 = vpack.c.bf16 %v7265_v56, %v7265_v56  ;;  %v6852_v31 = vmax.f32 %v5257_v57, 0.0 }
 0x42f   : > { %v8331_v0 = vunpack.c.l.bf16 %v7889_v59  ;;  %v7474_v3 = vpack.c.bf16 %v6642_v61, %v6642_v61 }
 0x430   : > { %v8383_v4 = vunpack.c.l.bf16 %v8097_v63  ;;  %v7684_v6 = vpack.c.bf16 %v6852_v31, %v6852_v31  ;;  %v5771_v7 = vpop.f32.mrf.mxu2 }
 0x431   : > { %v8702_v11 = vsel %vm8401_vm3, %v8331_v0, -inf  ;;  %v8228_v13 = vunpack.c.l.bf16 %v7474_v3  ;;  %v5772_v15 = vadd.f32 %v15581_v12, %v5771_v7  ;;  %v6291_v19 = vpop.f32.mrf.mxu3  ;;  %v4734_v18 = vpop.f32.mrf.mxu0 }
 0x432   : > { %v15845_v20 = vmax.f32 %v8701_v33, %v8702_v11  ;;  %v8816_v22 = vsel %vm8401_vm3, %v8383_v4, -inf  ;;  %v8282_v16 = vunpack.c.l.bf16 %v7684_v6  ;;  %v6292_v24 = vadd.f32 %v15851_v23, %v6291_v19  ;;  %v5259_v26 = vpop.f32.mrf.mxu1 }
 0x433   : > { %v15855_v28 = vmax.f32 %v8815_v47, %v8816_v22  ;;  %v8476_v12 = vsel %vm8401_vm3, %v8228_v13, -inf  ;;  %v7058_v30 = vmax.f32 %v5772_v15, 0.0  ;;  %v4735_v29 = vadd.f32 %v15851_v23, %v4734_v18 }
 0x434   : > { %v8477_v37 = vmax.f32 %v15834_v51, %v8476_v12  ;;  %v8594_v40 = vsel %vm8401_vm3, %v8282_v16, -inf  ;;  %v7266_v41 = vmax.f32 %v6292_v24, 0.0  ;;  %v5260_v34 = vadd.f32 %v15851_v23, %v5259_v26  ;;  %12902 = vmatmul.msk.bf16.gmra.mxu0 %vm3184_vm2, %v13346_v8  ;;  %13007 = vmatmul.msk.bf16.gmra.mxu1 %vm3184_vm2, %v13451_v10  ;;  %v13347_v12 = vld [vmem:[%s13817_s11 + $0x210] sm:$0xff] }
 0x435   : > { %v8595_v33 = vmax.f32 %v15838_v58, %v8594_v40  ;;  %v7890_v42 = vpack.c.bf16 %v7058_v30, %v7058_v30  ;;  %v6643_v44 = vmax.f32 %v4735_v29, 0.0  ;;  %13110 = vmatmul.msk.bf16.gmra.mxu2 %vm3184_vm2, %v13554_v53  ;;  %v13452_v30 = vld [vmem:[%s13817_s11 + $0x558] sm:$0xff] }
 0x436   : > { %v8098_v45 = vpack.c.bf16 %v7266_v41, %v7266_v41  ;;  %v6853_v46 = vmax.f32 %v5260_v34, 0.0  ;;  %13214 = vmatmul.msk.bf16.gmra.mxu3 %vm3184_vm2, %v13658_v27 }
 0x437   : > { %v8332_v47 = vunpack.c.l.bf16 %v7890_v42  ;;  %v7475_v48 = vpack.c.bf16 %v6643_v44, %v6643_v44 }
 0x438   : > { %v8384_v49 = vunpack.c.l.bf16 %v8098_v45  ;;  %v7685_v50 = vpack.c.bf16 %v6853_v46, %v6853_v46  ;;  %v5774_v51 = vpop.f32.mrf.mxu2 }
 0x439   : > { %v8704_v52 = vsel %vm8401_vm3, %v8332_v47, -inf  ;;  %v8229_v56 = vunpack.c.l.bf16 %v7475_v48  ;;  %v5775_v57 = vadd.f32 %v15851_v23, %v5774_v51  ;;  %v6294_v59 = vpop.f32.mrf.mxu3  ;;  %v4736_v58 = vpop.f32.mrf.mxu0  ;;  %v13659_v48 = vld [vmem:[%s13817_s11 + $0xbd0] sm:$0xff] }
 0x43a   : > { %v8705_v61 = vmax.f32 %v15845_v20, %v8704_v52  ;;  %v8818_v63 = vsel %vm8401_vm3, %v8384_v49, -inf  ;;  %v8283_v31 = vunpack.c.l.bf16 %v7685_v50  ;;  %v6295_v0 = vadd.f32 %v15851_v23, %v6294_v59  ;;  %v5261_v3 = vpop.f32.mrf.mxu1 }
 0x43b   : > { %v8819_v4 = vmax.f32 %v15855_v28, %v8818_v63  ;;  %v8478_v6 = vsel %vm8401_vm3, %v8229_v56, -inf  ;;  %v7059_v7 = vmax.f32 %v5775_v57, 0.0  ;;  %v4737_v8 = vadd.f32 %v15851_v23, %v4736_v58 }
 0x43c   : > { %v15875_v10 = vmax.f32 %v8477_v37, %v8478_v6  ;;  %v8596_v11 = vsel %vm8401_vm3, %v8283_v31, -inf  ;;  %v7267_v13 = vmax.f32 %v6295_v0, 0.0  ;;  %v5262_v15 = vadd.f32 %v15851_v23, %v5261_v3 }
 0x43d   : > { %v15879_v19 = vmax.f32 %v8595_v33, %v8596_v11  ;;  %v7891_v18 = vpack.c.bf16 %v7059_v7, %v7059_v7  ;;  %v6644_v53 = vmax.f32 %v4737_v8, 0.0  ;;  %v13555_v33 = vld [vmem:[%s13817_s11 + $0x890] sm:$0xff] }
 0x43e   : > { %v8099_v20 = vpack.c.bf16 %v7267_v13, %v7267_v13  ;;  %v6854_v22 = vmax.f32 %v5262_v15, 0.0 }
 0x43f   : > { %v8333_v16 = vunpack.c.l.bf16 %v7891_v18  ;;  %v7476_v24 = vpack.c.bf16 %v6644_v53, %v6644_v53 }
 0x440   : > { %v8385_v26 = vunpack.c.l.bf16 %v8099_v20  ;;  %v7686_v27 = vpack.c.bf16 %v6854_v22, %v6854_v22  ;;  %v5776_v28 = vpop.f32.mrf.mxu2 }
 0x441   : > { %v8706_v29 = vsel %vm8401_vm3, %v8333_v16, -inf  ;;  %v8230_v37 = vunpack.c.l.bf16 %v7476_v24  ;;  %v5777_v40 = vadd.f32 %v15851_v23, %v5776_v28  ;;  %v6296_v41 = vpop.f32.mrf.mxu3  ;;  %v4739_v34 = vpop.f32.mrf.mxu0 }
 0x442   : > { %v15886_v42 = vmax.f32 %v8705_v61, %v8706_v29  ;;  %v8820_v44 = vsel %vm8401_vm3, %v8385_v26, -inf  ;;  %v8284_v45 = vunpack.c.l.bf16 %v7686_v27  ;;  %v6297_v46 = vadd.f32 %v15851_v23, %v6296_v41  ;;  %v5264_v47 = vpop.f32.mrf.mxu1 }
 0x443   : > { %v15891_v49 = vmax.f32 %v8819_v4, %v8820_v44  ;;  %v8480_v50 = vsel %vm8401_vm3, %v8230_v37, -inf  ;;  %v7060_v51 = vmax.f32 %v5777_v40, 0.0  ;;  %v4740_v52 = vadd.f32 %v15851_v23, %v4739_v34 }
 0x444   : > { %v8481_v56 = vmax.f32 %v15875_v10, %v8480_v50  ;;  %v8598_v57 = vsel %vm8401_vm3, %v8284_v45, -inf  ;;  %v7268_v59 = vmax.f32 %v6297_v46, 0.0  ;;  %v5265_v58 = vadd.f32 %v15851_v23, %v5264_v47  ;;  %12903 = vmatmul.msk.bf16.gmra.mxu0 %vm3184_vm2, %v13347_v12  ;;  %13008 = vmatmul.msk.bf16.gmra.mxu1 %vm3184_vm2, %v13452_v30  ;;  %v13348_v50 = vld [vmem:[%s13817_s11 + $0x218] sm:$0xff] }
 0x445   : > { %v8599_v61 = vmax.f32 %v15879_v19, %v8598_v57  ;;  %v7892_v63 = vpack.c.bf16 %v7060_v51, %v7060_v51  ;;  %v6645_v31 = vmax.f32 %v4740_v52, 0.0  ;;  %13111 = vmatmul.msk.bf16.gmra.mxu2 %vm3184_vm2, %v13555_v33  ;;  %v13453_v51 = vld [vmem:[%s13817_s11 + $0x560] sm:$0xff] }
 0x446   : > { %v8100_v0 = vpack.c.bf16 %v7268_v59, %v7268_v59  ;;  %v6855_v3 = vmax.f32 %v5265_v58, 0.0  ;;  %13215 = vmatmul.msk.bf16.gmra.mxu3 %vm3184_vm2, %v13659_v48 }
 0x447   : > { %v8334_v4 = vunpack.c.l.bf16 %v7892_v63  ;;  %v7477_v6 = vpack.c.bf16 %v6645_v31, %v6645_v31 }
 0x448   : > { %v8386_v7 = vunpack.c.l.bf16 %v8100_v0  ;;  %v7687_v8 = vpack.c.bf16 %v6855_v3, %v6855_v3  ;;  %v5779_v10 = vpop.f32.mrf.mxu2 }
 0x449   : > { %v8708_v11 = vsel %vm8401_vm3, %v8334_v4, -inf  ;;  %v8231_v13 = vunpack.c.l.bf16 %v7477_v6  ;;  %v5780_v15 = vadd.f32 %v15851_v23, %v5779_v10  ;;  %v6299_v18 = vpop.f32.mrf.mxu3  ;;  %v4741_v19 = vpop.f32.mrf.mxu0  ;;  %v13660_v6 = vld [vmem:[%s13817_s11 + $0xbd8] sm:$0xff] }
 0x44a   : > { %v8709_v53 = vmax.f32 %v15886_v42, %v8708_v11  ;;  %v8822_v20 = vsel %vm8401_vm3, %v8386_v7, -inf  ;;  %v8285_v22 = vunpack.c.l.bf16 %v7687_v8  ;;  %v6300_v16 = vadd.f32 %v15851_v23, %v6299_v18  ;;  %v5266_v24 = vpop.f32.mrf.mxu1 }
 0x44b   : > { %v8823_v26 = vmax.f32 %v15891_v49, %v8822_v20  ;;  %v8482_v27 = vsel %vm8401_vm3, %v8231_v13, -inf  ;;  %v7061_v28 = vmax.f32 %v5780_v15, 0.0  ;;  %v4742_v12 = vadd.f32 %v15851_v23, %v4741_v19 }
 0x44c   : > { %v15911_v30 = vmax.f32 %v8481_v56, %v8482_v27  ;;  %v8600_v29 = vsel %vm8401_vm3, %v8285_v22, -inf  ;;  %v7269_v37 = vmax.f32 %v6300_v16, 0.0  ;;  %v5267_v40 = vadd.f32 %v15851_v23, %v5266_v24 }
 0x44d   : > { %v15915_v41 = vmax.f32 %v8599_v61, %v8600_v29  ;;  %v7893_v34 = vpack.c.bf16 %v7061_v28, %v7061_v28  ;;  %v6646_v33 = vmax.f32 %v4742_v12, 0.0  ;;  %v13556_v61 = vld [vmem:[%s13817_s11 + $0x898] sm:$0xff] }
 0x44e   : > { %v8101_v42 = vpack.c.bf16 %v7269_v37, %v7269_v37  ;;  %v6856_v44 = vmax.f32 %v5267_v40, 0.0 }
 0x44f   : > { %v8335_v45 = vunpack.c.l.bf16 %v7893_v34  ;;  %v7478_v46 = vpack.c.bf16 %v6646_v33, %v6646_v33 }
 0x450   : > { %v8387_v47 = vunpack.c.l.bf16 %v8101_v42  ;;  %v7688_v48 = vpack.c.bf16 %v6856_v44, %v6856_v44  ;;  %v5781_v49 = vpop.f32.mrf.mxu2 }
 0x451   : > { %v8710_v52 = vsel %vm8401_vm3, %v8335_v45, -inf  ;;  %v8232_v56 = vunpack.c.l.bf16 %v7478_v46  ;;  %v5782_v57 = vadd.f32 %v15851_v23, %v5781_v49  ;;  %v6301_v59 = vpop.f32.mrf.mxu3  ;;  %v4744_v58 = vpop.f32.mrf.mxu0 }
 0x452   : > { %v15922_v63 = vmax.f32 %v8709_v53, %v8710_v52  ;;  %v8824_v31 = vsel %vm8401_vm3, %v8387_v47, -inf  ;;  %v8286_v0 = vunpack.c.l.bf16 %v7688_v48  ;;  %v6302_v3 = vadd.f32 %v15851_v23, %v6301_v59  ;;  %v5269_v4 = vpop.f32.mrf.mxu1 }
 0x453   : > { %v15927_v7 = vmax.f32 %v8823_v26, %v8824_v31  ;;  %v8484_v8 = vsel %vm8401_vm3, %v8232_v56, -inf  ;;  %v7062_v10 = vmax.f32 %v5782_v57, 0.0  ;;  %v4745_v11 = vadd.f32 %v15851_v23, %v4744_v58 }
 0x454   : > { %v8485_v13 = vmax.f32 %v15911_v30, %v8484_v8  ;;  %v8602_v15 = vsel %vm8401_vm3, %v8286_v0, -inf  ;;  %v7270_v18 = vmax.f32 %v6302_v3, 0.0  ;;  %v5270_v19 = vadd.f32 %v15851_v23, %v5269_v4  ;;  %12904 = vmatmul.msk.bf16.gmra.mxu0 %vm3184_vm2, %v13348_v50  ;;  %13009 = vmatmul.msk.bf16.gmra.mxu1 %vm3184_vm2, %v13453_v51  ;;  %v13349_v8 = vld [vmem:[%s13817_s11 + $0x220] sm:$0xff] }
 0x455   : > { %v8603_v53 = vmax.f32 %v15915_v41, %v8602_v15  ;;  %v7894_v20 = vpack.c.bf16 %v7062_v10, %v7062_v10  ;;  %v6647_v22 = vmax.f32 %v4745_v11, 0.0  ;;  %13112 = vmatmul.msk.bf16.gmra.mxu2 %vm3184_vm2, %v13556_v61  ;;  %v13454_v10 = vld [vmem:[%s13817_s11 + $0x568] sm:$0xff] }
 0x456   : > { %v8102_v16 = vpack.c.bf16 %v7270_v18, %v7270_v18  ;;  %v6857_v24 = vmax.f32 %v5270_v19, 0.0  ;;  %13216 = vmatmul.msk.bf16.gmra.mxu3 %vm3184_vm2, %v13660_v6 }
 0x457   : > { %v8336_v26 = vunpack.c.l.bf16 %v7894_v20  ;;  %v7479_v27 = vpack.c.bf16 %v6647_v22, %v6647_v22 }
 0x458   : > { %v8388_v28 = vunpack.c.l.bf16 %v8102_v16  ;;  %v7689_v12 = vpack.c.bf16 %v6857_v24, %v6857_v24  ;;  %v5784_v30 = vpop.f32.mrf.mxu2 }
 0x459   : > { %v8712_v29 = vsel %vm8401_vm3, %v8336_v26, -inf  ;;  %v8233_v37 = vunpack.c.l.bf16 %v7479_v27  ;;  %v5785_v40 = vadd.f32 %v15851_v23, %v5784_v30  ;;  %v6304_v34 = vpop.f32.mrf.mxu3  ;;  %v4746_v41 = vpop.f32.mrf.mxu0  ;;  %v13661_v27 = vld [vmem:[%s13817_s11 + $0xbe0] sm:$0xff] }
 0x45a   : > { %v8713_v33 = vmax.f32 %v15922_v63, %v8712_v29  ;;  %v8826_v42 = vsel %vm8401_vm3, %v8388_v28, -inf  ;;  %v8287_v44 = vunpack.c.l.bf16 %v7689_v12  ;;  %v6305_v45 = vadd.f32 %v15851_v23, %v6304_v34  ;;  %v5271_v46 = vpop.f32.mrf.mxu1 }
 0x45b   : > { %v8827_v47 = vmax.f32 %v15927_v7, %v8826_v42  ;;  %v8486_v48 = vsel %vm8401_vm3, %v8233_v37, -inf  ;;  %v7063_v49 = vmax.f32 %v5785_v40, 0.0  ;;  %v4747_v50 = vadd.f32 %v15851_v23, %v4746_v41 }
 0x45c   : > { %v15947_v51 = vmax.f32 %v8485_v13, %v8486_v48  ;;  %v8604_v52 = vsel %vm8401_vm3, %v8287_v44, -inf  ;;  %v7271_v56 = vmax.f32 %v6305_v45, 0.0  ;;  %v5272_v57 = vadd.f32 %v15851_v23, %v5271_v46 }
 0x45d   : > { %v15951_v59 = vmax.f32 %v8603_v53, %v8604_v52  ;;  %v7895_v58 = vpack.c.bf16 %v7063_v49, %v7063_v49  ;;  %v6648_v61 = vmax.f32 %v4747_v50, 0.0  ;;  %v13557_v53 = vld [vmem:[%s13817_s11 + $0x8a0] sm:$0xff] }
 0x45e   : > { %v8103_v63 = vpack.c.bf16 %v7271_v56, %v7271_v56  ;;  %v6858_v31 = vmax.f32 %v5272_v57, 0.0 }
 0x45f   : > { %v8337_v0 = vunpack.c.l.bf16 %v7895_v58  ;;  %v7480_v3 = vpack.c.bf16 %v6648_v61, %v6648_v61 }
 0x460   : > { %v8389_v4 = vunpack.c.l.bf16 %v8103_v63  ;;  %v7690_v6 = vpack.c.bf16 %v6858_v31, %v6858_v31  ;;  %v5786_v7 = vpop.f32.mrf.mxu2 }
 0x461   : > { %v8714_v11 = vsel %vm8401_vm3, %v8337_v0, -inf  ;;  %v8234_v13 = vunpack.c.l.bf16 %v7480_v3  ;;  %v5787_v15 = vadd.f32 %v15851_v23, %v5786_v7  ;;  %v6306_v18 = vpop.f32.mrf.mxu3  ;;  %v4749_v19 = vpop.f32.mrf.mxu0 }
 0x462   : > { %v15958_v20 = vmax.f32 %v8713_v33, %v8714_v11  ;;  %v8828_v22 = vsel %vm8401_vm3, %v8389_v4, -inf  ;;  %v8288_v16 = vunpack.c.l.bf16 %v7690_v6  ;;  %v6307_v24 = vadd.f32 %v15851_v23, %v6306_v18  ;;  %v5274_v26 = vpop.f32.mrf.mxu1 }
 0x463   : > { %v15963_v28 = vmax.f32 %v8827_v47, %v8828_v22  ;;  %v8488_v12 = vsel %vm8401_vm3, %v8234_v13, -inf  ;;  %v7064_v30 = vmax.f32 %v5787_v15, 0.0  ;;  %v4750_v29 = vadd.f32 %v15851_v23, %v4749_v19 }
 0x464   : > { %v8489_v37 = vmax.f32 %v15947_v51, %v8488_v12  ;;  %v8606_v40 = vsel %vm8401_vm3, %v8288_v16, -inf  ;;  %v7272_v34 = vmax.f32 %v6307_v24, 0.0  ;;  %v5275_v41 = vadd.f32 %v15851_v23, %v5274_v26  ;;  %12905 = vmatmul.msk.bf16.gmra.mxu0 %vm3184_vm2, %v13349_v8  ;;  %13010 = vmatmul.msk.bf16.gmra.mxu1 %vm3184_vm2, %v13454_v10  ;;  %v13350_v12 = vld [vmem:[%s13817_s11 + $0x228] sm:$0xff] }
 0x465   : > { %v8607_v33 = vmax.f32 %v15951_v59, %v8606_v40  ;;  %v7896_v42 = vpack.c.bf16 %v7064_v30, %v7064_v30  ;;  %v6649_v44 = vmax.f32 %v4750_v29, 0.0  ;;  %13113 = vmatmul.msk.bf16.gmra.mxu2 %vm3184_vm2, %v13557_v53  ;;  %v13455_v30 = vld [vmem:[%s13817_s11 + $0x570] sm:$0xff] }
 0x466   : > { %v8104_v45 = vpack.c.bf16 %v7272_v34, %v7272_v34  ;;  %v6859_v46 = vmax.f32 %v5275_v41, 0.0  ;;  %13217 = vmatmul.msk.bf16.gmra.mxu3 %vm3184_vm2, %v13661_v27 }
 0x467   : > { %v8338_v47 = vunpack.c.l.bf16 %v7896_v42  ;;  %v7481_v48 = vpack.c.bf16 %v6649_v44, %v6649_v44 }
 0x468   : > { %v8390_v49 = vunpack.c.l.bf16 %v8104_v45  ;;  %v7691_v50 = vpack.c.bf16 %v6859_v46, %v6859_v46  ;;  %v5789_v51 = vpop.f32.mrf.mxu2 }
 0x469   : > { %v8716_v52 = vsel %vm8401_vm3, %v8338_v47, -inf  ;;  %v8235_v56 = vunpack.c.l.bf16 %v7481_v48  ;;  %v5790_v57 = vadd.f32 %v15851_v23, %v5789_v51  ;;  %v6309_v58 = vpop.f32.mrf.mxu3  ;;  %v4751_v59 = vpop.f32.mrf.mxu0  ;;  %v13662_v48 = vld [vmem:[%s13817_s11 + $0xbe8] sm:$0xff] }
 0x46a   : > { %v8717_v61 = vmax.f32 %v15958_v20, %v8716_v52  ;;  %v8830_v63 = vsel %vm8401_vm3, %v8390_v49, -inf  ;;  %v8289_v31 = vunpack.c.l.bf16 %v7691_v50  ;;  %v6310_v0 = vadd.f32 %v15851_v23, %v6309_v58  ;;  %v5276_v3 = vpop.f32.mrf.mxu1 }
 0x46b   : > { %v8831_v4 = vmax.f32 %v15963_v28, %v8830_v63  ;;  %v8490_v6 = vsel %vm8401_vm3, %v8235_v56, -inf  ;;  %v7065_v7 = vmax.f32 %v5790_v57, 0.0  ;;  %v4752_v8 = vadd.f32 %v15851_v23, %v4751_v59 }
 0x46c   : > { %v15983_v10 = vmax.f32 %v8489_v37, %v8490_v6  ;;  %v8608_v11 = vsel %vm8401_vm3, %v8289_v31, -inf  ;;  %v7273_v13 = vmax.f32 %v6310_v0, 0.0  ;;  %v5277_v15 = vadd.f32 %v15851_v23, %v5276_v3 }
 0x46d   : > { %v15987_v18 = vmax.f32 %v8607_v33, %v8608_v11  ;;  %v7897_v19 = vpack.c.bf16 %v7065_v7, %v7065_v7  ;;  %v6650_v53 = vmax.f32 %v4752_v8, 0.0  ;;  %v13558_v33 = vld [vmem:[%s13817_s11 + $0x8a8] sm:$0xff] }
 0x46e   : > { %v8105_v20 = vpack.c.bf16 %v7273_v13, %v7273_v13  ;;  %v6860_v22 = vmax.f32 %v5277_v15, 0.0 }
 0x46f   : > { %v8339_v16 = vunpack.c.l.bf16 %v7897_v19  ;;  %v7482_v24 = vpack.c.bf16 %v6650_v53, %v6650_v53 }
 0x470   : > { %v8391_v26 = vunpack.c.l.bf16 %v8105_v20  ;;  %v7692_v27 = vpack.c.bf16 %v6860_v22, %v6860_v22  ;;  %v5791_v28 = vpop.f32.mrf.mxu2 }
 0x471   : > { %v8718_v29 = vsel %vm8401_vm3, %v8339_v16, -inf  ;;  %v8236_v37 = vunpack.c.l.bf16 %v7482_v24  ;;  %v5792_v40 = vadd.f32 %v15851_v23, %v5791_v28  ;;  %v6311_v34 = vpop.f32.mrf.mxu3  ;;  %v4754_v41 = vpop.f32.mrf.mxu0 }
 0x472   : > { %v15994_v42 = vmax.f32 %v8717_v61, %v8718_v29  ;;  %v8832_v44 = vsel %vm8401_vm3, %v8391_v26, -inf  ;;  %v8290_v45 = vunpack.c.l.bf16 %v7692_v27  ;;  %v6312_v46 = vadd.f32 %v15851_v23, %v6311_v34  ;;  %v5279_v47 = vpop.f32.mrf.mxu1 }
 0x473   : > { %v15999_v49 = vmax.f32 %v8831_v4, %v8832_v44  ;;  %v8492_v50 = vsel %vm8401_vm3, %v8236_v37, -inf  ;;  %v7066_v51 = vmax.f32 %v5792_v40, 0.0  ;;  %v4755_v52 = vadd.f32 %v15851_v23, %v4754_v41 }
 0x474   : > { %v8493_v56 = vmax.f32 %v15983_v10, %v8492_v50  ;;  %v8610_v57 = vsel %vm8401_vm3, %v8290_v45, -inf  ;;  %v7274_v58 = vmax.f32 %v6312_v46, 0.0  ;;  %v5280_v59 = vadd.f32 %v15851_v23, %v5279_v47  ;;  %12906 = vmatmul.msk.bf16.gmra.mxu0 %vm3184_vm2, %v13350_v12  ;;  %13011 = vmatmul.msk.bf16.gmra.mxu1 %vm3184_vm2, %v13455_v30  ;;  %v13351_v50 = vld [vmem:[%s13817_s11 + $0x230] sm:$0xff] }
 0x475   : > { %v8611_v61 = vmax.f32 %v15987_v18, %v8610_v57  ;;  %v7898_v63 = vpack.c.bf16 %v7066_v51, %v7066_v51  ;;  %v6651_v31 = vmax.f32 %v4755_v52, 0.0  ;;  %13114 = vmatmul.msk.bf16.gmra.mxu2 %vm3184_vm2, %v13558_v33  ;;  %v13456_v51 = vld [vmem:[%s13817_s11 + $0x578] sm:$0xff] }
 0x476   : > { %v8106_v0 = vpack.c.bf16 %v7274_v58, %v7274_v58  ;;  %v6861_v3 = vmax.f32 %v5280_v59, 0.0  ;;  %13218 = vmatmul.msk.bf16.gmra.mxu3 %vm3184_vm2, %v13662_v48 }
 0x477   : > { %v8340_v4 = vunpack.c.l.bf16 %v7898_v63  ;;  %v7483_v6 = vpack.c.bf16 %v6651_v31, %v6651_v31 }
 0x478   : > { %v8392_v7 = vunpack.c.l.bf16 %v8106_v0  ;;  %v7693_v8 = vpack.c.bf16 %v6861_v3, %v6861_v3  ;;  %v5794_v10 = vpop.f32.mrf.mxu2 }
 0x479   : > { %v8720_v11 = vsel %vm8401_vm3, %v8340_v4, -inf  ;;  %v8237_v13 = vunpack.c.l.bf16 %v7483_v6  ;;  %v5795_v15 = vadd.f32 %v15851_v23, %v5794_v10  ;;  %v6314_v19 = vpop.f32.mrf.mxu3  ;;  %v4756_v18 = vpop.f32.mrf.mxu0  ;;  %v13663_v6 = vld [vmem:[%s13817_s11 + $0xbf0] sm:$0xff] }
 0x47a   : > { %v8721_v53 = vmax.f32 %v15994_v42, %v8720_v11  ;;  %v8834_v20 = vsel %vm8401_vm3, %v8392_v7, -inf  ;;  %v8291_v22 = vunpack.c.l.bf16 %v7693_v8  ;;  %v6315_v16 = vadd.f32 %v15851_v23, %v6314_v19  ;;  %v5281_v24 = vpop.f32.mrf.mxu1 }
 0x47b   : > { %v8835_v26 = vmax.f32 %v15999_v49, %v8834_v20  ;;  %v8494_v27 = vsel %vm8401_vm3, %v8237_v13, -inf  ;;  %v7067_v28 = vmax.f32 %v5795_v15, 0.0  ;;  %v4757_v12 = vadd.f32 %v15851_v23, %v4756_v18 }
 0x47c   : > { %v16019_v30 = vmax.f32 %v8493_v56, %v8494_v27  ;;  %v8612_v29 = vsel %vm8401_vm3, %v8291_v22, -inf  ;;  %v7275_v37 = vmax.f32 %v6315_v16, 0.0  ;;  %v5282_v40 = vadd.f32 %v15851_v23, %v5281_v24 }
 0x47d   : > { %v16023_v34 = vmax.f32 %v8611_v61, %v8612_v29  ;;  %v7899_v41 = vpack.c.bf16 %v7067_v28, %v7067_v28  ;;  %v6652_v33 = vmax.f32 %v4757_v12, 0.0  ;;  %v13559_v61 = vld [vmem:[%s13817_s11 + $0x8b0] sm:$0xff] }
 0x47e   : > { %v8107_v42 = vpack.c.bf16 %v7275_v37, %v7275_v37  ;;  %v6862_v44 = vmax.f32 %v5282_v40, 0.0 }
 0x47f   : > { %v8341_v45 = vunpack.c.l.bf16 %v7899_v41  ;;  %v7484_v46 = vpack.c.bf16 %v6652_v33, %v6652_v33 }
 0x480   : > { %v8393_v47 = vunpack.c.l.bf16 %v8107_v42  ;;  %v7694_v48 = vpack.c.bf16 %v6862_v44, %v6862_v44  ;;  %v5796_v49 = vpop.f32.mrf.mxu2 }
 0x481   : > { %v8722_v52 = vsel %vm8401_vm3, %v8341_v45, -inf  ;;  %v8238_v56 = vunpack.c.l.bf16 %v7484_v46  ;;  %v5797_v57 = vadd.f32 %v15851_v23, %v5796_v49  ;;  %v6316_v58 = vpop.f32.mrf.mxu3  ;;  %v4759_v59 = vpop.f32.mrf.mxu0 }
 0x482   : > { %v16030_v63 = vmax.f32 %v8721_v53, %v8722_v52  ;;  %v8836_v31 = vsel %vm8401_vm3, %v8393_v47, -inf  ;;  %v8292_v0 = vunpack.c.l.bf16 %v7694_v48  ;;  %v6317_v3 = vadd.f32 %v15851_v23, %v6316_v58  ;;  %v5284_v4 = vpop.f32.mrf.mxu1 }
 0x483   : > { %v16035_v7 = vmax.f32 %v8835_v26, %v8836_v31  ;;  %v8496_v8 = vsel %vm8401_vm3, %v8238_v56, -inf  ;;  %v7068_v10 = vmax.f32 %v5797_v57, 0.0  ;;  %v4760_v11 = vadd.f32 %v15851_v23, %v4759_v59 }
 0x484   : > { %v8497_v13 = vmax.f32 %v16019_v30, %v8496_v8  ;;  %v8614_v15 = vsel %vm8401_vm3, %v8292_v0, -inf  ;;  %v7276_v19 = vmax.f32 %v6317_v3, 0.0  ;;  %v5285_v18 = vadd.f32 %v15851_v23, %v5284_v4  ;;  %12907 = vmatmul.msk.bf16.gmra.mxu0 %vm3184_vm2, %v13351_v50  ;;  %13012 = vmatmul.msk.bf16.gmra.mxu1 %vm3184_vm2, %v13456_v51  ;;  %v13352_v8 = vld [vmem:[%s13817_s11 + $0x238] sm:$0xff] }
 0x485   : > { %v8615_v53 = vmax.f32 %v16023_v34, %v8614_v15  ;;  %v7900_v20 = vpack.c.bf16 %v7068_v10, %v7068_v10  ;;  %v6653_v22 = vmax.f32 %v4760_v11, 0.0  ;;  %13115 = vmatmul.msk.bf16.gmra.mxu2 %vm3184_vm2, %v13559_v61  ;;  %v13457_v10 = vld [vmem:[%s13817_s11 + $0x580] sm:$0xff] }
 0x486   : > { %v8108_v16 = vpack.c.bf16 %v7276_v19, %v7276_v19  ;;  %v6863_v24 = vmax.f32 %v5285_v18, 0.0  ;;  %13219 = vmatmul.msk.bf16.gmra.mxu3 %vm3184_vm2, %v13663_v6 }
 0x487   : > { %v8342_v26 = vunpack.c.l.bf16 %v7900_v20  ;;  %v7485_v27 = vpack.c.bf16 %v6653_v22, %v6653_v22 }
 0x488   : > { %v8394_v28 = vunpack.c.l.bf16 %v8108_v16  ;;  %v7695_v12 = vpack.c.bf16 %v6863_v24, %v6863_v24  ;;  %v5799_v30 = vpop.f32.mrf.mxu2 }
 0x489   : > { %v8724_v29 = vsel %vm8401_vm3, %v8342_v26, -inf  ;;  %v8239_v37 = vunpack.c.l.bf16 %v7485_v27  ;;  %v5800_v40 = vadd.f32 %v15851_v23, %v5799_v30  ;;  %v6319_v41 = vpop.f32.mrf.mxu3  ;;  %v4761_v34 = vpop.f32.mrf.mxu0  ;;  %v13664_v27 = vld [vmem:[%s13817_s11 + $0xbf8] sm:$0xff] }
 0x48a   : > { %v8725_v33 = vmax.f32 %v16030_v63, %v8724_v29  ;;  %v8838_v42 = vsel %vm8401_vm3, %v8394_v28, -inf  ;;  %v8293_v44 = vunpack.c.l.bf16 %v7695_v12  ;;  %v6320_v45 = vadd.f32 %v15851_v23, %v6319_v41  ;;  %v5286_v46 = vpop.f32.mrf.mxu1 }
 0x48b   : > { %v8839_v47 = vmax.f32 %v16035_v7, %v8838_v42  ;;  %v8498_v48 = vsel %vm8401_vm3, %v8239_v37, -inf  ;;  %v7069_v49 = vmax.f32 %v5800_v40, 0.0  ;;  %v4762_v50 = vadd.f32 %v15851_v23, %v4761_v34 }
 0x48c   : > { %v16055_v51 = vmax.f32 %v8497_v13, %v8498_v48  ;;  %v8616_v52 = vsel %vm8401_vm3, %v8293_v44, -inf  ;;  %v7277_v56 = vmax.f32 %v6320_v45, 0.0  ;;  %v5287_v57 = vadd.f32 %v15851_v23, %v5286_v46 }
 0x48d   : > { %v16059_v58 = vmax.f32 %v8615_v53, %v8616_v52  ;;  %v7901_v59 = vpack.c.bf16 %v7069_v49, %v7069_v49  ;;  %v6654_v61 = vmax.f32 %v4762_v50, 0.0  ;;  %v13560_v53 = vld [vmem:[%s13817_s11 + $0x8b8] sm:$0xff] }
 0x48e   : > { %v8109_v63 = vpack.c.bf16 %v7277_v56, %v7277_v56  ;;  %v6864_v31 = vmax.f32 %v5287_v57, 0.0 }
 0x48f   : > { %v8343_v0 = vunpack.c.l.bf16 %v7901_v59  ;;  %v7486_v3 = vpack.c.bf16 %v6654_v61, %v6654_v61 }
 0x490   : > { %v8395_v4 = vunpack.c.l.bf16 %v8109_v63  ;;  %v7696_v6 = vpack.c.bf16 %v6864_v31, %v6864_v31  ;;  %v5801_v7 = vpop.f32.mrf.mxu2 }
 0x491   : > { %v8726_v11 = vsel %vm8401_vm3, %v8343_v0, -inf  ;;  %v8240_v13 = vunpack.c.l.bf16 %v7486_v3  ;;  %v5802_v15 = vadd.f32 %v15851_v23, %v5801_v7  ;;  %v6321_v19 = vpop.f32.mrf.mxu3  ;;  %v4764_v18 = vpop.f32.mrf.mxu0 }
 0x492   : > { %v16066_v20 = vmax.f32 %v8725_v33, %v8726_v11  ;;  %v8840_v22 = vsel %vm8401_vm3, %v8395_v4, -inf  ;;  %v8294_v16 = vunpack.c.l.bf16 %v7696_v6  ;;  %v6322_v24 = vadd.f32 %v15851_v23, %v6321_v19  ;;  %v5289_v26 = vpop.f32.mrf.mxu1 }
 0x493   : > { %v16071_v28 = vmax.f32 %v8839_v47, %v8840_v22  ;;  %v8500_v12 = vsel %vm8401_vm3, %v8240_v13, -inf  ;;  %v7070_v30 = vmax.f32 %v5802_v15, 0.0  ;;  %v4765_v29 = vadd.f32 %v15851_v23, %v4764_v18 }
 0x494   : > { %v8501_v37 = vmax.f32 %v16055_v51, %v8500_v12  ;;  %v8618_v40 = vsel %vm8401_vm3, %v8294_v16, -inf  ;;  %v7278_v41 = vmax.f32 %v6322_v24, 0.0  ;;  %v5290_v34 = vadd.f32 %v15851_v23, %v5289_v26  ;;  %12908 = vmatmul.msk.bf16.gmra.mxu0 %vm3184_vm2, %v13352_v8  ;;  %13013 = vmatmul.msk.bf16.gmra.mxu1 %vm3184_vm2, %v13457_v10  ;;  %v13353_v12 = vld [vmem:[%s13817_s11 + $0x240] sm:$0xff] }
 0x495   : > { %v8619_v33 = vmax.f32 %v16059_v58, %v8618_v40  ;;  %v7902_v42 = vpack.c.bf16 %v7070_v30, %v7070_v30  ;;  %v6655_v44 = vmax.f32 %v4765_v29, 0.0  ;;  %13116 = vmatmul.msk.bf16.gmra.mxu2 %vm3184_vm2, %v13560_v53  ;;  %v13458_v30 = vld [vmem:[%s13817_s11 + $0x588] sm:$0xff] }
 0x496   : > { %v8110_v45 = vpack.c.bf16 %v7278_v41, %v7278_v41  ;;  %v6865_v46 = vmax.f32 %v5290_v34, 0.0  ;;  %13220 = vmatmul.msk.bf16.gmra.mxu3 %vm3184_vm2, %v13664_v27 }
 0x497   : > { %v8344_v47 = vunpack.c.l.bf16 %v7902_v42  ;;  %v7487_v48 = vpack.c.bf16 %v6655_v44, %v6655_v44 }
 0x498   : > { %v8396_v49 = vunpack.c.l.bf16 %v8110_v45  ;;  %v7697_v50 = vpack.c.bf16 %v6865_v46, %v6865_v46  ;;  %v5804_v51 = vpop.f32.mrf.mxu2 }
 0x499   : > { %v8728_v52 = vsel %vm8401_vm3, %v8344_v47, -inf  ;;  %v8241_v56 = vunpack.c.l.bf16 %v7487_v48  ;;  %v5805_v57 = vadd.f32 %v15851_v23, %v5804_v51  ;;  %v6324_v59 = vpop.f32.mrf.mxu3  ;;  %v4766_v58 = vpop.f32.mrf.mxu0  ;;  %v13665_v48 = vld [vmem:[%s13817_s11 + $0xc00] sm:$0xff] }
 0x49a   : > { %v8729_v61 = vmax.f32 %v16066_v20, %v8728_v52  ;;  %v8842_v63 = vsel %vm8401_vm3, %v8396_v49, -inf  ;;  %v8295_v31 = vunpack.c.l.bf16 %v7697_v50  ;;  %v6325_v0 = vadd.f32 %v15851_v23, %v6324_v59  ;;  %v5291_v3 = vpop.f32.mrf.mxu1 }
 0x49b   : > { %v8843_v4 = vmax.f32 %v16071_v28, %v8842_v63  ;;  %v8502_v6 = vsel %vm8401_vm3, %v8241_v56, -inf  ;;  %v7071_v7 = vmax.f32 %v5805_v57, 0.0  ;;  %v4767_v8 = vadd.f32 %v15851_v23, %v4766_v58 }
 0x49c   : > { %v16091_v10 = vmax.f32 %v8501_v37, %v8502_v6  ;;  %v8620_v11 = vsel %vm8401_vm3, %v8295_v31, -inf  ;;  %v7279_v13 = vmax.f32 %v6325_v0, 0.0  ;;  %v5292_v15 = vadd.f32 %v15851_v23, %v5291_v3 }
 0x49d   : > { %v8621_v19 = vmax.f32 %v8619_v33, %v8620_v11  ;;  %v7903_v18 = vpack.c.bf16 %v7071_v7, %v7071_v7  ;;  %v6656_v53 = vmax.f32 %v4767_v8, 0.0  ;;  %v13561_v33 = vld [vmem:[%s13817_s11 + $0x8c0] sm:$0xff] }
 0x49e   : > { %v8111_v20 = vpack.c.bf16 %v7279_v13, %v7279_v13  ;;  %v6866_v22 = vmax.f32 %v5292_v15, 0.0 }
 0x49f   : > { %v8345_v16 = vunpack.c.l.bf16 %v7903_v18  ;;  %v7488_v24 = vpack.c.bf16 %v6656_v53, %v6656_v53 }
 0x4a0   : > { %v8397_v26 = vunpack.c.l.bf16 %v8111_v20  ;;  %v7698_v27 = vpack.c.bf16 %v6866_v22, %v6866_v22  ;;  %v5806_v28 = vpop.f32.mrf.mxu2 }
 0x4a1   : > { %v8730_v29 = vsel %vm8401_vm3, %v8345_v16, -inf  ;;  %v8242_v37 = vunpack.c.l.bf16 %v7488_v24  ;;  %v5807_v40 = vadd.f32 %v15851_v23, %v5806_v28  ;;  %v6326_v41 = vpop.f32.mrf.mxu3  ;;  %v4769_v34 = vpop.f32.mrf.mxu0 }
 0x4a2   : > { %v16100_v42 = vmax.f32 %v8729_v61, %v8730_v29  ;;  %v8844_v44 = vsel %vm8401_vm3, %v8397_v26, -inf  ;;  %v8296_v45 = vunpack.c.l.bf16 %v7698_v27  ;;  %v6327_v46 = vadd.f32 %v15851_v23, %v6326_v41  ;;  %v5294_v47 = vpop.f32.mrf.mxu1 }
 0x4a3   : > { %v16105_v49 = vmax.f32 %v8843_v4, %v8844_v44  ;;  %v8504_v50 = vsel %vm8401_vm3, %v8242_v37, -inf  ;;  %v7072_v51 = vmax.f32 %v5807_v40, 0.0  ;;  %v4770_v52 = vadd.f32 %v15851_v23, %v4769_v34 }
 0x4a4   : > { %v8505_v56 = vmax.f32 %v16091_v10, %v8504_v50  ;;  %v8622_v57 = vsel %vm8401_vm3, %v8296_v45, -inf  ;;  %v7280_v59 = vmax.f32 %v6327_v46, 0.0  ;;  %v5295_v58 = vadd.f32 %v15851_v23, %v5294_v47  ;;  %12909 = vmatmul.msk.bf16.gmra.mxu0 %vm3184_vm2, %v13353_v12  ;;  %13014 = vmatmul.msk.bf16.gmra.mxu1 %vm3184_vm2, %v13458_v30  ;;  %v13459_v50 = vld [vmem:[%s13817_s11 + $0x590] sm:$0xff] }
 0x4a5   : > { %v16114_v61 = vmax.f32 %v8621_v19, %v8622_v57  ;;  %v7904_v63 = vpack.c.bf16 %v7072_v51, %v7072_v51  ;;  %v6657_v31 = vmax.f32 %v4770_v52, 0.0  ;;  %13117 = vmatmul.msk.bf16.gmra.mxu2 %vm3184_vm2, %v13561_v33  ;;  %v8453_v10 = vrot.slane %v14345_v62, 4 }
 0x4a6   : > { %v8112_v0 = vpack.c.bf16 %v7280_v59, %v7280_v59  ;;  %13221 = vmatmul.msk.bf16.gmra.mxu3 %vm3184_vm2, %v13665_v48  ;;  %v6867_v6 = vmax.f32 %v5295_v58, 0.0  ;;  %v13562_v58 = vld [vmem:[%s13817_s11 + $0x8c8] sm:$0xff] }
 0x4a7   : > { %v8346_v3 = vunpack.c.l.bf16 %v7904_v63  ;;  %v7489_v4 = vpack.c.bf16 %v6657_v31, %v6657_v31  ;;  %v8454_v37 = vmax.f32 %v14345_v62, %v8453_v10 }
 0x4a8   : > { %v8398_v7 = vunpack.c.l.bf16 %v8112_v0  ;;  %v5809_v8 = vpop.f32.mrf.mxu2  ;;  %v7699_v27 = vpack.c.bf16 %v6867_v6, %v6867_v6 }
 0x4a9   : > { %v8732_v11 = vsel %vm8401_vm3, %v8346_v3, -inf  ;;  %v8243_v13 = vunpack.c.l.bf16 %v7489_v4  ;;  %v5810_v15 = vadd.f32 %v15851_v23, %v5809_v8  ;;  %v6329_v19 = vpop.f32.mrf.mxu3  ;;  %v4771_v18 = vpop.f32.mrf.mxu0  ;;  %v8455_v51 = vrot.slane %v8454_v37, 2  ;;  %v16138_v3 = vld [vmem:[%s17625_s2] ss:$0 sm:$0xff] }
 0x4aa   : > { %v8733_v53 = vmax.f32 %v16100_v42, %v8732_v11  ;;  %v8846_v20 = vsel %vm8401_vm3, %v8398_v7, -inf  ;;  %v6330_v22 = vadd.f32 %v15851_v23, %v6329_v19  ;;  %v5296_v16 = vpop.f32.mrf.mxu1  ;;  %v4772_v29 = vadd.f32 %v15851_v23, %v4771_v18  ;;  %v13666_v7 = vld [vmem:[%s13817_s11 + $0xc08] sm:$0xff] }
 0x4ab   : > { %v8847_v24 = vmax.f32 %v16105_v49, %v8846_v20  ;;  %v8506_v26 = vsel %vm8401_vm3, %v8243_v13, -inf  ;;  %v7073_v28 = vmax.f32 %v5810_v15, 0.0  ;;  %v5297_v41 = vadd.f32 %v15851_v23, %v5296_v16  ;;  %v13354_v49 = vld [vmem:[%s13817_s11 + $0x248] sm:$0xff] }
 0x4ac   : > { %v8507_v12 = vmax.f32 %v8505_v56, %v8506_v26  ;;  %v7281_v30 = vmax.f32 %v6330_v22, 0.0  ;;  %v6658_v33 = vmax.f32 %v4772_v29, 0.0  ;;  %v8946_v42 = vunpack.c.l.bf16 %v7699_v27 }
 0x4ad   : > { %v7905_v40 = vpack.c.bf16 %v7073_v28, %v7073_v28  ;;  %v6868_v45 = vmax.f32 %v5297_v41, 0.0 }
 0x4ae   : > { %v8113_v34 = vpack.c.bf16 %v7281_v30, %v7281_v30  ;;  %v7490_v47 = vpack.c.bf16 %v6658_v33, %v6658_v33  ;;  %v9247_v8 = vsel %vm8401_vm3, %v8946_v42, -inf }
 0x4af   : > { %v8347_v44 = vunpack.c.l.bf16 %v7905_v40  ;;  %v7700_v56 = vpack.c.bf16 %v6868_v45, %v6868_v45 }
 0x4b0   : > { %v8399_v46 = vunpack.c.l.bf16 %v8113_v34  ;;  %v5811_v48 = vpop.f32.mrf.mxu2  ;;  %v8244_v0 = vunpack.c.l.bf16 %v7490_v47 }
 0x4b1   : > { %v8734_v52 = vsel %vm8401_vm3, %v8347_v44, -inf  ;;  %v5812_v62 = vadd.f32 %v15851_v23, %v5811_v48  ;;  %v6331_v57 = vpop.f32.mrf.mxu3  ;;  %v4774_v59 = vpop.f32.mrf.mxu0  ;;  %v8947_v23 = vunpack.c.l.bf16 %v7700_v56 }
 0x4b2   : > { %v8735_v63 = vmax.f32 %v8733_v53, %v8734_v52  ;;  %v8848_v31 = vsel %vm8401_vm3, %v8399_v46, -inf  ;;  %v6332_v4 = vadd.f32 %v16138_v3, %v6331_v57  ;;  %v5299_v6 = vpop.f32.mrf.mxu1  ;;  %v8508_v13 = vsel %vm8401_vm3, %v8244_v0, -inf }
 0x4b3   : > { %v8849_v10 = vmax.f32 %v8847_v24, %v8848_v31  ;;  %v7074_v11 = vmax.f32 %v5812_v62, 0.0  ;;  %v4775_v19 = vadd.f32 %v16138_v3, %v4774_v59  ;;  %v5300_v18 = vadd.f32 %v16138_v3, %v5299_v6 }
 0x4b4   : > { %v7282_v15 = vmax.f32 %v6332_v4, 0.0  ;;  %12910 = vmatmul.msk.bf16.gmra.mxu0 %vm3184_vm2, %v13354_v49  ;;  %13015 = vmatmul.msk.bf16.gmra.mxu1 %vm3184_vm2, %v13459_v50  ;;  %v8456_v53 = vmax.f32 %v8454_v37, %v8455_v51  ;;  %v8509_v20 = vmax.f32 %v8507_v12, %v8508_v13  ;;  %v9248_v22 = vsel %vm8401_vm3, %v8947_v23, -inf }
 0x4b5   : > { %v7906_v16 = vpack.c.bf16 %v7074_v11, %v7074_v11  ;;  %13118 = vmatmul.msk.bf16.gmra.mxu2 %vm3184_vm2, %v13562_v58  ;;  %v9249_v24 = vmax.f32 %v9247_v8, %v9248_v22  ;;  %v6869_v27 = vmax.f32 %v5300_v18, 0.0  ;;  %v6659_v40 = vmax.f32 %v4775_v19, 0.0  ;;  %v13460_v19 = vld [vmem:[%s13817_s11 + $0x598] sm:$0xff] }
 0x4b6   : > { %v8114_v26 = vpack.c.bf16 %v7282_v15, %v7282_v15  ;;  %13222 = vmatmul.msk.bf16.gmra.mxu3 %vm3184_vm2, %v13666_v7  ;;  %v8510_v28 = vrot.slane %v8509_v20, 4  ;;  %v8457_v33 = vrot.slane %v8456_v53, 1  ;;  %v13355_v15 = vld [vmem:[%s13817_s11 + $0x250] sm:$0xff] }
 0x4b7   : > { %v8348_v30 = vunpack.c.l.bf16 %v7906_v16  ;;  %v7701_v41 = vpack.c.bf16 %v6869_v27, %v6869_v27  ;;  %v7491_v62 = vpack.c.bf16 %v6659_v40, %v6659_v40 }
 0x4b8   : > { %v8400_v29 = vunpack.c.l.bf16 %v8114_v26  ;;  %v5814_v34 = vpop.f32.mrf.mxu2  ;;  %v8511_v42 = vmax.f32 %v8509_v20, %v8510_v28  ;;  %v8458_v58 = vmax.f32 %v8456_v53, %v8457_v33 }
 0x4b9   : > { %v8736_v12 = vsel %vm8401_vm3, %v8348_v30, -inf  ;;  %v5815_v37 = vadd.f32 %v16138_v3, %v5814_v34  ;;  %v6334_v44 = vpop.f32.mrf.mxu3  ;;  %v4776_v45 = vpop.f32.mrf.mxu0  ;;  %v8948_v48 = vunpack.c.l.bf16 %v7701_v41 }
 0x4ba   : > { %v16153_v46 = vmax.f32 %v8735_v63, %v8736_v12  ;;  %v8850_v47 = vsel %vm8401_vm3, %v8400_v29, -inf  ;;  %v5301_v49 = vpop.f32.mrf.mxu1  ;;  %v8512_v50 = vrot.slane %v8511_v42, 2  ;;  %v6335_v56 = vadd.f32 %v16138_v3, %v6334_v44  ;;  %v13667_v29 = vld [vmem:[%s13817_s11 + $0xc10] sm:$0xff] }
 0x4bb   : > { %v16156_v51 = vmax.f32 %v8849_v10, %v8850_v47  ;;  %v7075_v52 = vmax.f32 %v5815_v37, 0.0  ;;  %v9250_v57 = vsel %vm8401_vm3, %v8948_v48, -inf  ;;  %v4777_v59 = vadd.f32 %v16138_v3, %v4776_v45 }
 0x4bc   : > { %v8513_v63 = vmax.f32 %v8511_v42, %v8512_v50  ;;  %v16161_v31 = vmax.f32 %v9249_v24, %v9250_v57  ;;  %v7283_v0 = vmax.f32 %v6335_v56, 0.0  ;;  %v5302_v6 = vadd.f32 %v16138_v3, %v5301_v49  ;;  %v13563_v24 = vld [vmem:[%s13817_s11 + $0x8d0] sm:$0xff] }
 0x4bd   : > { %v6660_v4 = vmax.f32 %v4777_v59, 0.0  ;;  %v7907_v8 = vpack.c.bf16 %v7075_v52, %v7075_v52  ;;  %v8894_v10 = vunpack.c.l.bf16 %v7491_v62  ;;  %v8858_v18 = vpack.c.bf16 %v8458_v58, %v8458_v58 }
 0x4be   : > { %v8514_v7 = vrot.slane %v8513_v63, 1  ;;  %v6870_v11 = vmax.f32 %v5302_v6, 0.0  ;;  %v8115_v26 = vpack.c.bf16 %v7283_v0, %v7283_v0 }
 0x4bf   : > { %v7492_v23 = vpack.c.bf16 %v6660_v4, %v6660_v4  ;;  %v8998_v41 = vunpack.c.l.bf16 %v7907_v8  ;;  %v9133_v42 = vsel %vm8401_vm3, %v8894_v10, -inf  ;;  %v9604_v44 = vunpack.c.l.b16 %v8858_v18 }
 0x4c0   : > { %v5816_v13 = vpop.f32.mrf.mxu2  ;;  %v8515_v20 = vmax.f32 %v8513_v63, %v8514_v7  ;;  %v7702_v28 = vpack.c.bf16 %v6870_v11, %v6870_v11  ;;  %v9050_v49 = vunpack.c.l.bf16 %v8115_v26 }
 0x4c1   : > { %v5817_v53 = vadd.f32 %v16138_v3, %v5816_v13  ;;  %v6336_v22 = vpop.f32.mrf.mxu3  ;;  %v4779_v16 = vpop.f32.mrf.mxu0  ;;  %v8895_v27 = vunpack.c.l.bf16 %v7492_v23  ;;  %v9361_v57 = vsel %vm8401_vm3, %v8998_v41, -inf }
 0x4c2   : > { %v5304_v30 = vpop.f32.mrf.mxu1  ;;  %v8859_v40 = vpack.c.bf16 %v8515_v20, %v8515_v20  ;;  %v6337_v33 = vadd.f32 %v16138_v3, %v6336_v22  ;;  %v8949_v37 = vunpack.c.l.bf16 %v7702_v28  ;;  %v4780_v56 = vadd.f32 %v16138_v3, %v4779_v16 }
 0x4c3   : > { %v7076_v34 = vmax.f32 %v5817_v53, 0.0  ;;  %v9134_v12 = vsel %vm8401_vm3, %v8895_v27, -inf  ;;  %v5305_v4 = vadd.f32 %v16138_v3, %v5304_v30  ;;  %v9475_v11 = vsel %vm8401_vm3, %v9050_v49, -inf  ;;  %v13356_v49 = vld [vmem:[%s13817_s11 + $0x258] sm:$0xff] }
 0x4c4   : > { %12911 = vmatmul.msk.bf16.gmra.mxu0 %vm3184_vm2, %v13355_v15  ;;  %13016 = vmatmul.msk.bf16.gmra.mxu1 %vm3184_vm2, %v13460_v19  ;;  %v9605_v45 = vunpack.c.l.b16 %v8859_v40  ;;  %v9135_v47 = vmax.f32 %v9133_v42, %v9134_v12  ;;  %v9252_v50 = vsel %vm8401_vm3, %v8949_v37, -inf  ;;  %v7284_v52 = vmax.f32 %v6337_v33, 0.0 }
 0x4c5   : > { %v7908_v48 = vpack.c.bf16 %v7076_v34, %v7076_v34  ;;  %13119 = vmatmul.msk.bf16.gmra.mxu2 %vm3184_vm2, %v13563_v24  ;;  %v9253_v59 = vmax.f32 %v16161_v31, %v9252_v50  ;;  %v6661_v0 = vmax.f32 %v4780_v56, 0.0  ;;  %v6871_v20 = vmax.f32 %v5305_v4, 0.0  ;;  %v13461_v50 = vld [vmem:[%s13817_s11 + $0x5a0] sm:$0xff] }
 0x4c6   : > { %13223 = vmatmul.msk.bf16.gmra.mxu3 %vm3184_vm2, %v13667_v29  ;;  %v16179_v62 = vsel %vm9559_vm4, %v9605_v45, %v9604_v44  ;;  %v8116_v63 = vpack.c.bf16 %v7284_v52, %v7284_v52 }
 0x4c7   : > { %v8999_v58 = vunpack.c.l.bf16 %v7908_v48  ;;  %v7493_v19 = vpack.c.bf16 %v6661_v0, %v6661_v0  ;;  %v7703_v28 = vpack.c.bf16 %v6871_v20, %v6871_v20 }
 0x4c8   : > { %v5819_v6 = vpop.f32.mrf.mxu2  ;;  %v9051_v15 = vunpack.c.l.bf16 %v8116_v63 }
 0x4c9   : > { %v9362_v7 = vsel %vm8401_vm3, %v8999_v58, -inf  ;;  %v5820_v8 = vadd.f32 %v16138_v3, %v5819_v6  ;;  %v6339_v10 = vpop.f32.mrf.mxu3  ;;  %v4781_v23 = vpop.f32.mrf.mxu0  ;;  %v8896_v16 = vunpack.c.l.bf16 %v7493_v19  ;;  %v8950_v42 = vunpack.c.l.bf16 %v7703_v28 }
 0x4ca   : > { %v9363_v13 = vmax.f32 %v9361_v57, %v9362_v7  ;;  %v5306_v18 = vpop.f32.mrf.mxu1  ;;  %v6340_v53 = vadd.f32 %v16138_v3, %v6339_v10  ;;  %v9476_v22 = vsel %vm8401_vm3, %v9051_v15, -inf  ;;  %v4782_v24 = vadd.f32 %v16138_v3, %v4781_v23  ;;  %v13668_v23 = vld [vmem:[%s13817_s11 + $0xc18] sm:$0xff] }
 0x4cb   : > { %v7077_v31 = vmax.f32 %v5820_v8, 0.0  ;;  %v5307_v26 = vadd.f32 %v16138_v3, %v5306_v18  ;;  %v9477_v27 = vmax.f32 %v9475_v11, %v9476_v22  ;;  %v9136_v40 = vsel %vm8401_vm3, %v8896_v16, -inf }
 0x4cc   : > { %v7285_v29 = vmax.f32 %v6340_v53, 0.0  ;;  %v6662_v41 = vmax.f32 %v4782_v24, 0.0  ;;  %v16192_v33 = vmax.f32 %v9135_v47, %v9136_v40  ;;  %v9254_v52 = vsel %vm8401_vm3, %v8950_v42, -inf  ;;  %v13564_v47 = vld [vmem:[%s13817_s11 + $0x8d8] sm:$0xff] }
 0x4cd   : > { %v7909_v30 = vpack.c.bf16 %v7077_v31, %v7077_v31  ;;  %v6872_v34 = vmax.f32 %v5307_v26, 0.0  ;;  %v9255_v4 = vmax.f32 %v9253_v59, %v9254_v52 }
 0x4ce   : > { %v8117_v37 = vpack.c.bf16 %v7285_v29, %v7285_v29  ;;  %v7494_v44 = vpack.c.bf16 %v6662_v41, %v6662_v41 }
 0x4cf   : > { %v9000_v12 = vunpack.c.l.bf16 %v7909_v30  ;;  %v7704_v45 = vpack.c.bf16 %v6872_v34, %v6872_v34 }
 0x4d0   : > { %v5821_v48 = vpop.f32.mrf.mxu2  ;;  %v9052_v57 = vunpack.c.l.bf16 %v8117_v37  ;;  %v8897_v7 = vunpack.c.l.bf16 %v7494_v44 }
 0x4d1   : > { %v9364_v56 = vsel %vm8401_vm3, %v9000_v12, -inf  ;;  %v5822_v58 = vadd.f32 %v16138_v3, %v5821_v48  ;;  %v6341_v63 = vpop.f32.mrf.mxu3  ;;  %v4784_v0 = vpop.f32.mrf.mxu0  ;;  %v8951_v8 = vunpack.c.l.bf16 %v7704_v45 }
 0x4d2   : > { %v16200_v6 = vmax.f32 %v9363_v13, %v9364_v56  ;;  %v5309_v10 = vpop.f32.mrf.mxu1  ;;  %v9478_v11 = vsel %vm8401_vm3, %v9052_v57, -inf  ;;  %v6342_v19 = vadd.f32 %v16138_v3, %v6341_v63  ;;  %v4785_v18 = vadd.f32 %v16138_v3, %v4784_v0 }
 0x4d3   : > { %v7078_v15 = vmax.f32 %v5822_v58, 0.0  ;;  %v16206_v20 = vmax.f32 %v9477_v27, %v9478_v11  ;;  %v9138_v31 = vsel %vm8401_vm3, %v8897_v7, -inf  ;;  %v9256_v53 = vsel %vm8401_vm3, %v8951_v8, -inf }
 0x4d4   : > { %v5310_v59 = vadd.f32 %v16138_v3, %v5309_v10  ;;  %12912 = vmatmul.msk.bf16.gmra.mxu0 %vm3184_vm2, %v13356_v49  ;;  %13017 = vmatmul.msk.bf16.gmra.mxu1 %vm3184_vm2, %v13461_v50  ;;  %v9139_v13 = vmax.f32 %v16192_v33, %v9138_v31  ;;  %v9257_v22 = vmax.f32 %v9255_v4, %v9256_v53  ;;  %v7286_v24 = vmax.f32 %v6342_v19, 0.0  ;;  %v13357_v53 = vld [vmem:[%s13817_s11 + $0x260] sm:$0xff] }
 0x4d5   : > { %v7910_v16 = vpack.c.bf16 %v7078_v15, %v7078_v15  ;;  %13120 = vmatmul.msk.bf16.gmra.mxu2 %vm3184_vm2, %v13564_v47  ;;  %v6663_v26 = vmax.f32 %v4785_v18, 0.0 }
 0x4d6   : > { %v6873_v27 = vmax.f32 %v5310_v59, 0.0  ;;  %13224 = vmatmul.msk.bf16.gmra.mxu3 %vm3184_vm2, %v13668_v23  ;;  %v8118_v30 = vpack.c.bf16 %v7286_v24, %v7286_v24  ;;  %v13462_v59 = vld [vmem:[%s13817_s11 + $0x5a8] sm:$0xff] }
 0x4d7   : > { %v9001_v28 = vunpack.c.l.bf16 %v7910_v16  ;;  %v7495_v29 = vpack.c.bf16 %v6663_v26, %v6663_v26 }
 0x4d8   : > { %v7705_v40 = vpack.c.bf16 %v6873_v27, %v6873_v27  ;;  %v5824_v41 = vpop.f32.mrf.mxu2  ;;  %v9053_v42 = vunpack.c.l.bf16 %v8118_v30  ;;  %v13565_v27 = vld [vmem:[%s13817_s11 + $0x8e0] sm:$0xff] }
 0x4d9   : > { %v9366_v34 = vsel %vm8401_vm3, %v9001_v28, -inf  ;;  %v5825_v12 = vadd.f32 %v16138_v3, %v5824_v41  ;;  %v6344_v33 = vpop.f32.mrf.mxu3  ;;  %v4786_v37 = vpop.f32.mrf.mxu0  ;;  %v8898_v45 = vunpack.c.l.bf16 %v7495_v29 }
 0x4da   : > { %v9367_v44 = vmax.f32 %v16200_v6, %v9366_v34  ;;  %v8952_v48 = vunpack.c.l.bf16 %v7705_v40  ;;  %v6345_v49 = vadd.f32 %v16138_v3, %v6344_v33  ;;  %v5311_v50 = vpop.f32.mrf.mxu1  ;;  %v9480_v52 = vsel %vm8401_vm3, %v9053_v42, -inf  ;;  %v13669_v34 = vld [vmem:[%s13817_s11 + $0xc20] sm:$0xff] }
 0x4db   : > { %v7079_v56 = vmax.f32 %v5825_v12, 0.0  ;;  %v4787_v57 = vadd.f32 %v16138_v3, %v4786_v37  ;;  %v5312_v58 = vadd.f32 %v16138_v3, %v5311_v50  ;;  %v9481_v63 = vmax.f32 %v16206_v20, %v9480_v52 }
 0x4dc   : > { %v9140_v0 = vsel %vm8401_vm3, %v8898_v45, -inf  ;;  %v9258_v47 = vsel %vm8401_vm3, %v8952_v48, -inf  ;;  %v7287_v4 = vmax.f32 %v6345_v49, 0.0 }
 0x4dd   : > { %v9141_v6 = vmax.f32 %v9139_v13, %v9140_v0  ;;  %v16226_v7 = vmax.f32 %v9257_v22, %v9258_v47  ;;  %v7911_v8 = vpack.c.bf16 %v7079_v56, %v7079_v56  ;;  %v6664_v10 = vmax.f32 %v4787_v57, 0.0 }
 0x4de   : > { %v8119_v23 = vpack.c.bf16 %v7287_v4, %v7287_v4  ;;  %v6874_v11 = vmax.f32 %v5312_v58, 0.0 }
 0x4df   : > { %v9002_v15 = vunpack.c.l.bf16 %v7911_v8  ;;  %v7496_v19 = vpack.c.bf16 %v6664_v10, %v6664_v10 }
 0x4e0   : > { %v9054_v18 = vunpack.c.l.bf16 %v8119_v23  ;;  %v7706_v31 = vpack.c.bf16 %v6874_v11, %v6874_v11  ;;  %v5826_v20 = vpop.f32.mrf.mxu2 }
 0x4e1   : > { %v9368_v16 = vsel %vm8401_vm3, %v9002_v15, -inf  ;;  %v8899_v24 = vunpack.c.l.bf16 %v7496_v19  ;;  %v5827_v13 = vadd.f32 %v16138_v3, %v5826_v20  ;;  %v6346_v22 = vpop.f32.mrf.mxu3  ;;  %v4789_v26 = vpop.f32.mrf.mxu0 }
 0x4e2   : > { %v16233_v28 = vmax.f32 %v9367_v44, %v9368_v16  ;;  %v9482_v30 = vsel %vm8401_vm3, %v9054_v18, -inf  ;;  %v8953_v29 = vunpack.c.l.bf16 %v7706_v31  ;;  %v6347_v40 = vadd.f32 %v16138_v3, %v6346_v22  ;;  %v5314_v41 = vpop.f32.mrf.mxu1 }
 0x4e3   : > { %v16238_v42 = vmax.f32 %v9481_v63, %v9482_v30  ;;  %v9142_v12 = vsel %vm8401_vm3, %v8899_v24, -inf  ;;  %v7080_v33 = vmax.f32 %v5827_v13, 0.0  ;;  %v4790_v37 = vadd.f32 %v16138_v3, %v4789_v26 }
 0x4e4   : > { %v9143_v45 = vmax.f32 %v9141_v6, %v9142_v12  ;;  %v9260_v48 = vsel %vm8401_vm3, %v8953_v29, -inf  ;;  %v7288_v49 = vmax.f32 %v6347_v40, 0.0  ;;  %v5315_v44 = vadd.f32 %v16138_v3, %v5314_v41  ;;  %12913 = vmatmul.msk.bf16.gmra.mxu0 %vm3184_vm2, %v13357_v53  ;;  %13018 = vmatmul.msk.bf16.gmra.mxu1 %vm3184_vm2, %v13462_v59 }
 0x4e5   : > { %v9261_v50 = vmax.f32 %v16226_v7, %v9260_v48  ;;  %v7912_v52 = vpack.c.bf16 %v7080_v33, %v7080_v33  ;;  %v6665_v56 = vmax.f32 %v4790_v37, 0.0  ;;  %13121 = vmatmul.msk.bf16.gmra.mxu2 %vm3184_vm2, %v13565_v27  ;;  %v13463_v48 = vld [vmem:[%s13817_s11 + $0x5b0] sm:$0xff] }
 0x4e6   : > { %v8120_v57 = vpack.c.bf16 %v7288_v49, %v7288_v49  ;;  %v6875_v58 = vmax.f32 %v5315_v44, 0.0  ;;  %13225 = vmatmul.msk.bf16.gmra.mxu3 %vm3184_vm2, %v13669_v34 }
 0x4e7   : > { %v9003_v63 = vunpack.c.l.bf16 %v7912_v52  ;;  %v7497_v0 = vpack.c.bf16 %v6665_v56, %v6665_v56 }
 0x4e8   : > { %v9055_v47 = vunpack.c.l.bf16 %v8120_v57  ;;  %v7707_v4 = vpack.c.bf16 %v6875_v58, %v6875_v58  ;;  %v5829_v6 = vpop.f32.mrf.mxu2  ;;  %v13566_v57 = vld [vmem:[%s13817_s11 + $0x8e8] sm:$0xff] }
 0x4e9   : > { %v9370_v8 = vsel %vm8401_vm3, %v9003_v63, -inf  ;;  %v8900_v10 = vunpack.c.l.bf16 %v7497_v0  ;;  %v5830_v23 = vadd.f32 %v16138_v3, %v5829_v6  ;;  %v6349_v11 = vpop.f32.mrf.mxu3  ;;  %v4791_v7 = vpop.f32.mrf.mxu0  ;;  %v13670_v6 = vld [vmem:[%s13817_s11 + $0xc28] sm:$0xff] }
 0x4ea   : > { %v9371_v15 = vmax.f32 %v16233_v28, %v9370_v8  ;;  %v9484_v19 = vsel %vm8401_vm3, %v9055_v47, -inf  ;;  %v8954_v18 = vunpack.c.l.bf16 %v7707_v4  ;;  %v6350_v31 = vadd.f32 %v16138_v3, %v6349_v11  ;;  %v5316_v20 = vpop.f32.mrf.mxu1 }
 0x4eb   : > { %v9485_v53 = vmax.f32 %v16238_v42, %v9484_v19  ;;  %v9144_v59 = vsel %vm8401_vm3, %v8900_v10, -inf  ;;  %v7081_v16 = vmax.f32 %v5830_v23, 0.0  ;;  %v4792_v24 = vadd.f32 %v16138_v3, %v4791_v7 }
 0x4ec   : > { %v16257_v13 = vmax.f32 %v9143_v45, %v9144_v59  ;;  %v9262_v22 = vsel %vm8401_vm3, %v8954_v18, -inf  ;;  %v7289_v26 = vmax.f32 %v6350_v31, 0.0  ;;  %v5317_v27 = vadd.f32 %v16138_v3, %v5316_v20  ;;  %v13358_v45 = vld [vmem:[%s13817_s11 + $0x268] sm:$0xff] }
 0x4ed   : > { %v16261_v28 = vmax.f32 %v9261_v50, %v9262_v22  ;;  %v7913_v30 = vpack.c.bf16 %v7081_v16, %v7081_v16  ;;  %v6666_v29 = vmax.f32 %v4792_v24, 0.0 }
 0x4ee   : > { %v8121_v40 = vpack.c.bf16 %v7289_v26, %v7289_v26  ;;  %v6876_v41 = vmax.f32 %v5317_v27, 0.0 }
 0x4ef   : > { %v9004_v34 = vunpack.c.l.bf16 %v7913_v30  ;;  %v7498_v42 = vpack.c.bf16 %v6666_v29, %v6666_v29 }
 0x4f0   : > { %v9056_v12 = vunpack.c.l.bf16 %v8121_v40  ;;  %v7708_v33 = vpack.c.bf16 %v6876_v41, %v6876_v41  ;;  %v5831_v37 = vpop.f32.mrf.mxu2 }
 0x4f1   : > { %v9372_v49 = vsel %vm8401_vm3, %v9004_v34, -inf  ;;  %v8901_v44 = vunpack.c.l.bf16 %v7498_v42  ;;  %v5832_v52 = vadd.f32 %v16138_v3, %v5831_v37  ;;  %v6351_v50 = vpop.f32.mrf.mxu3  ;;  %v4794_v56 = vpop.f32.mrf.mxu0 }
 0x4f2   : > { %v16268_v58 = vmax.f32 %v9371_v15, %v9372_v49  ;;  %v9486_v63 = vsel %vm8401_vm3, %v9056_v12, -inf  ;;  %v8955_v0 = vunpack.c.l.bf16 %v7708_v33  ;;  %v6352_v47 = vadd.f32 %v16138_v3, %v6351_v50  ;;  %v5319_v4 = vpop.f32.mrf.mxu1 }
 0x4f3   : > { %v16273_v8 = vmax.f32 %v9485_v53, %v9486_v63  ;;  %v9146_v10 = vsel %vm8401_vm3, %v8901_v44, -inf  ;;  %v7082_v23 = vmax.f32 %v5832_v52, 0.0  ;;  %v4795_v11 = vadd.f32 %v16138_v3, %v4794_v56 }
 0x4f4   : > { %v9147_v7 = vmax.f32 %v16257_v13, %v9146_v10  ;;  %v9264_v19 = vsel %vm8401_vm3, %v8955_v0, -inf  ;;  %v7290_v15 = vmax.f32 %v6352_v47, 0.0  ;;  %v5320_v18 = vadd.f32 %v16138_v3, %v5319_v4  ;;  %12914 = vmatmul.msk.bf16.gmra.mxu0 %vm3184_vm2, %v13358_v45  ;;  %13019 = vmatmul.msk.bf16.gmra.mxu1 %vm3184_vm2, %v13463_v48 }
 0x4f5   : > { %v9265_v31 = vmax.f32 %v16261_v28, %v9264_v19  ;;  %v7914_v20 = vpack.c.bf16 %v7082_v23, %v7082_v23  ;;  %v6667_v53 = vmax.f32 %v4795_v11, 0.0  ;;  %13122 = vmatmul.msk.bf16.gmra.mxu2 %vm3184_vm2, %v13566_v57  ;;  %v13464_v19 = vld [vmem:[%s13817_s11 + $0x5b8] sm:$0xff] }
 0x4f6   : > { %v8122_v59 = vpack.c.bf16 %v7290_v15, %v7290_v15  ;;  %v6877_v16 = vmax.f32 %v5320_v18, 0.0  ;;  %13226 = vmatmul.msk.bf16.gmra.mxu3 %vm3184_vm2, %v13670_v6 }
 0x4f7   : > { %v9005_v24 = vunpack.c.l.bf16 %v7914_v20  ;;  %v7499_v13 = vpack.c.bf16 %v6667_v53, %v6667_v53 }
 0x4f8   : > { %v9057_v22 = vunpack.c.l.bf16 %v8122_v59  ;;  %v7709_v26 = vpack.c.bf16 %v6877_v16, %v6877_v16  ;;  %v5834_v27 = vpop.f32.mrf.mxu2  ;;  %v13567_v59 = vld [vmem:[%s13817_s11 + $0x8f0] sm:$0xff] }
 0x4f9   : > { %v9374_v30 = vsel %vm8401_vm3, %v9005_v24, -inf  ;;  %v8902_v29 = vunpack.c.l.bf16 %v7499_v13  ;;  %v5835_v40 = vadd.f32 %v16138_v3, %v5834_v27  ;;  %v6354_v41 = vpop.f32.mrf.mxu3  ;;  %v4796_v28 = vpop.f32.mrf.mxu0  ;;  %v13671_v27 = vld [vmem:[%s13817_s11 + $0xc30] sm:$0xff] }
 0x4fa   : > { %v9375_v34 = vmax.f32 %v16268_v58, %v9374_v30  ;;  %v9488_v42 = vsel %vm8401_vm3, %v9057_v22, -inf  ;;  %v8956_v12 = vunpack.c.l.bf16 %v7709_v26  ;;  %v6355_v33 = vadd.f32 %v16138_v3, %v6354_v41  ;;  %v5321_v37 = vpop.f32.mrf.mxu1 }
 0x4fb   : > { %v9489_v45 = vmax.f32 %v16273_v8, %v9488_v42  ;;  %v9148_v48 = vsel %vm8401_vm3, %v8902_v29, -inf  ;;  %v7083_v49 = vmax.f32 %v5835_v40, 0.0  ;;  %v4797_v44 = vadd.f32 %v16138_v3, %v4796_v28 }
 0x4fc   : > { %v16293_v52 = vmax.f32 %v9147_v7, %v9148_v48  ;;  %v9266_v50 = vsel %vm8401_vm3, %v8956_v12, -inf  ;;  %v7291_v56 = vmax.f32 %v6355_v33, 0.0  ;;  %v5322_v57 = vadd.f32 %v16138_v3, %v5321_v37  ;;  %v13359_v7 = vld [vmem:[%s13817_s11 + $0x270] sm:$0xff] }
 0x4fd   : > { %v16297_v58 = vmax.f32 %v9265_v31, %v9266_v50  ;;  %v7915_v63 = vpack.c.bf16 %v7083_v49, %v7083_v49  ;;  %v6668_v0 = vmax.f32 %v4797_v44, 0.0 }
 0x4fe   : > { %v8123_v47 = vpack.c.bf16 %v7291_v56, %v7291_v56  ;;  %v6878_v4 = vmax.f32 %v5322_v57, 0.0 }
 0x4ff   : > { %v9006_v6 = vunpack.c.l.bf16 %v7915_v63  ;;  %v7500_v8 = vpack.c.bf16 %v6668_v0, %v6668_v0 }
 0x500   : > { %v9058_v10 = vunpack.c.l.bf16 %v8123_v47  ;;  %v7710_v23 = vpack.c.bf16 %v6878_v4, %v6878_v4  ;;  %v5836_v11 = vpop.f32.mrf.mxu2 }
 0x501   : > { %v9376_v15 = vsel %vm8401_vm3, %v9006_v6, -inf  ;;  %v8903_v18 = vunpack.c.l.bf16 %v7500_v8  ;;  %v5837_v20 = vadd.f32 %v16138_v3, %v5836_v11  ;;  %v6356_v31 = vpop.f32.mrf.mxu3  ;;  %v4799_v53 = vpop.f32.mrf.mxu0 }
 0x502   : > { %v16304_v16 = vmax.f32 %v9375_v34, %v9376_v15  ;;  %v9490_v24 = vsel %vm8401_vm3, %v9058_v10, -inf  ;;  %v8957_v13 = vunpack.c.l.bf16 %v7710_v23  ;;  %v6357_v22 = vadd.f32 %v16138_v3, %v6356_v31  ;;  %v5324_v26 = vpop.f32.mrf.mxu1 }
 0x503   : > { %v16309_v30 = vmax.f32 %v9489_v45, %v9490_v24  ;;  %v9150_v29 = vsel %vm8401_vm3, %v8903_v18, -inf  ;;  %v7084_v40 = vmax.f32 %v5837_v20, 0.0  ;;  %v4800_v41 = vadd.f32 %v16138_v3, %v4799_v53 }
 0x504   : > { %v9151_v28 = vmax.f32 %v16293_v52, %v9150_v29  ;;  %v9268_v42 = vsel %vm8401_vm3, %v8957_v13, -inf  ;;  %v7292_v34 = vmax.f32 %v6357_v22, 0.0  ;;  %v5325_v12 = vadd.f32 %v16138_v3, %v5324_v26  ;;  %12915 = vmatmul.msk.bf16.gmra.mxu0 %vm3184_vm2, %v13359_v7  ;;  %13020 = vmatmul.msk.bf16.gmra.mxu1 %vm3184_vm2, %v13464_v19 }
 0x505   : > { %v9269_v33 = vmax.f32 %v16297_v58, %v9268_v42  ;;  %v7916_v37 = vpack.c.bf16 %v7084_v40, %v7084_v40  ;;  %v6669_v45 = vmax.f32 %v4800_v41, 0.0  ;;  %13123 = vmatmul.msk.bf16.gmra.mxu2 %vm3184_vm2, %v13567_v59  ;;  %v13465_v42 = vld [vmem:[%s13817_s11 + $0x5c0] sm:$0xff] }
 0x506   : > { %v8124_v48 = vpack.c.bf16 %v7292_v34, %v7292_v34  ;;  %v6879_v49 = vmax.f32 %v5325_v12, 0.0  ;;  %13227 = vmatmul.msk.bf16.gmra.mxu3 %vm3184_vm2, %v13671_v27 }
 0x507   : > { %v9007_v44 = vunpack.c.l.bf16 %v7916_v37  ;;  %v7501_v52 = vpack.c.bf16 %v6669_v45, %v6669_v45 }
 0x508   : > { %v9059_v50 = vunpack.c.l.bf16 %v8124_v48  ;;  %v7711_v56 = vpack.c.bf16 %v6879_v49, %v6879_v49  ;;  %v5839_v57 = vpop.f32.mrf.mxu2  ;;  %v13568_v48 = vld [vmem:[%s13817_s11 + $0x8f8] sm:$0xff] }
 0x509   : > { %v9378_v63 = vsel %vm8401_vm3, %v9007_v44, -inf  ;;  %v8904_v0 = vunpack.c.l.bf16 %v7501_v52  ;;  %v5840_v47 = vadd.f32 %v16138_v3, %v5839_v57  ;;  %v6359_v4 = vpop.f32.mrf.mxu3  ;;  %v4801_v58 = vpop.f32.mrf.mxu0  ;;  %v13672_v57 = vld [vmem:[%s13817_s11 + $0xc38] sm:$0xff] }
 0x50a   : > { %v9379_v6 = vmax.f32 %v16304_v16, %v9378_v63  ;;  %v9492_v8 = vsel %vm8401_vm3, %v9059_v50, -inf  ;;  %v8958_v10 = vunpack.c.l.bf16 %v7711_v56  ;;  %v6360_v23 = vadd.f32 %v16138_v3, %v6359_v4  ;;  %v5326_v11 = vpop.f32.mrf.mxu1 }
 0x50b   : > { %v9493_v7 = vmax.f32 %v16309_v30, %v9492_v8  ;;  %v9152_v19 = vsel %vm8401_vm3, %v8904_v0, -inf  ;;  %v7085_v15 = vmax.f32 %v5840_v47, 0.0  ;;  %v4802_v18 = vadd.f32 %v16138_v3, %v4801_v58 }
 0x50c   : > { %v16329_v20 = vmax.f32 %v9151_v28, %v9152_v19  ;;  %v9270_v31 = vsel %vm8401_vm3, %v8958_v10, -inf  ;;  %v7293_v53 = vmax.f32 %v6360_v23, 0.0  ;;  %v5327_v59 = vadd.f32 %v16138_v3, %v5326_v11  ;;  %v13360_v28 = vld [vmem:[%s13817_s11 + $0x278] sm:$0xff] }
 0x50d   : > { %v16333_v16 = vmax.f32 %v9269_v33, %v9270_v31  ;;  %v7917_v24 = vpack.c.bf16 %v7085_v15, %v7085_v15  ;;  %v6670_v13 = vmax.f32 %v4802_v18, 0.0 }
 0x50e   : > { %v8125_v22 = vpack.c.bf16 %v7293_v53, %v7293_v53  ;;  %v6880_v26 = vmax.f32 %v5327_v59, 0.0 }
 0x50f   : > { %v9008_v27 = vunpack.c.l.bf16 %v7917_v24  ;;  %v7502_v30 = vpack.c.bf16 %v6670_v13, %v6670_v13 }
 0x510   : > { %v9060_v29 = vunpack.c.l.bf16 %v8125_v22  ;;  %v7712_v40 = vpack.c.bf16 %v6880_v26, %v6880_v26  ;;  %v5841_v41 = vpop.f32.mrf.mxu2 }
 0x511   : > { %v9380_v34 = vsel %vm8401_vm3, %v9008_v27, -inf  ;;  %v8905_v12 = vunpack.c.l.bf16 %v7502_v30  ;;  %v5842_v37 = vadd.f32 %v16138_v3, %v5841_v41  ;;  %v6361_v33 = vpop.f32.mrf.mxu3  ;;  %v4804_v45 = vpop.f32.mrf.mxu0 }
 0x512   : > { %v16340_v49 = vmax.f32 %v9379_v6, %v9380_v34  ;;  %v9494_v44 = vsel %vm8401_vm3, %v9060_v29, -inf  ;;  %v8959_v52 = vunpack.c.l.bf16 %v7712_v40  ;;  %v6362_v50 = vadd.f32 %v16138_v3, %v6361_v33  ;;  %v5329_v56 = vpop.f32.mrf.mxu1 }
 0x513   : > { %v16345_v63 = vmax.f32 %v9493_v7, %v9494_v44  ;;  %v9154_v0 = vsel %vm8401_vm3, %v8905_v12, -inf  ;;  %v7086_v47 = vmax.f32 %v5842_v37, 0.0  ;;  %v4805_v4 = vadd.f32 %v16138_v3, %v4804_v45 }
 0x514   : > { %v9155_v58 = vmax.f32 %v16329_v20, %v9154_v0  ;;  %v9272_v8 = vsel %vm8401_vm3, %v8959_v52, -inf  ;;  %v7294_v6 = vmax.f32 %v6362_v50, 0.0  ;;  %v5330_v10 = vadd.f32 %v16138_v3, %v5329_v56  ;;  %12916 = vmatmul.msk.bf16.gmra.mxu0 %vm3184_vm2, %v13360_v28  ;;  %13021 = vmatmul.msk.bf16.gmra.mxu1 %vm3184_vm2, %v13465_v42 }
 0x515   : > { %v9273_v23 = vmax.f32 %v16333_v16, %v9272_v8  ;;  %v7918_v11 = vpack.c.bf16 %v7086_v47, %v7086_v47  ;;  %v6671_v7 = vmax.f32 %v4805_v4, 0.0  ;;  %13124 = vmatmul.msk.bf16.gmra.mxu2 %vm3184_vm2, %v13568_v48  ;;  %v13466_v8 = vld [vmem:[%s13817_s11 + $0x5c8] sm:$0xff] }
 0x516   : > { %v8126_v19 = vpack.c.bf16 %v7294_v6, %v7294_v6  ;;  %v6881_v15 = vmax.f32 %v5330_v10, 0.0  ;;  %13228 = vmatmul.msk.bf16.gmra.mxu3 %vm3184_vm2, %v13672_v57 }
 0x517   : > { %v9009_v18 = vunpack.c.l.bf16 %v7918_v11  ;;  %v7503_v20 = vpack.c.bf16 %v6671_v7, %v6671_v7 }
 0x518   : > { %v9061_v31 = vunpack.c.l.bf16 %v8126_v19  ;;  %v7713_v53 = vpack.c.bf16 %v6881_v15, %v6881_v15  ;;  %v5844_v59 = vpop.f32.mrf.mxu2  ;;  %v13569_v19 = vld [vmem:[%s13817_s11 + $0x900] sm:$0xff] }
 0x519   : > { %v9382_v24 = vsel %vm8401_vm3, %v9009_v18, -inf  ;;  %v8906_v13 = vunpack.c.l.bf16 %v7503_v20  ;;  %v5845_v22 = vadd.f32 %v16138_v3, %v5844_v59  ;;  %v6364_v26 = vpop.f32.mrf.mxu3  ;;  %v4806_v16 = vpop.f32.mrf.mxu0  ;;  %v13673_v59 = vld [vmem:[%s13817_s11 + $0xc40] sm:$0xff] }
 0x51a   : > { %v9383_v27 = vmax.f32 %v16340_v49, %v9382_v24  ;;  %v9496_v30 = vsel %vm8401_vm3, %v9061_v31, -inf  ;;  %v8960_v29 = vunpack.c.l.bf16 %v7713_v53  ;;  %v6365_v40 = vadd.f32 %v16138_v3, %v6364_v26  ;;  %v5331_v41 = vpop.f32.mrf.mxu1 }
 0x51b   : > { %v9497_v28 = vmax.f32 %v16345_v63, %v9496_v30  ;;  %v9156_v42 = vsel %vm8401_vm3, %v8906_v13, -inf  ;;  %v7087_v34 = vmax.f32 %v5845_v22, 0.0  ;;  %v4807_v12 = vadd.f32 %v16138_v3, %v4806_v16 }
 0x51c   : > { %v16365_v37 = vmax.f32 %v9155_v58, %v9156_v42  ;;  %v9274_v33 = vsel %vm8401_vm3, %v8960_v29, -inf  ;;  %v7295_v45 = vmax.f32 %v6365_v40, 0.0  ;;  %v5332_v48 = vadd.f32 %v16138_v3, %v5331_v41  ;;  %v13361_v58 = vld [vmem:[%s13817_s11 + $0x280] sm:$0xff] }
 0x51d   : > { %v16369_v49 = vmax.f32 %v9273_v23, %v9274_v33  ;;  %v7919_v44 = vpack.c.bf16 %v7087_v34, %v7087_v34  ;;  %v6672_v52 = vmax.f32 %v4807_v12, 0.0 }
 0x51e   : > { %v8127_v50 = vpack.c.bf16 %v7295_v45, %v7295_v45  ;;  %v6882_v56 = vmax.f32 %v5332_v48, 0.0 }
 0x51f   : > { %v9010_v57 = vunpack.c.l.bf16 %v7919_v44  ;;  %v7504_v63 = vpack.c.bf16 %v6672_v52, %v6672_v52 }
 0x520   : > { %v9062_v0 = vunpack.c.l.bf16 %v8127_v50  ;;  %v7714_v47 = vpack.c.bf16 %v6882_v56, %v6882_v56  ;;  %v5846_v4 = vpop.f32.mrf.mxu2 }
 0x521   : > { %v9384_v6 = vsel %vm8401_vm3, %v9010_v57, -inf  ;;  %v8907_v10 = vunpack.c.l.bf16 %v7504_v63  ;;  %v5847_v11 = vadd.f32 %v16138_v3, %v5846_v4  ;;  %v6366_v23 = vpop.f32.mrf.mxu3  ;;  %v4809_v7 = vpop.f32.mrf.mxu0 }
 0x522   : > { %v16376_v15 = vmax.f32 %v9383_v27, %v9384_v6  ;;  %v9498_v18 = vsel %vm8401_vm3, %v9062_v0, -inf  ;;  %v8961_v20 = vunpack.c.l.bf16 %v7714_v47  ;;  %v6367_v31 = vadd.f32 %v16138_v3, %v6366_v23  ;;  %v5334_v53 = vpop.f32.mrf.mxu1 }
 0x523   : > { %v16381_v24 = vmax.f32 %v9497_v28, %v9498_v18  ;;  %v9158_v13 = vsel %vm8401_vm3, %v8907_v10, -inf  ;;  %v7088_v22 = vmax.f32 %v5847_v11, 0.0  ;;  %v4810_v26 = vadd.f32 %v16138_v3, %v4809_v7 }
 0x524   : > { %v9159_v16 = vmax.f32 %v16365_v37, %v9158_v13  ;;  %v9276_v30 = vsel %vm8401_vm3, %v8961_v20, -inf  ;;  %v7296_v27 = vmax.f32 %v6367_v31, 0.0  ;;  %v5335_v29 = vadd.f32 %v16138_v3, %v5334_v53  ;;  %12917 = vmatmul.msk.bf16.gmra.mxu0 %vm3184_vm2, %v13361_v58  ;;  %13022 = vmatmul.msk.bf16.gmra.mxu1 %vm3184_vm2, %v13466_v8 }
 0x525   : > { %v9277_v40 = vmax.f32 %v16369_v49, %v9276_v30  ;;  %v7920_v41 = vpack.c.bf16 %v7088_v22, %v7088_v22  ;;  %v6673_v28 = vmax.f32 %v4810_v26, 0.0  ;;  %13125 = vmatmul.msk.bf16.gmra.mxu2 %vm3184_vm2, %v13569_v19  ;;  %v13467_v30 = vld [vmem:[%s13817_s11 + $0x5d0] sm:$0xff] }
 0x526   : > { %v8128_v42 = vpack.c.bf16 %v7296_v27, %v7296_v27  ;;  %v6883_v34 = vmax.f32 %v5335_v29, 0.0  ;;  %13229 = vmatmul.msk.bf16.gmra.mxu3 %vm3184_vm2, %v13673_v59 }
 0x527   : > { %v9011_v12 = vunpack.c.l.bf16 %v7920_v41  ;;  %v7505_v37 = vpack.c.bf16 %v6673_v28, %v6673_v28 }
 0x528   : > { %v9063_v33 = vunpack.c.l.bf16 %v8128_v42  ;;  %v7715_v45 = vpack.c.bf16 %v6883_v34, %v6883_v34  ;;  %v5849_v48 = vpop.f32.mrf.mxu2  ;;  %v13570_v42 = vld [vmem:[%s13817_s11 + $0x908] sm:$0xff] }
 0x529   : > { %v9386_v44 = vsel %vm8401_vm3, %v9011_v12, -inf  ;;  %v8908_v52 = vunpack.c.l.bf16 %v7505_v37  ;;  %v5850_v50 = vadd.f32 %v16138_v3, %v5849_v48  ;;  %v6369_v56 = vpop.f32.mrf.mxu3  ;;  %v4811_v49 = vpop.f32.mrf.mxu0  ;;  %v13674_v48 = vld [vmem:[%s13817_s11 + $0xc48] sm:$0xff] }
 0x52a   : > { %v9387_v57 = vmax.f32 %v16376_v15, %v9386_v44  ;;  %v9500_v63 = vsel %vm8401_vm3, %v9063_v33, -inf  ;;  %v8962_v0 = vunpack.c.l.bf16 %v7715_v45  ;;  %v6370_v47 = vadd.f32 %v16138_v3, %v6369_v56  ;;  %v5336_v4 = vpop.f32.mrf.mxu1 }
 0x52b   : > { %v9501_v58 = vmax.f32 %v16381_v24, %v9500_v63  ;;  %v9160_v8 = vsel %vm8401_vm3, %v8908_v52, -inf  ;;  %v7089_v6 = vmax.f32 %v5850_v50, 0.0  ;;  %v4812_v10 = vadd.f32 %v16138_v3, %v4811_v49 }
 0x52c   : > { %v16401_v11 = vmax.f32 %v9159_v16, %v9160_v8  ;;  %v9278_v23 = vsel %vm8401_vm3, %v8962_v0, -inf  ;;  %v7297_v7 = vmax.f32 %v6370_v47, 0.0  ;;  %v5337_v19 = vadd.f32 %v16138_v3, %v5336_v4  ;;  %v13362_v16 = vld [vmem:[%s13817_s11 + $0x288] sm:$0xff]  ;;  %v16413_v3 = vld [vmem:[%s17625_s2] ss:$0 sm:$0xff] }
 0x52d   : > { %v16405_v15 = vmax.f32 %v9277_v40, %v9278_v23  ;;  %v7921_v18 = vpack.c.bf16 %v7089_v6, %v7089_v6  ;;  %v6674_v20 = vmax.f32 %v4812_v10, 0.0 }
 0x52e   : > { %v8129_v31 = vpack.c.bf16 %v7297_v7, %v7297_v7  ;;  %v6884_v53 = vmax.f32 %v5337_v19, 0.0 }
 0x52f   : > { %v9012_v59 = vunpack.c.l.bf16 %v7921_v18  ;;  %v7506_v24 = vpack.c.bf16 %v6674_v20, %v6674_v20 }
 0x530   : > { %v9064_v13 = vunpack.c.l.bf16 %v8129_v31  ;;  %v7716_v22 = vpack.c.bf16 %v6884_v53, %v6884_v53  ;;  %v5851_v26 = vpop.f32.mrf.mxu2 }
 0x531   : > { %v9388_v27 = vsel %vm8401_vm3, %v9012_v59, -inf  ;;  %v8909_v29 = vunpack.c.l.bf16 %v7506_v24  ;;  %v5852_v40 = vadd.f32 %v16413_v3, %v5851_v26  ;;  %v6371_v41 = vpop.f32.mrf.mxu3  ;;  %v4814_v28 = vpop.f32.mrf.mxu0 }
 0x532   : > { %v16417_v34 = vmax.f32 %v9387_v57, %v9388_v27  ;;  %v9502_v12 = vsel %vm8401_vm3, %v9064_v13, -inf  ;;  %v8963_v37 = vunpack.c.l.bf16 %v7716_v22  ;;  %v6372_v33 = vadd.f32 %v16413_v3, %v6371_v41  ;;  %v5339_v45 = vpop.f32.mrf.mxu1 }
 0x533   : > { %v16422_v44 = vmax.f32 %v9501_v58, %v9502_v12  ;;  %v9162_v52 = vsel %vm8401_vm3, %v8909_v29, -inf  ;;  %v7090_v50 = vmax.f32 %v5852_v40, 0.0  ;;  %v4815_v56 = vadd.f32 %v16413_v3, %v4814_v28 }
 0x534   : > { %v9163_v49 = vmax.f32 %v16401_v11, %v9162_v52  ;;  %v9280_v63 = vsel %vm8401_vm3, %v8963_v37, -inf  ;;  %v7298_v57 = vmax.f32 %v6372_v33, 0.0  ;;  %v5340_v0 = vadd.f32 %v16413_v3, %v5339_v45  ;;  %12918 = vmatmul.msk.bf16.gmra.mxu0 %vm3184_vm2, %v13362_v16  ;;  %13023 = vmatmul.msk.bf16.gmra.mxu1 %vm3184_vm2, %v13467_v30 }
 0x535   : > { %v9281_v47 = vmax.f32 %v16405_v15, %v9280_v63  ;;  %v7922_v4 = vpack.c.bf16 %v7090_v50, %v7090_v50  ;;  %v6675_v58 = vmax.f32 %v4815_v56, 0.0  ;;  %13126 = vmatmul.msk.bf16.gmra.mxu2 %vm3184_vm2, %v13570_v42  ;;  %v13468_v63 = vld [vmem:[%s13817_s11 + $0x5d8] sm:$0xff] }
 0x536   : > { %v8130_v8 = vpack.c.bf16 %v7298_v57, %v7298_v57  ;;  %v6885_v6 = vmax.f32 %v5340_v0, 0.0  ;;  %13230 = vmatmul.msk.bf16.gmra.mxu3 %vm3184_vm2, %v13674_v48 }
 0x537   : > { %v9013_v10 = vunpack.c.l.bf16 %v7922_v4  ;;  %v7507_v11 = vpack.c.bf16 %v6675_v58, %v6675_v58 }
 0x538   : > { %v9065_v23 = vunpack.c.l.bf16 %v8130_v8  ;;  %v7717_v7 = vpack.c.bf16 %v6885_v6, %v6885_v6  ;;  %v5854_v19 = vpop.f32.mrf.mxu2  ;;  %v13571_v8 = vld [vmem:[%s13817_s11 + $0x910] sm:$0xff] }
 0x539   : > { %v9390_v18 = vsel %vm8401_vm3, %v9013_v10, -inf  ;;  %v8910_v20 = vunpack.c.l.bf16 %v7507_v11  ;;  %v5855_v31 = vadd.f32 %v16413_v3, %v5854_v19  ;;  %v6374_v53 = vpop.f32.mrf.mxu3  ;;  %v4816_v15 = vpop.f32.mrf.mxu0  ;;  %v13675_v19 = vld [vmem:[%s13817_s11 + $0xc50] sm:$0xff] }
 0x53a   : > { %v9391_v59 = vmax.f32 %v16417_v34, %v9390_v18  ;;  %v9504_v24 = vsel %vm8401_vm3, %v9065_v23, -inf  ;;  %v8964_v13 = vunpack.c.l.bf16 %v7717_v7  ;;  %v6375_v22 = vadd.f32 %v16413_v3, %v6374_v53  ;;  %v5341_v26 = vpop.f32.mrf.mxu1 }
 0x53b   : > { %v9505_v16 = vmax.f32 %v16422_v44, %v9504_v24  ;;  %v9164_v30 = vsel %vm8401_vm3, %v8910_v20, -inf  ;;  %v7091_v27 = vmax.f32 %v5855_v31, 0.0  ;;  %v4817_v29 = vadd.f32 %v16413_v3, %v4816_v15 }
 0x53c   : > { %v16442_v40 = vmax.f32 %v9163_v49, %v9164_v30  ;;  %v9282_v41 = vsel %vm8401_vm3, %v8964_v13, -inf  ;;  %v7299_v28 = vmax.f32 %v6375_v22, 0.0  ;;  %v5342_v42 = vadd.f32 %v16413_v3, %v5341_v26  ;;  %v13363_v49 = vld [vmem:[%s13817_s11 + $0x290] sm:$0xff] }
 0x53d   : > { %v16446_v34 = vmax.f32 %v9281_v47, %v9282_v41  ;;  %v7923_v12 = vpack.c.bf16 %v7091_v27, %v7091_v27  ;;  %v6676_v37 = vmax.f32 %v4817_v29, 0.0 }
 0x53e   : > { %v8131_v33 = vpack.c.bf16 %v7299_v28, %v7299_v28  ;;  %v6886_v45 = vmax.f32 %v5342_v42, 0.0 }
 0x53f   : > { %v9014_v48 = vunpack.c.l.bf16 %v7923_v12  ;;  %v7508_v44 = vpack.c.bf16 %v6676_v37, %v6676_v37 }
 0x540   : > { %v9066_v52 = vunpack.c.l.bf16 %v8131_v33  ;;  %v7718_v50 = vpack.c.bf16 %v6886_v45, %v6886_v45  ;;  %v5856_v56 = vpop.f32.mrf.mxu2 }
 0x541   : > { %v9392_v57 = vsel %vm8401_vm3, %v9014_v48, -inf  ;;  %v8911_v0 = vunpack.c.l.bf16 %v7508_v44  ;;  %v5857_v4 = vadd.f32 %v16413_v3, %v5856_v56  ;;  %v6376_v47 = vpop.f32.mrf.mxu3  ;;  %v4819_v58 = vpop.f32.mrf.mxu0 }
 0x542   : > { %v16453_v6 = vmax.f32 %v9391_v59, %v9392_v57  ;;  %v9506_v10 = vsel %vm8401_vm3, %v9066_v52, -inf  ;;  %v8965_v11 = vunpack.c.l.bf16 %v7718_v50  ;;  %v6377_v23 = vadd.f32 %v16413_v3, %v6376_v47  ;;  %v5344_v7 = vpop.f32.mrf.mxu1 }
 0x543   : > { %v16458_v18 = vmax.f32 %v9505_v16, %v9506_v10  ;;  %v9166_v20 = vsel %vm8401_vm3, %v8911_v0, -inf  ;;  %v7092_v31 = vmax.f32 %v5857_v4, 0.0  ;;  %v4820_v53 = vadd.f32 %v16413_v3, %v4819_v58 }
 0x544   : > { %v9167_v15 = vmax.f32 %v16442_v40, %v9166_v20  ;;  %v9284_v24 = vsel %vm8401_vm3, %v8965_v11, -inf  ;;  %v7300_v59 = vmax.f32 %v6377_v23, 0.0  ;;  %v5345_v13 = vadd.f32 %v16413_v3, %v5344_v7  ;;  %12919 = vmatmul.msk.bf16.gmra.mxu0 %vm3184_vm2, %v13363_v49  ;;  %13024 = vmatmul.msk.bf16.gmra.mxu1 %vm3184_vm2, %v13468_v63 }
 0x545   : > { %v9285_v22 = vmax.f32 %v16446_v34, %v9284_v24  ;;  %v7924_v26 = vpack.c.bf16 %v7092_v31, %v7092_v31  ;;  %v6677_v16 = vmax.f32 %v4820_v53, 0.0  ;;  %13127 = vmatmul.msk.bf16.gmra.mxu2 %vm3184_vm2, %v13571_v8  ;;  %v13469_v24 = vld [vmem:[%s13817_s11 + $0x5e0] sm:$0xff] }
 0x546   : > { %v8132_v30 = vpack.c.bf16 %v7300_v59, %v7300_v59  ;;  %v6887_v27 = vmax.f32 %v5345_v13, 0.0  ;;  %13231 = vmatmul.msk.bf16.gmra.mxu3 %vm3184_vm2, %v13675_v19  ;;  %v9241_v59 = vrot.slane %v14772_v38, 4 }
 0x547   : > { %v9015_v29 = vunpack.c.l.bf16 %v7924_v26  ;;  %v7509_v40 = vpack.c.bf16 %v6677_v16, %v6677_v16 }
 0x548   : > { %v9067_v41 = vunpack.c.l.bf16 %v8132_v30  ;;  %v7719_v28 = vpack.c.bf16 %v6887_v27, %v6887_v27  ;;  %v5859_v42 = vpop.f32.mrf.mxu2  ;;  %v13572_v27 = vld [vmem:[%s13817_s11 + $0x918] sm:$0xff] }
 0x549   : > { %v9394_v12 = vsel %vm8401_vm3, %v9015_v29, -inf  ;;  %v8912_v37 = vunpack.c.l.bf16 %v7509_v40  ;;  %v5860_v33 = vadd.f32 %v16413_v3, %v5859_v42  ;;  %v6379_v45 = vpop.f32.mrf.mxu3  ;;  %v4821_v34 = vpop.f32.mrf.mxu0 }
 0x54a   : > { %v9395_v48 = vmax.f32 %v16453_v6, %v9394_v12  ;;  %v9508_v44 = vsel %vm8401_vm3, %v9067_v41, -inf  ;;  %v8966_v52 = vunpack.c.l.bf16 %v7719_v28  ;;  %v6380_v50 = vadd.f32 %v16413_v3, %v6379_v45  ;;  %v5346_v56 = vpop.f32.mrf.mxu1  ;;  %v13676_v12 = vld [vmem:[%s13817_s11 + $0xc58] sm:$0xff] }
 0x54b   : > { %v9509_v49 = vmax.f32 %v16458_v18, %v9508_v44  ;;  %v9168_v63 = vsel %vm8401_vm3, %v8912_v37, -inf  ;;  %v7093_v57 = vmax.f32 %v5860_v33, 0.0  ;;  %v4822_v0 = vadd.f32 %v16413_v3, %v4821_v34 }
 0x54c   : > { %v16478_v4 = vmax.f32 %v9167_v15, %v9168_v63  ;;  %v9286_v47 = vsel %vm8401_vm3, %v8966_v52, -inf  ;;  %v7301_v58 = vmax.f32 %v6380_v50, 0.0  ;;  %v5347_v8 = vadd.f32 %v16413_v3, %v5346_v56  ;;  %v13364_v15 = vld [vmem:[%s13817_s11 + $0x298] sm:$0xff] }
 0x54d   : > { %v16482_v6 = vmax.f32 %v9285_v22, %v9286_v47  ;;  %v7925_v10 = vpack.c.bf16 %v7093_v57, %v7093_v57  ;;  %v6678_v11 = vmax.f32 %v4822_v0, 0.0  ;;  %v9127_v56 = vrot.slane %v14798_v39, 4 }
 0x54e   : > { %v8133_v23 = vpack.c.bf16 %v7301_v58, %v7301_v58  ;;  %v6888_v7 = vmax.f32 %v5347_v8, 0.0  ;;  %v16509_v8 = vmax.f32 %v14772_v38, %v9241_v59 }
 0x54f   : > { %v9016_v19 = vunpack.c.l.bf16 %v7925_v10  ;;  %v7510_v18 = vpack.c.bf16 %v6678_v11, %v6678_v11 }
 0x550   : > { %v9068_v20 = vunpack.c.l.bf16 %v8133_v23  ;;  %v7720_v31 = vpack.c.bf16 %v6888_v7, %v6888_v7  ;;  %v5861_v53 = vpop.f32.mrf.mxu2  ;;  %v16512_v7 = vmax.f32 %v14798_v39, %v9127_v56  ;;  %v13365_v56 = vld [vmem:[%s13817_s11 + $0x2a0] sm:$0xff] }
 0x551   : > { %v9396_v13 = vsel %vm8401_vm3, %v9016_v19, -inf  ;;  %v8913_v26 = vunpack.c.l.bf16 %v7510_v18  ;;  %v5862_v22 = vadd.f32 %v16413_v3, %v5861_v53  ;;  %v6381_v16 = vpop.f32.mrf.mxu3  ;;  %v4824_v30 = vpop.f32.mrf.mxu0 }
 0x552   : > { %v16490_v29 = vmax.f32 %v9395_v48, %v9396_v13  ;;  %v9510_v40 = vsel %vm8401_vm3, %v9068_v20, -inf  ;;  %v8967_v41 = vunpack.c.l.bf16 %v7720_v31  ;;  %v6382_v28 = vadd.f32 %v16413_v3, %v6381_v16  ;;  %v5349_v42 = vpop.f32.mrf.mxu1 }
 0x553   : > { %v16495_v37 = vmax.f32 %v9509_v49, %v9510_v40  ;;  %v9170_v33 = vsel %vm8401_vm3, %v8913_v26, -inf  ;;  %v7094_v45 = vmax.f32 %v5862_v22, 0.0  ;;  %v4825_v34 = vadd.f32 %v16413_v3, %v4824_v30 }
 0x554   : > { %v9171_v44 = vmax.f32 %v16478_v4, %v9170_v33  ;;  %v9288_v52 = vsel %vm8401_vm3, %v8967_v41, -inf  ;;  %v7302_v48 = vmax.f32 %v6382_v28, 0.0  ;;  %v5350_v50 = vadd.f32 %v16413_v3, %v5349_v42  ;;  %12920 = vmatmul.msk.bf16.gmra.mxu0 %vm3184_vm2, %v13364_v15  ;;  %13025 = vmatmul.msk.bf16.gmra.mxu1 %vm3184_vm2, %v13469_v24 }
 0x555   : > { %v9289_v49 = vmax.f32 %v16482_v6, %v9288_v52  ;;  %v7926_v63 = vpack.c.bf16 %v7094_v45, %v7094_v45  ;;  %v6679_v57 = vmax.f32 %v4825_v34, 0.0  ;;  %13128 = vmatmul.msk.bf16.gmra.mxu2 %vm3184_vm2, %v13572_v27  ;;  %v9129_v34 = vrot.slane %v16512_v7, 2 }
 0x556   : > { %v8134_v0 = vpack.c.bf16 %v7302_v48, %v7302_v48  ;;  %v6889_v47 = vmax.f32 %v5350_v50, 0.0  ;;  %13232 = vmatmul.msk.bf16.gmra.mxu3 %vm3184_vm2, %v13676_v12 }
 0x557   : > { %v9017_v4 = vunpack.c.l.bf16 %v7926_v63  ;;  %v7511_v58 = vpack.c.bf16 %v6679_v57, %v6679_v57  ;;  %v9469_v63 = vrot.slane %v14808_v60, 4 }
 0x558   : > { %v9069_v10 = vunpack.c.l.bf16 %v8134_v0  ;;  %v7721_v11 = vpack.c.bf16 %v6889_v47, %v6889_v47  ;;  %v5864_v23 = vpop.f32.mrf.mxu2 }
 0x559   : > { %v9398_v6 = vsel %vm8401_vm3, %v9017_v4, -inf  ;;  %v8914_v19 = vunpack.c.l.bf16 %v7511_v58  ;;  %v5865_v18 = vadd.f32 %v16413_v3, %v5864_v23  ;;  %v6384_v20 = vpop.f32.mrf.mxu3  ;;  %v4826_v31 = vpop.f32.mrf.mxu0 }
 0x55a   : > { %v9399_v53 = vmax.f32 %v16490_v29, %v9398_v6  ;;  %v9512_v15 = vsel %vm8401_vm3, %v9069_v10, -inf  ;;  %v8968_v24 = vunpack.c.l.bf16 %v7721_v11  ;;  %v6385_v38 = vadd.f32 %v16413_v3, %v6384_v20  ;;  %v5351_v59 = vpop.f32.mrf.mxu1  ;;  %v13573_v10 = vld [vmem:[%s13817_s11 + $0x920] sm:$0xff] }
 0x55b   : > { %v9513_v13 = vmax.f32 %v16495_v37, %v9512_v15  ;;  %v9172_v39 = vsel %vm8401_vm3, %v8914_v19, -inf  ;;  %v7095_v26 = vmax.f32 %v5865_v18, 0.0  ;;  %v4827_v22 = vadd.f32 %v16413_v3, %v4826_v31  ;;  %v13677_v20 = vld [vmem:[%s13817_s11 + $0xc60] sm:$0xff] }
 0x55c   : > { %v16522_v16 = vmax.f32 %v9171_v44, %v9172_v39  ;;  %v9290_v30 = vsel %vm8401_vm3, %v8968_v24, -inf  ;;  %v7303_v27 = vmax.f32 %v6385_v38, 0.0  ;;  %v5352_v29 = vadd.f32 %v16413_v3, %v5351_v59 }
 0x55d   : > { %v16526_v40 = vmax.f32 %v9289_v49, %v9290_v30  ;;  %v7927_v41 = vpack.c.bf16 %v7095_v26, %v7095_v26  ;;  %v6680_v28 = vmax.f32 %v4827_v22, 0.0  ;;  %v9243_v37 = vrot.slane %v16509_v8, 2  ;;  %v13470_v49 = vld [vmem:[%s13817_s11 + $0x5e8] sm:$0xff] }
 0x55e   : > { %v8135_v42 = vpack.c.bf16 %v7303_v27, %v7303_v27  ;;  %v6890_v12 = vmax.f32 %v5352_v29, 0.0  ;;  %v9355_v44 = vrot.slane %v14805_v55, 4 }
 0x55f   : > { %v9018_v33 = vunpack.c.l.bf16 %v7927_v41  ;;  %v7512_v45 = vpack.c.bf16 %v6680_v28, %v6680_v28 }
 0x560   : > { %v9070_v52 = vunpack.c.l.bf16 %v8135_v42  ;;  %v7722_v48 = vpack.c.bf16 %v6890_v12, %v6890_v12  ;;  %v5866_v50 = vpop.f32.mrf.mxu2  ;;  %v9356_v22 = vmax.f32 %v14805_v55, %v9355_v44  ;;  %v16559_v12 = vmax.f32 %v16512_v7, %v9129_v34 }
 0x561   : > { %v9400_v57 = vsel %vm8401_vm3, %v9018_v33, -inf  ;;  %v8915_v0 = vunpack.c.l.bf16 %v7512_v45  ;;  %v5867_v47 = vadd.f32 %v16413_v3, %v5866_v50  ;;  %v6386_v4 = vpop.f32.mrf.mxu3  ;;  %v4829_v58 = vpop.f32.mrf.mxu0  ;;  %v9470_v55 = vmax.f32 %v14808_v60, %v9469_v63 }
 0x562   : > { %v16537_v11 = vmax.f32 %v9399_v53, %v9400_v57  ;;  %v9514_v23 = vsel %vm8401_vm3, %v9070_v52, -inf  ;;  %v8969_v6 = vunpack.c.l.bf16 %v7722_v48  ;;  %v6387_v19 = vadd.f32 %v16413_v3, %v6386_v4  ;;  %v5354_v18 = vpop.f32.mrf.mxu1 }
 0x563   : > { %v16542_v31 = vmax.f32 %v9513_v13, %v9514_v23  ;;  %v9174_v15 = vsel %vm8401_vm3, %v8915_v0, -inf  ;;  %v7096_v24 = vmax.f32 %v5867_v47, 0.0  ;;  %v4830_v38 = vadd.f32 %v16413_v3, %v4829_v58 }
 0x564   : > { %v9175_v59 = vmax.f32 %v16522_v16, %v9174_v15  ;;  %v9292_v39 = vsel %vm8401_vm3, %v8969_v6, -inf  ;;  %v7304_v53 = vmax.f32 %v6387_v19, 0.0  ;;  %v5355_v26 = vadd.f32 %v16413_v3, %v5354_v18  ;;  %12921 = vmatmul.msk.bf16.gmra.mxu0 %vm3184_vm2, %v13365_v56  ;;  %13026 = vmatmul.msk.bf16.gmra.mxu1 %vm3184_vm2, %v13470_v49 }
 0x565   : > { %v9293_v13 = vmax.f32 %v16526_v40, %v9292_v39  ;;  %v7928_v30 = vpack.c.bf16 %v7096_v24, %v7096_v24  ;;  %v6681_v27 = vmax.f32 %v4830_v38, 0.0  ;;  %13129 = vmatmul.msk.bf16.gmra.mxu2 %vm3184_vm2, %v13573_v10  ;;  %v16556_v16 = vmax.f32 %v16509_v8, %v9243_v37 }
 0x566   : > { %v8136_v29 = vpack.c.bf16 %v7304_v53, %v7304_v53  ;;  %v6891_v41 = vmax.f32 %v5355_v26, 0.0  ;;  %13233 = vmatmul.msk.bf16.gmra.mxu3 %vm3184_vm2, %v13677_v20  ;;  %v9357_v44 = vrot.slane %v9356_v22, 2  ;;  %v9471_v23 = vrot.slane %v9470_v55, 2 }
 0x567   : > { %v9019_v28 = vunpack.c.l.bf16 %v7928_v30  ;;  %v7513_v42 = vpack.c.bf16 %v6681_v27, %v6681_v27  ;;  %v9245_v15 = vrot.slane %v16556_v16, 1  ;;  %v13366_v27 = vld [vmem:[%s13817_s11 + $0x2a8] sm:$0xff] }
 0x568   : > { %v9071_v33 = vunpack.c.l.bf16 %v8136_v29  ;;  %v7723_v40 = vpack.c.bf16 %v6891_v41, %v6891_v41  ;;  %v5869_v45 = vpop.f32.mrf.mxu2  ;;  %v9358_v39 = vmax.f32 %v9356_v22, %v9357_v44  ;;  %v13471_v29 = vld [vmem:[%s13817_s11 + $0x5f0] sm:$0xff]  ;;  %v9472_v41 = vmax.f32 %v9470_v55, %v9471_v23 }
 0x569   : > { %v9402_v52 = vsel %vm8401_vm3, %v9019_v28, -inf  ;;  %v8916_v48 = vunpack.c.l.bf16 %v7513_v42  ;;  %v5870_v50 = vadd.f32 %v16413_v3, %v5869_v45  ;;  %v6389_v56 = vpop.f32.mrf.mxu3  ;;  %v4831_v49 = vpop.f32.mrf.mxu0  ;;  %v13574_v45 = vld [vmem:[%s13817_s11 + $0x928] sm:$0xff] }
 0x56a   : > { %v9403_v8 = vmax.f32 %v16537_v11, %v9402_v52  ;;  %v9516_v37 = vsel %vm8401_vm3, %v9071_v33, -inf  ;;  %v8970_v57 = vunpack.c.l.bf16 %v7723_v40  ;;  %v6390_v7 = vadd.f32 %v16413_v3, %v6389_v56  ;;  %v5356_v34 = vpop.f32.mrf.mxu1  ;;  %v13678_v56 = vld [vmem:[%s13817_s11 + $0xc68] sm:$0xff] }
 0x56b   : > { %v9517_v60 = vmax.f32 %v16542_v31, %v9516_v37  ;;  %v9176_v63 = vsel %vm8401_vm3, %v8916_v48, -inf  ;;  %v7097_v0 = vmax.f32 %v5870_v50, 0.0  ;;  %v4832_v47 = vadd.f32 %v16413_v3, %v4831_v49 }
 0x56c   : > { %v16570_v4 = vmax.f32 %v9175_v59, %v9176_v63  ;;  %v9294_v58 = vsel %vm8401_vm3, %v8970_v57, -inf  ;;  %v7305_v10 = vmax.f32 %v6390_v7, 0.0  ;;  %v5357_v11 = vadd.f32 %v16413_v3, %v5356_v34 }
 0x56d   : > { %v9295_v6 = vmax.f32 %v9293_v13, %v9294_v58  ;;  %v7929_v19 = vpack.c.bf16 %v7097_v0, %v7097_v0  ;;  %v6682_v18 = vmax.f32 %v4832_v47, 0.0  ;;  %v9131_v59 = vrot.slane %v16559_v12, 1 }
 0x56e   : > { %v8137_v20 = vpack.c.bf16 %v7305_v10, %v7305_v10  ;;  %v6892_v31 = vmax.f32 %v5357_v11, 0.0  ;;  %v9359_v58 = vrot.slane %v9358_v39, 1 }
 0x56f   : > { %v9020_v24 = vunpack.c.l.bf16 %v7929_v19  ;;  %v7514_v38 = vpack.c.bf16 %v6682_v18, %v6682_v18  ;;  %v16598_v18 = vmax.f32 %v16556_v16, %v9245_v15 }
 0x570   : > { %v9072_v53 = vunpack.c.l.bf16 %v8137_v20  ;;  %v7724_v26 = vpack.c.bf16 %v6892_v31, %v6892_v31  ;;  %v5871_v30 = vpop.f32.mrf.mxu2  ;;  %v16601_v20 = vmax.f32 %v16559_v12, %v9131_v59  ;;  %v9473_v31 = vrot.slane %v9472_v41, 1 }
 0x571   : > { %v9404_v13 = vsel %vm8401_vm3, %v9020_v24, -inf  ;;  %v8917_v28 = vunpack.c.l.bf16 %v7514_v38  ;;  %v5872_v42 = vadd.f32 %v16413_v3, %v5871_v30  ;;  %v6391_v33 = vpop.f32.mrf.mxu3  ;;  %v4834_v40 = vpop.f32.mrf.mxu0 }
 0x572   : > { %v16581_v52 = vmax.f32 %v9403_v8, %v9404_v13  ;;  %v9518_v48 = vsel %vm8401_vm3, %v9072_v53, -inf  ;;  %v8971_v22 = vunpack.c.l.bf16 %v7724_v26  ;;  %v6392_v44 = vadd.f32 %v16413_v3, %v6391_v33  ;;  %v5359_v50 = vpop.f32.mrf.mxu1 }
 0x573   : > { %v16586_v49 = vmax.f32 %v9517_v60, %v9518_v48  ;;  %v9178_v55 = vsel %vm8401_vm3, %v8917_v28, -inf  ;;  %v7098_v37 = vmax.f32 %v5872_v42, 0.0  ;;  %v4835_v57 = vadd.f32 %v16413_v3, %v4834_v40 }
 0x574   : > { %v9179_v7 = vmax.f32 %v16570_v4, %v9178_v55  ;;  %v9296_v34 = vsel %vm8401_vm3, %v8971_v22, -inf  ;;  %v7306_v8 = vmax.f32 %v6392_v44, 0.0  ;;  %v5360_v63 = vadd.f32 %v16413_v3, %v5359_v50  ;;  %12922 = vmatmul.msk.bf16.gmra.mxu0 %vm3184_vm2, %v13366_v27  ;;  %13027 = vmatmul.msk.bf16.gmra.mxu1 %vm3184_vm2, %v13471_v29 }
 0x575   : > { %v9297_v0 = vmax.f32 %v9295_v6, %v9296_v34  ;;  %v7930_v47 = vpack.c.bf16 %v7098_v37, %v7098_v37  ;;  %v6683_v60 = vmax.f32 %v4835_v57, 0.0  ;;  %13130 = vmatmul.msk.bf16.gmra.mxu2 %vm3184_vm2, %v13574_v45  ;;  %v16605_v13 = vmax.f32 %v9358_v39, %v9359_v58  ;;  %v13472_v58 = vld [vmem:[%s13817_s11 + $0x5f8] sm:$0xff] }
 0x576   : > { %v8138_v10 = vpack.c.bf16 %v7306_v8, %v7306_v8  ;;  %13234 = vmatmul.msk.bf16.gmra.mxu3 %vm3184_vm2, %v13678_v56  ;;  %v6893_v19 = vmax.f32 %v5360_v63, 0.0  ;;  %v16612_v45 = vmax.f32 %v9472_v41, %v9473_v31  ;;  %v9534_v56 = vpack.c.bf16 %v16598_v18, %v16598_v18 }
 0x577   : > { %v9298_v11 = vrot.slane %v9297_v0, 4  ;;  %v9021_v4 = vunpack.c.l.bf16 %v7930_v47  ;;  %v7515_v23 = vpack.c.bf16 %v6683_v60, %v6683_v60  ;;  %v9532_v37 = vpack.c.bf16 %v16601_v20, %v16601_v20  ;;  %v13367_v60 = vld [vmem:[%s13817_s11 + $0x2b0] sm:$0xff] }
 0x578   : > { %v9073_v6 = vunpack.c.l.bf16 %v8138_v10  ;;  %v5874_v24 = vpop.f32.mrf.mxu2  ;;  %v7725_v33 = vpack.c.bf16 %v6893_v19, %v6893_v19  ;;  %v9536_v34 = vpack.c.bf16 %v16605_v13, %v16605_v13  ;;  %v9538_v8 = vpack.c.bf16 %v16612_v45, %v16612_v45  ;;  %v13575_v20 = vld [vmem:[%s13817_s11 + $0x930] sm:$0xff] }
 0x579   : > { %v9299_v38 = vmax.f32 %v9297_v0, %v9298_v11  ;;  %v9406_v53 = vsel %vm8401_vm3, %v9021_v4, -inf  ;;  %v8918_v26 = vunpack.c.l.bf16 %v7515_v23  ;;  %v5875_v30 = vadd.f32 %v16413_v3, %v5874_v24  ;;  %v6394_v27 = vpop.f32.mrf.mxu3  ;;  %v4836_v29 = vpop.f32.mrf.mxu0 }
 0x57a   : > { %v9407_v28 = vmax.f32 %v16581_v52, %v9406_v53  ;;  %v9520_v16 = vsel %vm8401_vm3, %v9073_v6, -inf  ;;  %v6395_v12 = vadd.f32 %v16413_v3, %v6394_v27  ;;  %v5361_v15 = vpop.f32.mrf.mxu1  ;;  %v4837_v39 = vadd.f32 %v16413_v3, %v4836_v29 }
 0x57b   : > { %v9521_v59 = vmax.f32 %v16586_v49, %v9520_v16  ;;  %v9180_v42 = vsel %vm8401_vm3, %v8918_v26, -inf  ;;  %v7099_v40 = vmax.f32 %v5875_v30, 0.0  ;;  %v9300_v44 = vrot.slane %v9299_v38, 2  ;;  %v13679_v30 = vld [vmem:[%s13817_s11 + $0xc70] sm:$0xff] }
 0x57c   : > { %v9181_v48 = vmax.f32 %v9179_v7, %v9180_v42  ;;  %v7307_v22 = vmax.f32 %v6395_v12, 0.0  ;;  %v5362_v50 = vadd.f32 %v16413_v3, %v5361_v15  ;;  %v6684_v55 = vmax.f32 %v4837_v39, 0.0 }
 0x57d   : > { %v7931_v52 = vpack.c.bf16 %v7099_v40, %v7099_v40  ;;  %v9720_v41 = vunpack.c.l.bf16 %v7725_v33  ;;  %v9301_v10 = vmax.f32 %v9299_v38, %v9300_v44 }
 0x57e   : > { %v8139_v49 = vpack.c.bf16 %v7307_v22, %v7307_v22  ;;  %v6894_v7 = vmax.f32 %v5362_v50, 0.0  ;;  %v7516_v0 = vpack.c.bf16 %v6684_v55, %v6684_v55  ;;  %v16643_v50 = vunpack.c.l.b16 %v9532_v37 }
 0x57f   : > { %v9022_v57 = vunpack.c.l.bf16 %v7931_v52  ;;  %v10021_v27 = vsel %vm8401_vm3, %v9720_v41, -inf  ;;  %v16641_v52 = vunpack.c.l.b16 %v9534_v56  ;;  %v16645_v41 = vunpack.c.l.b16 %v9536_v34 }
 0x580   : > { %v9074_v63 = vunpack.c.l.bf16 %v8139_v49  ;;  %v5876_v47 = vpop.f32.mrf.mxu2  ;;  %v7726_v4 = vpack.c.bf16 %v6894_v7, %v6894_v7  ;;  %v8919_v24 = vunpack.c.l.bf16 %v7516_v0  ;;  %v16647_v0 = vunpack.c.l.b16 %v9538_v8 }
 0x581   : > { %v9408_v11 = vsel %vm8401_vm3, %v9022_v57, -inf  ;;  %v5877_v23 = vadd.f32 %v16413_v3, %v5876_v47  ;;  %v6396_v19 = vpop.f32.mrf.mxu3  ;;  %v4839_v18 = vpop.f32.mrf.mxu0 }
 0x582   : > { %v9409_v31 = vmax.f32 %v9407_v28, %v9408_v11  ;;  %v9522_v6 = vsel %vm8401_vm3, %v9074_v63, -inf  ;;  %v6397_v53 = vadd.f32 %v16413_v3, %v6396_v19  ;;  %v5364_v26 = vpop.f32.mrf.mxu1  ;;  %v9721_v38 = vunpack.c.l.bf16 %v7726_v4 }
 0x583   : > { %v9523_v29 = vmax.f32 %v9521_v59, %v9522_v6  ;;  %v7100_v13 = vmax.f32 %v5877_v23, 0.0  ;;  %v9182_v16 = vsel %vm8401_vm3, %v8919_v24, -inf  ;;  %v4840_v15 = vadd.f32 %v16413_v3, %v4839_v18 }
 0x584   : > { %v7308_v12 = vmax.f32 %v6397_v53, 0.0  ;;  %v5365_v42 = vadd.f32 %v16413_v3, %v5364_v26  ;;  %12923 = vmatmul.msk.bf16.gmra.mxu0 %vm3184_vm2, %v13367_v60  ;;  %13028 = vmatmul.msk.bf16.gmra.mxu1 %vm3184_vm2, %v13472_v58  ;;  %v9302_v28 = vrot.slane %v9301_v10, 1  ;;  %v9183_v33 = vmax.f32 %v9181_v48, %v9182_v16 }
 0x585   : > { %v10022_v40 = vsel %vm8401_vm3, %v9721_v38, -inf  ;;  %v7932_v45 = vpack.c.bf16 %v7100_v13, %v7100_v13  ;;  %13131 = vmatmul.msk.bf16.gmra.mxu2 %vm3184_vm2, %v13575_v20  ;;  %v6685_v39 = vmax.f32 %v4840_v15, 0.0 }
 0x586   : > { %v10023_v59 = vmax.f32 %v10021_v27, %v10022_v40  ;;  %v8140_v22 = vpack.c.bf16 %v7308_v12, %v7308_v12  ;;  %v6895_v44 = vmax.f32 %v5365_v42, 0.0  ;;  %13235 = vmatmul.msk.bf16.gmra.mxu3 %vm3184_vm2, %v13679_v30  ;;  %v9184_v49 = vrot.slane %v9183_v33, 4 }
 0x587   : > { %v9023_v55 = vunpack.c.l.bf16 %v7932_v45  ;;  %v7517_v57 = vpack.c.bf16 %v6685_v39, %v6685_v39  ;;  %v16651_v4 = vmax.f32 %v9301_v10, %v9302_v28 }
 0x588   : > { %v9075_v48 = vunpack.c.l.bf16 %v8140_v22  ;;  %v7727_v7 = vpack.c.bf16 %v6895_v44, %v6895_v44  ;;  %v5879_v63 = vpop.f32.mrf.mxu2  ;;  %v9185_v47 = vmax.f32 %v9183_v33, %v9184_v49  ;;  %v13368_v44 = vld [vmem:[%s13817_s11 + $0x2b8] sm:$0xff]  ;;  %v13473_v49 = vld [vmem:[%s13817_s11 + $0x600] sm:$0xff] }
 0x589   : > { %v9410_v60 = vsel %vm8401_vm3, %v9023_v55, -inf  ;;  %v5880_v58 = vadd.f32 %v16413_v3, %v5879_v63  ;;  %v6399_v11 = vpop.f32.mrf.mxu3  ;;  %v4841_v56 = vpop.f32.mrf.mxu0  ;;  %v9668_v53 = vunpack.c.l.bf16 %v7517_v57  ;;  %v9535_v15 = vpack.c.bf16 %v16651_v4, %v16651_v4 }
 0x58a   : > { %v9411_v37 = vmax.f32 %v9409_v31, %v9410_v60  ;;  %v9524_v23 = vsel %vm8401_vm3, %v9075_v48, -inf  ;;  %v9722_v34 = vunpack.c.l.bf16 %v7727_v7  ;;  %v5366_v19 = vpop.f32.mrf.mxu1  ;;  %v9186_v18 = vrot.slane %v9185_v47, 2  ;;  %v13576_v60 = vld [vmem:[%s13817_s11 + $0x938] sm:$0xff] }
 0x58b   : > { %v9525_v20 = vmax.f32 %v9523_v29, %v9524_v23  ;;  %v7101_v6 = vmax.f32 %v5880_v58, 0.0  ;;  %v6400_v8 = vadd.f32 %v16413_v3, %v6399_v11  ;;  %v4842_v30 = vadd.f32 %v16413_v3, %v4841_v56  ;;  %v13680_v23 = vld [vmem:[%s13817_s11 + $0xc78] sm:$0xff] }
 0x58c   : > { %v9412_v24 = vrot.slane %v9411_v37, 4  ;;  %v10024_v26 = vsel %vm8401_vm3, %v9722_v34, -inf  ;;  %v9187_v27 = vmax.f32 %v9185_v47, %v9186_v18  ;;  %v5367_v12 = vadd.f32 %v16413_v3, %v5366_v19 }
 0x58d   : > { %v9526_v10 = vrot.slane %v9525_v20, 4  ;;  %v16657_v31 = vmax.f32 %v10023_v59, %v10024_v26  ;;  %v7933_v38 = vpack.c.bf16 %v7101_v6, %v7101_v6  ;;  %v7309_v16 = vmax.f32 %v6400_v8, 0.0 }
 0x58e   : > { %v9413_v13 = vmax.f32 %v9411_v37, %v9412_v24  ;;  %v6686_v29 = vmax.f32 %v4842_v30, 0.0  ;;  %v9188_v42 = vrot.slane %v9187_v27, 1  ;;  %v6896_v39 = vmax.f32 %v5367_v12, 0.0 }
 0x58f   : > { %v9527_v28 = vmax.f32 %v9525_v20, %v9526_v10  ;;  %v9772_v33 = vunpack.c.l.bf16 %v7933_v38  ;;  %v8141_v45 = vpack.c.bf16 %v7309_v16, %v7309_v16  ;;  %v16665_v57 = vsel %vm8401_vm3, %v9668_v53, -inf }
 0x590   : > { %v9414_v40 = vrot.slane %v9413_v13, 2  ;;  %v7518_v22 = vpack.c.bf16 %v6686_v29, %v6686_v29  ;;  %v5881_v59 = vpop.f32.mrf.mxu2  ;;  %v9189_v55 = vmax.f32 %v9187_v27, %v9188_v42  ;;  %v7728_v4 = vpack.c.bf16 %v6896_v39, %v6896_v39 }
 0x591   : > { %v9528_v48 = vrot.slane %v9527_v28, 2  ;;  %v5882_v7 = vadd.f32 %v16413_v3, %v5881_v59  ;;  %v6401_v63 = vpop.f32.mrf.mxu3  ;;  %v4844_v47 = vpop.f32.mrf.mxu0  ;;  %v16670_v11 = vsel %vm8401_vm3, %v9772_v33, -inf  ;;  %v9824_v8 = vunpack.c.l.bf16 %v8141_v45 }
 0x592   : > { %v9415_v58 = vmax.f32 %v9413_v13, %v9414_v40  ;;  %v9669_v56 = vunpack.c.l.bf16 %v7518_v22  ;;  %v5369_v37 = vpop.f32.mrf.mxu1  ;;  %v9533_v34 = vpack.c.bf16 %v9189_v55, %v9189_v55  ;;  %v6402_v20 = vadd.f32 %v16413_v3, %v6401_v63 }
 0x593   : > { %v9529_v19 = vmax.f32 %v9527_v28, %v9528_v48  ;;  %v7102_v18 = vmax.f32 %v5882_v7, 0.0  ;;  %v9723_v53 = vunpack.c.l.bf16 %v7728_v4  ;;  %v4845_v29 = vadd.f32 %v16413_v3, %v4844_v47 }
 0x594   : > { %v9416_v6 = vrot.slane %v9415_v58, 1  ;;  %v9908_v24 = vsel %vm8401_vm3, %v9669_v56, -inf  ;;  %12924 = vmatmul.msk.bf16.gmra.mxu0 %vm3184_vm2, %v13368_v44  ;;  %13029 = vmatmul.msk.bf16.gmra.mxu1 %vm3184_vm2, %v13473_v49  ;;  %v9552_v26 = vunpack.c.l.b16 %v9533_v34  ;;  %v7310_v16 = vmax.f32 %v6402_v20, 0.0 }
 0x595   : > { %v9530_v30 = vrot.slane %v9529_v19, 1  ;;  %v9909_v27 = vmax.f32 %v16665_v57, %v9908_v24  ;;  %v7934_v10 = vpack.c.bf16 %v7102_v18, %v7102_v18  ;;  %13132 = vmatmul.msk.bf16.gmra.mxu2 %vm3184_vm2, %v13576_v60  ;;  %v16680_v13 = vsel %vm8401_vm3, %v9723_v53, -inf }
 0x596   : > { %v9417_v38 = vmax.f32 %v9415_v58, %v9416_v6  ;;  %13236 = vmatmul.msk.bf16.gmra.mxu3 %vm3184_vm2, %v13680_v23  ;;  %v9560_v12 = vsel %vm9559_vm4, %v9552_v26, %v16643_v50  ;;  %v10027_v28 = vmax.f32 %v16657_v31, %v16680_v13  ;;  %v9554_v40 = vunpack.c.l.b16 %v9535_v15 }
 0x597   : > { %v16686_v42 = vmax.f32 %v9529_v19, %v9530_v30  ;;  %v9773_v33 = vunpack.c.l.bf16 %v7934_v10  ;;  %v9562_v45 = vsel %vm9561_vm5, %v16641_v52, %v9560_v12  ;;  %v8142_v22 = vpack.c.bf16 %v7310_v16, %v7310_v16  ;;  %v13369_v12 = vld [vmem:[%s13817_s11 + $0x2c0] sm:$0xff] }
 0x598   : > { %v6687_v39 = vmax.f32 %v4845_v29, 0.0  ;;  %v5884_v59 = vpop.f32.mrf.mxu2  ;;  %v10249_v44 = vsel %vm8401_vm3, %v9824_v8, -inf  ;;  %v5370_v55 = vadd.f32 %v16413_v3, %v5369_v37  ;;  %v9537_v7 = vpack.c.bf16 %v9417_v38, %v9417_v38 }
 0x599   : > { %v10136_v49 = vsel %vm8401_vm3, %v9773_v33, -inf  ;;  %v5885_v50 = vadd.f32 %v16413_v3, %v5884_v59  ;;  %v6404_v48 = vpop.f32.mrf.mxu3  ;;  %v4846_v57 = vpop.f32.mrf.mxu0  ;;  %v9825_v15 = vunpack.c.l.bf16 %v8142_v22  ;;  %v9539_v52 = vpack.c.bf16 %v16686_v42, %v16686_v42  ;;  %v13474_v42 = vld [vmem:[%s13817_s11 + $0x608] sm:$0xff] }
 0x59a   : > { %v10137_v31 = vmax.f32 %v16670_v11, %v10136_v49  ;;  %v7519_v63 = vpack.c.bf16 %v6687_v39, %v6687_v39  ;;  %v5371_v47 = vpop.f32.mrf.mxu1  ;;  %v6897_v60 = vmax.f32 %v5370_v55, 0.0  ;;  %v6405_v56 = vadd.f32 %v16413_v3, %v6404_v48  ;;  %v13577_v49 = vld [vmem:[%s13817_s11 + $0x940] sm:$0xff] }
 0x59b   : > { %v7103_v58 = vmax.f32 %v5885_v50, 0.0  ;;  %v10250_v4 = vsel %vm8401_vm3, %v9825_v15, -inf  ;;  %v4847_v23 = vadd.f32 %v16413_v3, %v4846_v57  ;;  %v5372_v34 = vadd.f32 %v16413_v3, %v5371_v47 }
 0x59c   : > { %v9670_v37 = vunpack.c.l.bf16 %v7519_v63  ;;  %v10251_v11 = vmax.f32 %v10249_v44, %v10250_v4  ;;  %v7729_v19 = vpack.c.bf16 %v6897_v60, %v6897_v60  ;;  %v7311_v20 = vmax.f32 %v6405_v56, 0.0 }
 0x59d   : > { %v7935_v18 = vpack.c.bf16 %v7103_v58, %v7103_v58  ;;  %v6688_v8 = vmax.f32 %v4847_v23, 0.0  ;;  %v6898_v24 = vmax.f32 %v5372_v34, 0.0  ;;  %v9564_v53 = vsel %vm9563_vm6, %v9554_v40, %v9562_v45  ;;  %v16716_v45 = vld [vmem:[%s17625_s2] ss:$0 sm:$0xff] }
 0x59e   : > { %v9910_v6 = vsel %vm8401_vm3, %v9670_v37, -inf  ;;  %v9724_v30 = vunpack.c.l.bf16 %v7729_v19  ;;  %v8143_v3 = vpack.c.bf16 %v7311_v20, %v7311_v20  ;;  %v9556_v38 = vunpack.c.l.b16 %v9537_v7  ;;  %v13681_v7 = vld [vmem:[%s13817_s11 + $0xc80] sm:$0xff] }
 0x59f   : > { %v16705_v26 = vmax.f32 %v9909_v27, %v9910_v6  ;;  %v9774_v10 = vunpack.c.l.bf16 %v7935_v18  ;;  %v7520_v13 = vpack.c.bf16 %v6688_v8, %v6688_v8  ;;  %v7730_v16 = vpack.c.bf16 %v6898_v24, %v6898_v24 }
 0x5a0   : > { %v5886_v29 = vpop.f32.mrf.mxu2  ;;  %v9566_v33 = vsel %vm9565_vm7, %v16645_v41, %v9564_v53  ;;  %v10028_v22 = vsel %vm8401_vm3, %v9724_v30, -inf  ;;  %v9826_v27 = vunpack.c.l.bf16 %v8143_v3  ;;  %v9558_v19 = vunpack.c.l.b16 %v9539_v52 }
 0x5a1   : > { %v10138_v40 = vsel %vm8401_vm3, %v9774_v10, -inf  ;;  %v5887_v39 = vadd.f32 %v16716_v45, %v5886_v29  ;;  %v6406_v59 = vpop.f32.mrf.mxu3  ;;  %v4849_v44 = vpop.f32.mrf.mxu0  ;;  %v10029_v55 = vmax.f32 %v10027_v28, %v10028_v22  ;;  %v9671_v48 = vunpack.c.l.bf16 %v7520_v13 }
 0x5a2   : > { %v16720_v50 = vmax.f32 %v10137_v31, %v10138_v40  ;;  %v9725_v41 = vunpack.c.l.bf16 %v7730_v16  ;;  %v5374_v57 = vpop.f32.mrf.mxu1  ;;  %v10252_v15 = vsel %vm8401_vm3, %v9826_v27, -inf  ;;  %v6407_v47 = vadd.f32 %v16716_v45, %v6406_v59 }
 0x5a3   : > { %v7104_v63 = vmax.f32 %v5887_v39, 0.0  ;;  %v4850_v60 = vadd.f32 %v16716_v45, %v4849_v44  ;;  %v16726_v58 = vmax.f32 %v10251_v11, %v10252_v15  ;;  %v9912_v56 = vsel %vm8401_vm3, %v9671_v48, -inf }
 0x5a4   : > { %v10030_v4 = vsel %vm8401_vm3, %v9725_v41, -inf  ;;  %v5375_v28 = vadd.f32 %v16716_v45, %v5374_v57  ;;  %12925 = vmatmul.msk.bf16.gmra.mxu0 %vm3184_vm2, %v13369_v12  ;;  %13030 = vmatmul.msk.bf16.gmra.mxu1 %vm3184_vm2, %v13474_v42  ;;  %v9913_v31 = vmax.f32 %v16705_v26, %v9912_v56  ;;  %v7312_v34 = vmax.f32 %v6407_v47, 0.0 }
 0x5a5   : > { %v10031_v37 = vmax.f32 %v10029_v55, %v10030_v4  ;;  %v7936_v23 = vpack.c.bf16 %v7104_v63, %v7104_v63  ;;  %13133 = vmatmul.msk.bf16.gmra.mxu2 %vm3184_vm2, %v13577_v49  ;;  %v6689_v11 = vmax.f32 %v4850_v60, 0.0  ;;  %v9568_v20 = vsel %vm9567_vm8, %v9556_v38, %v9566_v33  ;;  %v13370_v4 = vld [vmem:[%s13817_s11 + $0x2c8] sm:$0xff] }
 0x5a6   : > { %v6899_v18 = vmax.f32 %v5375_v28, 0.0  ;;  %13237 = vmatmul.msk.bf16.gmra.mxu3 %vm3184_vm2, %v13681_v7  ;;  %v8144_v8 = vpack.c.bf16 %v7312_v34, %v7312_v34  ;;  %v9570_v24 = vsel %vm9569_vm9, %v16647_v0, %v9568_v20  ;;  %v13475_v28 = vld [vmem:[%s13817_s11 + $0x610] sm:$0xff] }
 0x5a7   : > { %v9775_v6 = vunpack.c.l.bf16 %v7936_v23  ;;  %v7521_v53 = vpack.c.bf16 %v6689_v11, %v6689_v11  ;;  %v16740_v10 = vsel %vm9571_vm10, %v9558_v19, %v9570_v24  ;;  %v13578_v11 = vld [vmem:[%s13817_s11 + $0x948] sm:$0xff] }
 0x5a8   : > { %v7731_v30 = vpack.c.bf16 %v6899_v18, %v6899_v18  ;;  %v5889_v26 = vpop.f32.mrf.mxu2  ;;  %v9827_v52 = vunpack.c.l.bf16 %v8144_v8 }
 0x5a9   : > { %v10140_v3 = vsel %vm8401_vm3, %v9775_v6, -inf  ;;  %v5890_v13 = vadd.f32 %v16716_v45, %v5889_v26  ;;  %v6409_v16 = vpop.f32.mrf.mxu3  ;;  %v4851_v29 = vpop.f32.mrf.mxu0  ;;  %v9672_v12 = vunpack.c.l.bf16 %v7521_v53  ;;  %v13682_v53 = vld [vmem:[%s13817_s11 + $0xc88] sm:$0xff] }
 0x5aa   : > { %v10141_v38 = vmax.f32 %v16720_v50, %v10140_v3  ;;  %v9726_v42 = vunpack.c.l.bf16 %v7731_v30  ;;  %v6410_v33 = vadd.f32 %v16716_v45, %v6409_v16  ;;  %v5376_v0 = vpop.f32.mrf.mxu1  ;;  %v10254_v22 = vsel %vm8401_vm3, %v9827_v52, -inf }
 0x5ab   : > { %v7105_v40 = vmax.f32 %v5890_v13, 0.0  ;;  %v4852_v27 = vadd.f32 %v16716_v45, %v4851_v29  ;;  %v5377_v39 = vadd.f32 %v16716_v45, %v5376_v0  ;;  %v10255_v59 = vmax.f32 %v16726_v58, %v10254_v22 }
 0x5ac   : > { %v9914_v44 = vsel %vm8401_vm3, %v9672_v12, -inf  ;;  %v10032_v49 = vsel %vm8401_vm3, %v9726_v42, -inf  ;;  %v7313_v55 = vmax.f32 %v6410_v33, 0.0 }
 0x5ad   : > { %v9915_v50 = vmax.f32 %v9913_v31, %v9914_v44  ;;  %v16752_v48 = vmax.f32 %v10031_v37, %v10032_v49  ;;  %v7937_v41 = vpack.c.bf16 %v7105_v40, %v7105_v40  ;;  %v6690_v57 = vmax.f32 %v4852_v27, 0.0 }
 0x5ae   : > { %v8145_v7 = vpack.c.bf16 %v7313_v55, %v7313_v55  ;;  %v6900_v15 = vmax.f32 %v5377_v39, 0.0 }
 0x5af   : > { %v9776_v63 = vunpack.c.l.bf16 %v7937_v41  ;;  %v7522_v47 = vpack.c.bf16 %v6690_v57, %v6690_v57 }
 0x5b0   : > { %v9828_v60 = vunpack.c.l.bf16 %v8145_v7  ;;  %v7732_v56 = vpack.c.bf16 %v6900_v15, %v6900_v15  ;;  %v5891_v58 = vpop.f32.mrf.mxu2 }
 0x5b1   : > { %v10142_v23 = vsel %vm8401_vm3, %v9776_v63, -inf  ;;  %v9673_v34 = vunpack.c.l.bf16 %v7522_v47  ;;  %v5892_v31 = vadd.f32 %v16716_v45, %v5891_v58  ;;  %v6411_v37 = vpop.f32.mrf.mxu3  ;;  %v4854_v19 = vpop.f32.mrf.mxu0 }
 0x5b2   : > { %v16759_v18 = vmax.f32 %v10141_v38, %v10142_v23  ;;  %v10256_v20 = vsel %vm8401_vm3, %v9828_v60, -inf  ;;  %v9727_v6 = vunpack.c.l.bf16 %v7732_v56  ;;  %v6412_v8 = vadd.f32 %v16716_v45, %v6411_v37  ;;  %v5379_v24 = vpop.f32.mrf.mxu1 }
 0x5b3   : > { %v16764_v30 = vmax.f32 %v10255_v59, %v10256_v20  ;;  %v9916_v26 = vsel %vm8401_vm3, %v9673_v34, -inf  ;;  %v7106_v3 = vmax.f32 %v5892_v31, 0.0  ;;  %v4855_v52 = vadd.f32 %v16716_v45, %v4854_v19 }
 0x5b4   : > { %v9917_v13 = vmax.f32 %v9915_v50, %v9916_v26  ;;  %v10034_v16 = vsel %vm8401_vm3, %v9727_v6, -inf  ;;  %v7314_v29 = vmax.f32 %v6412_v8, 0.0  ;;  %v5380_v38 = vadd.f32 %v16716_v45, %v5379_v24  ;;  %12926 = vmatmul.msk.bf16.gmra.mxu0 %vm3184_vm2, %v13370_v4  ;;  %13031 = vmatmul.msk.bf16.gmra.mxu1 %vm3184_vm2, %v13475_v28  ;;  %v13371_v26 = vld [vmem:[%s13817_s11 + $0x2d0] sm:$0xff] }
 0x5b5   : > { %v10035_v12 = vmax.f32 %v16752_v48, %v10034_v16  ;;  %v7938_v42 = vpack.c.bf16 %v7106_v3, %v7106_v3  ;;  %v6691_v33 = vmax.f32 %v4855_v52, 0.0  ;;  %13134 = vmatmul.msk.bf16.gmra.mxu2 %vm3184_vm2, %v13578_v11  ;;  %v13476_v3 = vld [vmem:[%s13817_s11 + $0x618] sm:$0xff] }
 0x5b6   : > { %v8146_v0 = vpack.c.bf16 %v7314_v29, %v7314_v29  ;;  %v6901_v22 = vmax.f32 %v5380_v38, 0.0  ;;  %13238 = vmatmul.msk.bf16.gmra.mxu3 %vm3184_vm2, %v13682_v53 }
 0x5b7   : > { %v9777_v40 = vunpack.c.l.bf16 %v7938_v42  ;;  %v7523_v27 = vpack.c.bf16 %v6691_v33, %v6691_v33 }
 0x5b8   : > { %v9829_v39 = vunpack.c.l.bf16 %v8146_v0  ;;  %v7733_v59 = vpack.c.bf16 %v6901_v22, %v6901_v22  ;;  %v5894_v44 = vpop.f32.mrf.mxu2 }
 0x5b9   : > { %v10144_v49 = vsel %vm8401_vm3, %v9777_v40, -inf  ;;  %v9674_v55 = vunpack.c.l.bf16 %v7523_v27  ;;  %v5895_v50 = vadd.f32 %v16716_v45, %v5894_v44  ;;  %v6414_v41 = vpop.f32.mrf.mxu3  ;;  %v4856_v48 = vpop.f32.mrf.mxu0  ;;  %v13683_v27 = vld [vmem:[%s13817_s11 + $0xc90] sm:$0xff] }
 0x5ba   : > { %v10145_v57 = vmax.f32 %v16759_v18, %v10144_v49  ;;  %v10258_v7 = vsel %vm8401_vm3, %v9829_v39, -inf  ;;  %v9728_v15 = vunpack.c.l.bf16 %v7733_v59  ;;  %v6415_v63 = vadd.f32 %v16716_v45, %v6414_v41  ;;  %v5381_v47 = vpop.f32.mrf.mxu1 }
 0x5bb   : > { %v10259_v60 = vmax.f32 %v16764_v30, %v10258_v7  ;;  %v9918_v56 = vsel %vm8401_vm3, %v9674_v55, -inf  ;;  %v7107_v58 = vmax.f32 %v5895_v50, 0.0  ;;  %v4857_v4 = vadd.f32 %v16716_v45, %v4856_v48 }
 0x5bc   : > { %v16783_v28 = vmax.f32 %v9917_v13, %v9918_v56  ;;  %v10036_v23 = vsel %vm8401_vm3, %v9728_v15, -inf  ;;  %v7315_v34 = vmax.f32 %v6415_v63, 0.0  ;;  %v5382_v31 = vadd.f32 %v16716_v45, %v5381_v47 }
 0x5bd   : > { %v16787_v37 = vmax.f32 %v10035_v12, %v10036_v23  ;;  %v7939_v19 = vpack.c.bf16 %v7107_v58, %v7107_v58  ;;  %v6692_v11 = vmax.f32 %v4857_v4, 0.0  ;;  %v13579_v12 = vld [vmem:[%s13817_s11 + $0x950] sm:$0xff] }
 0x5be   : > { %v8147_v18 = vpack.c.bf16 %v7315_v34, %v7315_v34  ;;  %v6902_v20 = vmax.f32 %v5382_v31, 0.0 }
 0x5bf   : > { %v9778_v6 = vunpack.c.l.bf16 %v7939_v19  ;;  %v7524_v8 = vpack.c.bf16 %v6692_v11, %v6692_v11 }
 0x5c0   : > { %v9830_v24 = vunpack.c.l.bf16 %v8147_v18  ;;  %v7734_v53 = vpack.c.bf16 %v6902_v20, %v6902_v20  ;;  %v5896_v30 = vpop.f32.mrf.mxu2 }
 0x5c1   : > { %v10146_v52 = vsel %vm8401_vm3, %v9778_v6, -inf  ;;  %v9675_v13 = vunpack.c.l.bf16 %v7524_v8  ;;  %v5897_v16 = vadd.f32 %v16716_v45, %v5896_v30  ;;  %v6416_v29 = vpop.f32.mrf.mxu3  ;;  %v4859_v38 = vpop.f32.mrf.mxu0 }
 0x5c2   : > { %v16794_v42 = vmax.f32 %v10145_v57, %v10146_v52  ;;  %v10260_v33 = vsel %vm8401_vm3, %v9830_v24, -inf  ;;  %v9729_v0 = vunpack.c.l.bf16 %v7734_v53  ;;  %v6417_v22 = vadd.f32 %v16716_v45, %v6416_v29  ;;  %v5384_v40 = vpop.f32.mrf.mxu1 }
 0x5c3   : > { %v16799_v39 = vmax.f32 %v10259_v60, %v10260_v33  ;;  %v9920_v59 = vsel %vm8401_vm3, %v9675_v13, -inf  ;;  %v7108_v44 = vmax.f32 %v5897_v16, 0.0  ;;  %v4860_v49 = vadd.f32 %v16716_v45, %v4859_v38 }
 0x5c4   : > { %v9921_v55 = vmax.f32 %v16783_v28, %v9920_v59  ;;  %v10038_v50 = vsel %vm8401_vm3, %v9729_v0, -inf  ;;  %v7316_v41 = vmax.f32 %v6417_v22, 0.0  ;;  %v5385_v48 = vadd.f32 %v16716_v45, %v5384_v40  ;;  %12927 = vmatmul.msk.bf16.gmra.mxu0 %vm3184_vm2, %v13371_v26  ;;  %13032 = vmatmul.msk.bf16.gmra.mxu1 %vm3184_vm2, %v13476_v3  ;;  %v13372_v59 = vld [vmem:[%s13817_s11 + $0x2d8] sm:$0xff] }
 0x5c5   : > { %v10039_v57 = vmax.f32 %v16787_v37, %v10038_v50  ;;  %v7940_v7 = vpack.c.bf16 %v7108_v44, %v7108_v44  ;;  %v6693_v15 = vmax.f32 %v4860_v49, 0.0  ;;  %13135 = vmatmul.msk.bf16.gmra.mxu2 %vm3184_vm2, %v13579_v12  ;;  %v13477_v44 = vld [vmem:[%s13817_s11 + $0x620] sm:$0xff] }
 0x5c6   : > { %v8148_v63 = vpack.c.bf16 %v7316_v41, %v7316_v41  ;;  %v6903_v47 = vmax.f32 %v5385_v48, 0.0  ;;  %13239 = vmatmul.msk.bf16.gmra.mxu3 %vm3184_vm2, %v13683_v27 }
 0x5c7   : > { %v9779_v60 = vunpack.c.l.bf16 %v7940_v7  ;;  %v7525_v56 = vpack.c.bf16 %v6693_v15, %v6693_v15 }
 0x5c8   : > { %v9831_v58 = vunpack.c.l.bf16 %v8148_v63  ;;  %v7735_v4 = vpack.c.bf16 %v6903_v47, %v6903_v47  ;;  %v5899_v28 = vpop.f32.mrf.mxu2 }
 0x5c9   : > { %v10148_v23 = vsel %vm8401_vm3, %v9779_v60, -inf  ;;  %v9676_v34 = vunpack.c.l.bf16 %v7525_v56  ;;  %v5900_v31 = vadd.f32 %v16716_v45, %v5899_v28  ;;  %v6419_v19 = vpop.f32.mrf.mxu3  ;;  %v4861_v37 = vpop.f32.mrf.mxu0  ;;  %v13684_v56 = vld [vmem:[%s13817_s11 + $0xc98] sm:$0xff] }
 0x5ca   : > { %v10149_v11 = vmax.f32 %v16794_v42, %v10148_v23  ;;  %v10262_v18 = vsel %vm8401_vm3, %v9831_v58, -inf  ;;  %v9730_v20 = vunpack.c.l.bf16 %v7735_v4  ;;  %v6420_v6 = vadd.f32 %v16716_v45, %v6419_v19  ;;  %v5386_v8 = vpop.f32.mrf.mxu1 }
 0x5cb   : > { %v10263_v24 = vmax.f32 %v16799_v39, %v10262_v18  ;;  %v9922_v53 = vsel %vm8401_vm3, %v9676_v34, -inf  ;;  %v7109_v30 = vmax.f32 %v5900_v31, 0.0  ;;  %v4862_v26 = vadd.f32 %v16716_v45, %v4861_v37 }
 0x5cc   : > { %v16819_v3 = vmax.f32 %v9921_v55, %v9922_v53  ;;  %v10040_v52 = vsel %vm8401_vm3, %v9730_v20, -inf  ;;  %v7317_v13 = vmax.f32 %v6420_v6, 0.0  ;;  %v5387_v16 = vadd.f32 %v16716_v45, %v5386_v8 }
 0x5cd   : > { %v16823_v29 = vmax.f32 %v10039_v57, %v10040_v52  ;;  %v7941_v38 = vpack.c.bf16 %v7109_v30, %v7109_v30  ;;  %v6694_v12 = vmax.f32 %v4862_v26, 0.0  ;;  %v13580_v57 = vld [vmem:[%s13817_s11 + $0x958] sm:$0xff] }
 0x5ce   : > { %v8149_v42 = vpack.c.bf16 %v7317_v13, %v7317_v13  ;;  %v6904_v33 = vmax.f32 %v5387_v16, 0.0 }
 0x5cf   : > { %v9780_v0 = vunpack.c.l.bf16 %v7941_v38  ;;  %v7526_v22 = vpack.c.bf16 %v6694_v12, %v6694_v12 }
 0x5d0   : > { %v9832_v40 = vunpack.c.l.bf16 %v8149_v42  ;;  %v7736_v27 = vpack.c.bf16 %v6904_v33, %v6904_v33  ;;  %v5901_v39 = vpop.f32.mrf.mxu2 }
 0x5d1   : > { %v10150_v49 = vsel %vm8401_vm3, %v9780_v0, -inf  ;;  %v9677_v55 = vunpack.c.l.bf16 %v7526_v22  ;;  %v5902_v50 = vadd.f32 %v16716_v45, %v5901_v39  ;;  %v6421_v41 = vpop.f32.mrf.mxu3  ;;  %v4864_v48 = vpop.f32.mrf.mxu0 }
 0x5d2   : > { %v16830_v7 = vmax.f32 %v10149_v11, %v10150_v49  ;;  %v10264_v15 = vsel %vm8401_vm3, %v9832_v40, -inf  ;;  %v9731_v63 = vunpack.c.l.bf16 %v7736_v27  ;;  %v6422_v47 = vadd.f32 %v16716_v45, %v6421_v41  ;;  %v5389_v60 = vpop.f32.mrf.mxu1 }
 0x5d3   : > { %v16835_v58 = vmax.f32 %v10263_v24, %v10264_v15  ;;  %v9924_v4 = vsel %vm8401_vm3, %v9677_v55, -inf  ;;  %v7110_v28 = vmax.f32 %v5902_v50, 0.0  ;;  %v4865_v23 = vadd.f32 %v16716_v45, %v4864_v48 }
 0x5d4   : > { %v9925_v34 = vmax.f32 %v16819_v3, %v9924_v4  ;;  %v10042_v31 = vsel %vm8401_vm3, %v9731_v63, -inf  ;;  %v7318_v19 = vmax.f32 %v6422_v47, 0.0  ;;  %v5390_v37 = vadd.f32 %v16716_v45, %v5389_v60  ;;  %12928 = vmatmul.msk.bf16.gmra.mxu0 %vm3184_vm2, %v13372_v59  ;;  %13033 = vmatmul.msk.bf16.gmra.mxu1 %vm3184_vm2, %v13477_v44  ;;  %v13373_v4 = vld [vmem:[%s13817_s11 + $0x2e0] sm:$0xff] }
 0x5d5   : > { %v10043_v11 = vmax.f32 %v16823_v29, %v10042_v31  ;;  %v7942_v18 = vpack.c.bf16 %v7110_v28, %v7110_v28  ;;  %v6695_v20 = vmax.f32 %v4865_v23, 0.0  ;;  %13136 = vmatmul.msk.bf16.gmra.mxu2 %vm3184_vm2, %v13580_v57  ;;  %v13478_v28 = vld [vmem:[%s13817_s11 + $0x628] sm:$0xff] }
 0x5d6   : > { %v8150_v6 = vpack.c.bf16 %v7318_v19, %v7318_v19  ;;  %v6905_v8 = vmax.f32 %v5390_v37, 0.0  ;;  %13240 = vmatmul.msk.bf16.gmra.mxu3 %vm3184_vm2, %v13684_v56 }
 0x5d7   : > { %v9781_v24 = vunpack.c.l.bf16 %v7942_v18  ;;  %v7527_v53 = vpack.c.bf16 %v6695_v20, %v6695_v20 }
 0x5d8   : > { %v9833_v30 = vunpack.c.l.bf16 %v8150_v6  ;;  %v7737_v26 = vpack.c.bf16 %v6905_v8, %v6905_v8  ;;  %v5904_v3 = vpop.f32.mrf.mxu2 }
 0x5d9   : > { %v10152_v52 = vsel %vm8401_vm3, %v9781_v24, -inf  ;;  %v9678_v13 = vunpack.c.l.bf16 %v7527_v53  ;;  %v5905_v16 = vadd.f32 %v16716_v45, %v5904_v3  ;;  %v6424_v38 = vpop.f32.mrf.mxu3  ;;  %v4866_v29 = vpop.f32.mrf.mxu0  ;;  %v13685_v53 = vld [vmem:[%s13817_s11 + $0xca0] sm:$0xff] }
 0x5da   : > { %v10153_v12 = vmax.f32 %v16830_v7, %v10152_v52  ;;  %v10266_v42 = vsel %vm8401_vm3, %v9833_v30, -inf  ;;  %v9732_v33 = vunpack.c.l.bf16 %v7737_v26  ;;  %v6425_v0 = vadd.f32 %v16716_v45, %v6424_v38  ;;  %v5391_v22 = vpop.f32.mrf.mxu1 }
 0x5db   : > { %v10267_v40 = vmax.f32 %v16835_v58, %v10266_v42  ;;  %v9926_v27 = vsel %vm8401_vm3, %v9678_v13, -inf  ;;  %v7111_v39 = vmax.f32 %v5905_v16, 0.0  ;;  %v4867_v59 = vadd.f32 %v16716_v45, %v4866_v29 }
 0x5dc   : > { %v16855_v44 = vmax.f32 %v9925_v34, %v9926_v27  ;;  %v10044_v49 = vsel %vm8401_vm3, %v9732_v33, -inf  ;;  %v7319_v55 = vmax.f32 %v6425_v0, 0.0  ;;  %v5392_v50 = vadd.f32 %v16716_v45, %v5391_v22 }
 0x5dd   : > { %v16859_v41 = vmax.f32 %v10043_v11, %v10044_v49  ;;  %v7943_v48 = vpack.c.bf16 %v7111_v39, %v7111_v39  ;;  %v6696_v57 = vmax.f32 %v4867_v59, 0.0  ;;  %v13581_v11 = vld [vmem:[%s13817_s11 + $0x960] sm:$0xff] }
 0x5de   : > { %v8151_v7 = vpack.c.bf16 %v7319_v55, %v7319_v55  ;;  %v6906_v15 = vmax.f32 %v5392_v50, 0.0 }
 0x5df   : > { %v9782_v63 = vunpack.c.l.bf16 %v7943_v48  ;;  %v7528_v47 = vpack.c.bf16 %v6696_v57, %v6696_v57 }
 0x5e0   : > { %v9834_v60 = vunpack.c.l.bf16 %v8151_v7  ;;  %v7738_v56 = vpack.c.bf16 %v6906_v15, %v6906_v15  ;;  %v5906_v58 = vpop.f32.mrf.mxu2 }
 0x5e1   : > { %v10154_v23 = vsel %vm8401_vm3, %v9782_v63, -inf  ;;  %v9679_v34 = vunpack.c.l.bf16 %v7528_v47  ;;  %v5907_v31 = vadd.f32 %v16716_v45, %v5906_v58  ;;  %v6426_v19 = vpop.f32.mrf.mxu3  ;;  %v4869_v37 = vpop.f32.mrf.mxu0 }
 0x5e2   : > { %v16866_v18 = vmax.f32 %v10153_v12, %v10154_v23  ;;  %v10268_v20 = vsel %vm8401_vm3, %v9834_v60, -inf  ;;  %v9733_v6 = vunpack.c.l.bf16 %v7738_v56  ;;  %v6427_v8 = vadd.f32 %v16716_v45, %v6426_v19  ;;  %v5394_v24 = vpop.f32.mrf.mxu1 }
 0x5e3   : > { %v16871_v30 = vmax.f32 %v10267_v40, %v10268_v20  ;;  %v9928_v26 = vsel %vm8401_vm3, %v9679_v34, -inf  ;;  %v7112_v3 = vmax.f32 %v5907_v31, 0.0  ;;  %v4870_v52 = vadd.f32 %v16716_v45, %v4869_v37 }
 0x5e4   : > { %v9929_v13 = vmax.f32 %v16855_v44, %v9928_v26  ;;  %v10046_v16 = vsel %vm8401_vm3, %v9733_v6, -inf  ;;  %v7320_v38 = vmax.f32 %v6427_v8, 0.0  ;;  %v5395_v29 = vadd.f32 %v16716_v45, %v5394_v24  ;;  %12929 = vmatmul.msk.bf16.gmra.mxu0 %vm3184_vm2, %v13373_v4  ;;  %13034 = vmatmul.msk.bf16.gmra.mxu1 %vm3184_vm2, %v13478_v28  ;;  %v13374_v26 = vld [vmem:[%s13817_s11 + $0x2e8] sm:$0xff] }
 0x5e5   : > { %v10047_v12 = vmax.f32 %v16859_v41, %v10046_v16  ;;  %v7944_v42 = vpack.c.bf16 %v7112_v3, %v7112_v3  ;;  %v6697_v33 = vmax.f32 %v4870_v52, 0.0  ;;  %13137 = vmatmul.msk.bf16.gmra.mxu2 %vm3184_vm2, %v13581_v11  ;;  %v13479_v3 = vld [vmem:[%s13817_s11 + $0x630] sm:$0xff] }
 0x5e6   : > { %v8152_v0 = vpack.c.bf16 %v7320_v38, %v7320_v38  ;;  %v6907_v22 = vmax.f32 %v5395_v29, 0.0  ;;  %13241 = vmatmul.msk.bf16.gmra.mxu3 %vm3184_vm2, %v13685_v53 }
 0x5e7   : > { %v9783_v40 = vunpack.c.l.bf16 %v7944_v42  ;;  %v7529_v27 = vpack.c.bf16 %v6697_v33, %v6697_v33 }
 0x5e8   : > { %v9835_v39 = vunpack.c.l.bf16 %v8152_v0  ;;  %v7739_v59 = vpack.c.bf16 %v6907_v22, %v6907_v22  ;;  %v5909_v44 = vpop.f32.mrf.mxu2 }
 0x5e9   : > { %v10156_v49 = vsel %vm8401_vm3, %v9783_v40, -inf  ;;  %v9680_v55 = vunpack.c.l.bf16 %v7529_v27  ;;  %v5910_v50 = vadd.f32 %v16716_v45, %v5909_v44  ;;  %v6429_v48 = vpop.f32.mrf.mxu3  ;;  %v4871_v41 = vpop.f32.mrf.mxu0  ;;  %v13686_v27 = vld [vmem:[%s13817_s11 + $0xca8] sm:$0xff] }
 0x5ea   : > { %v10157_v57 = vmax.f32 %v16866_v18, %v10156_v49  ;;  %v10270_v7 = vsel %vm8401_vm3, %v9835_v39, -inf  ;;  %v9734_v15 = vunpack.c.l.bf16 %v7739_v59  ;;  %v6430_v63 = vadd.f32 %v16716_v45, %v6429_v48  ;;  %v5396_v47 = vpop.f32.mrf.mxu1 }
 0x5eb   : > { %v10271_v60 = vmax.f32 %v16871_v30, %v10270_v7  ;;  %v9930_v56 = vsel %vm8401_vm3, %v9680_v55, -inf  ;;  %v7113_v58 = vmax.f32 %v5910_v50, 0.0  ;;  %v4872_v4 = vadd.f32 %v16716_v45, %v4871_v41 }
 0x5ec   : > { %v16891_v28 = vmax.f32 %v9929_v13, %v9930_v56  ;;  %v10048_v23 = vsel %vm8401_vm3, %v9734_v15, -inf  ;;  %v7321_v34 = vmax.f32 %v6430_v63, 0.0  ;;  %v5397_v31 = vadd.f32 %v16716_v45, %v5396_v47 }
 0x5ed   : > { %v16895_v19 = vmax.f32 %v10047_v12, %v10048_v23  ;;  %v7945_v37 = vpack.c.bf16 %v7113_v58, %v7113_v58  ;;  %v6698_v11 = vmax.f32 %v4872_v4, 0.0  ;;  %v13582_v12 = vld [vmem:[%s13817_s11 + $0x968] sm:$0xff] }
 0x5ee   : > { %v8153_v18 = vpack.c.bf16 %v7321_v34, %v7321_v34  ;;  %v6908_v20 = vmax.f32 %v5397_v31, 0.0 }
 0x5ef   : > { %v9784_v6 = vunpack.c.l.bf16 %v7945_v37  ;;  %v7530_v8 = vpack.c.bf16 %v6698_v11, %v6698_v11 }
 0x5f0   : > { %v9836_v24 = vunpack.c.l.bf16 %v8153_v18  ;;  %v7740_v53 = vpack.c.bf16 %v6908_v20, %v6908_v20  ;;  %v5911_v30 = vpop.f32.mrf.mxu2 }
 0x5f1   : > { %v10158_v52 = vsel %vm8401_vm3, %v9784_v6, -inf  ;;  %v9681_v13 = vunpack.c.l.bf16 %v7530_v8  ;;  %v5912_v16 = vadd.f32 %v16716_v45, %v5911_v30  ;;  %v6431_v38 = vpop.f32.mrf.mxu3  ;;  %v4874_v29 = vpop.f32.mrf.mxu0 }
 0x5f2   : > { %v16902_v42 = vmax.f32 %v10157_v57, %v10158_v52  ;;  %v10272_v33 = vsel %vm8401_vm3, %v9836_v24, -inf  ;;  %v9735_v0 = vunpack.c.l.bf16 %v7740_v53  ;;  %v6432_v22 = vadd.f32 %v16716_v45, %v6431_v38  ;;  %v5399_v40 = vpop.f32.mrf.mxu1 }
 0x5f3   : > { %v16907_v39 = vmax.f32 %v10271_v60, %v10272_v33  ;;  %v9932_v59 = vsel %vm8401_vm3, %v9681_v13, -inf  ;;  %v7114_v44 = vmax.f32 %v5912_v16, 0.0  ;;  %v4875_v49 = vadd.f32 %v16716_v45, %v4874_v29 }
 0x5f4   : > { %v9933_v55 = vmax.f32 %v16891_v28, %v9932_v59  ;;  %v10050_v50 = vsel %vm8401_vm3, %v9735_v0, -inf  ;;  %v7322_v48 = vmax.f32 %v6432_v22, 0.0  ;;  %v5400_v41 = vadd.f32 %v16716_v45, %v5399_v40  ;;  %12930 = vmatmul.msk.bf16.gmra.mxu0 %vm3184_vm2, %v13374_v26  ;;  %13035 = vmatmul.msk.bf16.gmra.mxu1 %vm3184_vm2, %v13479_v3  ;;  %v13375_v59 = vld [vmem:[%s13817_s11 + $0x2f0] sm:$0xff] }
 0x5f5   : > { %v10051_v57 = vmax.f32 %v16895_v19, %v10050_v50  ;;  %v7946_v7 = vpack.c.bf16 %v7114_v44, %v7114_v44  ;;  %v6699_v15 = vmax.f32 %v4875_v49, 0.0  ;;  %13138 = vmatmul.msk.bf16.gmra.mxu2 %vm3184_vm2, %v13582_v12  ;;  %v13480_v44 = vld [vmem:[%s13817_s11 + $0x638] sm:$0xff] }
 0x5f6   : > { %v8154_v63 = vpack.c.bf16 %v7322_v48, %v7322_v48  ;;  %v6909_v47 = vmax.f32 %v5400_v41, 0.0  ;;  %13242 = vmatmul.msk.bf16.gmra.mxu3 %vm3184_vm2, %v13686_v27 }
 0x5f7   : > { %v9785_v60 = vunpack.c.l.bf16 %v7946_v7  ;;  %v7531_v56 = vpack.c.bf16 %v6699_v15, %v6699_v15 }
 0x5f8   : > { %v9837_v58 = vunpack.c.l.bf16 %v8154_v63  ;;  %v7741_v4 = vpack.c.bf16 %v6909_v47, %v6909_v47  ;;  %v5914_v28 = vpop.f32.mrf.mxu2 }
 0x5f9   : > { %v10160_v23 = vsel %vm8401_vm3, %v9785_v60, -inf  ;;  %v9682_v34 = vunpack.c.l.bf16 %v7531_v56  ;;  %v5915_v31 = vadd.f32 %v16716_v45, %v5914_v28  ;;  %v6434_v37 = vpop.f32.mrf.mxu3  ;;  %v4876_v19 = vpop.f32.mrf.mxu0  ;;  %v13687_v56 = vld [vmem:[%s13817_s11 + $0xcb0] sm:$0xff] }
 0x5fa   : > { %v10161_v11 = vmax.f32 %v16902_v42, %v10160_v23  ;;  %v10274_v18 = vsel %vm8401_vm3, %v9837_v58, -inf  ;;  %v9736_v20 = vunpack.c.l.bf16 %v7741_v4  ;;  %v6435_v6 = vadd.f32 %v16716_v45, %v6434_v37  ;;  %v5401_v8 = vpop.f32.mrf.mxu1 }
 0x5fb   : > { %v10275_v24 = vmax.f32 %v16907_v39, %v10274_v18  ;;  %v9934_v53 = vsel %vm8401_vm3, %v9682_v34, -inf  ;;  %v7115_v30 = vmax.f32 %v5915_v31, 0.0  ;;  %v4877_v26 = vadd.f32 %v16716_v45, %v4876_v19 }
 0x5fc   : > { %v16927_v3 = vmax.f32 %v9933_v55, %v9934_v53  ;;  %v10052_v52 = vsel %vm8401_vm3, %v9736_v20, -inf  ;;  %v7323_v13 = vmax.f32 %v6435_v6, 0.0  ;;  %v5402_v16 = vadd.f32 %v16716_v45, %v5401_v8 }
 0x5fd   : > { %v16931_v38 = vmax.f32 %v10051_v57, %v10052_v52  ;;  %v7947_v29 = vpack.c.bf16 %v7115_v30, %v7115_v30  ;;  %v6700_v12 = vmax.f32 %v4877_v26, 0.0  ;;  %v13583_v57 = vld [vmem:[%s13817_s11 + $0x970] sm:$0xff] }
 0x5fe   : > { %v8155_v42 = vpack.c.bf16 %v7323_v13, %v7323_v13  ;;  %v6910_v33 = vmax.f32 %v5402_v16, 0.0 }
 0x5ff   : > { %v9786_v0 = vunpack.c.l.bf16 %v7947_v29  ;;  %v7532_v22 = vpack.c.bf16 %v6700_v12, %v6700_v12 }
 0x600   : > { %v9838_v40 = vunpack.c.l.bf16 %v8155_v42  ;;  %v7742_v27 = vpack.c.bf16 %v6910_v33, %v6910_v33  ;;  %v5916_v39 = vpop.f32.mrf.mxu2 }
 0x601   : > { %v10162_v49 = vsel %vm8401_vm3, %v9786_v0, -inf  ;;  %v9683_v55 = vunpack.c.l.bf16 %v7532_v22  ;;  %v5917_v50 = vadd.f32 %v16716_v45, %v5916_v39  ;;  %v6436_v48 = vpop.f32.mrf.mxu3  ;;  %v4879_v41 = vpop.f32.mrf.mxu0 }
 0x602   : > { %v16938_v7 = vmax.f32 %v10161_v11, %v10162_v49  ;;  %v10276_v15 = vsel %vm8401_vm3, %v9838_v40, -inf  ;;  %v9737_v63 = vunpack.c.l.bf16 %v7742_v27  ;;  %v6437_v47 = vadd.f32 %v16716_v45, %v6436_v48  ;;  %v5404_v60 = vpop.f32.mrf.mxu1 }
 0x603   : > { %v16943_v58 = vmax.f32 %v10275_v24, %v10276_v15  ;;  %v9936_v4 = vsel %vm8401_vm3, %v9683_v55, -inf  ;;  %v7116_v28 = vmax.f32 %v5917_v50, 0.0  ;;  %v4880_v23 = vadd.f32 %v16716_v45, %v4879_v41 }
 0x604   : > { %v9937_v34 = vmax.f32 %v16927_v3, %v9936_v4  ;;  %v10054_v31 = vsel %vm8401_vm3, %v9737_v63, -inf  ;;  %v7324_v37 = vmax.f32 %v6437_v47, 0.0  ;;  %v5405_v19 = vadd.f32 %v16716_v45, %v5404_v60  ;;  %12931 = vmatmul.msk.bf16.gmra.mxu0 %vm3184_vm2, %v13375_v59  ;;  %13036 = vmatmul.msk.bf16.gmra.mxu1 %vm3184_vm2, %v13480_v44  ;;  %v13376_v4 = vld [vmem:[%s13817_s11 + $0x2f8] sm:$0xff] }
 0x605   : > { %v10055_v11 = vmax.f32 %v16931_v38, %v10054_v31  ;;  %v7948_v18 = vpack.c.bf16 %v7116_v28, %v7116_v28  ;;  %v6701_v20 = vmax.f32 %v4880_v23, 0.0  ;;  %13139 = vmatmul.msk.bf16.gmra.mxu2 %vm3184_vm2, %v13583_v57  ;;  %v13481_v28 = vld [vmem:[%s13817_s11 + $0x640] sm:$0xff] }
 0x606   : > { %v8156_v6 = vpack.c.bf16 %v7324_v37, %v7324_v37  ;;  %v6911_v8 = vmax.f32 %v5405_v19, 0.0  ;;  %13243 = vmatmul.msk.bf16.gmra.mxu3 %vm3184_vm2, %v13687_v56 }
 0x607   : > { %v9787_v24 = vunpack.c.l.bf16 %v7948_v18  ;;  %v7533_v53 = vpack.c.bf16 %v6701_v20, %v6701_v20 }
 0x608   : > { %v9839_v30 = vunpack.c.l.bf16 %v8156_v6  ;;  %v7743_v26 = vpack.c.bf16 %v6911_v8, %v6911_v8  ;;  %v5919_v3 = vpop.f32.mrf.mxu2 }
 0x609   : > { %v10164_v52 = vsel %vm8401_vm3, %v9787_v24, -inf  ;;  %v9684_v13 = vunpack.c.l.bf16 %v7533_v53  ;;  %v5920_v16 = vadd.f32 %v16716_v45, %v5919_v3  ;;  %v6439_v29 = vpop.f32.mrf.mxu3  ;;  %v4881_v38 = vpop.f32.mrf.mxu0  ;;  %v13688_v53 = vld [vmem:[%s13817_s11 + $0xcb8] sm:$0xff] }
 0x60a   : > { %v10165_v12 = vmax.f32 %v16938_v7, %v10164_v52  ;;  %v10278_v42 = vsel %vm8401_vm3, %v9839_v30, -inf  ;;  %v9738_v33 = vunpack.c.l.bf16 %v7743_v26  ;;  %v6440_v0 = vadd.f32 %v16716_v45, %v6439_v29  ;;  %v5406_v22 = vpop.f32.mrf.mxu1 }
 0x60b   : > { %v10279_v40 = vmax.f32 %v16943_v58, %v10278_v42  ;;  %v9938_v27 = vsel %vm8401_vm3, %v9684_v13, -inf  ;;  %v7117_v39 = vmax.f32 %v5920_v16, 0.0  ;;  %v4882_v59 = vadd.f32 %v16716_v45, %v4881_v38 }
 0x60c   : > { %v16963_v44 = vmax.f32 %v9937_v34, %v9938_v27  ;;  %v10056_v49 = vsel %vm8401_vm3, %v9738_v33, -inf  ;;  %v7325_v55 = vmax.f32 %v6440_v0, 0.0  ;;  %v5407_v50 = vadd.f32 %v16716_v45, %v5406_v22 }
 0x60d   : > { %v16967_v48 = vmax.f32 %v10055_v11, %v10056_v49  ;;  %v7949_v41 = vpack.c.bf16 %v7117_v39, %v7117_v39  ;;  %v6702_v57 = vmax.f32 %v4882_v59, 0.0  ;;  %v13584_v11 = vld [vmem:[%s13817_s11 + $0x978] sm:$0xff] }
 0x60e   : > { %v8157_v7 = vpack.c.bf16 %v7325_v55, %v7325_v55  ;;  %v6912_v15 = vmax.f32 %v5407_v50, 0.0 }
 0x60f   : > { %v9788_v63 = vunpack.c.l.bf16 %v7949_v41  ;;  %v7534_v47 = vpack.c.bf16 %v6702_v57, %v6702_v57 }
 0x610   : > { %v9840_v60 = vunpack.c.l.bf16 %v8157_v7  ;;  %v7744_v56 = vpack.c.bf16 %v6912_v15, %v6912_v15  ;;  %v5921_v58 = vpop.f32.mrf.mxu2 }
 0x611   : > { %v10166_v23 = vsel %vm8401_vm3, %v9788_v63, -inf  ;;  %v9685_v34 = vunpack.c.l.bf16 %v7534_v47  ;;  %v5922_v31 = vadd.f32 %v16716_v45, %v5921_v58  ;;  %v6441_v37 = vpop.f32.mrf.mxu3  ;;  %v4884_v19 = vpop.f32.mrf.mxu0 }
 0x612   : > { %v16974_v18 = vmax.f32 %v10165_v12, %v10166_v23  ;;  %v10280_v20 = vsel %vm8401_vm3, %v9840_v60, -inf  ;;  %v9739_v6 = vunpack.c.l.bf16 %v7744_v56  ;;  %v6442_v8 = vadd.f32 %v16716_v45, %v6441_v37  ;;  %v5409_v24 = vpop.f32.mrf.mxu1 }
 0x613   : > { %v16979_v30 = vmax.f32 %v10279_v40, %v10280_v20  ;;  %v9940_v26 = vsel %vm8401_vm3, %v9685_v34, -inf  ;;  %v7118_v3 = vmax.f32 %v5922_v31, 0.0  ;;  %v4885_v52 = vadd.f32 %v16716_v45, %v4884_v19 }
 0x614   : > { %v9941_v13 = vmax.f32 %v16963_v44, %v9940_v26  ;;  %v10058_v16 = vsel %vm8401_vm3, %v9739_v6, -inf  ;;  %v7326_v29 = vmax.f32 %v6442_v8, 0.0  ;;  %v5410_v38 = vadd.f32 %v16716_v45, %v5409_v24  ;;  %12932 = vmatmul.msk.bf16.gmra.mxu0 %vm3184_vm2, %v13376_v4  ;;  %13037 = vmatmul.msk.bf16.gmra.mxu1 %vm3184_vm2, %v13481_v28 }
 0x615   : > { %v10059_v12 = vmax.f32 %v16967_v48, %v10058_v16  ;;  %v7950_v42 = vpack.c.bf16 %v7118_v3, %v7118_v3  ;;  %v6703_v33 = vmax.f32 %v4885_v52, 0.0  ;;  %13140 = vmatmul.msk.bf16.gmra.mxu2 %vm3184_vm2, %v13584_v11  ;;  %v10015_v37 = vrot.slane %v15217_v9, 4  ;;  %v13377_v3 = vld [vmem:[%s13817_s11 + $0x300] sm:$0xff]  ;;  %v13482_v52 = vld [vmem:[%s13817_s11 + $0x648] sm:$0xff] }
 0x616   : > { %v8158_v0 = vpack.c.bf16 %v7326_v29, %v7326_v29  ;;  %v6913_v22 = vmax.f32 %v5410_v38, 0.0  ;;  %13244 = vmatmul.msk.bf16.gmra.mxu3 %vm3184_vm2, %v13688_v53  ;;  %v17015_v29 = vld [vmem:[%s17625_s2] ss:$0 sm:$0xff] }
 0x617   : > { %v9789_v40 = vunpack.c.l.bf16 %v7950_v42  ;;  %v7535_v27 = vpack.c.bf16 %v6703_v33, %v6703_v33  ;;  %v13585_v33 = vld [vmem:[%s13817_s11 + $0x980] sm:$0xff] }
 0x618   : > { %v9841_v39 = vunpack.c.l.bf16 %v8158_v0  ;;  %v7745_v59 = vpack.c.bf16 %v6913_v22, %v6913_v22  ;;  %v5924_v44 = vpop.f32.mrf.mxu2 }
 0x619   : > { %v10168_v49 = vsel %vm8401_vm3, %v9789_v40, -inf  ;;  %v9686_v55 = vunpack.c.l.bf16 %v7535_v27  ;;  %v5925_v50 = vadd.f32 %v16716_v45, %v5924_v44  ;;  %v6444_v41 = vpop.f32.mrf.mxu3  ;;  %v4886_v48 = vpop.f32.mrf.mxu0 }
 0x61a   : > { %v10169_v57 = vmax.f32 %v16974_v18, %v10168_v49  ;;  %v10282_v7 = vsel %vm8401_vm3, %v9841_v39, -inf  ;;  %v9740_v15 = vunpack.c.l.bf16 %v7745_v59  ;;  %v6445_v63 = vadd.f32 %v16716_v45, %v6444_v41  ;;  %v5411_v47 = vpop.f32.mrf.mxu1  ;;  %v13689_v39 = vld [vmem:[%s13817_s11 + $0xcc0] sm:$0xff] }
 0x61b   : > { %v10283_v60 = vmax.f32 %v16979_v30, %v10282_v7  ;;  %v9942_v56 = vsel %vm8401_vm3, %v9686_v55, -inf  ;;  %v7119_v58 = vmax.f32 %v5925_v50, 0.0  ;;  %v4887_v4 = vadd.f32 %v16716_v45, %v4886_v48 }
 0x61c   : > { %v16999_v28 = vmax.f32 %v9941_v13, %v9942_v56  ;;  %v10060_v23 = vsel %vm8401_vm3, %v9740_v15, -inf  ;;  %v7327_v34 = vmax.f32 %v6445_v63, 0.0  ;;  %v5412_v31 = vadd.f32 %v16716_v45, %v5411_v47 }
 0x61d   : > { %v17004_v19 = vmax.f32 %v10059_v12, %v10060_v23  ;;  %v7951_v11 = vpack.c.bf16 %v7119_v58, %v7119_v58  ;;  %v6704_v18 = vmax.f32 %v4887_v4, 0.0  ;;  %v17009_v13 = vmax.f32 %v15217_v9, %v10015_v37 }
 0x61e   : > { %v8159_v20 = vpack.c.bf16 %v7327_v34, %v7327_v34  ;;  %v6914_v6 = vmax.f32 %v5412_v31, 0.0  ;;  %v9901_v31 = vrot.slane %v15243_v14, 4 }
 0x61f   : > { %v9790_v8 = vunpack.c.l.bf16 %v7951_v11  ;;  %v7536_v24 = vpack.c.bf16 %v6704_v18, %v6704_v18  ;;  %v10017_v4 = vrot.slane %v17009_v13, 2 }
 0x620   : > { %v9842_v53 = vunpack.c.l.bf16 %v8159_v20  ;;  %v7746_v30 = vpack.c.bf16 %v6914_v6, %v6914_v6  ;;  %v5926_v26 = vpop.f32.mrf.mxu2 }
 0x621   : > { %v10170_v45 = vsel %vm8401_vm3, %v9790_v8, -inf  ;;  %v9687_v16 = vunpack.c.l.bf16 %v7536_v24  ;;  %v5927_v38 = vadd.f32 %v17015_v29, %v5926_v26  ;;  %v6446_v12 = vpop.f32.mrf.mxu3  ;;  %v4889_v42 = vpop.f32.mrf.mxu0 }
 0x622   : > { %v17019_v0 = vmax.f32 %v10169_v57, %v10170_v45  ;;  %v10284_v22 = vsel %vm8401_vm3, %v9842_v53, -inf  ;;  %v9741_v40 = vunpack.c.l.bf16 %v7746_v30  ;;  %v6447_v9 = vadd.f32 %v17015_v29, %v6446_v12  ;;  %v5414_v27 = vpop.f32.mrf.mxu1 }
 0x623   : > { %v17024_v59 = vmax.f32 %v10283_v60, %v10284_v22  ;;  %v9944_v44 = vsel %vm8401_vm3, %v9687_v16, -inf  ;;  %v7120_v49 = vmax.f32 %v5927_v38, 0.0  ;;  %v4890_v55 = vadd.f32 %v17015_v29, %v4889_v42 }
 0x624   : > { %v9945_v50 = vmax.f32 %v16999_v28, %v9944_v44  ;;  %v10062_v41 = vsel %vm8401_vm3, %v9741_v40, -inf  ;;  %v7328_v48 = vmax.f32 %v6447_v9, 0.0  ;;  %v5415_v57 = vadd.f32 %v17015_v29, %v5414_v27  ;;  %12933 = vmatmul.msk.bf16.gmra.mxu0 %vm3184_vm2, %v13377_v3  ;;  %13038 = vmatmul.msk.bf16.gmra.mxu1 %vm3184_vm2, %v13482_v52 }
 0x625   : > { %v10063_v7 = vmax.f32 %v17004_v19, %v10062_v41  ;;  %v7952_v15 = vpack.c.bf16 %v7120_v49, %v7120_v49  ;;  %v6705_v63 = vmax.f32 %v4890_v55, 0.0  ;;  %13141 = vmatmul.msk.bf16.gmra.mxu2 %vm3184_vm2, %v13585_v33  ;;  %v9902_v33 = vmax.f32 %v15243_v14, %v9901_v31  ;;  %v13378_v41 = vld [vmem:[%s13817_s11 + $0x308] sm:$0xff] }
 0x626   : > { %v8160_v47 = vpack.c.bf16 %v7328_v48, %v7328_v48  ;;  %v6915_v60 = vmax.f32 %v5415_v57, 0.0  ;;  %13245 = vmatmul.msk.bf16.gmra.mxu3 %vm3184_vm2, %v13689_v39  ;;  %v17054_v44 = vmax.f32 %v17009_v13, %v10017_v4  ;;  %v13483_v48 = vld [vmem:[%s13817_s11 + $0x650] sm:$0xff] }
 0x627   : > { %v9791_v56 = vunpack.c.l.bf16 %v7952_v15  ;;  %v7537_v58 = vpack.c.bf16 %v6705_v63, %v6705_v63  ;;  %v9903_v57 = vrot.slane %v9902_v33, 2 }
 0x628   : > { %v9843_v28 = vunpack.c.l.bf16 %v8160_v47  ;;  %v7747_v23 = vpack.c.bf16 %v6915_v60, %v6915_v60  ;;  %v5929_v34 = vpop.f32.mrf.mxu2  ;;  %v13586_v60 = vld [vmem:[%s13817_s11 + $0x988] sm:$0xff] }
 0x629   : > { %v10172_v37 = vsel %vm8401_vm3, %v9791_v56, -inf  ;;  %v9688_v19 = vunpack.c.l.bf16 %v7537_v58  ;;  %v5930_v11 = vadd.f32 %v17015_v29, %v5929_v34  ;;  %v6449_v18 = vpop.f32.mrf.mxu3  ;;  %v4891_v20 = vpop.f32.mrf.mxu0 }
 0x62a   : > { %v10173_v6 = vmax.f32 %v17019_v0, %v10172_v37  ;;  %v10286_v8 = vsel %vm8401_vm3, %v9843_v28, -inf  ;;  %v9742_v24 = vunpack.c.l.bf16 %v7747_v23  ;;  %v6450_v53 = vadd.f32 %v17015_v29, %v6449_v18  ;;  %v5416_v30 = vpop.f32.mrf.mxu1  ;;  %v13690_v23 = vld [vmem:[%s13817_s11 + $0xcc8] sm:$0xff] }
 0x62b   : > { %v10287_v26 = vmax.f32 %v17024_v59, %v10286_v8  ;;  %v9946_v3 = vsel %vm8401_vm3, %v9688_v19, -inf  ;;  %v7121_v52 = vmax.f32 %v5930_v11, 0.0  ;;  %v4892_v45 = vadd.f32 %v17015_v29, %v4891_v20 }
 0x62c   : > { %v17046_v16 = vmax.f32 %v9945_v50, %v9946_v3  ;;  %v10064_v38 = vsel %vm8401_vm3, %v9742_v24, -inf  ;;  %v7329_v12 = vmax.f32 %v6450_v53, 0.0  ;;  %v5417_v42 = vadd.f32 %v17015_v29, %v5416_v30 }
 0x62d   : > { %v17051_v0 = vmax.f32 %v10063_v7, %v10064_v38  ;;  %v7953_v22 = vpack.c.bf16 %v7121_v52, %v7121_v52  ;;  %v6706_v40 = vmax.f32 %v4892_v45, 0.0  ;;  %v10129_v8 = vrot.slane %v15250_v32, 4 }
 0x62e   : > { %v8161_v9 = vpack.c.bf16 %v7329_v12, %v7329_v12  ;;  %v6916_v27 = vmax.f32 %v5417_v42, 0.0  ;;  %v10019_v52 = vrot.slane %v17054_v44, 1  ;;  %v17080_v38 = vmax.f32 %v9902_v33, %v9903_v57 }
 0x62f   : > { %v9792_v39 = vunpack.c.l.bf16 %v7953_v22  ;;  %v7538_v59 = vpack.c.bf16 %v6706_v40, %v6706_v40  ;;  %v10243_v12 = vrot.slane %v15253_v35, 4 }
 0x630   : > { %v9844_v49 = vunpack.c.l.bf16 %v8161_v9  ;;  %v7748_v55 = vpack.c.bf16 %v6916_v27, %v6916_v27  ;;  %v5931_v50 = vpop.f32.mrf.mxu2 }
 0x631   : > { %v10174_v14 = vsel %vm8401_vm3, %v9792_v39, -inf  ;;  %v9689_v7 = vunpack.c.l.bf16 %v7538_v59  ;;  %v5932_v15 = vadd.f32 %v17015_v29, %v5931_v50  ;;  %v6451_v63 = vpop.f32.mrf.mxu3  ;;  %v4894_v47 = vpop.f32.mrf.mxu0 }
 0x632   : > { %v17061_v56 = vmax.f32 %v10173_v6, %v10174_v14  ;;  %v10288_v13 = vsel %vm8401_vm3, %v9844_v49, -inf  ;;  %v9743_v58 = vunpack.c.l.bf16 %v7748_v55  ;;  %v6452_v4 = vadd.f32 %v17015_v29, %v6451_v63  ;;  %v5419_v28 = vpop.f32.mrf.mxu1 }
 0x633   : > { %v17066_v34 = vmax.f32 %v10287_v26, %v10288_v13  ;;  %v9948_v31 = vsel %vm8401_vm3, %v9689_v7, -inf  ;;  %v7122_v37 = vmax.f32 %v5932_v15, 0.0  ;;  %v4895_v19 = vadd.f32 %v17015_v29, %v4894_v47 }
 0x634   : > { %v9949_v11 = vmax.f32 %v17046_v16, %v9948_v31  ;;  %v10066_v18 = vsel %vm8401_vm3, %v9743_v58, -inf  ;;  %v7330_v20 = vmax.f32 %v6452_v4, 0.0  ;;  %v5420_v6 = vadd.f32 %v17015_v29, %v5419_v28  ;;  %12934 = vmatmul.msk.bf16.gmra.mxu0 %vm3184_vm2, %v13378_v41  ;;  %13039 = vmatmul.msk.bf16.gmra.mxu1 %vm3184_vm2, %v13483_v48 }
 0x635   : > { %v10067_v24 = vmax.f32 %v17051_v0, %v10066_v18  ;;  %v7954_v53 = vpack.c.bf16 %v7122_v37, %v7122_v37  ;;  %v6707_v30 = vmax.f32 %v4895_v19, 0.0  ;;  %13142 = vmatmul.msk.bf16.gmra.mxu2 %vm3184_vm2, %v13586_v60  ;;  %v10130_v0 = vmax.f32 %v15250_v32, %v10129_v8  ;;  %v13379_v8 = vld [vmem:[%s13817_s11 + $0x310] sm:$0xff] }
 0x636   : > { %v8162_v26 = vpack.c.bf16 %v7330_v20, %v7330_v20  ;;  %v6917_v3 = vmax.f32 %v5420_v6, 0.0  ;;  %13246 = vmatmul.msk.bf16.gmra.mxu3 %vm3184_vm2, %v13690_v23  ;;  %v9905_v19 = vrot.slane %v17080_v38, 1 }
 0x637   : > { %v9793_v45 = vunpack.c.l.bf16 %v7954_v53  ;;  %v7539_v16 = vpack.c.bf16 %v6707_v30, %v6707_v30 }
 0x638   : > { %v9845_v42 = vunpack.c.l.bf16 %v8162_v26  ;;  %v7749_v22 = vpack.c.bf16 %v6917_v3, %v6917_v3  ;;  %v5934_v40 = vpop.f32.mrf.mxu2 }
 0x639   : > { %v10176_v9 = vsel %vm8401_vm3, %v9793_v45, -inf  ;;  %v9690_v27 = vunpack.c.l.bf16 %v7539_v16  ;;  %v5935_v39 = vadd.f32 %v17015_v29, %v5934_v40  ;;  %v6454_v59 = vpop.f32.mrf.mxu3  ;;  %v4896_v49 = vpop.f32.mrf.mxu0  ;;  %v13691_v40 = vld [vmem:[%s13817_s11 + $0xcd0] sm:$0xff] }
 0x63a   : > { %v10177_v55 = vmax.f32 %v17061_v56, %v10176_v9  ;;  %v10290_v50 = vsel %vm8401_vm3, %v9845_v42, -inf  ;;  %v9744_v33 = vunpack.c.l.bf16 %v7749_v22  ;;  %v6455_v41 = vadd.f32 %v17015_v29, %v6454_v59  ;;  %v5421_v48 = vpop.f32.mrf.mxu1 }
 0x63b   : > { %v10291_v57 = vmax.f32 %v17066_v34, %v10290_v50  ;;  %v9950_v14 = vsel %vm8401_vm3, %v9690_v27, -inf  ;;  %v7123_v32 = vmax.f32 %v5935_v39, 0.0  ;;  %v4897_v7 = vadd.f32 %v17015_v29, %v4896_v49 }
 0x63c   : > { %v17092_v15 = vmax.f32 %v9949_v11, %v9950_v14  ;;  %v10068_v63 = vsel %vm8401_vm3, %v9744_v33, -inf  ;;  %v7331_v47 = vmax.f32 %v6455_v41, 0.0  ;;  %v5422_v60 = vadd.f32 %v17015_v29, %v5421_v48 }
 0x63d   : > { %v10244_v56 = vmax.f32 %v15253_v35, %v10243_v12  ;;  %v10069_v13 = vmax.f32 %v10067_v24, %v10068_v63  ;;  %v7955_v58 = vpack.c.bf16 %v7123_v32, %v7123_v32  ;;  %v6708_v4 = vmax.f32 %v4897_v7, 0.0  ;;  %v13484_v35 = vld [vmem:[%s13817_s11 + $0x658] sm:$0xff] }
 0x63e   : > { %v8163_v28 = vpack.c.bf16 %v7331_v47, %v7331_v47  ;;  %v6918_v23 = vmax.f32 %v5422_v60, 0.0  ;;  %v17098_v34 = vmax.f32 %v17054_v44, %v10019_v52  ;;  %v10131_v11 = vrot.slane %v10130_v0, 2  ;;  %v13587_v52 = vld [vmem:[%s13817_s11 + $0x990] sm:$0xff] }
 0x63f   : > { %v9794_v31 = vunpack.c.l.bf16 %v7955_v58  ;;  %v7540_v37 = vpack.c.bf16 %v6708_v4, %v6708_v4  ;;  %v10245_v24 = vrot.slane %v10244_v56, 2  ;;  %v9906_v4 = vmax.f32 %v17080_v38, %v9905_v19 }
 0x640   : > { %v9846_v18 = vunpack.c.l.bf16 %v8163_v28  ;;  %v7750_v20 = vpack.c.bf16 %v6918_v23, %v6918_v23  ;;  %v5936_v6 = vpop.f32.mrf.mxu2  ;;  %v10132_v41 = vmax.f32 %v10130_v0, %v10131_v11  ;;  %v10308_v58 = vpack.c.bf16 %v17098_v34, %v17098_v34 }
 0x641   : > { %v10178_v53 = vsel %vm8401_vm3, %v9794_v31, -inf  ;;  %v9691_v30 = vunpack.c.l.bf16 %v7540_v37  ;;  %v5937_v26 = vadd.f32 %v17015_v29, %v5936_v6  ;;  %v6456_v44 = vpop.f32.mrf.mxu3  ;;  %v4899_v3 = vpop.f32.mrf.mxu0  ;;  %v10246_v28 = vmax.f32 %v10244_v56, %v10245_v24 }
 0x642   : > { %v17106_v45 = vmax.f32 %v10177_v55, %v10178_v53  ;;  %v10292_v16 = vsel %vm8401_vm3, %v9846_v18, -inf  ;;  %v9745_v12 = vunpack.c.l.bf16 %v7750_v20  ;;  %v6457_v42 = vadd.f32 %v17015_v29, %v6456_v44  ;;  %v5424_v22 = vpop.f32.mrf.mxu1 }
 0x643   : > { %v17111_v9 = vmax.f32 %v10291_v57, %v10292_v16  ;;  %v17114_v27 = vsel %vm8401_vm3, %v9691_v30, -inf  ;;  %v7124_v39 = vmax.f32 %v5937_v26, 0.0  ;;  %v4900_v59 = vadd.f32 %v17015_v29, %v4899_v3 }
 0x644   : > { %v9953_v49 = vmax.f32 %v17092_v15, %v17114_v27  ;;  %v10070_v55 = vsel %vm8401_vm3, %v9745_v12, -inf  ;;  %v7332_v50 = vmax.f32 %v6457_v42, 0.0  ;;  %v5425_v33 = vadd.f32 %v17015_v29, %v5424_v22  ;;  %12935 = vmatmul.msk.bf16.gmra.mxu0 %vm3184_vm2, %v13379_v8  ;;  %13040 = vmatmul.msk.bf16.gmra.mxu1 %vm3184_vm2, %v13484_v35 }
 0x645   : > { %v10071_v48 = vmax.f32 %v10069_v13, %v10070_v55  ;;  %v7956_v57 = vpack.c.bf16 %v7124_v39, %v7124_v39  ;;  %v6709_v14 = vmax.f32 %v4900_v59, 0.0  ;;  %13143 = vmatmul.msk.bf16.gmra.mxu2 %vm3184_vm2, %v13587_v52  ;;  %v10133_v13 = vrot.slane %v10132_v41, 1 }
 0x646   : > { %v8164_v32 = vpack.c.bf16 %v7332_v50, %v7332_v50  ;;  %v6919_v7 = vmax.f32 %v5425_v33, 0.0  ;;  %13247 = vmatmul.msk.bf16.gmra.mxu3 %vm3184_vm2, %v13691_v40  ;;  %v10306_v30 = vpack.c.bf16 %v9906_v4, %v9906_v4  ;;  %v10247_v26 = vrot.slane %v10246_v28, 1 }
 0x647   : > { %v10072_v63 = vrot.slane %v10071_v48, 4  ;;  %v9795_v47 = vunpack.c.l.bf16 %v7956_v57  ;;  %v7541_v60 = vpack.c.bf16 %v6709_v14, %v6709_v14  ;;  %v10134_v52 = vmax.f32 %v10132_v41, %v10133_v13  ;;  %v13588_v13 = vld [vmem:[%s13817_s11 + $0x998] sm:$0xff] }
 0x648   : > { %v9847_v23 = vunpack.c.l.bf16 %v8164_v32  ;;  %v5939_v0 = vpop.f32.mrf.mxu2  ;;  %v7751_v34 = vpack.c.bf16 %v6919_v7, %v6919_v7  ;;  %v17143_v33 = vunpack.c.l.b16 %v10308_v58  ;;  %v17147_v57 = vmax.f32 %v10246_v28, %v10247_v26  ;;  %v13380_v32 = vld [vmem:[%s13817_s11 + $0x318] sm:$0xff]  ;;  %v13485_v7 = vld [vmem:[%s13817_s11 + $0x660] sm:$0xff] }
 0x649   : > { %v10073_v31 = vmax.f32 %v10071_v48, %v10072_v63  ;;  %v17129_v37 = vsel %vm8401_vm3, %v9795_v47, -inf  ;;  %v5940_v11 = vadd.f32 %v17015_v29, %v5939_v0  ;;  %v6459_v18 = vpop.f32.mrf.mxu3  ;;  %v4901_v20 = vpop.f32.mrf.mxu0  ;;  %v9692_v24 = vunpack.c.l.bf16 %v7541_v60 }
 0x64a   : > { %v10181_v6 = vmax.f32 %v17106_v45, %v17129_v37  ;;  %v17135_v8 = vsel %vm8401_vm3, %v9847_v23, -inf  ;;  %v6460_v38 = vadd.f32 %v17015_v29, %v6459_v18  ;;  %v5426_v56 = vpop.f32.mrf.mxu1  ;;  %v4902_v3 = vadd.f32 %v17015_v29, %v4901_v20  ;;  %v13692_v20 = vld [vmem:[%s13817_s11 + $0xcd8] sm:$0xff] }
 0x64b   : > { %v10074_v19 = vrot.slane %v10073_v31, 2  ;;  %v10295_v35 = vmax.f32 %v17111_v9, %v17135_v8  ;;  %v7125_v53 = vmax.f32 %v5940_v11, 0.0  ;;  %v5427_v12 = vadd.f32 %v17015_v29, %v5426_v56 }
 0x64c   : > { %v7333_v44 = vmax.f32 %v6460_v38, 0.0  ;;  %v10442_v42 = vunpack.c.l.bf16 %v7751_v34  ;;  %v6710_v40 = vmax.f32 %v4902_v3, 0.0  ;;  %v9954_v59 = vsel %vm8401_vm3, %v9692_v24, -inf }
 0x64d   : > { %v7957_v16 = vpack.c.bf16 %v7125_v53, %v7125_v53  ;;  %v10075_v39 = vmax.f32 %v10073_v31, %v10074_v19  ;;  %v6920_v50 = vmax.f32 %v5427_v12, 0.0  ;;  %v17145_v48 = vunpack.c.l.b16 %v10306_v30 }
 0x64e   : > { %v8165_v22 = vpack.c.bf16 %v7333_v44, %v7333_v44  ;;  %v7542_v41 = vpack.c.bf16 %v6710_v40, %v6710_v40  ;;  %v10310_v63 = vpack.c.bf16 %v10134_v52, %v10134_v52  ;;  %v9955_v58 = vmax.f32 %v9953_v49, %v9954_v59 }
 0x64f   : > { %v9796_v55 = vunpack.c.l.bf16 %v7957_v16  ;;  %v7752_v60 = vpack.c.bf16 %v6920_v50, %v6920_v50  ;;  %v10743_v28 = vsel %vm8401_vm3, %v10442_v42, -inf  ;;  %v10076_v34 = vrot.slane %v10075_v39, 1 }
 0x650   : > { %v5941_v14 = vpop.f32.mrf.mxu2  ;;  %v9848_v47 = vunpack.c.l.bf16 %v8165_v22  ;;  %v9693_v31 = vunpack.c.l.bf16 %v7542_v41  ;;  %v17169_v42 = vunpack.c.l.b16 %v10310_v63  ;;  %v10312_v22 = vpack.c.bf16 %v17147_v57, %v17147_v57 }
 0x651   : > { %v5942_v4 = vadd.f32 %v17015_v29, %v5941_v14  ;;  %v6461_v23 = vpop.f32.mrf.mxu3  ;;  %v4904_v0 = vpop.f32.mrf.mxu0  ;;  %v10182_v38 = vsel %vm8401_vm3, %v9796_v55, -inf  ;;  %v10443_v56 = vunpack.c.l.bf16 %v7752_v60 }
 0x652   : > { %v6462_v11 = vadd.f32 %v17015_v29, %v6461_v23  ;;  %v5429_v18 = vpop.f32.mrf.mxu1  ;;  %v9956_v24 = vsel %vm8401_vm3, %v9693_v31, -inf  ;;  %v4905_v30 = vadd.f32 %v17015_v29, %v4904_v0  ;;  %v10296_v27 = vsel %vm8401_vm3, %v9848_v47, -inf }
 0x653   : > { %v7126_v19 = vmax.f32 %v5942_v4, 0.0  ;;  %v5430_v15 = vadd.f32 %v17015_v29, %v5429_v18  ;;  %v9957_v49 = vmax.f32 %v9955_v58, %v9956_v24  ;;  %v10744_v26 = vsel %vm8401_vm3, %v10443_v56, -inf }
 0x654   : > { %v7334_v53 = vmax.f32 %v6462_v11, 0.0  ;;  %12936 = vmatmul.msk.bf16.gmra.mxu0 %vm3184_vm2, %v13380_v32  ;;  %13041 = vmatmul.msk.bf16.gmra.mxu1 %vm3184_vm2, %v13485_v7  ;;  %v10745_v3 = vmax.f32 %v10743_v28, %v10744_v26  ;;  %v6711_v16 = vmax.f32 %v4905_v30, 0.0  ;;  %v10183_v55 = vmax.f32 %v10181_v6, %v10182_v38 }
 0x655   : > { %v7958_v44 = vpack.c.bf16 %v7126_v19, %v7126_v19  ;;  %13144 = vmatmul.msk.bf16.gmra.mxu2 %vm3184_vm2, %v13588_v13  ;;  %v6921_v12 = vmax.f32 %v5430_v15, 0.0  ;;  %v9958_v40 = vrot.slane %v9957_v49, 4  ;;  %v10297_v7 = vmax.f32 %v10295_v35, %v10296_v27 }
 0x656   : > { %v8166_v52 = vpack.c.bf16 %v7334_v53, %v7334_v53  ;;  %13248 = vmatmul.msk.bf16.gmra.mxu3 %vm3184_vm2, %v13692_v20  ;;  %v7543_v41 = vpack.c.bf16 %v6711_v16, %v6711_v16  ;;  %v17181_v0 = vmax.f32 %v10075_v39, %v10076_v34 }
 0x657   : > { %v9797_v59 = vunpack.c.l.bf16 %v7958_v44  ;;  %v7753_v14 = vpack.c.bf16 %v6921_v12, %v6921_v12  ;;  %v9959_v47 = vmax.f32 %v9957_v49, %v9958_v40  ;;  %v13381_v12 = vld [vmem:[%s13817_s11 + $0x320] sm:$0xff]  ;;  %v13486_v40 = vld [vmem:[%s13817_s11 + $0x668] sm:$0xff] }
 0x658   : > { %v9849_v50 = vunpack.c.l.bf16 %v8166_v52  ;;  %v5944_v32 = vpop.f32.mrf.mxu2  ;;  %v10390_v35 = vunpack.c.l.bf16 %v7543_v41  ;;  %v10309_v30 = vpack.c.bf16 %v17181_v0, %v17181_v0  ;;  %v13693_v0 = vld [vmem:[%s13817_s11 + $0xce0] sm:$0xff] }
 0x659   : > { %v10184_v63 = vsel %vm8401_vm3, %v9797_v59, -inf  ;;  %v5945_v60 = vadd.f32 %v17015_v29, %v5944_v32  ;;  %v6464_v4 = vpop.f32.mrf.mxu3  ;;  %v4906_v23 = vpop.f32.mrf.mxu0  ;;  %v10444_v37 = vunpack.c.l.bf16 %v7753_v14  ;;  %v9960_v58 = vrot.slane %v9959_v47, 2 }
 0x65a   : > { %v10185_v13 = vmax.f32 %v10183_v55, %v10184_v63  ;;  %v10298_v45 = vsel %vm8401_vm3, %v9849_v50, -inf  ;;  %v5431_v6 = vpop.f32.mrf.mxu1  ;;  %v6465_v9 = vadd.f32 %v17015_v29, %v6464_v4  ;;  %v4907_v18 = vadd.f32 %v17015_v29, %v4906_v23 }
 0x65b   : > { %v10299_v28 = vmax.f32 %v10297_v7, %v10298_v45  ;;  %v7127_v31 = vmax.f32 %v5945_v60, 0.0  ;;  %v10746_v11 = vsel %vm8401_vm3, %v10444_v37, -inf  ;;  %v9961_v20 = vmax.f32 %v9959_v47, %v9960_v58  ;;  %v13589_v7 = vld [vmem:[%s13817_s11 + $0x9a0] sm:$0xff] }
 0x65c   : > { %v10186_v8 = vrot.slane %v10185_v13, 4  ;;  %v17187_v39 = vmax.f32 %v10745_v3, %v10746_v11  ;;  %v7335_v19 = vmax.f32 %v6465_v9, 0.0  ;;  %v6712_v24 = vmax.f32 %v4907_v18, 0.0 }
 0x65d   : > { %v10300_v38 = vrot.slane %v10299_v28, 4  ;;  %v7959_v34 = vpack.c.bf16 %v7127_v31, %v7127_v31  ;;  %v5432_v53 = vadd.f32 %v17015_v29, %v5431_v6  ;;  %v9962_v15 = vrot.slane %v9961_v20, 1 }
 0x65e   : > { %v10187_v56 = vmax.f32 %v10185_v13, %v10186_v8  ;;  %v8167_v44 = vpack.c.bf16 %v7335_v19, %v7335_v19  ;;  %v7544_v52 = vpack.c.bf16 %v6712_v24, %v6712_v24  ;;  %v17195_v50 = vsel %vm8401_vm3, %v10390_v35, -inf }
 0x65f   : > { %v10301_v27 = vmax.f32 %v10299_v28, %v10300_v38  ;;  %v10494_v49 = vunpack.c.l.bf16 %v7959_v34  ;;  %v6922_v16 = vmax.f32 %v5432_v53, 0.0  ;;  %v9963_v59 = vmax.f32 %v9961_v20, %v9962_v15 }
 0x660   : > { %v10188_v26 = vrot.slane %v10187_v56, 2  ;;  %v5946_v3 = vpop.f32.mrf.mxu2  ;;  %v10391_v60 = vunpack.c.l.bf16 %v7544_v52  ;;  %v10546_v28 = vunpack.c.l.bf16 %v8167_v44 }
 0x661   : > { %v10302_v55 = vrot.slane %v10301_v27, 2  ;;  %v5947_v41 = vadd.f32 %v17015_v29, %v5946_v3  ;;  %v6466_v14 = vpop.f32.mrf.mxu3  ;;  %v4909_v32 = vpop.f32.mrf.mxu0  ;;  %v17200_v63 = vsel %vm8401_vm3, %v10494_v49, -inf  ;;  %v7754_v4 = vpack.c.bf16 %v6922_v16, %v6922_v16 }
 0x662   : > { %v10189_v47 = vmax.f32 %v10187_v56, %v10188_v26  ;;  %v5434_v23 = vpop.f32.mrf.mxu1  ;;  %v10307_v13 = vpack.c.bf16 %v9963_v59, %v9963_v59  ;;  %v6467_v6 = vadd.f32 %v17015_v29, %v6466_v14  ;;  %v10630_v31 = vsel %vm8401_vm3, %v10391_v60, -inf }
 0x663   : > { %v10303_v45 = vmax.f32 %v10301_v27, %v10302_v55  ;;  %v7128_v37 = vmax.f32 %v5947_v41, 0.0  ;;  %v10445_v9 = vunpack.c.l.bf16 %v7754_v4  ;;  %v10631_v11 = vmax.f32 %v17195_v50, %v10630_v31 }
 0x664   : > { %v10190_v58 = vrot.slane %v10189_v47, 1  ;;  %12937 = vmatmul.msk.bf16.gmra.mxu0 %vm3184_vm2, %v13381_v12  ;;  %13042 = vmatmul.msk.bf16.gmra.mxu1 %vm3184_vm2, %v13486_v40  ;;  %v10326_v8 = vunpack.c.l.b16 %v10307_v13  ;;  %v7336_v34 = vmax.f32 %v6467_v6, 0.0  ;;  %v4910_v56 = vadd.f32 %v17015_v29, %v4909_v32 }
 0x665   : > { %v10304_v35 = vrot.slane %v10303_v45, 1  ;;  %v7960_v18 = vpack.c.bf16 %v7128_v37, %v7128_v37  ;;  %13145 = vmatmul.msk.bf16.gmra.mxu2 %vm3184_vm2, %v13589_v7  ;;  %v10748_v38 = vsel %vm8401_vm3, %v10445_v9, -inf  ;;  %v10328_v27 = vunpack.c.l.b16 %v10309_v30 }
 0x666   : > { %v10191_v20 = vmax.f32 %v10189_v47, %v10190_v58  ;;  %13249 = vmatmul.msk.bf16.gmra.mxu3 %vm3184_vm2, %v13693_v0  ;;  %v10333_v19 = vsel %vm9559_vm4, %v10326_v8, %v17145_v48  ;;  %v10749_v53 = vmax.f32 %v17187_v39, %v10748_v38  ;;  %v8168_v26 = vpack.c.bf16 %v7336_v34, %v7336_v34 }
 0x667   : > { %v17214_v24 = vmax.f32 %v10303_v45, %v10304_v35  ;;  %v10495_v15 = vunpack.c.l.bf16 %v7960_v18  ;;  %v10334_v49 = vsel %vm9561_vm5, %v17143_v33, %v10333_v19  ;;  %v6713_v44 = vmax.f32 %v4910_v56, 0.0  ;;  %v13382_v56 = vld [vmem:[%s13817_s11 + $0x328] sm:$0xff]  ;;  %v13487_v19 = vld [vmem:[%s13817_s11 + $0x670] sm:$0xff] }
 0x668   : > { %v5949_v52 = vpop.f32.mrf.mxu2  ;;  %v10971_v16 = vsel %vm8401_vm3, %v10546_v28, -inf  ;;  %v5435_v12 = vadd.f32 %v17015_v29, %v5434_v23  ;;  %v10311_v55 = vpack.c.bf16 %v10191_v20, %v10191_v20  ;;  %v10547_v30 = vunpack.c.l.bf16 %v8168_v26 }
 0x669   : > { %v10858_v3 = vsel %vm8401_vm3, %v10495_v15, -inf  ;;  %v5950_v48 = vadd.f32 %v17015_v29, %v5949_v52  ;;  %v6469_v40 = vpop.f32.mrf.mxu3  ;;  %v4911_v59 = vpop.f32.mrf.mxu0  ;;  %v7545_v50 = vpack.c.bf16 %v6713_v44, %v6713_v44  ;;  %v10313_v33 = vpack.c.bf16 %v17214_v24, %v17214_v24  ;;  %v13590_v52 = vld [vmem:[%s13817_s11 + $0x9a8] sm:$0xff] }
 0x66a   : > { %v10859_v39 = vmax.f32 %v17200_v63, %v10858_v3  ;;  %v5436_v41 = vpop.f32.mrf.mxu1  ;;  %v6923_v14 = vmax.f32 %v5435_v12, 0.0  ;;  %v6470_v7 = vadd.f32 %v17015_v29, %v6469_v40  ;;  %v10972_v47 = vsel %vm8401_vm3, %v10547_v30, -inf }
 0x66b   : > { %v7129_v32 = vmax.f32 %v5950_v48, 0.0  ;;  %v10392_v60 = vunpack.c.l.bf16 %v7545_v50  ;;  %v4912_v4 = vadd.f32 %v17015_v29, %v4911_v59  ;;  %v5437_v23 = vadd.f32 %v17015_v29, %v5436_v41  ;;  %v13694_v59 = vld [vmem:[%s13817_s11 + $0xce8] sm:$0xff] }
 0x66c   : > { %v10973_v0 = vmax.f32 %v10971_v16, %v10972_v47  ;;  %v7755_v63 = vpack.c.bf16 %v6923_v14, %v6923_v14  ;;  %v7337_v45 = vmax.f32 %v6470_v7, 0.0  ;;  %v10335_v28 = vsel %vm9563_vm6, %v10328_v27, %v10334_v49 }
 0x66d   : > { %v7961_v13 = vpack.c.bf16 %v7129_v32, %v7129_v32  ;;  %v10632_v37 = vsel %vm8401_vm3, %v10392_v60, -inf  ;;  %v6714_v6 = vmax.f32 %v4912_v4, 0.0  ;;  %v6924_v58 = vmax.f32 %v5437_v23, 0.0 }
 0x66e   : > { %v17232_v31 = vmax.f32 %v10631_v11, %v10632_v37  ;;  %v10446_v9 = vunpack.c.l.bf16 %v7755_v63  ;;  %v8169_v35 = vpack.c.bf16 %v7337_v45, %v7337_v45  ;;  %v10330_v18 = vunpack.c.l.b16 %v10311_v55 }
 0x66f   : > { %v10496_v8 = vunpack.c.l.bf16 %v7961_v13  ;;  %v7546_v20 = vpack.c.bf16 %v6714_v6, %v6714_v6  ;;  %v7756_v38 = vpack.c.bf16 %v6924_v58, %v6924_v58  ;;  %v10336_v24 = vsel %vm9565_vm7, %v17169_v42, %v10335_v28 }
 0x670   : > { %v5951_v34 = vpop.f32.mrf.mxu2  ;;  %v10750_v15 = vsel %vm8401_vm3, %v10446_v9, -inf  ;;  %v10548_v11 = vunpack.c.l.bf16 %v8169_v35  ;;  %v10331_v41 = vunpack.c.l.b16 %v10312_v22  ;;  %v10332_v32 = vunpack.c.l.b16 %v10313_v33 }
 0x671   : > { %v10860_v27 = vsel %vm8401_vm3, %v10496_v8, -inf  ;;  %v5952_v49 = vadd.f32 %v17015_v29, %v5951_v34  ;;  %v6471_v26 = vpop.f32.mrf.mxu3  ;;  %v4914_v44 = vpop.f32.mrf.mxu0  ;;  %v10751_v16 = vmax.f32 %v10749_v53, %v10750_v15  ;;  %v10393_v12 = vunpack.c.l.bf16 %v7546_v20 }
 0x672   : > { %v17242_v3 = vmax.f32 %v10859_v39, %v10860_v27  ;;  %v10447_v48 = vunpack.c.l.bf16 %v7756_v38  ;;  %v5439_v40 = vpop.f32.mrf.mxu1  ;;  %v10974_v55 = vsel %vm8401_vm3, %v10548_v11, -inf  ;;  %v6472_v30 = vadd.f32 %v17015_v29, %v6471_v26 }
 0x673   : > { %v7130_v42 = vmax.f32 %v5952_v49, 0.0  ;;  %v4915_v50 = vadd.f32 %v17015_v29, %v4914_v44  ;;  %v17251_v14 = vmax.f32 %v10973_v0, %v10974_v55  ;;  %v10634_v53 = vsel %vm8401_vm3, %v10393_v12, -inf }
 0x674   : > { %v5440_v39 = vadd.f32 %v17015_v29, %v5439_v40  ;;  %12938 = vmatmul.msk.bf16.gmra.mxu0 %vm3184_vm2, %v13382_v56  ;;  %13043 = vmatmul.msk.bf16.gmra.mxu1 %vm3184_vm2, %v13487_v19  ;;  %v10635_v7 = vmax.f32 %v17232_v31, %v10634_v53  ;;  %v7338_v60 = vmax.f32 %v6472_v30, 0.0  ;;  %v10752_v57 = vsel %vm8401_vm3, %v10447_v48, -inf  ;;  %v13488_v53 = vld [vmem:[%s13817_s11 + $0x678] sm:$0xff] }
 0x675   : > { %v7962_v47 = vpack.c.bf16 %v7130_v42, %v7130_v42  ;;  %13146 = vmatmul.msk.bf16.gmra.mxu2 %vm3184_vm2, %v13590_v52  ;;  %v6715_v22 = vmax.f32 %v4915_v50, 0.0  ;;  %v10337_v23 = vsel %vm9567_vm8, %v10330_v18, %v10336_v24  ;;  %v10753_v58 = vmax.f32 %v10751_v16, %v10752_v57  ;;  %v13591_v57 = vld [vmem:[%s13817_s11 + $0x9b0] sm:$0xff] }
 0x676   : > { %v6925_v4 = vmax.f32 %v5440_v39, 0.0  ;;  %13250 = vmatmul.msk.bf16.gmra.mxu3 %vm3184_vm2, %v13694_v59  ;;  %v8170_v63 = vpack.c.bf16 %v7338_v60, %v7338_v60  ;;  %v10338_v13 = vsel %vm9569_vm9, %v10331_v41, %v10337_v23 }
 0x677   : > { %v10497_v0 = vunpack.c.l.bf16 %v7962_v47  ;;  %v7547_v45 = vpack.c.bf16 %v6715_v22, %v6715_v22  ;;  %v17264_v6 = vsel %vm9571_vm10, %v10332_v32, %v10338_v13 }
 0x678   : > { %v7757_v33 = vpack.c.bf16 %v6925_v4, %v6925_v4  ;;  %v5954_v37 = vpop.f32.mrf.mxu2  ;;  %v10549_v28 = vunpack.c.l.bf16 %v8170_v63  ;;  %v13695_v63 = vld [vmem:[%s13817_s11 + $0xcf0] sm:$0xff] }
 0x679   : > { %v5955_v31 = vadd.f32 %v17015_v29, %v5954_v37  ;;  %v6474_v9 = vpop.f32.mrf.mxu3  ;;  %v4916_v8 = vpop.f32.mrf.mxu0  ;;  %v10862_v35 = vsel %vm8401_vm3, %v10497_v0, -inf  ;;  %v10394_v20 = vunpack.c.l.bf16 %v7547_v45 }
 0x67a   : > { %v10448_v18 = vunpack.c.l.bf16 %v7757_v33  ;;  %v6475_v38 = vadd.f32 %v17015_v29, %v6474_v9  ;;  %v5441_v34 = vpop.f32.mrf.mxu1  ;;  %v10976_v56 = vsel %vm8401_vm3, %v10549_v28, -inf  ;;  %v4917_v24 = vadd.f32 %v17015_v29, %v4916_v8 }
 0x67b   : > { %v7131_v19 = vmax.f32 %v5955_v31, 0.0  ;;  %v5442_v15 = vadd.f32 %v17015_v29, %v5441_v34  ;;  %v10977_v27 = vmax.f32 %v17251_v14, %v10976_v56  ;;  %v10636_v11 = vsel %vm8401_vm3, %v10394_v20, -inf  ;;  %v13383_v14 = vld [vmem:[%s13817_s11 + $0x330] sm:$0xff] }
 0x67c   : > { %v10754_v49 = vsel %vm8401_vm3, %v10448_v18, -inf  ;;  %v7339_v26 = vmax.f32 %v6475_v38, 0.0  ;;  %v17275_v44 = vmax.f32 %v10635_v7, %v10636_v11  ;;  %v6716_v12 = vmax.f32 %v4917_v24, 0.0 }
 0x67d   : > { %v17277_v52 = vmax.f32 %v10753_v58, %v10754_v49  ;;  %v7963_v16 = vpack.c.bf16 %v7131_v19, %v7131_v19  ;;  %v6926_v40 = vmax.f32 %v5442_v15, 0.0  ;;  %v10863_v42 = vmax.f32 %v17242_v3, %v10862_v35 }
 0x67e   : > { %v8171_v48 = vpack.c.bf16 %v7339_v26, %v7339_v26  ;;  %v7548_v55 = vpack.c.bf16 %v6716_v12, %v6716_v12 }
 0x67f   : > { %v10498_v59 = vunpack.c.l.bf16 %v7963_v16  ;;  %v7758_v50 = vpack.c.bf16 %v6926_v40, %v6926_v40 }
 0x680   : > { %v10550_v30 = vunpack.c.l.bf16 %v8171_v48  ;;  %v5956_v41 = vpop.f32.mrf.mxu2  ;;  %v10395_v32 = vunpack.c.l.bf16 %v7548_v55 }
 0x681   : > { %v10864_v39 = vsel %vm8401_vm3, %v10498_v59, -inf  ;;  %v5957_v7 = vadd.f32 %v17015_v29, %v5956_v41  ;;  %v6476_v47 = vpop.f32.mrf.mxu3  ;;  %v4919_v60 = vpop.f32.mrf.mxu0  ;;  %v10449_v23 = vunpack.c.l.bf16 %v7758_v50 }
 0x682   : > { %v17285_v22 = vmax.f32 %v10863_v42, %v10864_v39  ;;  %v10978_v4 = vsel %vm8401_vm3, %v10550_v30, -inf  ;;  %v6477_v3 = vadd.f32 %v17015_v29, %v6476_v47  ;;  %v5444_v0 = vpop.f32.mrf.mxu1  ;;  %v10638_v45 = vsel %vm8401_vm3, %v10395_v32, -inf }
 0x683   : > { %v17290_v13 = vmax.f32 %v10977_v27, %v10978_v4  ;;  %v7132_v33 = vmax.f32 %v5957_v7, 0.0  ;;  %v4920_v37 = vadd.f32 %v17015_v29, %v4919_v60  ;;  %v10639_v58 = vmax.f32 %v17275_v44, %v10638_v45 }
 0x684   : > { %v10756_v28 = vsel %vm8401_vm3, %v10449_v23, -inf  ;;  %v7340_v31 = vmax.f32 %v6477_v3, 0.0  ;;  %v5445_v9 = vadd.f32 %v17015_v29, %v5444_v0  ;;  %12939 = vmatmul.msk.bf16.gmra.mxu0 %vm3184_vm2, %v13383_v14  ;;  %13044 = vmatmul.msk.bf16.gmra.mxu1 %vm3184_vm2, %v13488_v53  ;;  %v13384_v0 = vld [vmem:[%s13817_s11 + $0x338] sm:$0xff] }
 0x685   : > { %v10757_v8 = vmax.f32 %v17277_v52, %v10756_v28  ;;  %v7964_v35 = vpack.c.bf16 %v7132_v33, %v7132_v33  ;;  %v6717_v20 = vmax.f32 %v4920_v37, 0.0  ;;  %13147 = vmatmul.msk.bf16.gmra.mxu2 %vm3184_vm2, %v13591_v57  ;;  %v9573_v28 = vpack.c.b16 %v16740_v10, %v16740_v10 }
 0x686   : > { %v8172_v18 = vpack.c.bf16 %v7340_v31, %v7340_v31  ;;  %v6927_v38 = vmax.f32 %v5445_v9, 0.0  ;;  %13251 = vmatmul.msk.bf16.gmra.mxu3 %vm3184_vm2, %v13695_v63 }
 0x687   : > { %v10499_v34 = vunpack.c.l.bf16 %v7964_v35  ;;  %v7549_v56 = vpack.c.bf16 %v6717_v20, %v6717_v20 }
 0x688   : > { %v10551_v19 = vunpack.c.l.bf16 %v8172_v18  ;;  %v7759_v24 = vpack.c.bf16 %v6927_v38, %v6927_v38  ;;  %v5959_v15 = vpop.f32.mrf.mxu2  ;;  %v13696_v18 = vld [vmem:[%s13817_s11 + $0xcf8] sm:$0xff] }
 0x689   : > { %v10866_v27 = vsel %vm8401_vm3, %v10499_v34, -inf  ;;  %v10396_v11 = vunpack.c.l.bf16 %v7549_v56  ;;  %v5960_v49 = vadd.f32 %v17015_v29, %v5959_v15  ;;  %v6479_v26 = vpop.f32.mrf.mxu3  ;;  %v4921_v44 = vpop.f32.mrf.mxu0 }
 0x68a   : > { %v10867_v52 = vmax.f32 %v17285_v22, %v10866_v27  ;;  %v10980_v16 = vsel %vm8401_vm3, %v10551_v19, -inf  ;;  %v10450_v12 = vunpack.c.l.bf16 %v7759_v24  ;;  %v6480_v48 = vadd.f32 %v17015_v29, %v6479_v26  ;;  %v5446_v40 = vpop.f32.mrf.mxu1 }
 0x68b   : > { %v10981_v59 = vmax.f32 %v17290_v13, %v10980_v16  ;;  %v10640_v55 = vsel %vm8401_vm3, %v10396_v11, -inf  ;;  %v7133_v42 = vmax.f32 %v5960_v49, 0.0  ;;  %v4922_v30 = vadd.f32 %v17015_v29, %v4921_v44 }
 0x68c   : > { %v17310_v50 = vmax.f32 %v10639_v58, %v10640_v55  ;;  %v10758_v41 = vsel %vm8401_vm3, %v10450_v12, -inf  ;;  %v7341_v14 = vmax.f32 %v6480_v48, 0.0  ;;  %v5447_v53 = vadd.f32 %v17015_v29, %v5446_v40  ;;  %v17321_v29 = vld [vmem:[%s17625_s2] ss:$0 sm:$0xff]  ;;  %v13592_v58 = vld [vmem:[%s13817_s11 + $0x9b8] sm:$0xff] }
 0x68d   : > { %v17314_v39 = vmax.f32 %v10757_v8, %v10758_v41  ;;  %v7965_v32 = vpack.c.bf16 %v7133_v42, %v7133_v42  ;;  %v6718_v7 = vmax.f32 %v4922_v30, 0.0 }
 0x68e   : > { %v8173_v47 = vpack.c.bf16 %v7341_v14, %v7341_v14  ;;  %v6928_v60 = vmax.f32 %v5447_v53, 0.0 }
 0x68f   : > { %v10500_v57 = vunpack.c.l.bf16 %v7965_v32  ;;  %v7550_v22 = vpack.c.bf16 %v6718_v7, %v6718_v7 }
 0x690   : > { %v10552_v4 = vunpack.c.l.bf16 %v8173_v47  ;;  %v7760_v23 = vpack.c.bf16 %v6928_v60, %v6928_v60  ;;  %v5961_v3 = vpop.f32.mrf.mxu2 }
 0x691   : > { %v10868_v63 = vsel %vm8401_vm3, %v10500_v57, -inf  ;;  %v10397_v13 = vunpack.c.l.bf16 %v7550_v22  ;;  %v5962_v45 = vadd.f32 %v17321_v29, %v5961_v3  ;;  %v6481_v33 = vpop.f32.mrf.mxu3  ;;  %v4924_v37 = vpop.f32.mrf.mxu0 }
 0x692   : > { %v17327_v31 = vmax.f32 %v10867_v52, %v10868_v63  ;;  %v10982_v9 = vsel %vm8401_vm3, %v10552_v4, -inf  ;;  %v10451_v8 = vunpack.c.l.bf16 %v7760_v23  ;;  %v6482_v35 = vadd.f32 %v17321_v29, %v6481_v33  ;;  %v5449_v20 = vpop.f32.mrf.mxu1 }
 0x693   : > { %v17332_v38 = vmax.f32 %v10981_v59, %v10982_v9  ;;  %v10642_v34 = vsel %vm8401_vm3, %v10397_v13, -inf  ;;  %v7134_v56 = vmax.f32 %v5962_v45, 0.0  ;;  %v4925_v19 = vadd.f32 %v17321_v29, %v4924_v37 }
 0x694   : > { %v10643_v24 = vmax.f32 %v17310_v50, %v10642_v34  ;;  %v10760_v10 = vsel %vm8401_vm3, %v10451_v8, -inf  ;;  %v7342_v15 = vmax.f32 %v6482_v35, 0.0  ;;  %v5450_v27 = vadd.f32 %v17321_v29, %v5449_v20  ;;  %12940 = vmatmul.msk.bf16.gmra.mxu0 %vm3184_vm2, %v13384_v0  ;;  %13259 = vmatmul.msk.bf16.vlgmr.msrb.gmra.mxu1 %vm8401_vm3, %v9573_v28  ;;  %v13385_v35 = vld [vmem:[%s13817_s11 + $0x340] sm:$0xff] }
 0x695   : > { %v10761_v11 = vmax.f32 %v17314_v39, %v10760_v10  ;;  %v7966_v49 = vpack.c.bf16 %v7134_v56, %v7134_v56  ;;  %v6719_v26 = vmax.f32 %v4925_v19, 0.0  ;;  %13148 = vmatmul.msk.bf16.gmra.mxu2 %vm3184_vm2, %v13592_v58  ;;  %v10340_v19 = vpack.c.b16 %v17264_v6, %v17264_v6 }
 0x696   : > { %v8174_v44 = vpack.c.bf16 %v7342_v15, %v7342_v15  ;;  %v6929_v52 = vmax.f32 %v5450_v27, 0.0  ;;  %13252 = vmatmul.msk.bf16.gmra.mxu3 %vm3184_vm2, %v13696_v18 }
 0x697   : > { %v10501_v16 = vunpack.c.l.bf16 %v7966_v49  ;;  %v7551_v12 = vpack.c.bf16 %v6719_v26, %v6719_v26 }
 0x698   : > { %v10553_v48 = vunpack.c.l.bf16 %v8174_v44  ;;  %v7761_v40 = vpack.c.bf16 %v6929_v52, %v6929_v52  ;;  %v5964_v59 = vpop.f32.mrf.mxu2 }
 0x699   : > { %v10870_v55 = vsel %vm8401_vm3, %v10501_v16, -inf  ;;  %v10398_v42 = vunpack.c.l.bf16 %v7551_v12  ;;  %v5965_v30 = vadd.f32 %v17321_v29, %v5964_v59  ;;  %v6484_v50 = vpop.f32.mrf.mxu3  ;;  %v4926_v41 = vpop.f32.mrf.mxu0 }
 0x69a   : > { %v10871_v14 = vmax.f32 %v17327_v31, %v10870_v55  ;;  %v10984_v53 = vsel %vm8401_vm3, %v10553_v48, -inf  ;;  %v10452_v39 = vunpack.c.l.bf16 %v7761_v40  ;;  %v6485_v32 = vadd.f32 %v17321_v29, %v6484_v50  ;;  %v5451_v7 = vpop.f32.mrf.mxu1 }
 0x69b   : > { %v10985_v47 = vmax.f32 %v17332_v38, %v10984_v53  ;;  %v10644_v60 = vsel %vm8401_vm3, %v10398_v42, -inf  ;;  %v7135_v57 = vmax.f32 %v5965_v30, 0.0  ;;  %v4927_v22 = vadd.f32 %v17321_v29, %v4926_v41 }
 0x69c   : > { %v10645_v4 = vmax.f32 %v10643_v24, %v10644_v60  ;;  %v10762_v23 = vsel %vm8401_vm3, %v10452_v39, -inf  ;;  %v7343_v3 = vmax.f32 %v6485_v32, 0.0  ;;  %v5452_v0 = vadd.f32 %v17321_v29, %v5451_v7 }
 0x69d   : > { %v10763_v63 = vmax.f32 %v10761_v11, %v10762_v23  ;;  %v7967_v13 = vpack.c.bf16 %v7135_v57, %v7135_v57  ;;  %v6720_v45 = vmax.f32 %v4927_v22, 0.0 }
 0x69e   : > { %v8175_v33 = vpack.c.bf16 %v7343_v3, %v7343_v3  ;;  %v6930_v37 = vmax.f32 %v5452_v0, 0.0 }
 0x69f   : > { %v10502_v58 = vunpack.c.l.bf16 %v7967_v13  ;;  %v7552_v28 = vpack.c.bf16 %v6720_v45, %v6720_v45 }
 0x6a0   : > { %v10554_v31 = vunpack.c.l.bf16 %v8175_v33  ;;  %v7762_v9 = vpack.c.bf16 %v6930_v37, %v6930_v37  ;;  %v5966_v8 = vpop.f32.mrf.mxu2 }
 0x6a1   : > { %v10872_v20 = vsel %vm8401_vm3, %v10502_v58, -inf  ;;  %v10399_v18 = vunpack.c.l.bf16 %v7552_v28  ;;  %v5967_v38 = vadd.f32 %v17321_v29, %v5966_v8  ;;  %v6486_v34 = vpop.f32.mrf.mxu3  ;;  %v4929_v56 = vpop.f32.mrf.mxu0 }
 0x6a2   : > { %v10873_v24 = vmax.f32 %v10871_v14, %v10872_v20  ;;  %v10986_v10 = vsel %vm8401_vm3, %v10554_v31, -inf  ;;  %v10453_v15 = vunpack.c.l.bf16 %v7762_v9  ;;  %v6487_v27 = vadd.f32 %v17321_v29, %v6486_v34  ;;  %v5454_v11 = vpop.f32.mrf.mxu1 }
 0x6a3   : > { %v10987_v49 = vmax.f32 %v10985_v47, %v10986_v10  ;;  %v10646_v26 = vsel %vm8401_vm3, %v10399_v18, -inf  ;;  %v7136_v44 = vmax.f32 %v5967_v38, 0.0  ;;  %v4930_v52 = vadd.f32 %v17321_v29, %v4929_v56 }
 0x6a4   : > { %v10647_v16 = vmax.f32 %v10645_v4, %v10646_v26  ;;  %v10764_v12 = vsel %vm8401_vm3, %v10453_v15, -inf  ;;  %v7344_v48 = vmax.f32 %v6487_v27, 0.0  ;;  %v5455_v40 = vadd.f32 %v17321_v29, %v5454_v11  ;;  %12941 = vmatmul.msk.bf16.gmra.mxu0 %vm3184_vm2, %v13385_v35 }
 0x6a5   : > { %v10765_v6 = vmax.f32 %v10763_v63, %v10764_v12  ;;  %v7968_v59 = vpack.c.bf16 %v7136_v44, %v7136_v44  ;;  %v6721_v55 = vmax.f32 %v4930_v52, 0.0 }
 0x6a6   : > { %v8176_v42 = vpack.c.bf16 %v7344_v48, %v7344_v48  ;;  %v6931_v30 = vmax.f32 %v5455_v40, 0.0  ;;  %13271 = vmatmul.msk.bf16.vlgmr.msrb.gmra.mxu3 %vm8401_vm3, %v10340_v19 }
 0x6a7   : > { %v10503_v50 = vunpack.c.l.bf16 %v7968_v59  ;;  %v7553_v41 = vpack.c.bf16 %v6721_v55, %v6721_v55 }
 0x6a8   : > { %v10555_v14 = vunpack.c.l.bf16 %v8176_v42  ;;  %v7763_v53 = vpack.c.bf16 %v6931_v30, %v6931_v30  ;;  %v5969_v39 = vpop.f32.mrf.mxu2 }
 0x6a9   : > { %v10874_v32 = vsel %vm8401_vm3, %v10503_v50, -inf  ;;  %v10400_v7 = vunpack.c.l.bf16 %v7553_v41  ;;  %v5970_v47 = vadd.f32 %v17321_v29, %v5969_v39  ;;  %v6489_v60 = vpop.f32.mrf.mxu3  ;;  %v4931_v57 = vpop.f32.mrf.mxu0 }
 0x6aa   : > { %v10875_v22 = vmax.f32 %v10873_v24, %v10874_v32  ;;  %v10988_v4 = vsel %vm8401_vm3, %v10555_v14, -inf  ;;  %v10454_v23 = vunpack.c.l.bf16 %v7763_v53  ;;  %v6490_v3 = vadd.f32 %v17321_v29, %v6489_v60  ;;  %v5456_v0 = vpop.f32.mrf.mxu1 }
 0x6ab   : > { %v10989_v63 = vmax.f32 %v10987_v49, %v10988_v4  ;;  %v10648_v13 = vsel %vm8401_vm3, %v10400_v7, -inf  ;;  %v7137_v45 = vmax.f32 %v5970_v47, 0.0  ;;  %v4932_v33 = vadd.f32 %v17321_v29, %v4931_v57 }
 0x6ac   : > { %v10649_v37 = vmax.f32 %v10647_v16, %v10648_v13  ;;  %v10766_v58 = vsel %vm8401_vm3, %v10454_v23, -inf  ;;  %v7345_v28 = vmax.f32 %v6490_v3, 0.0  ;;  %v5457_v31 = vadd.f32 %v17321_v29, %v5456_v0 }
 0x6ad   : > { %v10767_v9 = vmax.f32 %v10765_v6, %v10766_v58  ;;  %v7969_v8 = vpack.c.bf16 %v7137_v45, %v7137_v45  ;;  %v6722_v35 = vmax.f32 %v4932_v33, 0.0 }
 0x6ae   : > { %v8177_v20 = vpack.c.bf16 %v7345_v28, %v7345_v28  ;;  %v6932_v18 = vmax.f32 %v5457_v31, 0.0 }
 0x6af   : > { %v10504_v38 = vunpack.c.l.bf16 %v7969_v8  ;;  %v7554_v34 = vpack.c.bf16 %v6722_v35, %v6722_v35 }
 0x6b0   : > { %v10556_v56 = vunpack.c.l.bf16 %v8177_v20  ;;  %v7764_v19 = vpack.c.bf16 %v6932_v18, %v6932_v18  ;;  %v5971_v24 = vpop.f32.mrf.mxu2 }
 0x6b1   : > { %v10876_v10 = vsel %vm8401_vm3, %v10504_v38, -inf  ;;  %v10401_v15 = vunpack.c.l.bf16 %v7554_v34  ;;  %v5972_v27 = vadd.f32 %v17321_v29, %v5971_v24  ;;  %v6491_v11 = vpop.f32.mrf.mxu3  ;;  %v4934_v49 = vpop.f32.mrf.mxu0 }
 0x6b2   : > { %v10877_v26 = vmax.f32 %v10875_v22, %v10876_v10  ;;  %v10990_v44 = vsel %vm8401_vm3, %v10556_v56, -inf  ;;  %v10455_v52 = vunpack.c.l.bf16 %v7764_v19  ;;  %v6492_v16 = vadd.f32 %v17321_v29, %v6491_v11  ;;  %v5459_v12 = vpop.f32.mrf.mxu1 }
 0x6b3   : > { %v10991_v48 = vmax.f32 %v10989_v63, %v10990_v44  ;;  %v10650_v40 = vsel %vm8401_vm3, %v10401_v15, -inf  ;;  %v7138_v6 = vmax.f32 %v5972_v27, 0.0  ;;  %v4935_v59 = vadd.f32 %v17321_v29, %v4934_v49 }
 0x6b4   : > { %v10651_v55 = vmax.f32 %v10649_v37, %v10650_v40  ;;  %v10768_v42 = vsel %vm8401_vm3, %v10455_v52, -inf  ;;  %v7346_v30 = vmax.f32 %v6492_v16, 0.0  ;;  %v5460_v50 = vadd.f32 %v17321_v29, %v5459_v12 }
 0x6b5   : > { %v10769_v41 = vmax.f32 %v10767_v9, %v10768_v42  ;;  %v7970_v14 = vpack.c.bf16 %v7138_v6, %v7138_v6  ;;  %v6723_v53 = vmax.f32 %v4935_v59, 0.0 }
 0x6b6   : > { %v8178_v39 = vpack.c.bf16 %v7346_v30, %v7346_v30  ;;  %v6933_v32 = vmax.f32 %v5460_v50, 0.0 }
 0x6b7   : > { %v10505_v7 = vunpack.c.l.bf16 %v7970_v14  ;;  %v7555_v47 = vpack.c.bf16 %v6723_v53, %v6723_v53 }
 0x6b8   : > { %v10557_v60 = vunpack.c.l.bf16 %v8178_v39  ;;  %v7765_v57 = vpack.c.bf16 %v6933_v32, %v6933_v32  ;;  %v5974_v22 = vpop.f32.mrf.mxu2 }
 0x6b9   : > { %v10878_v4 = vsel %vm8401_vm3, %v10505_v7, -inf  ;;  %v10402_v23 = vunpack.c.l.bf16 %v7555_v47  ;;  %v5975_v3 = vadd.f32 %v17321_v29, %v5974_v22  ;;  %v6494_v0 = vpop.f32.mrf.mxu3  ;;  %v4936_v63 = vpop.f32.mrf.mxu0 }
 0x6ba   : > { %v10879_v13 = vmax.f32 %v10877_v26, %v10878_v4  ;;  %v10992_v45 = vsel %vm8401_vm3, %v10557_v60, -inf  ;;  %v10456_v33 = vunpack.c.l.bf16 %v7765_v57  ;;  %v6495_v37 = vadd.f32 %v17321_v29, %v6494_v0  ;;  %v5461_v58 = vpop.f32.mrf.mxu1 }
 0x6bb   : > { %v10993_v28 = vmax.f32 %v10991_v48, %v10992_v45  ;;  %v10652_v31 = vsel %vm8401_vm3, %v10402_v23, -inf  ;;  %v7139_v9 = vmax.f32 %v5975_v3, 0.0  ;;  %v4937_v8 = vadd.f32 %v17321_v29, %v4936_v63 }
 0x6bc   : > { %v10653_v35 = vmax.f32 %v10651_v55, %v10652_v31  ;;  %v10770_v20 = vsel %vm8401_vm3, %v10456_v33, -inf  ;;  %v7347_v18 = vmax.f32 %v6495_v37, 0.0  ;;  %v5462_v38 = vadd.f32 %v17321_v29, %v5461_v58 }
 0x6bd   : > { %v10771_v34 = vmax.f32 %v10769_v41, %v10770_v20  ;;  %v7971_v56 = vpack.c.bf16 %v7139_v9, %v7139_v9  ;;  %v6724_v19 = vmax.f32 %v4937_v8, 0.0 }
 0x6be   : > { %v8179_v24 = vpack.c.bf16 %v7347_v18, %v7347_v18  ;;  %v6934_v10 = vmax.f32 %v5462_v38, 0.0 }
 0x6bf   : > { %v10506_v15 = vunpack.c.l.bf16 %v7971_v56  ;;  %v7556_v27 = vpack.c.bf16 %v6724_v19, %v6724_v19 }
 0x6c0   : > { %v10558_v11 = vunpack.c.l.bf16 %v8179_v24  ;;  %v7766_v49 = vpack.c.bf16 %v6934_v10, %v6934_v10  ;;  %v5976_v26 = vpop.f32.mrf.mxu2 }
 0x6c1   : > { %v10880_v44 = vsel %vm8401_vm3, %v10506_v15, -inf  ;;  %v10403_v52 = vunpack.c.l.bf16 %v7556_v27  ;;  %v5977_v16 = vadd.f32 %v17321_v29, %v5976_v26  ;;  %v6496_v12 = vpop.f32.mrf.mxu3  ;;  %v4939_v48 = vpop.f32.mrf.mxu0 }
 0x6c2   : > { %v10881_v40 = vmax.f32 %v10879_v13, %v10880_v44  ;;  %v10994_v6 = vsel %vm8401_vm3, %v10558_v11, -inf  ;;  %v10457_v59 = vunpack.c.l.bf16 %v7766_v49  ;;  %v6497_v55 = vadd.f32 %v17321_v29, %v6496_v12  ;;  %v5464_v42 = vpop.f32.mrf.mxu1 }
 0x6c3   : > { %v10995_v30 = vmax.f32 %v10993_v28, %v10994_v6  ;;  %v10654_v50 = vsel %vm8401_vm3, %v10403_v52, -inf  ;;  %v7140_v41 = vmax.f32 %v5977_v16, 0.0  ;;  %v4940_v14 = vadd.f32 %v17321_v29, %v4939_v48 }
 0x6c4   : > { %v10655_v53 = vmax.f32 %v10653_v35, %v10654_v50  ;;  %v10772_v39 = vsel %vm8401_vm3, %v10457_v59, -inf  ;;  %v7348_v32 = vmax.f32 %v6497_v55, 0.0  ;;  %v5465_v7 = vadd.f32 %v17321_v29, %v5464_v42 }
 0x6c5   : > { %v10773_v47 = vmax.f32 %v10771_v34, %v10772_v39  ;;  %v7972_v60 = vpack.c.bf16 %v7140_v41, %v7140_v41  ;;  %v6725_v57 = vmax.f32 %v4940_v14, 0.0  ;;  %v10737_v14 = vrot.slane %v15667_v54, 4 }
 0x6c6   : > { %v8180_v22 = vpack.c.bf16 %v7348_v32, %v7348_v32  ;;  %v6935_v4 = vmax.f32 %v5465_v7, 0.0 }
 0x6c7   : > { %v10507_v23 = vunpack.c.l.bf16 %v7972_v60  ;;  %v7557_v3 = vpack.c.bf16 %v6725_v57, %v6725_v57  ;;  %v10738_v7 = vmax.f32 %v15667_v54, %v10737_v14  ;;  %v10623_v57 = vrot.slane %v15693_v1, 4 }
 0x6c8   : > { %v10559_v0 = vunpack.c.l.bf16 %v8180_v22  ;;  %v7767_v63 = vpack.c.bf16 %v6935_v4, %v6935_v4  ;;  %v5979_v13 = vpop.f32.mrf.mxu2 }
 0x6c9   : > { %v10882_v45 = vsel %vm8401_vm3, %v10507_v23, -inf  ;;  %v10404_v33 = vunpack.c.l.bf16 %v7557_v3  ;;  %v5980_v37 = vadd.f32 %v17321_v29, %v5979_v13  ;;  %v6499_v58 = vpop.f32.mrf.mxu3  ;;  %v4941_v28 = vpop.f32.mrf.mxu0  ;;  %v10739_v60 = vrot.slane %v10738_v7, 2 }
 0x6ca   : > { %v10883_v31 = vmax.f32 %v10881_v40, %v10882_v45  ;;  %v10996_v9 = vsel %vm8401_vm3, %v10559_v0, -inf  ;;  %v10458_v8 = vunpack.c.l.bf16 %v7767_v63  ;;  %v6500_v35 = vadd.f32 %v17321_v29, %v6499_v58  ;;  %v5466_v20 = vpop.f32.mrf.mxu1 }
 0x6cb   : > { %v10997_v18 = vmax.f32 %v10995_v30, %v10996_v9  ;;  %v10656_v38 = vsel %vm8401_vm3, %v10404_v33, -inf  ;;  %v7141_v34 = vmax.f32 %v5980_v37, 0.0  ;;  %v5467_v10 = vadd.f32 %v17321_v29, %v5466_v20 }
 0x6cc   : > { %v17404_v56 = vmax.f32 %v10655_v53, %v10656_v38  ;;  %v10774_v19 = vsel %vm8401_vm3, %v10458_v8, -inf  ;;  %v7349_v24 = vmax.f32 %v6500_v35, 0.0  ;;  %v4942_v22 = vadd.f32 %v17321_v29, %v4941_v28 }
 0x6cd   : > { %v17408_v15 = vmax.f32 %v10773_v47, %v10774_v19  ;;  %v7973_v27 = vpack.c.bf16 %v7141_v34, %v7141_v34  ;;  %v6936_v49 = vmax.f32 %v5467_v10, 0.0  ;;  %v8681_v23 = vrot.slane %v14355_v17, 4 }
 0x6ce   : > { %v8181_v11 = vpack.c.bf16 %v7349_v24, %v7349_v24  ;;  %v8795_v3 = vrot.slane %v14358_v21, 4  ;;  %v10740_v45 = vmax.f32 %v10738_v7, %v10739_v60  ;;  %v10624_v33 = vmax.f32 %v15693_v1, %v10623_v57 }
 0x6cf   : > { %v10508_v26 = vunpack.c.l.bf16 %v7973_v27  ;;  %v7768_v52 = vpack.c.bf16 %v6936_v49, %v6936_v49  ;;  %v6726_v37 = vmax.f32 %v4942_v22, 0.0 }
 0x6d0   : > { %v10560_v44 = vunpack.c.l.bf16 %v8181_v11  ;;  %v5981_v16 = vpop.f32.mrf.mxu2  ;;  %v17432_v28 = vmax.f32 %v14358_v21, %v8795_v3  ;;  %v10741_v8 = vrot.slane %v10740_v45, 1  ;;  %v10625_v35 = vrot.slane %v10624_v33, 2 }
 0x6d1   : > { %v10884_v12 = vsel %vm8401_vm3, %v10508_v26, -inf  ;;  %v6501_v48 = vpop.f32.mrf.mxu3  ;;  %v4944_v40 = vpop.f32.mrf.mxu0  ;;  %v10459_v55 = vunpack.c.l.bf16 %v7768_v52  ;;  %v5982_v0 = vadd.f32 %v17321_v29, %v5981_v16  ;;  %v7558_v20 = vpack.c.bf16 %v6726_v37, %v6726_v37 }
 0x6d2   : > { %v17411_v6 = vmax.f32 %v10883_v31, %v10884_v12  ;;  %v10998_v59 = vsel %vm8401_vm3, %v10560_v44, -inf  ;;  %v5469_v42 = vpop.f32.mrf.mxu1  ;;  %v6502_v58 = vadd.f32 %v17321_v29, %v6501_v48  ;;  %v8682_v31 = vmax.f32 %v14355_v17, %v8681_v23 }
 0x6d3   : > { %v17414_v30 = vmax.f32 %v10997_v18, %v10998_v59  ;;  %v17417_v50 = vsel %vm8401_vm3, %v10459_v55, -inf  ;;  %v7142_v9 = vmax.f32 %v5982_v0, 0.0  ;;  %v4945_v38 = vadd.f32 %v17321_v29, %v4944_v40 }
 0x6d4   : > { %v10777_v41 = vmax.f32 %v17408_v15, %v17417_v50  ;;  %v7350_v18 = vmax.f32 %v6502_v58, 0.0  ;;  %v5470_v34 = vadd.f32 %v17321_v29, %v5469_v42  ;;  %v8683_v10 = vrot.slane %v8682_v31, 2 }
 0x6d5   : > { %v8797_v17 = vrot.slane %v17432_v28, 2  ;;  %v7974_v27 = vpack.c.bf16 %v7142_v9, %v7142_v9  ;;  %v17439_v49 = vmax.f32 %v10740_v45, %v10741_v8  ;;  %v10626_v26 = vmax.f32 %v10624_v33, %v10625_v35 }
 0x6d6   : > { %v10851_v44 = vrot.slane %v15700_v43, 4  ;;  %v10405_v52 = vunpack.c.l.bf16 %v7558_v20  ;;  %v8182_v12 = vpack.c.bf16 %v7350_v18, %v7350_v18  ;;  %v6727_v48 = vmax.f32 %v4945_v38, 0.0 }
 0x6d7   : > { %v6937_v40 = vmax.f32 %v5470_v34, 0.0  ;;  %v10965_v55 = vrot.slane %v15703_v25, 4  ;;  %v10509_v7 = vunpack.c.l.bf16 %v7974_v27  ;;  %v11030_v22 = vpack.c.bf16 %v17439_v49, %v17439_v49 }
 0x6d8   : > { %v5984_v53 = vpop.f32.mrf.mxu2  ;;  %v10627_v23 = vrot.slane %v10626_v26, 1  ;;  %v17452_v3 = vmax.f32 %v15700_v43, %v10851_v44  ;;  %v10658_v0 = vsel %vm8401_vm3, %v10405_v52, -inf  ;;  %v10561_v45 = vunpack.c.l.bf16 %v8182_v12 }
 0x6d9   : > { %v6504_v39 = vpop.f32.mrf.mxu3  ;;  %v4946_v32 = vpop.f32.mrf.mxu0  ;;  %v5985_v1 = vadd.f32 %v17321_v29, %v5984_v53  ;;  %v7769_v33 = vpack.c.bf16 %v6937_v40, %v6937_v40  ;;  %v17456_v37 = vmax.f32 %v15703_v25, %v10965_v55  ;;  %v10886_v9 = vsel %vm8401_vm3, %v10509_v7, -inf }
 0x6da   : > { %v5471_v47 = vpop.f32.mrf.mxu1  ;;  %v6505_v19 = vadd.f32 %v17321_v29, %v6504_v39  ;;  %v4947_v14 = vadd.f32 %v17321_v29, %v4946_v32  ;;  %v17445_v39 = vmax.f32 %v8682_v31, %v8683_v10  ;;  %v7559_v32 = vpack.c.bf16 %v6727_v48, %v6727_v48 }
 0x6db   : > { %v7143_v59 = vmax.f32 %v5985_v1, 0.0  ;;  %v5472_v53 = vadd.f32 %v17321_v29, %v5471_v47  ;;  %v17460_v38 = vmax.f32 %v10626_v26, %v10627_v23  ;;  %v10853_v34 = vrot.slane %v17452_v3, 2 }
 0x6dc   : > { %v7351_v42 = vmax.f32 %v6505_v19, 0.0  ;;  %v10659_v1 = vmax.f32 %v17404_v56, %v10658_v0  ;;  %v11000_v10 = vsel %vm8401_vm3, %v10561_v45, -inf  ;;  %v10406_v27 = vunpack.c.l.bf16 %v7559_v32 }
 0x6dd   : > { %v7975_v47 = vpack.c.bf16 %v7143_v59, %v7143_v59  ;;  %v6938_v31 = vmax.f32 %v5472_v53, 0.0  ;;  %v10460_v44 = vunpack.c.l.bf16 %v7769_v33  ;;  %v10887_v12 = vmax.f32 %v17411_v6, %v10886_v9 }
 0x6de   : > { %v8183_v58 = vpack.c.bf16 %v7351_v42, %v7351_v42  ;;  %v11001_v56 = vmax.f32 %v17414_v30, %v11000_v10  ;;  %v10660_v7 = vsel %vm8401_vm3, %v10406_v27, -inf }
 0x6df   : > { %v10510_v52 = vunpack.c.l.bf16 %v7975_v47  ;;  %v7770_v40 = vpack.c.bf16 %v6938_v31, %v6938_v31 }
 0x6e0   : > { %v5986_v4 = vpop.f32.mrf.mxu2  ;;  %v10562_v48 = vunpack.c.l.bf16 %v8183_v58 }
 0x6e1   : > { %v6506_v63 = vpop.f32.mrf.mxu3  ;;  %v4949_v13 = vpop.f32.mrf.mxu0  ;;  %v5987_v60 = vadd.f32 %v17321_v29, %v5986_v4  ;;  %v6728_v4 = vmax.f32 %v4947_v14, 0.0  ;;  %v10888_v6 = vsel %vm8401_vm3, %v10510_v52, -inf  ;;  %v10461_v45 = vunpack.c.l.bf16 %v7770_v40 }
 0x6e2   : > { %v5474_v54 = vpop.f32.mrf.mxu1  ;;  %v6507_v57 = vadd.f32 %v17321_v29, %v6506_v63  ;;  %v4950_v43 = vadd.f32 %v17321_v29, %v4949_v13  ;;  %v11002_v23 = vsel %vm8401_vm3, %v10562_v48, -inf }
 0x6e3   : > { %v7144_v8 = vmax.f32 %v5987_v60, 0.0  ;;  %v5475_v25 = vadd.f32 %v17321_v29, %v5474_v54  ;;  %v7560_v13 = vpack.c.bf16 %v6728_v4, %v6728_v4  ;;  %v10778_v60 = vsel %vm8401_vm3, %v10460_v44, -inf }
 0x6e4   : > { %v7352_v35 = vmax.f32 %v6507_v57, 0.0  ;;  %v6729_v55 = vmax.f32 %v4950_v43, 0.0  ;;  %v10661_v4 = vmax.f32 %v10659_v1, %v10660_v7  ;;  %v10889_v43 = vmax.f32 %v10887_v12, %v10888_v6 }
 0x6e5   : > { %v7976_v59 = vpack.c.bf16 %v7144_v8, %v7144_v8  ;;  %v6939_v14 = vmax.f32 %v5475_v25, 0.0  ;;  %v10407_v0 = vunpack.c.l.bf16 %v7560_v13  ;;  %v11003_v10 = vmax.f32 %v11001_v56, %v11002_v23 }
 0x6e6   : > { %v8184_v26 = vpack.c.bf16 %v7352_v35, %v7352_v35  ;;  %v10780_v44 = vsel %vm8401_vm3, %v10461_v45, -inf }
 0x6e7   : > { %v10511_v32 = vunpack.c.l.bf16 %v7976_v59  ;;  %v7771_v31 = vpack.c.bf16 %v6939_v14, %v6939_v14  ;;  %v10662_v27 = vsel %vm8401_vm3, %v10407_v0, -inf }
 0x6e8   : > { %v5989_v24 = vpop.f32.mrf.mxu2  ;;  %v10563_v33 = vunpack.c.l.bf16 %v8184_v26  ;;  %v10663_v56 = vmax.f32 %v10661_v4, %v10662_v27 }
 0x6e9   : > { %v6509_v21 = vpop.f32.mrf.mxu3  ;;  %v4951_v11 = vpop.f32.mrf.mxu0  ;;  %v5990_v42 = vadd.f32 %v17321_v29, %v5989_v24  ;;  %v10890_v1 = vsel %vm8401_vm3, %v10511_v32, -inf  ;;  %v10462_v59 = vunpack.c.l.bf16 %v7771_v31 }
 0x6ea   : > { %v5476_v16 = vpop.f32.mrf.mxu1  ;;  %v6510_v54 = vadd.f32 %v17321_v29, %v6509_v21  ;;  %v4952_v53 = vadd.f32 %v17321_v29, %v4951_v11  ;;  %v7561_v21 = vpack.c.bf16 %v6729_v55, %v6729_v55  ;;  %v11004_v48 = vsel %vm8401_vm3, %v10563_v33, -inf }
 0x6eb   : > { %v5477_v57 = vadd.f32 %v17321_v29, %v5476_v16  ;;  %v7145_v47 = vmax.f32 %v5990_v42, 0.0  ;;  %v10779_v16 = vmax.f32 %v10777_v41, %v10778_v60  ;;  %v17489_v42 = vmax.f32 %v17452_v3, %v10853_v34 }
 0x6ec   : > { %v7353_v9 = vmax.f32 %v6510_v54, 0.0  ;;  %v6730_v8 = vmax.f32 %v4952_v53, 0.0  ;;  %v10408_v13 = vunpack.c.l.bf16 %v7561_v21  ;;  %v10891_v7 = vmax.f32 %v10889_v43, %v10890_v1 }
 0x6ed   : > { %v6940_v25 = vmax.f32 %v5477_v57, 0.0  ;;  %v7977_v40 = vpack.c.bf16 %v7145_v47, %v7145_v47  ;;  %v10781_v14 = vmax.f32 %v10779_v16, %v10780_v44  ;;  %v11005_v60 = vmax.f32 %v11003_v10, %v11004_v48 }
 0x6ee   : > { %v8185_v26 = vpack.c.bf16 %v7353_v9, %v7353_v9  ;;  %v7562_v15 = vpack.c.bf16 %v6730_v8, %v6730_v8  ;;  %v10664_v6 = vsel %vm8401_vm3, %v10408_v13, -inf  ;;  %v10782_v45 = vsel %vm8401_vm3, %v10462_v59, -inf }
 0x6ef   : > { %v7772_v41 = vpack.c.bf16 %v6940_v25, %v6940_v25  ;;  %v10512_v57 = vunpack.c.l.bf16 %v7977_v40  ;;  %v17493_v47 = vmax.f32 %v10663_v56, %v10664_v6  ;;  %v10783_v8 = vmax.f32 %v10781_v14, %v10782_v45 }
 0x6f0   : > { %v5991_v63 = vpop.f32.mrf.mxu2 }
 0x6f1   : > { %v6511_v20 = vpop.f32.mrf.mxu3  ;;  %v4954_v18 = vpop.f32.mrf.mxu0  ;;  %v5992_v24 = vadd.f32 %v17321_v29, %v5991_v63  ;;  %v10463_v33 = vunpack.c.l.bf16 %v7772_v41 }
 0x6f2   : > { %v5479_v19 = vpop.f32.mrf.mxu1  ;;  %v4955_v12 = vadd.f32 %v17321_v29, %v4954_v18 }
 0x6f3   : > { %v5480_v63 = vadd.f32 %v17321_v29, %v5479_v19  ;;  %v7146_v52 = vmax.f32 %v5992_v24, 0.0  ;;  %v6512_v19 = vadd.f32 %v17321_v29, %v6511_v20  ;;  %v10564_v20 = vunpack.c.l.bf16 %v8185_v26 }
 0x6f4   : > { %v10409_v24 = vunpack.c.l.bf16 %v7562_v15  ;;  %v6731_v34 = vmax.f32 %v4955_v12, 0.0  ;;  %v10784_v44 = vsel %vm8401_vm3, %v10463_v33, -inf }
 0x6f5   : > { %v6941_v55 = vmax.f32 %v5480_v63, 0.0  ;;  %v7978_v54 = vpack.c.bf16 %v7146_v52, %v7146_v52  ;;  %v7354_v3 = vmax.f32 %v6512_v19, 0.0  ;;  %v11006_v25 = vsel %vm8401_vm3, %v10564_v20, -inf }
 0x6f6   : > { %v17502_v63 = vsel %vm8401_vm3, %v10409_v24, -inf  ;;  %v17510_v59 = vmax.f32 %v11005_v60, %v11006_v25 }
 0x6f7   : > { %v7773_v21 = vpack.c.bf16 %v6941_v55, %v6941_v55  ;;  %v10513_v4 = vunpack.c.l.bf16 %v7978_v54  ;;  %v8186_v52 = vpack.c.bf16 %v7354_v3, %v7354_v3  ;;  %v10667_v12 = vmax.f32 %v17493_v47, %v17502_v63 }
 0x6f8   : > { %v5994_v30 = vpop.f32.mrf.mxu2  ;;  %v10785_v55 = vmax.f32 %v10783_v8, %v10784_v44 }
 0x6f9   : > { %v6514_v11 = vpop.f32.mrf.mxu3  ;;  %v4956_v58 = vpop.f32.mrf.mxu0  ;;  %v5995_v16 = vadd.f32 %v17321_v29, %v5994_v30  ;;  %v10464_v1 = vunpack.c.l.bf16 %v7773_v21  ;;  %v17508_v13 = vsel %vm8401_vm3, %v10513_v4, -inf  ;;  %v10565_v6 = vunpack.c.l.bf16 %v8186_v52 }
 0x6fa   : > { %v5481_v35 = vpop.f32.mrf.mxu1  ;;  %v4957_v31 = vadd.f32 %v17321_v29, %v4956_v58  ;;  %v6515_v43 = vadd.f32 %v17321_v29, %v6514_v11  ;;  %v7563_v58 = vpack.c.bf16 %v6731_v34, %v6731_v34 }
 0x6fb   : > { %v5482_v50 = vadd.f32 %v17321_v29, %v5481_v35  ;;  %v10892_v35 = vsel %vm8401_vm3, %v10512_v57, -inf  ;;  %v7147_v26 = vmax.f32 %v5995_v16, 0.0  ;;  %v10786_v57 = vsel %vm8401_vm3, %v10464_v1, -inf }
 0x6fc   : > { %v17505_v48 = vmax.f32 %v10891_v7, %v10892_v35  ;;  %v6732_v30 = vmax.f32 %v4957_v31, 0.0  ;;  %v7355_v15 = vmax.f32 %v6515_v43, 0.0  ;;  %v10410_v60 = vunpack.c.l.bf16 %v7563_v58 }
 0x6fd   : > { %v6942_v18 = vmax.f32 %v5482_v50, 0.0  ;;  %v17525_v4 = vsel %vm8401_vm3, %v10565_v6, -inf }
 0x6fe   : > { %v10895_v7 = vmax.f32 %v17505_v48, %v17508_v13  ;;  %v7564_v45 = vpack.c.bf16 %v6732_v30, %v6732_v30  ;;  %v10668_v31 = vsel %vm8401_vm3, %v10410_v60, -inf }
 0x6ff   : > { %v7774_v10 = vpack.c.bf16 %v6942_v18, %v6942_v18  ;;  %v7979_v18 = vpack.c.bf16 %v7147_v26, %v7147_v26 }
 0x700   : > { %v5996_v53 = vpop.f32.mrf.mxu2  ;;  %v10411_v35 = vunpack.c.l.bf16 %v7564_v45 }
 0x701   : > { %v6516_v23 = vpop.f32.mrf.mxu3  ;;  %v4959_v0 = vpop.f32.mrf.mxu0  ;;  %v5997_v50 = vadd.f32 %v17321_v29, %v5996_v53  ;;  %v10465_v56 = vunpack.c.l.bf16 %v7774_v10  ;;  %v10514_v63 = vunpack.c.l.bf16 %v7979_v18 }
 0x702   : > { %v5484_v32 = vpop.f32.mrf.mxu1  ;;  %v4960_v14 = vadd.f32 %v17321_v29, %v4959_v0  ;;  %v6517_v3 = vadd.f32 %v17321_v29, %v6516_v23 }
 0x703   : > { %v5485_v9 = vadd.f32 %v17321_v29, %v5484_v32  ;;  %v8187_v32 = vpack.c.bf16 %v7355_v15, %v7355_v15  ;;  %v7148_v33 = vmax.f32 %v5997_v50, 0.0  ;;  %v10788_v0 = vsel %vm8401_vm3, %v10465_v56, -inf }
 0x704   : > { %v6733_v34 = vmax.f32 %v4960_v14, 0.0  ;;  %v7356_v44 = vmax.f32 %v6517_v3, 0.0 }
 0x705   : > { %v6943_v27 = vmax.f32 %v5485_v9, 0.0  ;;  %v10787_v9 = vmax.f32 %v10785_v55, %v10786_v57  ;;  %v10566_v1 = vunpack.c.l.bf16 %v8187_v32  ;;  %v10670_v55 = vsel %vm8401_vm3, %v10411_v35, -inf }
 0x706   : > { %v7565_v30 = vpack.c.bf16 %v6733_v34, %v6733_v34  ;;  %v8188_v60 = vpack.c.bf16 %v7356_v44, %v7356_v44 }
 0x707   : > { %v7775_v40 = vpack.c.bf16 %v6943_v27, %v6943_v27  ;;  %v10789_v10 = vmax.f32 %v10787_v9, %v10788_v0  ;;  %v7980_v27 = vpack.c.bf16 %v7148_v33, %v7148_v33  ;;  %v11010_v34 = vsel %vm8401_vm3, %v10566_v1, -inf }
 0x708   : > { %v5999_v11 = vpop.f32.mrf.mxu2  ;;  %v10412_v18 = vunpack.c.l.bf16 %v7565_v30 }
 0x709   : > { %v6519_v41 = vpop.f32.mrf.mxu3  ;;  %v4961_v19 = vpop.f32.mrf.mxu0  ;;  %v10466_v20 = vunpack.c.l.bf16 %v7775_v40  ;;  %v6000_v21 = vadd.f32 %v17321_v29, %v5999_v11  ;;  %v10515_v6 = vunpack.c.l.bf16 %v7980_v27 }
 0x70a   : > { %v5486_v54 = vpop.f32.mrf.mxu1  ;;  %v4962_v53 = vadd.f32 %v17321_v29, %v4961_v19  ;;  %v6520_v8 = vadd.f32 %v17321_v29, %v6519_v41 }
 0x70b   : > { %v5487_v24 = vadd.f32 %v17321_v29, %v5486_v54  ;;  %v10790_v16 = vsel %vm8401_vm3, %v10466_v20, -inf  ;;  %v7149_v40 = vmax.f32 %v6000_v21, 0.0  ;;  %v11009_v20 = vmax.f32 %v17510_v59, %v17525_v4 }
 0x70c   : > { %v6734_v43 = vmax.f32 %v4962_v53, 0.0  ;;  %v10791_v15 = vmax.f32 %v10789_v10, %v10790_v16  ;;  %v7357_v50 = vmax.f32 %v6520_v8, 0.0  ;;  %v10669_v53 = vmax.f32 %v10667_v12, %v10668_v31 }
 0x70d   : > { %v6944_v47 = vmax.f32 %v5487_v24, 0.0  ;;  %v10896_v24 = vsel %vm8401_vm3, %v10514_v63, -inf  ;;  %v7981_v32 = vpack.c.bf16 %v7149_v40, %v7149_v40  ;;  %v10898_v35 = vsel %vm8401_vm3, %v10515_v6, -inf }
 0x70e   : > { %v7566_v56 = vpack.c.bf16 %v6734_v43, %v6734_v43  ;;  %v8189_v33 = vpack.c.bf16 %v7357_v50, %v7357_v50  ;;  %v10671_v21 = vmax.f32 %v10669_v53, %v10670_v55  ;;  %v10567_v16 = vunpack.c.l.bf16 %v8188_v60  ;;  %v13705_v53 = vld [vmem:[%s17626_s3 + $0x18] sm:$0xff] }
 0x70f   : > { %v7776_v25 = vpack.c.bf16 %v6944_v47, %v6944_v47  ;;  %v10672_v31 = vsel %vm8401_vm3, %v10412_v18, -inf  ;;  %v10516_v27 = vunpack.c.l.bf16 %v7981_v32  ;;  %v11011_v55 = vmax.f32 %v11009_v20, %v11010_v34  ;;  %11079 = vmatpush.bf16.msra.mxu1 %v13705_v53 }
 0x710   : > { %v6001_v23 = vpop.f32.mrf.mxu2  ;;  %v10413_v47 = vunpack.c.l.bf16 %v7566_v56  ;;  %v10568_v44 = vunpack.c.l.bf16 %v8189_v33  ;;  %v10673_v50 = vmax.f32 %v10671_v21, %v10672_v31  ;;  %v11012_v6 = vsel %vm8401_vm3, %v10567_v16, -inf  ;;  %v13745_v33 = vld [vmem:[%s17625_s2] ss:$0 sm:$0xff] }
 0x711   : > { %v6521_v52 = vpop.f32.mrf.mxu3  ;;  %v4964_v58 = vpop.f32.mrf.mxu0  ;;  %v10467_v11 = vunpack.c.l.bf16 %v7776_v25  ;;  %v6002_v41 = vadd.f32 %v17321_v29, %v6001_v23  ;;  %v10900_v48 = vsel %vm8401_vm3, %v10516_v27, -inf  ;;  %v11013_v21 = vmax.f32 %v11011_v55, %v11012_v6 }
 0x712   : > { %v17530_v26 = vpop.f32.mrf.mxu1  ;;  %v4965_v19 = vadd.f32 %v17321_v29, %v4964_v58  ;;  %v6522_v54 = vadd.f32 %v17321_v29, %v6521_v52  ;;  %v10674_v1 = vsel %vm8401_vm3, %v10413_v47, -inf  ;;  %v11014_v13 = vsel %vm8401_vm3, %v10568_v44, -inf }
 0x713   : > { %v10792_v14 = vsel %vm8401_vm3, %v10467_v11, -inf  ;;  %v7150_v3 = vmax.f32 %v6002_v41, 0.0  ;;  %v10675_v60 = vmax.f32 %v10673_v50, %v10674_v1  ;;  %v10855_v50 = vrot.slane %v17489_v42, 1 }
 0x714   : > { %v10793_v57 = vmax.f32 %v10791_v15, %v10792_v14  ;;  %v6735_v45 = vmax.f32 %v4965_v19, 0.0  ;;  %v7358_v9 = vmax.f32 %v6522_v54, 0.0  ;;  %v10897_v15 = vmax.f32 %v10895_v7, %v10896_v24 }
 0x715   : > { %v7982_v52 = vpack.c.bf16 %v7150_v3, %v7150_v3 }
 0x716   : > { %v7567_v0 = vpack.c.bf16 %v6735_v45, %v6735_v45  ;;  %v10794_v43 = vrot.slane %v10793_v57, 4  ;;  %v8190_v30 = vpack.c.bf16 %v7358_v9, %v7358_v9  ;;  %v10899_v54 = vmax.f32 %v10897_v15, %v10898_v35 }
 0x717   : > { %v10517_v45 = vunpack.c.l.bf16 %v7982_v52 }
 0x718   : > { %v6004_v8 = vpop.f32.mrf.mxu2  ;;  %v10414_v25 = vunpack.c.l.bf16 %v7567_v0  ;;  %v10795_v41 = vmax.f32 %v10793_v57, %v10794_v43  ;;  %v10569_v7 = vunpack.c.l.bf16 %v8190_v30  ;;  %v10901_v35 = vmax.f32 %v10899_v54, %v10900_v48 }
 0x719   : > { %v6005_v59 = vadd.f32 %v17321_v29, %v6004_v8  ;;  %v6524_v12 = vpop.f32.mrf.mxu3  ;;  %v4966_v4 = vpop.f32.mrf.mxu0  ;;  %v10902_v16 = vsel %vm8401_vm3, %v10517_v45, -inf  ;;  %v10967_v30 = vrot.slane %v17456_v37, 2 }
 0x71a   : > { %v6525_v23 = vadd.f32 %v17321_v29, %v6524_v12  ;;  %v4967_v63 = vadd.f32 %v17321_v29, %v4966_v4  ;;  %v9594_v10 = vpop.f32.mrf.mxu1  ;;  %v10676_v29 = vsel %vm8401_vm3, %v10414_v25, -inf  ;;  %v10796_v24 = vrot.slane %v10795_v41, 2 }
 0x71b   : > { %v7151_v58 = vmax.f32 %v6005_v59, 0.0  ;;  %v10677_v18 = vmax.f32 %v10675_v60, %v10676_v29  ;;  %v11015_v12 = vmax.f32 %v11013_v21, %v11014_v13  ;;  %v11016_v4 = vsel %vm8401_vm3, %v10569_v7, -inf }
 0x71c   : > { %v7359_v40 = vmax.f32 %v6525_v23, 0.0  ;;  %v6736_v11 = vmax.f32 %v4967_v63, 0.0  ;;  %v10797_v23 = vmax.f32 %v10795_v41, %v10796_v24  ;;  %v10903_v44 = vmax.f32 %v10901_v35, %v10902_v16 }
 0x71d   : > { %v7983_v19 = vpack.c.bf16 %v7151_v58, %v7151_v58  ;;  %v11028_v7 = vpack.c.bf16 %v17460_v38, %v17460_v38 }
 0x71e   : > { %v8191_v56 = vpack.c.bf16 %v7359_v40, %v7359_v40  ;;  %v7568_v14 = vpack.c.bf16 %v6736_v11, %v6736_v11  ;;  %v11017_v40 = vmax.f32 %v11015_v12, %v11016_v4  ;;  %v10798_v29 = vrot.slane %v10797_v23, 1 }
 0x71f   : > { %v10518_v32 = vunpack.c.l.bf16 %v7983_v19  ;;  %v8624_v19 = vrot.slane %v16114_v61, 4  ;;  %v11047_v16 = vunpack.c.l.b16 %v11028_v7 }
 0x720   : > { %v10415_v57 = vunpack.c.l.bf16 %v7568_v14  ;;  %v6006_v20 = vpop.f32.mrf.mxu2  ;;  %v10570_v47 = vunpack.c.l.bf16 %v8191_v56  ;;  %v10799_v21 = vmax.f32 %v10797_v23, %v10798_v29 }
 0x721   : > { %v6007_v3 = vadd.f32 %v13745_v33, %v6006_v20  ;;  %v6526_v0 = vpop.f32.mrf.mxu3  ;;  %v4969_v34 = vpop.f32.mrf.mxu0  ;;  %v10904_v63 = vsel %vm8401_vm3, %v10518_v32, -inf  ;;  %v8738_v32 = vrot.slane %v16153_v46, 4 }
 0x722   : > { %v10678_v9 = vsel %vm8401_vm3, %v10415_v57, -inf  ;;  %v6527_v8 = vadd.f32 %v13745_v33, %v6526_v0  ;;  %v4970_v25 = vadd.f32 %v13745_v33, %v4969_v34  ;;  %v11018_v52 = vsel %vm8401_vm3, %v10570_v47, -inf }
 0x723   : > { %v10679_v43 = vmax.f32 %v10677_v18, %v10678_v9  ;;  %v7152_v59 = vmax.f32 %v6007_v3, 0.0  ;;  %v10905_v55 = vmax.f32 %v10903_v44, %v10904_v63  ;;  %v11019_v56 = vmax.f32 %v11017_v40, %v11018_v52 }
 0x724   : > { %v7360_v31 = vmax.f32 %v6527_v8, 0.0  ;;  %v6737_v1 = vmax.f32 %v4970_v25, 0.0  ;;  %v10968_v57 = vmax.f32 %v17456_v37, %v10967_v30  ;;  %v10856_v18 = vmax.f32 %v17489_v42, %v10855_v50 }
 0x725   : > { %v10680_v10 = vrot.slane %v10679_v43, 4  ;;  %v7984_v27 = vpack.c.bf16 %v7152_v59, %v7152_v59  ;;  %v8625_v34 = vmax.f32 %v16114_v61, %v8624_v19  ;;  %v8739_v42 = vmax.f32 %v16153_v46, %v8738_v32 }
 0x726   : > { %v8192_v58 = vpack.c.bf16 %v7360_v31, %v7360_v31  ;;  %v7569_v48 = vpack.c.bf16 %v6737_v1, %v6737_v1  ;;  %v10969_v37 = vrot.slane %v10968_v57, 1  ;;  %v11032_v12 = vpack.c.bf16 %v10856_v18, %v10856_v18 }
 0x727   : > { %v10681_v11 = vmax.f32 %v10679_v43, %v10680_v10  ;;  %v10519_v15 = vunpack.c.l.bf16 %v7984_v27  ;;  %v8626_v25 = vrot.slane %v8625_v34, 2  ;;  %v11031_v63 = vpack.c.bf16 %v10799_v21, %v10799_v21 }
 0x728   : > { %v10571_v41 = vunpack.c.l.bf16 %v8192_v58  ;;  %v8245_v35 = vunpack.c.l.bf16 %v7569_v48  ;;  %v10970_v1 = vmax.f32 %v10968_v57, %v10969_v37  ;;  %v11049_v46 = vunpack.c.l.b16 %v11030_v22 }
 0x729   : > { %v10682_v14 = vrot.slane %v10681_v11, 2  ;;  %v10906_v54 = vsel %vm8401_vm3, %v10519_v15, -inf  ;;  %v17569_v6 = vpop.f32.mrf.mxu3  ;;  %v4971_v60 = vpop.f32.mrf.mxu0  ;;  %v11051_v15 = vunpack.c.l.b16 %v11032_v12  ;;  %v8740_v50 = vrot.slane %v8739_v42, 2 }
 0x72a   : > { %v10907_v45 = vmax.f32 %v10905_v55, %v10906_v54  ;;  %v11020_v53 = vsel %vm8401_vm3, %v10571_v41, -inf  ;;  %v4972_v13 = vadd.f32 %v13745_v33, %v4971_v60  ;;  %v8852_v33 = vrot.slane %v16156_v51, 4 }
 0x72b   : > { %v10683_v20 = vmax.f32 %v10681_v11, %v10682_v14  ;;  %v11021_v24 = vmax.f32 %v11019_v56, %v11020_v53  ;;  %v8516_v52 = vsel %vm8401_vm3, %v8245_v35, -inf  ;;  %v11050_v55 = vunpack.c.l.b16 %v11031_v63 }
 0x72c   : > { %v10908_v3 = vrot.slane %v10907_v45, 4  ;;  %v6738_v0 = vmax.f32 %v4972_v13, 0.0  ;;  %v8853_v27 = vmax.f32 %v16156_v51, %v8852_v33  ;;  %v8627_v56 = vmax.f32 %v8625_v34, %v8626_v25 }
 0x72d   : > { %v10684_v47 = vrot.slane %v10683_v20, 1  ;;  %v11022_v9 = vrot.slane %v11021_v24, 4  ;;  %v8741_v48 = vmax.f32 %v8739_v42, %v8740_v50  ;;  %v8798_v57 = vmax.f32 %v17432_v28, %v8797_v17 }
 0x72e   : > { %v10909_v8 = vmax.f32 %v10907_v45, %v10908_v3  ;;  %v7570_v38 = vpack.c.bf16 %v6738_v0, %v6738_v0  ;;  %v8854_v14 = vrot.slane %v8853_v27, 2  ;;  %v11034_v45 = vpack.c.bf16 %v10970_v1, %v10970_v1 }
 0x72f   : > { %v10685_v43 = vmax.f32 %v10683_v20, %v10684_v47  ;;  %v11023_v59 = vmax.f32 %v11021_v24, %v11022_v9  ;;  %v8685_v18 = vrot.slane %v17445_v39, 1  ;;  %v8742_v0 = vrot.slane %v8741_v48, 1 }
 0x730   : > { %v10910_v4 = vrot.slane %v10909_v8, 2  ;;  %v8246_v31 = vunpack.c.l.bf16 %v7570_v38  ;;  %v8855_v20 = vmax.f32 %v8853_v27, %v8854_v14  ;;  %v11053_v32 = vunpack.c.l.b16 %v11034_v45 }
 0x731   : > { %v11029_v61 = vpack.c.bf16 %v10685_v43, %v10685_v43  ;;  %v11024_v23 = vrot.slane %v11023_v59, 2  ;;  %v10361_v10 = vpop.f32.mrf.mxu3  ;;  %v8799_v47 = vrot.slane %v8798_v57, 1  ;;  %v8686_v17 = vmax.f32 %v17445_v39, %v8685_v18 }
 0x732   : > { %v10911_v44 = vmax.f32 %v10909_v8, %v10910_v4  ;;  %v8517_v58 = vsel %vm8401_vm3, %v8246_v31, -inf  ;;  %v8856_v35 = vrot.slane %v8855_v20, 1  ;;  %v8743_v37 = vmax.f32 %v8741_v48, %v8742_v0 }
 0x733   : > { %v11048_v30 = vunpack.c.l.b16 %v11029_v61  ;;  %v11025_v40 = vmax.f32 %v11023_v59, %v11024_v23  ;;  %v8518_v11 = vmax.f32 %v8516_v52, %v8517_v58  ;;  %v8800_v43 = vmax.f32 %v8798_v57, %v8799_v47 }
 0x734   : > { %v10912_v19 = vrot.slane %v10911_v44, 1  ;;  %v8857_v42 = vmax.f32 %v8855_v20, %v8856_v35  ;;  %v8862_v4 = vpack.c.bf16 %v8686_v17, %v8686_v17  ;;  %v8863_v25 = vpack.c.bf16 %v8743_v37, %v8743_v37 }
 0x735   : > { %v11055_v41 = vsel %vm9559_vm4, %v11048_v30, %v11047_v16  ;;  %v11026_v51 = vrot.slane %v11025_v40, 1  ;;  %v8566_v29 = vmax.f32 %v8564_v5, %v8518_v11  ;;  %v8628_v5 = vrot.slane %v8627_v56, 1 }
 0x736   : > { %v11056_v54 = vsel %vm9561_vm5, %v11049_v46, %v11055_v41  ;;  %v10913_v60 = vmax.f32 %v10911_v44, %v10912_v19  ;;  %v8864_v63 = vpack.c.bf16 %v8800_v43, %v8800_v43  ;;  %v8865_v10 = vpack.c.bf16 %v8857_v42, %v8857_v42 }
 0x737   : > { %v11057_v49 = vsel %vm9563_vm6, %v11050_v55, %v11056_v54  ;;  %v11027_v22 = vmax.f32 %v11025_v40, %v11026_v51  ;;  %v8567_v53 = vrot.slane %v8566_v29, 4  ;;  %v8629_v8 = vmax.f32 %v8627_v56, %v8628_v5  ;;  %v13732_v51 = vld [vmem:[%s17627_s4] ss:$0 sm:$0xff] }
 0x738   : > { %v11033_v13 = vpack.c.bf16 %v10913_v60, %v10913_v60  ;;  %v11058_v7 = vsel %vm9565_vm7, %v11051_v15, %v11057_v49  ;;  %v9608_v27 = vunpack.c.l.b16 %v8862_v4  ;;  %v9609_v44 = vunpack.c.l.b16 %v8863_v25 }
 0x739   : > { %v11035_v36 = vpack.c.bf16 %v11027_v22, %v11027_v22  ;;  %v8568_v2 = vmax.f32 %v8566_v29, %v8567_v53  ;;  %v8861_v12 = vpack.c.bf16 %v8629_v8, %v8629_v8  ;;  %v9610_v58 = vunpack.c.l.b16 %v8864_v63 }
 0x73a   : > { %v11052_v24 = vunpack.c.l.b16 %v11033_v13  ;;  %v9611_v30 = vunpack.c.l.b16 %v8865_v10 }
 0x73b   : > { %v8569_v3 = vrot.slane %v8568_v2, 2  ;;  %v11054_v21 = vunpack.c.l.b16 %v11035_v36  ;;  %v9607_v23 = vunpack.c.l.b16 %v8861_v12 }
 0x73c   : > { %v11059_v34 = vsel %vm9567_vm8, %v11052_v24, %v11058_v7 }
 0x73d   : > { %v11060_v9 = vsel %vm9569_vm9, %v11053_v32, %v11059_v34  ;;  %v8570_v33 = vmax.f32 %v8568_v2, %v8569_v3 }
 0x73e   : > { %v11061_v28 = vsel %vm9571_vm10, %v11054_v21, %v11060_v9 }
 0x73f   : > { %v11062_v38 = vpack.c.b16 %v11061_v28, %v11061_v28  ;;  %v8571_v16 = vrot.slane %v8570_v33, 1 }
 0x741   : > { %13278 = vmatmul.msk.bf16.vlgmr.msra.gmra.mxu1 %vm8401_vm3, %v11062_v38  ;;  %v8572_v59 = vmax.f32 %v8570_v33, %v8571_v16 }
 0x743   : > { %v8860_v31 = vpack.c.bf16 %v8572_v59, %v8572_v59 }
 0x745   : > { %v9606_v61 = vunpack.c.l.b16 %v8860_v31 }
 0x747   : > { %v9613_v39 = vsel %vm9561_vm5, %v9606_v61, %v16179_v62 }
 0x748   : > { %v9614_v52 = vsel %vm9563_vm6, %v9607_v23, %v9613_v39 }
 0x749   : > { %v9615_v1 = vsel %vm9565_vm7, %v9608_v27, %v9614_v52 }
 0x74a   : > { %v9616_v40 = vsel %vm9567_vm8, %v9609_v44, %v9615_v1 }
 0x74b   : > { %v9617_v11 = vsel %vm9569_vm9, %v9610_v58, %v9616_v40 }
 0x74c   : > { %v9618_v46 = vsel %vm9571_vm10, %v9611_v30, %v9617_v11 }
 0x74d   : > { %v9619_v15 = vpack.c.b16 %v9618_v46, %v9618_v46 }
 0x74f   : > { %13264 = vmatmul.msk.bf16.vlgmr.msrb.gmra.mxu2 %vm8401_vm3, %v9619_v15 }
 0x7be   : > { %v11081_v50 = vpop.f32.mrf.mxu1 }
 0x7c6   : > { %v11083_v19 = vpop.f32.mrf.mxu1 }
 0x7d2   : > { %v9638_v62 = vpop.f32.mrf.mxu2 }
 0x7d3   : > { %v9639_v55 = vadd.f32 %v9638_v62, %v17530_v26 }
 0x7d5   : > { %v10363_v41 = vadd.f32 %v17569_v6, %v9639_v55 }
 0x7d7   : > { %v11085_v29 = vadd.f32 %v11081_v50, %v10363_v41 }
 0x7d9   : > { %v11090_v56 = vadd.f32 %v13732_v51, %v11085_v29 }
 0x7da   : > { %v9640_v14 = vpop.f32.mrf.mxu2 }
 0x7db   : > { %11091 = vst [vmem:[%s227_s7] sm:$0xff] %v11090_v56 }
 0x7dc PF: > { %s15_s18 = sadd.s32 1, %s13752_s18  }
 0x7dd   : > { %p12_p5 = scmp.ge.s32.totalorder %s15_s18, 4  }
 0x7df   :  { %14 = sbr.rel (!%p12_p5) target bundleno = 1 (0x1), region = 73 }

</bundles_post_ra>
